<compile_context>
chip_gen: v5e
topology: v5e:2x2
jax: 0.10.0
libtpu: 0.0.40
codegen_flags: <defaults>
</compile_context>

<pallas_src>
import functools
import math

import jax
import jax.numpy as jnp
from jax import lax
from jax.experimental import pallas as pl
from jax.experimental.pallas import tpu as pltpu


# Order in which packed parameters are passed to (and unpacked inside) the kernel.
PARAM_ORDER = (
    "emb_wt", "emb_b",
    "sa_qkv_wt", "sa_qkv_b", "sa_out_wt", "sa_out_b", "n1_w", "n1_b",
    "ca_q_wt", "ca_q_b", "ca_kv_wt", "ca_kv_b", "ca_out_wt", "ca_out_b",
    "n2_w", "n2_b",
    "ff1_wt", "ff1_b", "ff2_wt", "ff2_b", "n3_w", "n3_b",
    "out_wt", "out_b",
)


# --------------------------------------------------------------------------- #
# Fused whole-forward kernel
# --------------------------------------------------------------------------- #
def _build_decoder_kernel(*, S, T, B, d_model, nhead, num_layers, out_dim,
                          has_tgt_mask, has_mem_mask, mxu_dtype, eps=1e-5):
    """Build the fused kernel closure for static shapes / flags."""
    dh = d_model // nhead
    scale = 1.0 / math.sqrt(dh)

    def mxu(a, b):
        # MXU dot with narrow operands, f32 accumulation.
        return jnp.dot(a.astype(mxu_dtype), b.astype(mxu_dtype),
                       preferred_element_type=jnp.float32)

    def layer_norm(h, g, b):
        mu = jnp.mean(h, axis=-1, keepdims=True)
        var = jnp.mean(jnp.square(h - mu), axis=-1, keepdims=True)
        return (h - mu) * lax.rsqrt(var + eps) * g + b

    def kernel(*refs):
        it = iter(refs)
        trg_ref = next(it)                               # (B*S, out_dim)
        mem_ref = next(it)                               # (B*T, D)
        pe_ref = next(it)                                # (B*S, D)
        tgt_mask_ref = next(it) if has_tgt_mask else None   # (S, S) float
        mem_mask_ref = next(it) if has_mem_mask else None   # (S, T) float
        (emb_wt, emb_b,
         sa_qkv_wt, sa_qkv_b, sa_out_wt, sa_out_b, n1_w, n1_b,
         ca_q_wt, ca_q_b, ca_kv_wt, ca_kv_b, ca_out_wt, ca_out_b, n2_w, n2_b,
         ff1_wt, ff1_b, ff2_wt, ff2_b, n3_w, n3_b,
         out_wt, out_b) = [next(it) for _ in range(24)]
        o_ref = next(it)                                 # (B*S, out_dim)
        attn_scr = next(it)                              # VMEM (B*S, D) f32

        def attend(q2d, k2d, v2d, kv_len, mask_ref):
            # q2d: (B*S, D); k2d/v2d: (B*kv_len, D); rows are batch-major, so a
            # batch is a contiguous row block (no strided loads / relayouts).
            mask = mask_ref[...] if mask_ref is not None else None
            for b in range(B):
                qb = q2d[b * S:(b + 1) * S, :]
                kb = k2d[b * kv_len:(b + 1) * kv_len, :]
                vb = v2d[b * kv_len:(b + 1) * kv_len, :]
                for h in range(nhead):
                    sl = slice(h * dh, (h + 1) * dh)
                    qh = qb[:, sl].astype(mxu_dtype)
                    kh = kb[:, sl].astype(mxu_dtype)
                    s = lax.dot_general(qh, kh, (((1,), (1,)), ((), ())),
                                        preferred_element_type=jnp.float32)
                    s = s * scale
                    if mask is not None:
                        s = s + mask
                    # TODO(synk): rows fully masked to -inf produce NaN, same as PyTorch.
                    s = s - jnp.max(s, axis=-1, keepdims=True)
                    p = jnp.exp(s)
                    p = p * pl.reciprocal(jnp.sum(p, axis=-1, keepdims=True),
                                          approx=True)
                    oh = jnp.dot(p.astype(mxu_dtype), vb[:, sl].astype(mxu_dtype),
                                 preferred_element_type=jnp.float32)
                    # Write each head straight into the VMEM slab (no concat).
                    attn_scr[b * S:(b + 1) * S, sl] = oh
            return attn_scr[...]

        # Embedding linear + fused positional-encoding add.
        x = mxu(trg_ref[...], emb_wt[...]) + emb_b[...] + pe_ref[...]   # (B*S, D)
        mem = mem_ref[...]                                              # (B*T, D)

        for li in range(num_layers):                     # static unroll, weights VMEM-resident
            # ---- self-attention block (post-norm) ----
            qkv = mxu(x, sa_qkv_wt[li]) + sa_qkv_b[li]                  # (B*S, 3D)
            sa = attend(qkv[:, :d_model], qkv[:, d_model:2 * d_model],
                        qkv[:, 2 * d_model:], S, tgt_mask_ref)
            x = layer_norm(mxu(sa, sa_out_wt[li]) + sa_out_b[li] + x,
                           n1_w[li], n1_b[li])

            # ---- cross-attention block ----
            q = mxu(x, ca_q_wt[li]) + ca_q_b[li]                        # (B*S, D)
            kv = mxu(mem, ca_kv_wt[li]) + ca_kv_b[li]                   # (B*T, 2D)
            ca = attend(q, kv[:, :d_model], kv[:, d_model:], T, mem_mask_ref)
            x = layer_norm(mxu(ca, ca_out_wt[li]) + ca_out_b[li] + x,
                           n2_w[li], n2_b[li])

            # ---- feed-forward block ----
            hid = jnp.maximum(mxu(x, ff1_wt[li]) + ff1_b[li], 0.0)      # (B*S, dff)
            x = layer_norm(mxu(hid, ff2_wt[li]) + ff2_b[li] + x,
                           n3_w[li], n3_b[li])

        # Final projection.  N = out_dim (=32) is not lane-dense; the single
        # (B*S, 32) store is ~2 KB so masked stores are irrelevant here.
        o_ref[...] = (mxu(x, out_wt[...]) + out_b[...]).astype(o_ref.dtype)

    return kernel


# --------------------------------------------------------------------------- #
# Module glue (dropout = identity in eval mode)
# --------------------------------------------------------------------------- #
def positional_encoding(seq_len, d_model):
    position = jnp.arange(seq_len, dtype=jnp.float32)[:, None]
    div_term = jnp.exp(jnp.arange(0, d_model, 2, dtype=jnp.float32)
                       * (-math.log(10000.0) / d_model))
    ang = position * div_term
    pe = jnp.zeros((seq_len, d_model), jnp.float32)
    pe = pe.at[:, 0::2].set(jnp.sin(ang))
    pe = pe.at[:, 1::2].set(jnp.cos(ang))
    return pe


def transformer_decoder_forward(trg, memory, params, *, nhead,
                                src_mask=None, trg_mask=None):
    """trg:(S,B,output_dim), memory:(T,B,d_model) -> (S,B,output_dim).

    Whole forward in one pallas_call; only float additive masks supported.
    """
    # TODO(synk): dropout (p=0.1 in the PyTorch module) is identity (eval mode);
    #             bool attn_mask / key_padding_mask variants are not supported.
    S, B, out_dim = trg.shape
    T = memory.shape[0]
    d_model = params["emb_wt"].shape[1]
    dff = params["ff1_wt"].shape[-1]
    num_layers = int(params["sa_qkv_wt"].shape[0])
    assert d_model % nhead == 0

    pe = positional_encoding(S, d_model)                      # (S, D)
    pe_bm = jnp.tile(pe, (B, 1))                              # (B*S, D), batch-major

    # Batch-major flattening so each attention batch is a contiguous row block
    # inside the kernel (tiny one-time XLA transposes at the boundary only).
    trg_bm = jnp.transpose(trg, (1, 0, 2)).reshape(B * S, out_dim)
    mem_bm = jnp.transpose(memory, (1, 0, 2)).reshape(B * T, d_model)

    inputs = [trg_bm, mem_bm, pe_bm]
    if trg_mask is not None:
        inputs.append(trg_mask.astype(jnp.float32))
    if src_mask is not None:
        inputs.append(src_mask.astype(jnp.float32))
    inputs += [params[k] for k in PARAM_ORDER]

    kernel = _build_decoder_kernel(
        S=S, T=T, B=B, d_model=d_model, nhead=nhead, num_layers=num_layers,
        out_dim=out_dim, has_tgt_mask=trg_mask is not None,
        has_mem_mask=src_mask is not None, mxu_dtype=params["emb_wt"].dtype)

    # Advisory cost estimate for XLA scheduling around the fused call.
    M = B * S
    per_layer = (2 * M * d_model * 3 * d_model        # self-attn qkv proj
                 + 4 * B * S * S * d_model            # self-attn scores + PV
                 + 2 * M * d_model * d_model          # self-attn out proj
                 + 2 * M * d_model * d_model          # cross-attn q proj
                 + 2 * (B * T) * d_model * 2 * d_model  # cross-attn kv proj
                 + 4 * B * S * T * d_model            # cross-attn scores + PV
                 + 2 * M * d_model * d_model          # cross-attn out proj
                 + 4 * M * d_model * dff)             # ffn
    flops = int(2 * M * out_dim * d_model + num_layers * per_layer
                + 2 * M * d_model * out_dim)
    transcendentals = int(num_layers * B * nhead * (S * S + S * T)
                          + 3 * num_layers * M)
    bytes_accessed = int(sum(math.prod(a.shape) * jnp.dtype(a.dtype).itemsize
                             for a in inputs)
                         + B * S * out_dim * 4)

    vmem_spec = pl.BlockSpec(memory_space=pltpu.MemorySpace.VMEM)
    y_bm = pl.pallas_call(
        kernel,
        out_shape=jax.ShapeDtypeStruct((B * S, out_dim), trg.dtype),
        in_specs=[vmem_spec] * len(inputs),
        out_specs=vmem_spec,
        scratch_shapes=[pltpu.VMEM((B * S, d_model), jnp.float32)],
        cost_estimate=pl.CostEstimate(flops=flops, transcendentals=transcendentals,
                                      bytes_accessed=bytes_accessed),
    )(*inputs)

    return jnp.transpose(y_bm.reshape(B, S, out_dim), (1, 0, 2))


# --------------------------------------------------------------------------- #
# Parameter init (PyTorch layout) and packing (pre-transposed, layer-stacked)
# --------------------------------------------------------------------------- #
def init_raw_params(key, *, output_dim, d_model, num_layers, dim_feedforward):
    """Parameters in PyTorch layout: Linear weight = (out_features, in_features)."""
    def linear_init(k, out_d, in_d):
        bound = 1.0 / math.sqrt(in_d)
        kw, kb = jax.random.split(k)
        w = jax.random.uniform(kw, (out_d, in_d), jnp.float32, -bound, bound)
        b = jax.random.uniform(kb, (out_d,), jnp.float32, -bound, bound)
        return w, b

    keys = jax.random.split(key, num_layers + 2)
    emb_w, emb_b = linear_init(keys[0], d_model, output_dim)
    out_w, out_b = linear_init(keys[1], output_dim, d_model)
    ones = jnp.ones((d_model,), jnp.float32)
    zeros = jnp.zeros((d_model,), jnp.float32)
    layers = []
    for li in range(num_layers):
        lk = jax.random.split(keys[2 + li], 6)
        sa_in_w, sa_in_b = linear_init(lk[0], 3 * d_model, d_model)
        sa_out_w, sa_out_b = linear_init(lk[1], d_model, d_model)
        ca_in_w, ca_in_b = linear_init(lk[2], 3 * d_model, d_model)
        ca_out_w, ca_out_b = linear_init(lk[3], d_model, d_model)
        ff1_w, ff1_b = linear_init(lk[4], dim_feedforward, d_model)
        ff2_w, ff2_b = linear_init(lk[5], d_model, dim_feedforward)
        layers.append(dict(
            sa_in_w=sa_in_w, sa_in_b=sa_in_b, sa_out_w=sa_out_w, sa_out_b=sa_out_b,
            ca_in_w=ca_in_w, ca_in_b=ca_in_b, ca_out_w=ca_out_w, ca_out_b=ca_out_b,
            ff1_w=ff1_w, ff1_b=ff1_b, ff2_w=ff2_w, ff2_b=ff2_b,
            n1_w=ones, n1_b=zeros, n2_w=ones, n2_b=zeros, n3_w=ones, n3_b=zeros,
        ))
    return dict(emb_w=emb_w, emb_b=emb_b, out_w=out_w, out_b=out_b, layers=layers)


def pack_params(raw, *, d_model, mxu_dtype=jnp.float32):
    """Pre-transpose weights to (K, N), stack per-layer tensors, cast GEMM
    weights to mxu_dtype (bf16 on v6e/v7x halves DMA + doubles MXU rate;
    biases / LayerNorm params stay f32).  Done once at init — no .T in forward."""
    L = len(raw["layers"])
    d = d_model

    def stack(name):
        return jnp.stack([raw["layers"][i][name] for i in range(L)])

    def wt(x):
        return jnp.swapaxes(x, -1, -2).astype(mxu_dtype)

    sa_in_w, sa_in_b = stack("sa_in_w"), stack("sa_in_b")
    ca_in_w, ca_in_b = stack("ca_in_w"), stack("ca_in_b")
    return {
        "emb_wt": wt(raw["emb_w"]),                       # (out_dim, D)
        "emb_b": raw["emb_b"].reshape(1, -1),
        "sa_qkv_wt": wt(sa_in_w),                         # (L, D, 3D)
        "sa_qkv_b": sa_in_b.reshape(L, 1, 3 * d),
        "sa_out_wt": wt(stack("sa_out_w")),               # (L, D, D)
        "sa_out_b": stack("sa_out_b").reshape(L, 1, d),
        "n1_w": stack("n1_w").reshape(L, 1, d),
        "n1_b": stack("n1_b").reshape(L, 1, d),
        "ca_q_wt": wt(ca_in_w[:, :d, :]),                 # (L, D, D)
        "ca_q_b": ca_in_b[:, :d].reshape(L, 1, d),
        "ca_kv_wt": wt(ca_in_w[:, d:, :]),                # (L, D, 2D)
        "ca_kv_b": ca_in_b[:, d:].reshape(L, 1, 2 * d),
        "ca_out_wt": wt(stack("ca_out_w")),               # (L, D, D)
        "ca_out_b": stack("ca_out_b").reshape(L, 1, d),
        "n2_w": stack("n2_w").reshape(L, 1, d),
        "n2_b": stack("n2_b").reshape(L, 1, d),
        "ff1_wt": wt(stack("ff1_w")),                     # (L, D, dff)
        "ff1_b": stack("ff1_b").reshape(L, 1, -1),
        "ff2_wt": wt(stack("ff2_w")),                     # (L, dff, D)
        "ff2_b": stack("ff2_b").reshape(L, 1, d),
        "n3_w": stack("n3_w").reshape(L, 1, d),
        "n3_b": stack("n3_b").reshape(L, 1, d),
        "out_wt": wt(raw["out_w"]),                       # (D, out_dim)
        "out_b": raw["out_b"].reshape(1, -1),
    }


# --------------------------------------------------------------------------- #
# Main
# --------------------------------------------------------------------------- #
if __name__ == "__main__":
    output_dim, d_model, nhead, num_layers, dim_ff = 32, 128, 4, 2, 256
    S, T, B = 8, 16, 2          # target length, memory length, batch

    key = jax.random.PRNGKey(0)
    kp, kt, km = jax.random.split(key, 3)
    raw = init_raw_params(kp, output_dim=output_dim, d_model=d_model,
                          num_layers=num_layers, dim_feedforward=dim_ff)
    # bf16 GEMM operands (f32 accumulation); use jnp.float32 for bit-closer
    # PyTorch numerics.
    params = pack_params(raw, d_model=d_model, mxu_dtype=jnp.bfloat16)

    trg = jax.random.normal(kt, (S, B, output_dim), dtype=jnp.float32)
    memory = jax.random.normal(km, (T, B, d_model), dtype=jnp.float32)

    fwd = jax.jit(functools.partial(transformer_decoder_forward, nhead=nhead))

    # Unmasked forward.
    out = fwd(trg, memory, params)
    jax.block_until_ready(out)
    assert out.shape == (S, B, output_dim), out.shape
    assert bool(jnp.all(jnp.isfinite(out))), "non-finite output"

    # Causal (float additive) target mask variant.
    causal = jnp.triu(jnp.full((S, S), -1e9, jnp.float32), k=1)
    out_m = fwd(trg, memory, params, trg_mask=causal)
    jax.block_until_ready(out_m)
    assert out_m.shape == (S, B, output_dim), out_m.shape
    assert bool(jnp.all(jnp.isfinite(out_m))), "non-finite masked output"

    print("KERNEL_OK")
</pallas_src>

<mosaic_0001>
module attributes {stable_mosaic.version = 11 : i64} {
  func.func @kernel(%arg0: memref<16x32xf32, #tpu.memory_space<vmem>>, %arg1: memref<32x128xf32, #tpu.memory_space<vmem>>, %arg2: memref<16x128xf32, #tpu.memory_space<vmem>>, %arg3: memref<32x128xbf16, #tpu.memory_space<vmem>>, %arg4: memref<1x128xf32, #tpu.memory_space<vmem>>, %arg5: memref<2x128x384xbf16, #tpu.memory_space<vmem>>, %arg6: memref<2x1x384xf32, #tpu.memory_space<vmem>>, %arg7: memref<2x128x128xbf16, #tpu.memory_space<vmem>>, %arg8: memref<2x1x128xf32, #tpu.memory_space<vmem>>, %arg9: memref<2x1x128xf32, #tpu.memory_space<vmem>>, %arg10: memref<2x1x128xf32, #tpu.memory_space<vmem>>, %arg11: memref<2x128x128xbf16, #tpu.memory_space<vmem>>, %arg12: memref<2x1x128xf32, #tpu.memory_space<vmem>>, %arg13: memref<2x128x256xbf16, #tpu.memory_space<vmem>>, %arg14: memref<2x1x256xf32, #tpu.memory_space<vmem>>, %arg15: memref<2x128x128xbf16, #tpu.memory_space<vmem>>, %arg16: memref<2x1x128xf32, #tpu.memory_space<vmem>>, %arg17: memref<2x1x128xf32, #tpu.memory_space<vmem>>, %arg18: memref<2x1x128xf32, #tpu.memory_space<vmem>>, %arg19: memref<2x128x256xbf16, #tpu.memory_space<vmem>>, %arg20: memref<2x1x256xf32, #tpu.memory_space<vmem>>, %arg21: memref<2x256x128xbf16, #tpu.memory_space<vmem>>, %arg22: memref<2x1x128xf32, #tpu.memory_space<vmem>>, %arg23: memref<2x1x128xf32, #tpu.memory_space<vmem>>, %arg24: memref<2x1x128xf32, #tpu.memory_space<vmem>>, %arg25: memref<128x32xbf16, #tpu.memory_space<vmem>>, %arg26: memref<1x32xf32, #tpu.memory_space<vmem>>, %arg27: memref<16x32xf32, #tpu.memory_space<vmem>>, %arg28: memref<16x128xf32, #tpu.memory_space<vmem>>) attributes {dimension_semantics = [], scalar_prefetch = 0 : i64, scratch_operands = 1 : i64, tpu.core_type = #tpu.core_type<tc>} {
    %c0 = arith.constant 0 : index
    %c0_0 = arith.constant 0 : index
    %0 = vector.load %arg0[%c0, %c0_0] : memref<16x32xf32, #tpu.memory_space<vmem>>, vector<16x32xf32>
    %c0_1 = arith.constant 0 : index
    %c0_2 = arith.constant 0 : index
    %1 = vector.load %arg3[%c0_1, %c0_2] : memref<32x128xbf16, #tpu.memory_space<vmem>>, vector<32x128xbf16>
    %2 = arith.truncf %0 : vector<16x32xf32> to vector<16x32xbf16>
    %cst = arith.constant dense<0.000000e+00> : vector<16x128xf32>
    %3 = tpu.matmul %2, %1, %cst {dimension_numbers = #tpu.dot_dimension_numbers<[1], [0], [0], [1], [0, 0, 1, 1], [], []>} : vector<16x32xbf16>, vector<32x128xbf16>, vector<16x128xf32> -> vector<16x128xf32>
    %c0_3 = arith.constant 0 : index
    %c0_4 = arith.constant 0 : index
    %4 = vector.load %arg4[%c0_3, %c0_4] : memref<1x128xf32, #tpu.memory_space<vmem>>, vector<1x128xf32>
    %5 = vector.broadcast %4 : vector<1x128xf32> to vector<16x128xf32>
    %6 = arith.addf %3, %5 : vector<16x128xf32>
    %c0_5 = arith.constant 0 : index
    %c0_6 = arith.constant 0 : index
    %7 = vector.load %arg2[%c0_5, %c0_6] : memref<16x128xf32, #tpu.memory_space<vmem>>, vector<16x128xf32>
    %8 = arith.addf %6, %7 : vector<16x128xf32>
    %c0_7 = arith.constant 0 : index
    %c0_8 = arith.constant 0 : index
    %9 = vector.load %arg1[%c0_7, %c0_8] : memref<32x128xf32, #tpu.memory_space<vmem>>, vector<32x128xf32>
    %c0_9 = arith.constant 0 : index
    %c0_10 = arith.constant 0 : index
    %c0_11 = arith.constant 0 : index
    %10 = vector.load %arg5[%c0_9, %c0_10, %c0_11] : memref<2x128x384xbf16, #tpu.memory_space<vmem>>, vector<1x128x384xbf16>
    %11 = vector.shape_cast %10 : vector<1x128x384xbf16> to vector<128x384xbf16>
    %12 = arith.truncf %8 : vector<16x128xf32> to vector<16x128xbf16>
    %cst_12 = arith.constant dense<0.000000e+00> : vector<16x384xf32>
    %13 = tpu.matmul %12, %11, %cst_12 {dimension_numbers = #tpu.dot_dimension_numbers<[1], [0], [0], [1], [0, 0, 1, 1], [], []>} : vector<16x128xbf16>, vector<128x384xbf16>, vector<16x384xf32> -> vector<16x384xf32>
    %c0_13 = arith.constant 0 : index
    %c0_14 = arith.constant 0 : index
    %c0_15 = arith.constant 0 : index
    %14 = vector.load %arg6[%c0_13, %c0_14, %c0_15] : memref<2x1x384xf32, #tpu.memory_space<vmem>>, vector<1x1x384xf32>
    %15 = vector.shape_cast %14 : vector<1x1x384xf32> to vector<1x384xf32>
    %16 = vector.broadcast %15 : vector<1x384xf32> to vector<16x384xf32>
    %17 = arith.addf %13, %16 : vector<16x384xf32>
    %18 = vector.extract_strided_slice %17 {offsets = [0, 0], sizes = [16, 128], strides = [1, 1]} : vector<16x384xf32> to vector<16x128xf32>
    %19 = vector.extract_strided_slice %17 {offsets = [0, 128], sizes = [16, 128], strides = [1, 1]} : vector<16x384xf32> to vector<16x128xf32>
    %20 = vector.extract_strided_slice %17 {offsets = [0, 256], sizes = [16, 128], strides = [1, 1]} : vector<16x384xf32> to vector<16x128xf32>
    %21 = vector.extract_strided_slice %18 {offsets = [0, 0], sizes = [8, 128], strides = [1, 1]} : vector<16x128xf32> to vector<8x128xf32>
    %22 = vector.extract_strided_slice %19 {offsets = [0, 0], sizes = [8, 128], strides = [1, 1]} : vector<16x128xf32> to vector<8x128xf32>
    %23 = vector.extract_strided_slice %20 {offsets = [0, 0], sizes = [8, 128], strides = [1, 1]} : vector<16x128xf32> to vector<8x128xf32>
    %24 = vector.extract_strided_slice %21 {offsets = [0, 0], sizes = [8, 32], strides = [1, 1]} : vector<8x128xf32> to vector<8x32xf32>
    %25 = arith.truncf %24 : vector<8x32xf32> to vector<8x32xbf16>
    %26 = vector.extract_strided_slice %22 {offsets = [0, 0], sizes = [8, 32], strides = [1, 1]} : vector<8x128xf32> to vector<8x32xf32>
    %27 = arith.truncf %26 : vector<8x32xf32> to vector<8x32xbf16>
    %cst_16 = arith.constant dense<0.000000e+00> : vector<8x8xf32>
    %28 = tpu.matmul %25, %27, %cst_16 {dimension_numbers = #tpu.dot_dimension_numbers<[1], [1], [0], [0], [0, 0, 1, 0], [], []>} : vector<8x32xbf16>, vector<8x32xbf16>, vector<8x8xf32> -> vector<8x8xf32>
    %cst_17 = arith.constant 0.176776692 : f32
    %29 = vector.broadcast %cst_17 : f32 to vector<8x8xf32>
    %30 = arith.mulf %28, %29 : vector<8x8xf32>
    %cst_18 = arith.constant dense<0xFF800000> : vector<8xf32>
    %31 = vector.multi_reduction <maximumf>, %30, %cst_18 [1] : vector<8x8xf32> to vector<8xf32>
    %32 = vector.shape_cast %31 : vector<8xf32> to vector<8x1xf32>
    %33 = vector.broadcast %32 : vector<8x1xf32> to vector<8x8xf32>
    %34 = arith.subf %30, %33 : vector<8x8xf32>
    %35 = math.exp %34 : vector<8x8xf32>
    %cst_19 = arith.constant dense<0.000000e+00> : vector<8xf32>
    %36 = vector.multi_reduction <add>, %35, %cst_19 [1] : vector<8x8xf32> to vector<8xf32>
    %37 = vector.shape_cast %36 : vector<8xf32> to vector<8x1xf32>
    %38 = tpu.reciprocal %37 {approx = true} : vector<8x1xf32> -> vector<8x1xf32>
    %39 = vector.broadcast %38 : vector<8x1xf32> to vector<8x8xf32>
    %40 = arith.mulf %35, %39 : vector<8x8xf32>
    %41 = arith.truncf %40 : vector<8x8xf32> to vector<8x8xbf16>
    %42 = vector.extract_strided_slice %23 {offsets = [0, 0], sizes = [8, 32], strides = [1, 1]} : vector<8x128xf32> to vector<8x32xf32>
    %43 = arith.truncf %42 : vector<8x32xf32> to vector<8x32xbf16>
    %cst_20 = arith.constant dense<0.000000e+00> : vector<8x32xf32>
    %44 = tpu.matmul %41, %43, %cst_20 {dimension_numbers = #tpu.dot_dimension_numbers<[1], [0], [0], [1], [0, 0, 1, 1], [], []>} : vector<8x8xbf16>, vector<8x32xbf16>, vector<8x32xf32> -> vector<8x32xf32>
    %c0_21 = arith.constant 0 : index
    %c0_22 = arith.constant 0 : index
    %45 = vector.load %arg28[%c0_21, %c0_22] : memref<16x128xf32, #tpu.memory_space<vmem>>, vector<8x32xf32>
    tpu.vector_store %arg28[%c0_21, %c0_22], %44 {strides = array<i32>} : memref<16x128xf32, #tpu.memory_space<vmem>>, vector<8x32xf32>,
    %46 = vector.extract_strided_slice %21 {offsets = [0, 32], sizes = [8, 32], strides = [1, 1]} : vector<8x128xf32> to vector<8x32xf32>
    %47 = arith.truncf %46 : vector<8x32xf32> to vector<8x32xbf16>
    %48 = vector.extract_strided_slice %22 {offsets = [0, 32], sizes = [8, 32], strides = [1, 1]} : vector<8x128xf32> to vector<8x32xf32>
    %49 = arith.truncf %48 : vector<8x32xf32> to vector<8x32xbf16>
    %cst_23 = arith.constant dense<0.000000e+00> : vector<8x8xf32>
    %50 = tpu.matmul %47, %49, %cst_23 {dimension_numbers = #tpu.dot_dimension_numbers<[1], [1], [0], [0], [0, 0, 1, 0], [], []>} : vector<8x32xbf16>, vector<8x32xbf16>, vector<8x8xf32> -> vector<8x8xf32>
    %cst_24 = arith.constant 0.176776692 : f32
    %51 = vector.broadcast %cst_24 : f32 to vector<8x8xf32>
    %52 = arith.mulf %50, %51 : vector<8x8xf32>
    %cst_25 = arith.constant dense<0xFF800000> : vector<8xf32>
    %53 = vector.multi_reduction <maximumf>, %52, %cst_25 [1] : vector<8x8xf32> to vector<8xf32>
    %54 = vector.shape_cast %53 : vector<8xf32> to vector<8x1xf32>
    %55 = vector.broadcast %54 : vector<8x1xf32> to vector<8x8xf32>
    %56 = arith.subf %52, %55 : vector<8x8xf32>
    %57 = math.exp %56 : vector<8x8xf32>
    %cst_26 = arith.constant dense<0.000000e+00> : vector<8xf32>
    %58 = vector.multi_reduction <add>, %57, %cst_26 [1] : vector<8x8xf32> to vector<8xf32>
    %59 = vector.shape_cast %58 : vector<8xf32> to vector<8x1xf32>
    %60 = tpu.reciprocal %59 {approx = true} : vector<8x1xf32> -> vector<8x1xf32>
    %61 = vector.broadcast %60 : vector<8x1xf32> to vector<8x8xf32>
    %62 = arith.mulf %57, %61 : vector<8x8xf32>
    %63 = arith.truncf %62 : vector<8x8xf32> to vector<8x8xbf16>
    %64 = vector.extract_strided_slice %23 {offsets = [0, 32], sizes = [8, 32], strides = [1, 1]} : vector<8x128xf32> to vector<8x32xf32>
    %65 = arith.truncf %64 : vector<8x32xf32> to vector<8x32xbf16>
    %cst_27 = arith.constant dense<0.000000e+00> : vector<8x32xf32>
    %66 = tpu.matmul %63, %65, %cst_27 {dimension_numbers = #tpu.dot_dimension_numbers<[1], [0], [0], [1], [0, 0, 1, 1], [], []>} : vector<8x8xbf16>, vector<8x32xbf16>, vector<8x32xf32> -> vector<8x32xf32>
    %c0_28 = arith.constant 0 : index
    %c32 = arith.constant 32 : index
    %67 = vector.load %arg28[%c0_28, %c32] : memref<16x128xf32, #tpu.memory_space<vmem>>, vector<8x32xf32>
    tpu.vector_store %arg28[%c0_28, %c32], %66 {strides = array<i32>} : memref<16x128xf32, #tpu.memory_space<vmem>>, vector<8x32xf32>,
    %68 = vector.extract_strided_slice %21 {offsets = [0, 64], sizes = [8, 32], strides = [1, 1]} : vector<8x128xf32> to vector<8x32xf32>
    %69 = arith.truncf %68 : vector<8x32xf32> to vector<8x32xbf16>
    %70 = vector.extract_strided_slice %22 {offsets = [0, 64], sizes = [8, 32], strides = [1, 1]} : vector<8x128xf32> to vector<8x32xf32>
    %71 = arith.truncf %70 : vector<8x32xf32> to vector<8x32xbf16>
    %cst_29 = arith.constant dense<0.000000e+00> : vector<8x8xf32>
    %72 = tpu.matmul %69, %71, %cst_29 {dimension_numbers = #tpu.dot_dimension_numbers<[1], [1], [0], [0], [0, 0, 1, 0], [], []>} : vector<8x32xbf16>, vector<8x32xbf16>, vector<8x8xf32> -> vector<8x8xf32>
    %cst_30 = arith.constant 0.176776692 : f32
    %73 = vector.broadcast %cst_30 : f32 to vector<8x8xf32>
    %74 = arith.mulf %72, %73 : vector<8x8xf32>
    %cst_31 = arith.constant dense<0xFF800000> : vector<8xf32>
    %75 = vector.multi_reduction <maximumf>, %74, %cst_31 [1] : vector<8x8xf32> to vector<8xf32>
    %76 = vector.shape_cast %75 : vector<8xf32> to vector<8x1xf32>
    %77 = vector.broadcast %76 : vector<8x1xf32> to vector<8x8xf32>
    %78 = arith.subf %74, %77 : vector<8x8xf32>
    %79 = math.exp %78 : vector<8x8xf32>
    %cst_32 = arith.constant dense<0.000000e+00> : vector<8xf32>
    %80 = vector.multi_reduction <add>, %79, %cst_32 [1] : vector<8x8xf32> to vector<8xf32>
    %81 = vector.shape_cast %80 : vector<8xf32> to vector<8x1xf32>
    %82 = tpu.reciprocal %81 {approx = true} : vector<8x1xf32> -> vector<8x1xf32>
    %83 = vector.broadcast %82 : vector<8x1xf32> to vector<8x8xf32>
    %84 = arith.mulf %79, %83 : vector<8x8xf32>
    %85 = arith.truncf %84 : vector<8x8xf32> to vector<8x8xbf16>
    %86 = vector.extract_strided_slice %23 {offsets = [0, 64], sizes = [8, 32], strides = [1, 1]} : vector<8x128xf32> to vector<8x32xf32>
    %87 = arith.truncf %86 : vector<8x32xf32> to vector<8x32xbf16>
    %cst_33 = arith.constant dense<0.000000e+00> : vector<8x32xf32>
    %88 = tpu.matmul %85, %87, %cst_33 {dimension_numbers = #tpu.dot_dimension_numbers<[1], [0], [0], [1], [0, 0, 1, 1], [], []>} : vector<8x8xbf16>, vector<8x32xbf16>, vector<8x32xf32> -> vector<8x32xf32>
    %c0_34 = arith.constant 0 : index
    %c64 = arith.constant 64 : index
    %89 = vector.load %arg28[%c0_34, %c64] : memref<16x128xf32, #tpu.memory_space<vmem>>, vector<8x32xf32>
    tpu.vector_store %arg28[%c0_34, %c64], %88 {strides = array<i32>} : memref<16x128xf32, #tpu.memory_space<vmem>>, vector<8x32xf32>,
    %90 = vector.extract_strided_slice %21 {offsets = [0, 96], sizes = [8, 32], strides = [1, 1]} : vector<8x128xf32> to vector<8x32xf32>
    %91 = arith.truncf %90 : vector<8x32xf32> to vector<8x32xbf16>
    %92 = vector.extract_strided_slice %22 {offsets = [0, 96], sizes = [8, 32], strides = [1, 1]} : vector<8x128xf32> to vector<8x32xf32>
    %93 = arith.truncf %92 : vector<8x32xf32> to vector<8x32xbf16>
    %cst_35 = arith.constant dense<0.000000e+00> : vector<8x8xf32>
    %94 = tpu.matmul %91, %93, %cst_35 {dimension_numbers = #tpu.dot_dimension_numbers<[1], [1], [0], [0], [0, 0, 1, 0], [], []>} : vector<8x32xbf16>, vector<8x32xbf16>, vector<8x8xf32> -> vector<8x8xf32>
    %cst_36 = arith.constant 0.176776692 : f32
    %95 = vector.broadcast %cst_36 : f32 to vector<8x8xf32>
    %96 = arith.mulf %94, %95 : vector<8x8xf32>
    %cst_37 = arith.constant dense<0xFF800000> : vector<8xf32>
    %97 = vector.multi_reduction <maximumf>, %96, %cst_37 [1] : vector<8x8xf32> to vector<8xf32>
    %98 = vector.shape_cast %97 : vector<8xf32> to vector<8x1xf32>
    %99 = vector.broadcast %98 : vector<8x1xf32> to vector<8x8xf32>
    %100 = arith.subf %96, %99 : vector<8x8xf32>
    %101 = math.exp %100 : vector<8x8xf32>
    %cst_38 = arith.constant dense<0.000000e+00> : vector<8xf32>
    %102 = vector.multi_reduction <add>, %101, %cst_38 [1] : vector<8x8xf32> to vector<8xf32>
    %103 = vector.shape_cast %102 : vector<8xf32> to vector<8x1xf32>
    %104 = tpu.reciprocal %103 {approx = true} : vector<8x1xf32> -> vector<8x1xf32>
    %105 = vector.broadcast %104 : vector<8x1xf32> to vector<8x8xf32>
    %106 = arith.mulf %101, %105 : vector<8x8xf32>
    %107 = arith.truncf %106 : vector<8x8xf32> to vector<8x8xbf16>
    %108 = vector.extract_strided_slice %23 {offsets = [0, 96], sizes = [8, 32], strides = [1, 1]} : vector<8x128xf32> to vector<8x32xf32>
    %109 = arith.truncf %108 : vector<8x32xf32> to vector<8x32xbf16>
    %cst_39 = arith.constant dense<0.000000e+00> : vector<8x32xf32>
    %110 = tpu.matmul %107, %109, %cst_39 {dimension_numbers = #tpu.dot_dimension_numbers<[1], [0], [0], [1], [0, 0, 1, 1], [], []>} : vector<8x8xbf16>, vector<8x32xbf16>, vector<8x32xf32> -> vector<8x32xf32>
    %c0_40 = arith.constant 0 : index
    %c96 = arith.constant 96 : index
    %111 = vector.load %arg28[%c0_40, %c96] : memref<16x128xf32, #tpu.memory_space<vmem>>, vector<8x32xf32>
    tpu.vector_store %arg28[%c0_40, %c96], %110 {strides = array<i32>} : memref<16x128xf32, #tpu.memory_space<vmem>>, vector<8x32xf32>,
    %112 = vector.extract_strided_slice %18 {offsets = [8, 0], sizes = [8, 128], strides = [1, 1]} : vector<16x128xf32> to vector<8x128xf32>
    %113 = vector.extract_strided_slice %19 {offsets = [8, 0], sizes = [8, 128], strides = [1, 1]} : vector<16x128xf32> to vector<8x128xf32>
    %114 = vector.extract_strided_slice %20 {offsets = [8, 0], sizes = [8, 128], strides = [1, 1]} : vector<16x128xf32> to vector<8x128xf32>
    %115 = vector.extract_strided_slice %112 {offsets = [0, 0], sizes = [8, 32], strides = [1, 1]} : vector<8x128xf32> to vector<8x32xf32>
    %116 = arith.truncf %115 : vector<8x32xf32> to vector<8x32xbf16>
    %117 = vector.extract_strided_slice %113 {offsets = [0, 0], sizes = [8, 32], strides = [1, 1]} : vector<8x128xf32> to vector<8x32xf32>
    %118 = arith.truncf %117 : vector<8x32xf32> to vector<8x32xbf16>
    %cst_41 = arith.constant dense<0.000000e+00> : vector<8x8xf32>
    %119 = tpu.matmul %116, %118, %cst_41 {dimension_numbers = #tpu.dot_dimension_numbers<[1], [1], [0], [0], [0, 0, 1, 0], [], []>} : vector<8x32xbf16>, vector<8x32xbf16>, vector<8x8xf32> -> vector<8x8xf32>
    %cst_42 = arith.constant 0.176776692 : f32
    %120 = vector.broadcast %cst_42 : f32 to vector<8x8xf32>
    %121 = arith.mulf %119, %120 : vector<8x8xf32>
    %cst_43 = arith.constant dense<0xFF800000> : vector<8xf32>
    %122 = vector.multi_reduction <maximumf>, %121, %cst_43 [1] : vector<8x8xf32> to vector<8xf32>
    %123 = vector.shape_cast %122 : vector<8xf32> to vector<8x1xf32>
    %124 = vector.broadcast %123 : vector<8x1xf32> to vector<8x8xf32>
    %125 = arith.subf %121, %124 : vector<8x8xf32>
    %126 = math.exp %125 : vector<8x8xf32>
    %cst_44 = arith.constant dense<0.000000e+00> : vector<8xf32>
    %127 = vector.multi_reduction <add>, %126, %cst_44 [1] : vector<8x8xf32> to vector<8xf32>
    %128 = vector.shape_cast %127 : vector<8xf32> to vector<8x1xf32>
    %129 = tpu.reciprocal %128 {approx = true} : vector<8x1xf32> -> vector<8x1xf32>
    %130 = vector.broadcast %129 : vector<8x1xf32> to vector<8x8xf32>
    %131 = arith.mulf %126, %130 : vector<8x8xf32>
    %132 = arith.truncf %131 : vector<8x8xf32> to vector<8x8xbf16>
    %133 = vector.extract_strided_slice %114 {offsets = [0, 0], sizes = [8, 32], strides = [1, 1]} : vector<8x128xf32> to vector<8x32xf32>
    %134 = arith.truncf %133 : vector<8x32xf32> to vector<8x32xbf16>
    %cst_45 = arith.constant dense<0.000000e+00> : vector<8x32xf32>
    %135 = tpu.matmul %132, %134, %cst_45 {dimension_numbers = #tpu.dot_dimension_numbers<[1], [0], [0], [1], [0, 0, 1, 1], [], []>} : vector<8x8xbf16>, vector<8x32xbf16>, vector<8x32xf32> -> vector<8x32xf32>
    %c8 = arith.constant 8 : index
    %c0_46 = arith.constant 0 : index
    %136 = vector.load %arg28[%c8, %c0_46] : memref<16x128xf32, #tpu.memory_space<vmem>>, vector<8x32xf32>
    tpu.vector_store %arg28[%c8, %c0_46], %135 {strides = array<i32>} : memref<16x128xf32, #tpu.memory_space<vmem>>, vector<8x32xf32>,
    %137 = vector.extract_strided_slice %112 {offsets = [0, 32], sizes = [8, 32], strides = [1, 1]} : vector<8x128xf32> to vector<8x32xf32>
    %138 = arith.truncf %137 : vector<8x32xf32> to vector<8x32xbf16>
    %139 = vector.extract_strided_slice %113 {offsets = [0, 32], sizes = [8, 32], strides = [1, 1]} : vector<8x128xf32> to vector<8x32xf32>
    %140 = arith.truncf %139 : vector<8x32xf32> to vector<8x32xbf16>
    %cst_47 = arith.constant dense<0.000000e+00> : vector<8x8xf32>
    %141 = tpu.matmul %138, %140, %cst_47 {dimension_numbers = #tpu.dot_dimension_numbers<[1], [1], [0], [0], [0, 0, 1, 0], [], []>} : vector<8x32xbf16>, vector<8x32xbf16>, vector<8x8xf32> -> vector<8x8xf32>
    %cst_48 = arith.constant 0.176776692 : f32
    %142 = vector.broadcast %cst_48 : f32 to vector<8x8xf32>
    %143 = arith.mulf %141, %142 : vector<8x8xf32>
    %cst_49 = arith.constant dense<0xFF800000> : vector<8xf32>
    %144 = vector.multi_reduction <maximumf>, %143, %cst_49 [1] : vector<8x8xf32> to vector<8xf32>
    %145 = vector.shape_cast %144 : vector<8xf32> to vector<8x1xf32>
    %146 = vector.broadcast %145 : vector<8x1xf32> to vector<8x8xf32>
    %147 = arith.subf %143, %146 : vector<8x8xf32>
    %148 = math.exp %147 : vector<8x8xf32>
    %cst_50 = arith.constant dense<0.000000e+00> : vector<8xf32>
    %149 = vector.multi_reduction <add>, %148, %cst_50 [1] : vector<8x8xf32> to vector<8xf32>
    %150 = vector.shape_cast %149 : vector<8xf32> to vector<8x1xf32>
    %151 = tpu.reciprocal %150 {approx = true} : vector<8x1xf32> -> vector<8x1xf32>
    %152 = vector.broadcast %151 : vector<8x1xf32> to vector<8x8xf32>
    %153 = arith.mulf %148, %152 : vector<8x8xf32>
    %154 = arith.truncf %153 : vector<8x8xf32> to vector<8x8xbf16>
    %155 = vector.extract_strided_slice %114 {offsets = [0, 32], sizes = [8, 32], strides = [1, 1]} : vector<8x128xf32> to vector<8x32xf32>
    %156 = arith.truncf %155 : vector<8x32xf32> to vector<8x32xbf16>
    %cst_51 = arith.constant dense<0.000000e+00> : vector<8x32xf32>
    %157 = tpu.matmul %154, %156, %cst_51 {dimension_numbers = #tpu.dot_dimension_numbers<[1], [0], [0], [1], [0, 0, 1, 1], [], []>} : vector<8x8xbf16>, vector<8x32xbf16>, vector<8x32xf32> -> vector<8x32xf32>
    %c8_52 = arith.constant 8 : index
    %c32_53 = arith.constant 32 : index
    %158 = vector.load %arg28[%c8_52, %c32_53] : memref<16x128xf32, #tpu.memory_space<vmem>>, vector<8x32xf32>
    tpu.vector_store %arg28[%c8_52, %c32_53], %157 {strides = array<i32>} : memref<16x128xf32, #tpu.memory_space<vmem>>, vector<8x32xf32>,
    %159 = vector.extract_strided_slice %112 {offsets = [0, 64], sizes = [8, 32], strides = [1, 1]} : vector<8x128xf32> to vector<8x32xf32>
    %160 = arith.truncf %159 : vector<8x32xf32> to vector<8x32xbf16>
    %161 = vector.extract_strided_slice %113 {offsets = [0, 64], sizes = [8, 32], strides = [1, 1]} : vector<8x128xf32> to vector<8x32xf32>
    %162 = arith.truncf %161 : vector<8x32xf32> to vector<8x32xbf16>
    %cst_54 = arith.constant dense<0.000000e+00> : vector<8x8xf32>
    %163 = tpu.matmul %160, %162, %cst_54 {dimension_numbers = #tpu.dot_dimension_numbers<[1], [1], [0], [0], [0, 0, 1, 0], [], []>} : vector<8x32xbf16>, vector<8x32xbf16>, vector<8x8xf32> -> vector<8x8xf32>
    %cst_55 = arith.constant 0.176776692 : f32
    %164 = vector.broadcast %cst_55 : f32 to vector<8x8xf32>
    %165 = arith.mulf %163, %164 : vector<8x8xf32>
    %cst_56 = arith.constant dense<0xFF800000> : vector<8xf32>
    %166 = vector.multi_reduction <maximumf>, %165, %cst_56 [1] : vector<8x8xf32> to vector<8xf32>
    %167 = vector.shape_cast %166 : vector<8xf32> to vector<8x1xf32>
    %168 = vector.broadcast %167 : vector<8x1xf32> to vector<8x8xf32>
    %169 = arith.subf %165, %168 : vector<8x8xf32>
    %170 = math.exp %169 : vector<8x8xf32>
    %cst_57 = arith.constant dense<0.000000e+00> : vector<8xf32>
    %171 = vector.multi_reduction <add>, %170, %cst_57 [1] : vector<8x8xf32> to vector<8xf32>
    %172 = vector.shape_cast %171 : vector<8xf32> to vector<8x1xf32>
    %173 = tpu.reciprocal %172 {approx = true} : vector<8x1xf32> -> vector<8x1xf32>
    %174 = vector.broadcast %173 : vector<8x1xf32> to vector<8x8xf32>
    %175 = arith.mulf %170, %174 : vector<8x8xf32>
    %176 = arith.truncf %175 : vector<8x8xf32> to vector<8x8xbf16>
    %177 = vector.extract_strided_slice %114 {offsets = [0, 64], sizes = [8, 32], strides = [1, 1]} : vector<8x128xf32> to vector<8x32xf32>
    %178 = arith.truncf %177 : vector<8x32xf32> to vector<8x32xbf16>
    %cst_58 = arith.constant dense<0.000000e+00> : vector<8x32xf32>
    %179 = tpu.matmul %176, %178, %cst_58 {dimension_numbers = #tpu.dot_dimension_numbers<[1], [0], [0], [1], [0, 0, 1, 1], [], []>} : vector<8x8xbf16>, vector<8x32xbf16>, vector<8x32xf32> -> vector<8x32xf32>
    %c8_59 = arith.constant 8 : index
    %c64_60 = arith.constant 64 : index
    %180 = vector.load %arg28[%c8_59, %c64_60] : memref<16x128xf32, #tpu.memory_space<vmem>>, vector<8x32xf32>
    tpu.vector_store %arg28[%c8_59, %c64_60], %179 {strides = array<i32>} : memref<16x128xf32, #tpu.memory_space<vmem>>, vector<8x32xf32>,
    %181 = vector.extract_strided_slice %112 {offsets = [0, 96], sizes = [8, 32], strides = [1, 1]} : vector<8x128xf32> to vector<8x32xf32>
    %182 = arith.truncf %181 : vector<8x32xf32> to vector<8x32xbf16>
    %183 = vector.extract_strided_slice %113 {offsets = [0, 96], sizes = [8, 32], strides = [1, 1]} : vector<8x128xf32> to vector<8x32xf32>
    %184 = arith.truncf %183 : vector<8x32xf32> to vector<8x32xbf16>
    %cst_61 = arith.constant dense<0.000000e+00> : vector<8x8xf32>
    %185 = tpu.matmul %182, %184, %cst_61 {dimension_numbers = #tpu.dot_dimension_numbers<[1], [1], [0], [0], [0, 0, 1, 0], [], []>} : vector<8x32xbf16>, vector<8x32xbf16>, vector<8x8xf32> -> vector<8x8xf32>
    %cst_62 = arith.constant 0.176776692 : f32
    %186 = vector.broadcast %cst_62 : f32 to vector<8x8xf32>
    %187 = arith.mulf %185, %186 : vector<8x8xf32>
    %cst_63 = arith.constant dense<0xFF800000> : vector<8xf32>
    %188 = vector.multi_reduction <maximumf>, %187, %cst_63 [1] : vector<8x8xf32> to vector<8xf32>
    %189 = vector.shape_cast %188 : vector<8xf32> to vector<8x1xf32>
    %190 = vector.broadcast %189 : vector<8x1xf32> to vector<8x8xf32>
    %191 = arith.subf %187, %190 : vector<8x8xf32>
    %192 = math.exp %191 : vector<8x8xf32>
    %cst_64 = arith.constant dense<0.000000e+00> : vector<8xf32>
    %193 = vector.multi_reduction <add>, %192, %cst_64 [1] : vector<8x8xf32> to vector<8xf32>
    %194 = vector.shape_cast %193 : vector<8xf32> to vector<8x1xf32>
    %195 = tpu.reciprocal %194 {approx = true} : vector<8x1xf32> -> vector<8x1xf32>
    %196 = vector.broadcast %195 : vector<8x1xf32> to vector<8x8xf32>
    %197 = arith.mulf %192, %196 : vector<8x8xf32>
    %198 = arith.truncf %197 : vector<8x8xf32> to vector<8x8xbf16>
    %199 = vector.extract_strided_slice %114 {offsets = [0, 96], sizes = [8, 32], strides = [1, 1]} : vector<8x128xf32> to vector<8x32xf32>
    %200 = arith.truncf %199 : vector<8x32xf32> to vector<8x32xbf16>
    %cst_65 = arith.constant dense<0.000000e+00> : vector<8x32xf32>
    %201 = tpu.matmul %198, %200, %cst_65 {dimension_numbers = #tpu.dot_dimension_numbers<[1], [0], [0], [1], [0, 0, 1, 1], [], []>} : vector<8x8xbf16>, vector<8x32xbf16>, vector<8x32xf32> -> vector<8x32xf32>
    %c8_66 = arith.constant 8 : index
    %c96_67 = arith.constant 96 : index
    %202 = vector.load %arg28[%c8_66, %c96_67] : memref<16x128xf32, #tpu.memory_space<vmem>>, vector<8x32xf32>
    tpu.vector_store %arg28[%c8_66, %c96_67], %201 {strides = array<i32>} : memref<16x128xf32, #tpu.memory_space<vmem>>, vector<8x32xf32>,
    %c0_68 = arith.constant 0 : index
    %c0_69 = arith.constant 0 : index
    %203 = vector.load %arg28[%c0_68, %c0_69] : memref<16x128xf32, #tpu.memory_space<vmem>>, vector<16x128xf32>
    %c0_70 = arith.constant 0 : index
    %c0_71 = arith.constant 0 : index
    %c0_72 = arith.constant 0 : index
    %204 = vector.load %arg7[%c0_70, %c0_71, %c0_72] : memref<2x128x128xbf16, #tpu.memory_space<vmem>>, vector<1x128x128xbf16>
    %205 = vector.shape_cast %204 : vector<1x128x128xbf16> to vector<128x128xbf16>
    %206 = arith.truncf %203 : vector<16x128xf32> to vector<16x128xbf16>
    %cst_73 = arith.constant dense<0.000000e+00> : vector<16x128xf32>
    %207 = tpu.matmul %206, %205, %cst_73 {dimension_numbers = #tpu.dot_dimension_numbers<[1], [0], [0], [1], [0, 0, 1, 1], [], []>} : vector<16x128xbf16>, vector<128x128xbf16>, vector<16x128xf32> -> vector<16x128xf32>
    %c0_74 = arith.constant 0 : index
    %c0_75 = arith.constant 0 : index
    %c0_76 = arith.constant 0 : index
    %208 = vector.load %arg8[%c0_74, %c0_75, %c0_76] : memref<2x1x128xf32, #tpu.memory_space<vmem>>, vector<1x1x128xf32>
    %209 = vector.shape_cast %208 : vector<1x1x128xf32> to vector<1x128xf32>
    %210 = vector.broadcast %209 : vector<1x128xf32> to vector<16x128xf32>
    %211 = arith.addf %207, %210 : vector<16x128xf32>
    %212 = arith.addf %211, %8 : vector<16x128xf32>
    %c0_77 = arith.constant 0 : index
    %c0_78 = arith.constant 0 : index
    %c0_79 = arith.constant 0 : index
    %213 = vector.load %arg9[%c0_77, %c0_78, %c0_79] : memref<2x1x128xf32, #tpu.memory_space<vmem>>, vector<1x1x128xf32>
    %214 = vector.shape_cast %213 : vector<1x1x128xf32> to vector<1x128xf32>
    %c0_80 = arith.constant 0 : index
    %c0_81 = arith.constant 0 : index
    %c0_82 = arith.constant 0 : index
    %215 = vector.load %arg10[%c0_80, %c0_81, %c0_82] : memref<2x1x128xf32, #tpu.memory_space<vmem>>, vector<1x1x128xf32>
    %216 = vector.shape_cast %215 : vector<1x1x128xf32> to vector<1x128xf32>
    %cst_83 = arith.constant dense<0.000000e+00> : vector<16xf32>
    %217 = vector.multi_reduction <add>, %212, %cst_83 [1] : vector<16x128xf32> to vector<16xf32>
    %218 = vector.shape_cast %217 : vector<16xf32> to vector<16x1xf32>
    %cst_84 = arith.constant 1.280000e+02 : f32
    %219 = vector.broadcast %cst_84 : f32 to vector<16x1xf32>
    %220 = arith.divf %218, %219 : vector<16x1xf32>
    %221 = vector.broadcast %220 : vector<16x1xf32> to vector<16x128xf32>
    %222 = arith.subf %212, %221 : vector<16x128xf32>
    %223 = arith.mulf %222, %222 : vector<16x128xf32>
    %cst_85 = arith.constant dense<0.000000e+00> : vector<16xf32>
    %224 = vector.multi_reduction <add>, %223, %cst_85 [1] : vector<16x128xf32> to vector<16xf32>
    %225 = vector.shape_cast %224 : vector<16xf32> to vector<16x1xf32>
    %cst_86 = arith.constant 1.280000e+02 : f32
    %226 = vector.broadcast %cst_86 : f32 to vector<16x1xf32>
    %227 = arith.divf %225, %226 : vector<16x1xf32>
    %228 = vector.broadcast %220 : vector<16x1xf32> to vector<16x128xf32>
    %229 = arith.subf %212, %228 : vector<16x128xf32>
    %cst_87 = arith.constant 9.99999974E-6 : f32
    %230 = vector.broadcast %cst_87 : f32 to vector<16x1xf32>
    %231 = arith.addf %227, %230 : vector<16x1xf32>
    %232 = math.rsqrt %231 : vector<16x1xf32>
    %233 = vector.broadcast %232 : vector<16x1xf32> to vector<16x128xf32>
    %234 = arith.mulf %229, %233 : vector<16x128xf32>
    %235 = vector.broadcast %214 : vector<1x128xf32> to vector<16x128xf32>
    %236 = arith.mulf %234, %235 : vector<16x128xf32>
    %237 = vector.broadcast %216 : vector<1x128xf32> to vector<16x128xf32>
    %238 = arith.addf %236, %237 : vector<16x128xf32>
    %c0_88 = arith.constant 0 : index
    %c0_89 = arith.constant 0 : index
    %c0_90 = arith.constant 0 : index
    %239 = vector.load %arg11[%c0_88, %c0_89, %c0_90] : memref<2x128x128xbf16, #tpu.memory_space<vmem>>, vector<1x128x128xbf16>
    %240 = vector.shape_cast %239 : vector<1x128x128xbf16> to vector<128x128xbf16>
    %241 = arith.truncf %238 : vector<16x128xf32> to vector<16x128xbf16>
    %cst_91 = arith.constant dense<0.000000e+00> : vector<16x128xf32>
    %242 = tpu.matmul %241, %240, %cst_91 {dimension_numbers = #tpu.dot_dimension_numbers<[1], [0], [0], [1], [0, 0, 1, 1], [], []>} : vector<16x128xbf16>, vector<128x128xbf16>, vector<16x128xf32> -> vector<16x128xf32>
    %c0_92 = arith.constant 0 : index
    %c0_93 = arith.constant 0 : index
    %c0_94 = arith.constant 0 : index
    %243 = vector.load %arg12[%c0_92, %c0_93, %c0_94] : memref<2x1x128xf32, #tpu.memory_space<vmem>>, vector<1x1x128xf32>
    %244 = vector.shape_cast %243 : vector<1x1x128xf32> to vector<1x128xf32>
    %245 = vector.broadcast %244 : vector<1x128xf32> to vector<16x128xf32>
    %246 = arith.addf %242, %245 : vector<16x128xf32>
    %c0_95 = arith.constant 0 : index
    %c0_96 = arith.constant 0 : index
    %c0_97 = arith.constant 0 : index
    %247 = vector.load %arg13[%c0_95, %c0_96, %c0_97] : memref<2x128x256xbf16, #tpu.memory_space<vmem>>, vector<1x128x256xbf16>
    %248 = vector.shape_cast %247 : vector<1x128x256xbf16> to vector<128x256xbf16>
    %249 = arith.truncf %9 : vector<32x128xf32> to vector<32x128xbf16>
    %cst_98 = arith.constant dense<0.000000e+00> : vector<32x256xf32>
    %250 = tpu.matmul %249, %248, %cst_98 {dimension_numbers = #tpu.dot_dimension_numbers<[1], [0], [0], [1], [0, 0, 1, 1], [], []>} : vector<32x128xbf16>, vector<128x256xbf16>, vector<32x256xf32> -> vector<32x256xf32>
    %c0_99 = arith.constant 0 : index
    %c0_100 = arith.constant 0 : index
    %c0_101 = arith.constant 0 : index
    %251 = vector.load %arg14[%c0_99, %c0_100, %c0_101] : memref<2x1x256xf32, #tpu.memory_space<vmem>>, vector<1x1x256xf32>
    %252 = vector.shape_cast %251 : vector<1x1x256xf32> to vector<1x256xf32>
    %253 = vector.broadcast %252 : vector<1x256xf32> to vector<32x256xf32>
    %254 = arith.addf %250, %253 : vector<32x256xf32>
    %255 = vector.extract_strided_slice %254 {offsets = [0, 0], sizes = [32, 128], strides = [1, 1]} : vector<32x256xf32> to vector<32x128xf32>
    %256 = vector.extract_strided_slice %254 {offsets = [0, 128], sizes = [32, 128], strides = [1, 1]} : vector<32x256xf32> to vector<32x128xf32>
    %257 = vector.extract_strided_slice %246 {offsets = [0, 0], sizes = [8, 128], strides = [1, 1]} : vector<16x128xf32> to vector<8x128xf32>
    %258 = vector.extract_strided_slice %255 {offsets = [0, 0], sizes = [16, 128], strides = [1, 1]} : vector<32x128xf32> to vector<16x128xf32>
    %259 = vector.extract_strided_slice %256 {offsets = [0, 0], sizes = [16, 128], strides = [1, 1]} : vector<32x128xf32> to vector<16x128xf32>
    %260 = vector.extract_strided_slice %257 {offsets = [0, 0], sizes = [8, 32], strides = [1, 1]} : vector<8x128xf32> to vector<8x32xf32>
    %261 = arith.truncf %260 : vector<8x32xf32> to vector<8x32xbf16>
    %262 = vector.extract_strided_slice %258 {offsets = [0, 0], sizes = [16, 32], strides = [1, 1]} : vector<16x128xf32> to vector<16x32xf32>
    %263 = arith.truncf %262 : vector<16x32xf32> to vector<16x32xbf16>
    %cst_102 = arith.constant dense<0.000000e+00> : vector<8x16xf32>
    %264 = tpu.matmul %261, %263, %cst_102 {dimension_numbers = #tpu.dot_dimension_numbers<[1], [1], [0], [0], [0, 0, 1, 0], [], []>} : vector<8x32xbf16>, vector<16x32xbf16>, vector<8x16xf32> -> vector<8x16xf32>
    %cst_103 = arith.constant 0.176776692 : f32
    %265 = vector.broadcast %cst_103 : f32 to vector<8x16xf32>
    %266 = arith.mulf %264, %265 : vector<8x16xf32>
    %cst_104 = arith.constant dense<0xFF800000> : vector<8xf32>
    %267 = vector.multi_reduction <maximumf>, %266, %cst_104 [1] : vector<8x16xf32> to vector<8xf32>
    %268 = vector.shape_cast %267 : vector<8xf32> to vector<8x1xf32>
    %269 = vector.broadcast %268 : vector<8x1xf32> to vector<8x16xf32>
    %270 = arith.subf %266, %269 : vector<8x16xf32>
    %271 = math.exp %270 : vector<8x16xf32>
    %cst_105 = arith.constant dense<0.000000e+00> : vector<8xf32>
    %272 = vector.multi_reduction <add>, %271, %cst_105 [1] : vector<8x16xf32> to vector<8xf32>
    %273 = vector.shape_cast %272 : vector<8xf32> to vector<8x1xf32>
    %274 = tpu.reciprocal %273 {approx = true} : vector<8x1xf32> -> vector<8x1xf32>
    %275 = vector.broadcast %274 : vector<8x1xf32> to vector<8x16xf32>
    %276 = arith.mulf %271, %275 : vector<8x16xf32>
    %277 = arith.truncf %276 : vector<8x16xf32> to vector<8x16xbf16>
    %278 = vector.extract_strided_slice %259 {offsets = [0, 0], sizes = [16, 32], strides = [1, 1]} : vector<16x128xf32> to vector<16x32xf32>
    %279 = arith.truncf %278 : vector<16x32xf32> to vector<16x32xbf16>
    %cst_106 = arith.constant dense<0.000000e+00> : vector<8x32xf32>
    %280 = tpu.matmul %277, %279, %cst_106 {dimension_numbers = #tpu.dot_dimension_numbers<[1], [0], [0], [1], [0, 0, 1, 1], [], []>} : vector<8x16xbf16>, vector<16x32xbf16>, vector<8x32xf32> -> vector<8x32xf32>
    %c0_107 = arith.constant 0 : index
    %c0_108 = arith.constant 0 : index
    %281 = vector.load %arg28[%c0_107, %c0_108] : memref<16x128xf32, #tpu.memory_space<vmem>>, vector<8x32xf32>
    tpu.vector_store %arg28[%c0_107, %c0_108], %280 {strides = array<i32>} : memref<16x128xf32, #tpu.memory_space<vmem>>, vector<8x32xf32>,
    %282 = vector.extract_strided_slice %257 {offsets = [0, 32], sizes = [8, 32], strides = [1, 1]} : vector<8x128xf32> to vector<8x32xf32>
    %283 = arith.truncf %282 : vector<8x32xf32> to vector<8x32xbf16>
    %284 = vector.extract_strided_slice %258 {offsets = [0, 32], sizes = [16, 32], strides = [1, 1]} : vector<16x128xf32> to vector<16x32xf32>
    %285 = arith.truncf %284 : vector<16x32xf32> to vector<16x32xbf16>
    %cst_109 = arith.constant dense<0.000000e+00> : vector<8x16xf32>
    %286 = tpu.matmul %283, %285, %cst_109 {dimension_numbers = #tpu.dot_dimension_numbers<[1], [1], [0], [0], [0, 0, 1, 0], [], []>} : vector<8x32xbf16>, vector<16x32xbf16>, vector<8x16xf32> -> vector<8x16xf32>
    %cst_110 = arith.constant 0.176776692 : f32
    %287 = vector.broadcast %cst_110 : f32 to vector<8x16xf32>
    %288 = arith.mulf %286, %287 : vector<8x16xf32>
    %cst_111 = arith.constant dense<0xFF800000> : vector<8xf32>
    %289 = vector.multi_reduction <maximumf>, %288, %cst_111 [1] : vector<8x16xf32> to vector<8xf32>
    %290 = vector.shape_cast %289 : vector<8xf32> to vector<8x1xf32>
    %291 = vector.broadcast %290 : vector<8x1xf32> to vector<8x16xf32>
    %292 = arith.subf %288, %291 : vector<8x16xf32>
    %293 = math.exp %292 : vector<8x16xf32>
    %cst_112 = arith.constant dense<0.000000e+00> : vector<8xf32>
    %294 = vector.multi_reduction <add>, %293, %cst_112 [1] : vector<8x16xf32> to vector<8xf32>
    %295 = vector.shape_cast %294 : vector<8xf32> to vector<8x1xf32>
    %296 = tpu.reciprocal %295 {approx = true} : vector<8x1xf32> -> vector<8x1xf32>
    %297 = vector.broadcast %296 : vector<8x1xf32> to vector<8x16xf32>
    %298 = arith.mulf %293, %297 : vector<8x16xf32>
    %299 = arith.truncf %298 : vector<8x16xf32> to vector<8x16xbf16>
    %300 = vector.extract_strided_slice %259 {offsets = [0, 32], sizes = [16, 32], strides = [1, 1]} : vector<16x128xf32> to vector<16x32xf32>
    %301 = arith.truncf %300 : vector<16x32xf32> to vector<16x32xbf16>
    %cst_113 = arith.constant dense<0.000000e+00> : vector<8x32xf32>
    %302 = tpu.matmul %299, %301, %cst_113 {dimension_numbers = #tpu.dot_dimension_numbers<[1], [0], [0], [1], [0, 0, 1, 1], [], []>} : vector<8x16xbf16>, vector<16x32xbf16>, vector<8x32xf32> -> vector<8x32xf32>
    %c0_114 = arith.constant 0 : index
    %c32_115 = arith.constant 32 : index
    %303 = vector.load %arg28[%c0_114, %c32_115] : memref<16x128xf32, #tpu.memory_space<vmem>>, vector<8x32xf32>
    tpu.vector_store %arg28[%c0_114, %c32_115], %302 {strides = array<i32>} : memref<16x128xf32, #tpu.memory_space<vmem>>, vector<8x32xf32>,
    %304 = vector.extract_strided_slice %257 {offsets = [0, 64], sizes = [8, 32], strides = [1, 1]} : vector<8x128xf32> to vector<8x32xf32>
    %305 = arith.truncf %304 : vector<8x32xf32> to vector<8x32xbf16>
    %306 = vector.extract_strided_slice %258 {offsets = [0, 64], sizes = [16, 32], strides = [1, 1]} : vector<16x128xf32> to vector<16x32xf32>
    %307 = arith.truncf %306 : vector<16x32xf32> to vector<16x32xbf16>
    %cst_116 = arith.constant dense<0.000000e+00> : vector<8x16xf32>
    %308 = tpu.matmul %305, %307, %cst_116 {dimension_numbers = #tpu.dot_dimension_numbers<[1], [1], [0], [0], [0, 0, 1, 0], [], []>} : vector<8x32xbf16>, vector<16x32xbf16>, vector<8x16xf32> -> vector<8x16xf32>
    %cst_117 = arith.constant 0.176776692 : f32
    %309 = vector.broadcast %cst_117 : f32 to vector<8x16xf32>
    %310 = arith.mulf %308, %309 : vector<8x16xf32>
    %cst_118 = arith.constant dense<0xFF800000> : vector<8xf32>
    %311 = vector.multi_reduction <maximumf>, %310, %cst_118 [1] : vector<8x16xf32> to vector<8xf32>
    %312 = vector.shape_cast %311 : vector<8xf32> to vector<8x1xf32>
    %313 = vector.broadcast %312 : vector<8x1xf32> to vector<8x16xf32>
    %314 = arith.subf %310, %313 : vector<8x16xf32>
    %315 = math.exp %314 : vector<8x16xf32>
    %cst_119 = arith.constant dense<0.000000e+00> : vector<8xf32>
    %316 = vector.multi_reduction <add>, %315, %cst_119 [1] : vector<8x16xf32> to vector<8xf32>
    %317 = vector.shape_cast %316 : vector<8xf32> to vector<8x1xf32>
    %318 = tpu.reciprocal %317 {approx = true} : vector<8x1xf32> -> vector<8x1xf32>
    %319 = vector.broadcast %318 : vector<8x1xf32> to vector<8x16xf32>
    %320 = arith.mulf %315, %319 : vector<8x16xf32>
    %321 = arith.truncf %320 : vector<8x16xf32> to vector<8x16xbf16>
    %322 = vector.extract_strided_slice %259 {offsets = [0, 64], sizes = [16, 32], strides = [1, 1]} : vector<16x128xf32> to vector<16x32xf32>
    %323 = arith.truncf %322 : vector<16x32xf32> to vector<16x32xbf16>
    %cst_120 = arith.constant dense<0.000000e+00> : vector<8x32xf32>
    %324 = tpu.matmul %321, %323, %cst_120 {dimension_numbers = #tpu.dot_dimension_numbers<[1], [0], [0], [1], [0, 0, 1, 1], [], []>} : vector<8x16xbf16>, vector<16x32xbf16>, vector<8x32xf32> -> vector<8x32xf32>
    %c0_121 = arith.constant 0 : index
    %c64_122 = arith.constant 64 : index
    %325 = vector.load %arg28[%c0_121, %c64_122] : memref<16x128xf32, #tpu.memory_space<vmem>>, vector<8x32xf32>
    tpu.vector_store %arg28[%c0_121, %c64_122], %324 {strides = array<i32>} : memref<16x128xf32, #tpu.memory_space<vmem>>, vector<8x32xf32>,
    %326 = vector.extract_strided_slice %257 {offsets = [0, 96], sizes = [8, 32], strides = [1, 1]} : vector<8x128xf32> to vector<8x32xf32>
    %327 = arith.truncf %326 : vector<8x32xf32> to vector<8x32xbf16>
    %328 = vector.extract_strided_slice %258 {offsets = [0, 96], sizes = [16, 32], strides = [1, 1]} : vector<16x128xf32> to vector<16x32xf32>
    %329 = arith.truncf %328 : vector<16x32xf32> to vector<16x32xbf16>
    %cst_123 = arith.constant dense<0.000000e+00> : vector<8x16xf32>
    %330 = tpu.matmul %327, %329, %cst_123 {dimension_numbers = #tpu.dot_dimension_numbers<[1], [1], [0], [0], [0, 0, 1, 0], [], []>} : vector<8x32xbf16>, vector<16x32xbf16>, vector<8x16xf32> -> vector<8x16xf32>
    %cst_124 = arith.constant 0.176776692 : f32
    %331 = vector.broadcast %cst_124 : f32 to vector<8x16xf32>
    %332 = arith.mulf %330, %331 : vector<8x16xf32>
    %cst_125 = arith.constant dense<0xFF800000> : vector<8xf32>
    %333 = vector.multi_reduction <maximumf>, %332, %cst_125 [1] : vector<8x16xf32> to vector<8xf32>
    %334 = vector.shape_cast %333 : vector<8xf32> to vector<8x1xf32>
    %335 = vector.broadcast %334 : vector<8x1xf32> to vector<8x16xf32>
    %336 = arith.subf %332, %335 : vector<8x16xf32>
    %337 = math.exp %336 : vector<8x16xf32>
    %cst_126 = arith.constant dense<0.000000e+00> : vector<8xf32>
    %338 = vector.multi_reduction <add>, %337, %cst_126 [1] : vector<8x16xf32> to vector<8xf32>
    %339 = vector.shape_cast %338 : vector<8xf32> to vector<8x1xf32>
    %340 = tpu.reciprocal %339 {approx = true} : vector<8x1xf32> -> vector<8x1xf32>
    %341 = vector.broadcast %340 : vector<8x1xf32> to vector<8x16xf32>
    %342 = arith.mulf %337, %341 : vector<8x16xf32>
    %343 = arith.truncf %342 : vector<8x16xf32> to vector<8x16xbf16>
    %344 = vector.extract_strided_slice %259 {offsets = [0, 96], sizes = [16, 32], strides = [1, 1]} : vector<16x128xf32> to vector<16x32xf32>
    %345 = arith.truncf %344 : vector<16x32xf32> to vector<16x32xbf16>
    %cst_127 = arith.constant dense<0.000000e+00> : vector<8x32xf32>
    %346 = tpu.matmul %343, %345, %cst_127 {dimension_numbers = #tpu.dot_dimension_numbers<[1], [0], [0], [1], [0, 0, 1, 1], [], []>} : vector<8x16xbf16>, vector<16x32xbf16>, vector<8x32xf32> -> vector<8x32xf32>
    %c0_128 = arith.constant 0 : index
    %c96_129 = arith.constant 96 : index
    %347 = vector.load %arg28[%c0_128, %c96_129] : memref<16x128xf32, #tpu.memory_space<vmem>>, vector<8x32xf32>
    tpu.vector_store %arg28[%c0_128, %c96_129], %346 {strides = array<i32>} : memref<16x128xf32, #tpu.memory_space<vmem>>, vector<8x32xf32>,
    %348 = vector.extract_strided_slice %246 {offsets = [8, 0], sizes = [8, 128], strides = [1, 1]} : vector<16x128xf32> to vector<8x128xf32>
    %349 = vector.extract_strided_slice %255 {offsets = [16, 0], sizes = [16, 128], strides = [1, 1]} : vector<32x128xf32> to vector<16x128xf32>
    %350 = vector.extract_strided_slice %256 {offsets = [16, 0], sizes = [16, 128], strides = [1, 1]} : vector<32x128xf32> to vector<16x128xf32>
    %351 = vector.extract_strided_slice %348 {offsets = [0, 0], sizes = [8, 32], strides = [1, 1]} : vector<8x128xf32> to vector<8x32xf32>
    %352 = arith.truncf %351 : vector<8x32xf32> to vector<8x32xbf16>
    %353 = vector.extract_strided_slice %349 {offsets = [0, 0], sizes = [16, 32], strides = [1, 1]} : vector<16x128xf32> to vector<16x32xf32>
    %354 = arith.truncf %353 : vector<16x32xf32> to vector<16x32xbf16>
    %cst_130 = arith.constant dense<0.000000e+00> : vector<8x16xf32>
    %355 = tpu.matmul %352, %354, %cst_130 {dimension_numbers = #tpu.dot_dimension_numbers<[1], [1], [0], [0], [0, 0, 1, 0], [], []>} : vector<8x32xbf16>, vector<16x32xbf16>, vector<8x16xf32> -> vector<8x16xf32>
    %cst_131 = arith.constant 0.176776692 : f32
    %356 = vector.broadcast %cst_131 : f32 to vector<8x16xf32>
    %357 = arith.mulf %355, %356 : vector<8x16xf32>
    %cst_132 = arith.constant dense<0xFF800000> : vector<8xf32>
    %358 = vector.multi_reduction <maximumf>, %357, %cst_132 [1] : vector<8x16xf32> to vector<8xf32>
    %359 = vector.shape_cast %358 : vector<8xf32> to vector<8x1xf32>
    %360 = vector.broadcast %359 : vector<8x1xf32> to vector<8x16xf32>
    %361 = arith.subf %357, %360 : vector<8x16xf32>
    %362 = math.exp %361 : vector<8x16xf32>
    %cst_133 = arith.constant dense<0.000000e+00> : vector<8xf32>
    %363 = vector.multi_reduction <add>, %362, %cst_133 [1] : vector<8x16xf32> to vector<8xf32>
    %364 = vector.shape_cast %363 : vector<8xf32> to vector<8x1xf32>
    %365 = tpu.reciprocal %364 {approx = true} : vector<8x1xf32> -> vector<8x1xf32>
    %366 = vector.broadcast %365 : vector<8x1xf32> to vector<8x16xf32>
    %367 = arith.mulf %362, %366 : vector<8x16xf32>
    %368 = arith.truncf %367 : vector<8x16xf32> to vector<8x16xbf16>
    %369 = vector.extract_strided_slice %350 {offsets = [0, 0], sizes = [16, 32], strides = [1, 1]} : vector<16x128xf32> to vector<16x32xf32>
    %370 = arith.truncf %369 : vector<16x32xf32> to vector<16x32xbf16>
    %cst_134 = arith.constant dense<0.000000e+00> : vector<8x32xf32>
    %371 = tpu.matmul %368, %370, %cst_134 {dimension_numbers = #tpu.dot_dimension_numbers<[1], [0], [0], [1], [0, 0, 1, 1], [], []>} : vector<8x16xbf16>, vector<16x32xbf16>, vector<8x32xf32> -> vector<8x32xf32>
    %c8_135 = arith.constant 8 : index
    %c0_136 = arith.constant 0 : index
    %372 = vector.load %arg28[%c8_135, %c0_136] : memref<16x128xf32, #tpu.memory_space<vmem>>, vector<8x32xf32>
    tpu.vector_store %arg28[%c8_135, %c0_136], %371 {strides = array<i32>} : memref<16x128xf32, #tpu.memory_space<vmem>>, vector<8x32xf32>,
    %373 = vector.extract_strided_slice %348 {offsets = [0, 32], sizes = [8, 32], strides = [1, 1]} : vector<8x128xf32> to vector<8x32xf32>
    %374 = arith.truncf %373 : vector<8x32xf32> to vector<8x32xbf16>
    %375 = vector.extract_strided_slice %349 {offsets = [0, 32], sizes = [16, 32], strides = [1, 1]} : vector<16x128xf32> to vector<16x32xf32>
    %376 = arith.truncf %375 : vector<16x32xf32> to vector<16x32xbf16>
    %cst_137 = arith.constant dense<0.000000e+00> : vector<8x16xf32>
    %377 = tpu.matmul %374, %376, %cst_137 {dimension_numbers = #tpu.dot_dimension_numbers<[1], [1], [0], [0], [0, 0, 1, 0], [], []>} : vector<8x32xbf16>, vector<16x32xbf16>, vector<8x16xf32> -> vector<8x16xf32>
    %cst_138 = arith.constant 0.176776692 : f32
    %378 = vector.broadcast %cst_138 : f32 to vector<8x16xf32>
    %379 = arith.mulf %377, %378 : vector<8x16xf32>
    %cst_139 = arith.constant dense<0xFF800000> : vector<8xf32>
    %380 = vector.multi_reduction <maximumf>, %379, %cst_139 [1] : vector<8x16xf32> to vector<8xf32>
    %381 = vector.shape_cast %380 : vector<8xf32> to vector<8x1xf32>
    %382 = vector.broadcast %381 : vector<8x1xf32> to vector<8x16xf32>
    %383 = arith.subf %379, %382 : vector<8x16xf32>
    %384 = math.exp %383 : vector<8x16xf32>
    %cst_140 = arith.constant dense<0.000000e+00> : vector<8xf32>
    %385 = vector.multi_reduction <add>, %384, %cst_140 [1] : vector<8x16xf32> to vector<8xf32>
    %386 = vector.shape_cast %385 : vector<8xf32> to vector<8x1xf32>
    %387 = tpu.reciprocal %386 {approx = true} : vector<8x1xf32> -> vector<8x1xf32>
    %388 = vector.broadcast %387 : vector<8x1xf32> to vector<8x16xf32>
    %389 = arith.mulf %384, %388 : vector<8x16xf32>
    %390 = arith.truncf %389 : vector<8x16xf32> to vector<8x16xbf16>
    %391 = vector.extract_strided_slice %350 {offsets = [0, 32], sizes = [16, 32], strides = [1, 1]} : vector<16x128xf32> to vector<16x32xf32>
    %392 = arith.truncf %391 : vector<16x32xf32> to vector<16x32xbf16>
    %cst_141 = arith.constant dense<0.000000e+00> : vector<8x32xf32>
    %393 = tpu.matmul %390, %392, %cst_141 {dimension_numbers = #tpu.dot_dimension_numbers<[1], [0], [0], [1], [0, 0, 1, 1], [], []>} : vector<8x16xbf16>, vector<16x32xbf16>, vector<8x32xf32> -> vector<8x32xf32>
    %c8_142 = arith.constant 8 : index
    %c32_143 = arith.constant 32 : index
    %394 = vector.load %arg28[%c8_142, %c32_143] : memref<16x128xf32, #tpu.memory_space<vmem>>, vector<8x32xf32>
    tpu.vector_store %arg28[%c8_142, %c32_143], %393 {strides = array<i32>} : memref<16x128xf32, #tpu.memory_space<vmem>>, vector<8x32xf32>,
    %395 = vector.extract_strided_slice %348 {offsets = [0, 64], sizes = [8, 32], strides = [1, 1]} : vector<8x128xf32> to vector<8x32xf32>
    %396 = arith.truncf %395 : vector<8x32xf32> to vector<8x32xbf16>
    %397 = vector.extract_strided_slice %349 {offsets = [0, 64], sizes = [16, 32], strides = [1, 1]} : vector<16x128xf32> to vector<16x32xf32>
    %398 = arith.truncf %397 : vector<16x32xf32> to vector<16x32xbf16>
    %cst_144 = arith.constant dense<0.000000e+00> : vector<8x16xf32>
    %399 = tpu.matmul %396, %398, %cst_144 {dimension_numbers = #tpu.dot_dimension_numbers<[1], [1], [0], [0], [0, 0, 1, 0], [], []>} : vector<8x32xbf16>, vector<16x32xbf16>, vector<8x16xf32> -> vector<8x16xf32>
    %cst_145 = arith.constant 0.176776692 : f32
    %400 = vector.broadcast %cst_145 : f32 to vector<8x16xf32>
    %401 = arith.mulf %399, %400 : vector<8x16xf32>
    %cst_146 = arith.constant dense<0xFF800000> : vector<8xf32>
    %402 = vector.multi_reduction <maximumf>, %401, %cst_146 [1] : vector<8x16xf32> to vector<8xf32>
    %403 = vector.shape_cast %402 : vector<8xf32> to vector<8x1xf32>
    %404 = vector.broadcast %403 : vector<8x1xf32> to vector<8x16xf32>
    %405 = arith.subf %401, %404 : vector<8x16xf32>
    %406 = math.exp %405 : vector<8x16xf32>
    %cst_147 = arith.constant dense<0.000000e+00> : vector<8xf32>
    %407 = vector.multi_reduction <add>, %406, %cst_147 [1] : vector<8x16xf32> to vector<8xf32>
    %408 = vector.shape_cast %407 : vector<8xf32> to vector<8x1xf32>
    %409 = tpu.reciprocal %408 {approx = true} : vector<8x1xf32> -> vector<8x1xf32>
    %410 = vector.broadcast %409 : vector<8x1xf32> to vector<8x16xf32>
    %411 = arith.mulf %406, %410 : vector<8x16xf32>
    %412 = arith.truncf %411 : vector<8x16xf32> to vector<8x16xbf16>
    %413 = vector.extract_strided_slice %350 {offsets = [0, 64], sizes = [16, 32], strides = [1, 1]} : vector<16x128xf32> to vector<16x32xf32>
    %414 = arith.truncf %413 : vector<16x32xf32> to vector<16x32xbf16>
    %cst_148 = arith.constant dense<0.000000e+00> : vector<8x32xf32>
    %415 = tpu.matmul %412, %414, %cst_148 {dimension_numbers = #tpu.dot_dimension_numbers<[1], [0], [0], [1], [0, 0, 1, 1], [], []>} : vector<8x16xbf16>, vector<16x32xbf16>, vector<8x32xf32> -> vector<8x32xf32>
    %c8_149 = arith.constant 8 : index
    %c64_150 = arith.constant 64 : index
    %416 = vector.load %arg28[%c8_149, %c64_150] : memref<16x128xf32, #tpu.memory_space<vmem>>, vector<8x32xf32>
    tpu.vector_store %arg28[%c8_149, %c64_150], %415 {strides = array<i32>} : memref<16x128xf32, #tpu.memory_space<vmem>>, vector<8x32xf32>,
    %417 = vector.extract_strided_slice %348 {offsets = [0, 96], sizes = [8, 32], strides = [1, 1]} : vector<8x128xf32> to vector<8x32xf32>
    %418 = arith.truncf %417 : vector<8x32xf32> to vector<8x32xbf16>
    %419 = vector.extract_strided_slice %349 {offsets = [0, 96], sizes = [16, 32], strides = [1, 1]} : vector<16x128xf32> to vector<16x32xf32>
    %420 = arith.truncf %419 : vector<16x32xf32> to vector<16x32xbf16>
    %cst_151 = arith.constant dense<0.000000e+00> : vector<8x16xf32>
    %421 = tpu.matmul %418, %420, %cst_151 {dimension_numbers = #tpu.dot_dimension_numbers<[1], [1], [0], [0], [0, 0, 1, 0], [], []>} : vector<8x32xbf16>, vector<16x32xbf16>, vector<8x16xf32> -> vector<8x16xf32>
    %cst_152 = arith.constant 0.176776692 : f32
    %422 = vector.broadcast %cst_152 : f32 to vector<8x16xf32>
    %423 = arith.mulf %421, %422 : vector<8x16xf32>
    %cst_153 = arith.constant dense<0xFF800000> : vector<8xf32>
    %424 = vector.multi_reduction <maximumf>, %423, %cst_153 [1] : vector<8x16xf32> to vector<8xf32>
    %425 = vector.shape_cast %424 : vector<8xf32> to vector<8x1xf32>
    %426 = vector.broadcast %425 : vector<8x1xf32> to vector<8x16xf32>
    %427 = arith.subf %423, %426 : vector<8x16xf32>
    %428 = math.exp %427 : vector<8x16xf32>
    %cst_154 = arith.constant dense<0.000000e+00> : vector<8xf32>
    %429 = vector.multi_reduction <add>, %428, %cst_154 [1] : vector<8x16xf32> to vector<8xf32>
    %430 = vector.shape_cast %429 : vector<8xf32> to vector<8x1xf32>
    %431 = tpu.reciprocal %430 {approx = true} : vector<8x1xf32> -> vector<8x1xf32>
    %432 = vector.broadcast %431 : vector<8x1xf32> to vector<8x16xf32>
    %433 = arith.mulf %428, %432 : vector<8x16xf32>
    %434 = arith.truncf %433 : vector<8x16xf32> to vector<8x16xbf16>
    %435 = vector.extract_strided_slice %350 {offsets = [0, 96], sizes = [16, 32], strides = [1, 1]} : vector<16x128xf32> to vector<16x32xf32>
    %436 = arith.truncf %435 : vector<16x32xf32> to vector<16x32xbf16>
    %cst_155 = arith.constant dense<0.000000e+00> : vector<8x32xf32>
    %437 = tpu.matmul %434, %436, %cst_155 {dimension_numbers = #tpu.dot_dimension_numbers<[1], [0], [0], [1], [0, 0, 1, 1], [], []>} : vector<8x16xbf16>, vector<16x32xbf16>, vector<8x32xf32> -> vector<8x32xf32>
    %c8_156 = arith.constant 8 : index
    %c96_157 = arith.constant 96 : index
    %438 = vector.load %arg28[%c8_156, %c96_157] : memref<16x128xf32, #tpu.memory_space<vmem>>, vector<8x32xf32>
    tpu.vector_store %arg28[%c8_156, %c96_157], %437 {strides = array<i32>} : memref<16x128xf32, #tpu.memory_space<vmem>>, vector<8x32xf32>,
    %c0_158 = arith.constant 0 : index
    %c0_159 = arith.constant 0 : index
    %439 = vector.load %arg28[%c0_158, %c0_159] : memref<16x128xf32, #tpu.memory_space<vmem>>, vector<16x128xf32>
    %c0_160 = arith.constant 0 : index
    %c0_161 = arith.constant 0 : index
    %c0_162 = arith.constant 0 : index
    %440 = vector.load %arg15[%c0_160, %c0_161, %c0_162] : memref<2x128x128xbf16, #tpu.memory_space<vmem>>, vector<1x128x128xbf16>
    %441 = vector.shape_cast %440 : vector<1x128x128xbf16> to vector<128x128xbf16>
    %442 = arith.truncf %439 : vector<16x128xf32> to vector<16x128xbf16>
    %cst_163 = arith.constant dense<0.000000e+00> : vector<16x128xf32>
    %443 = tpu.matmul %442, %441, %cst_163 {dimension_numbers = #tpu.dot_dimension_numbers<[1], [0], [0], [1], [0, 0, 1, 1], [], []>} : vector<16x128xbf16>, vector<128x128xbf16>, vector<16x128xf32> -> vector<16x128xf32>
    %c0_164 = arith.constant 0 : index
    %c0_165 = arith.constant 0 : index
    %c0_166 = arith.constant 0 : index
    %444 = vector.load %arg16[%c0_164, %c0_165, %c0_166] : memref<2x1x128xf32, #tpu.memory_space<vmem>>, vector<1x1x128xf32>
    %445 = vector.shape_cast %444 : vector<1x1x128xf32> to vector<1x128xf32>
    %446 = vector.broadcast %445 : vector<1x128xf32> to vector<16x128xf32>
    %447 = arith.addf %443, %446 : vector<16x128xf32>
    %448 = arith.addf %447, %238 : vector<16x128xf32>
    %c0_167 = arith.constant 0 : index
    %c0_168 = arith.constant 0 : index
    %c0_169 = arith.constant 0 : index
    %449 = vector.load %arg17[%c0_167, %c0_168, %c0_169] : memref<2x1x128xf32, #tpu.memory_space<vmem>>, vector<1x1x128xf32>
    %450 = vector.shape_cast %449 : vector<1x1x128xf32> to vector<1x128xf32>
    %c0_170 = arith.constant 0 : index
    %c0_171 = arith.constant 0 : index
    %c0_172 = arith.constant 0 : index
    %451 = vector.load %arg18[%c0_170, %c0_171, %c0_172] : memref<2x1x128xf32, #tpu.memory_space<vmem>>, vector<1x1x128xf32>
    %452 = vector.shape_cast %451 : vector<1x1x128xf32> to vector<1x128xf32>
    %cst_173 = arith.constant dense<0.000000e+00> : vector<16xf32>
    %453 = vector.multi_reduction <add>, %448, %cst_173 [1] : vector<16x128xf32> to vector<16xf32>
    %454 = vector.shape_cast %453 : vector<16xf32> to vector<16x1xf32>
    %cst_174 = arith.constant 1.280000e+02 : f32
    %455 = vector.broadcast %cst_174 : f32 to vector<16x1xf32>
    %456 = arith.divf %454, %455 : vector<16x1xf32>
    %457 = vector.broadcast %456 : vector<16x1xf32> to vector<16x128xf32>
    %458 = arith.subf %448, %457 : vector<16x128xf32>
    %459 = arith.mulf %458, %458 : vector<16x128xf32>
    %cst_175 = arith.constant dense<0.000000e+00> : vector<16xf32>
    %460 = vector.multi_reduction <add>, %459, %cst_175 [1] : vector<16x128xf32> to vector<16xf32>
    %461 = vector.shape_cast %460 : vector<16xf32> to vector<16x1xf32>
    %cst_176 = arith.constant 1.280000e+02 : f32
    %462 = vector.broadcast %cst_176 : f32 to vector<16x1xf32>
    %463 = arith.divf %461, %462 : vector<16x1xf32>
    %464 = vector.broadcast %456 : vector<16x1xf32> to vector<16x128xf32>
    %465 = arith.subf %448, %464 : vector<16x128xf32>
    %cst_177 = arith.constant 9.99999974E-6 : f32
    %466 = vector.broadcast %cst_177 : f32 to vector<16x1xf32>
    %467 = arith.addf %463, %466 : vector<16x1xf32>
    %468 = math.rsqrt %467 : vector<16x1xf32>
    %469 = vector.broadcast %468 : vector<16x1xf32> to vector<16x128xf32>
    %470 = arith.mulf %465, %469 : vector<16x128xf32>
    %471 = vector.broadcast %450 : vector<1x128xf32> to vector<16x128xf32>
    %472 = arith.mulf %470, %471 : vector<16x128xf32>
    %473 = vector.broadcast %452 : vector<1x128xf32> to vector<16x128xf32>
    %474 = arith.addf %472, %473 : vector<16x128xf32>
    %c0_178 = arith.constant 0 : index
    %c0_179 = arith.constant 0 : index
    %c0_180 = arith.constant 0 : index
    %475 = vector.load %arg19[%c0_178, %c0_179, %c0_180] : memref<2x128x256xbf16, #tpu.memory_space<vmem>>, vector<1x128x256xbf16>
    %476 = vector.shape_cast %475 : vector<1x128x256xbf16> to vector<128x256xbf16>
    %477 = arith.truncf %474 : vector<16x128xf32> to vector<16x128xbf16>
    %cst_181 = arith.constant dense<0.000000e+00> : vector<16x256xf32>
    %478 = tpu.matmul %477, %476, %cst_181 {dimension_numbers = #tpu.dot_dimension_numbers<[1], [0], [0], [1], [0, 0, 1, 1], [], []>} : vector<16x128xbf16>, vector<128x256xbf16>, vector<16x256xf32> -> vector<16x256xf32>
    %c0_182 = arith.constant 0 : index
    %c0_183 = arith.constant 0 : index
    %c0_184 = arith.constant 0 : index
    %479 = vector.load %arg20[%c0_182, %c0_183, %c0_184] : memref<2x1x256xf32, #tpu.memory_space<vmem>>, vector<1x1x256xf32>
    %480 = vector.shape_cast %479 : vector<1x1x256xf32> to vector<1x256xf32>
    %481 = vector.broadcast %480 : vector<1x256xf32> to vector<16x256xf32>
    %482 = arith.addf %478, %481 : vector<16x256xf32>
    %cst_185 = arith.constant 0.000000e+00 : f32
    %483 = vector.broadcast %cst_185 : f32 to vector<16x256xf32>
    %484 = arith.maximumf %482, %483 : vector<16x256xf32>
    %c0_186 = arith.constant 0 : index
    %c0_187 = arith.constant 0 : index
    %c0_188 = arith.constant 0 : index
    %485 = vector.load %arg21[%c0_186, %c0_187, %c0_188] : memref<2x256x128xbf16, #tpu.memory_space<vmem>>, vector<1x256x128xbf16>
    %486 = vector.shape_cast %485 : vector<1x256x128xbf16> to vector<256x128xbf16>
    %487 = arith.truncf %484 : vector<16x256xf32> to vector<16x256xbf16>
    %cst_189 = arith.constant dense<0.000000e+00> : vector<16x128xf32>
    %488 = tpu.matmul %487, %486, %cst_189 {dimension_numbers = #tpu.dot_dimension_numbers<[1], [0], [0], [1], [0, 0, 1, 1], [], []>} : vector<16x256xbf16>, vector<256x128xbf16>, vector<16x128xf32> -> vector<16x128xf32>
    %c0_190 = arith.constant 0 : index
    %c0_191 = arith.constant 0 : index
    %c0_192 = arith.constant 0 : index
    %489 = vector.load %arg22[%c0_190, %c0_191, %c0_192] : memref<2x1x128xf32, #tpu.memory_space<vmem>>, vector<1x1x128xf32>
    %490 = vector.shape_cast %489 : vector<1x1x128xf32> to vector<1x128xf32>
    %491 = vector.broadcast %490 : vector<1x128xf32> to vector<16x128xf32>
    %492 = arith.addf %488, %491 : vector<16x128xf32>
    %493 = arith.addf %492, %474 : vector<16x128xf32>
    %c0_193 = arith.constant 0 : index
    %c0_194 = arith.constant 0 : index
    %c0_195 = arith.constant 0 : index
    %494 = vector.load %arg23[%c0_193, %c0_194, %c0_195] : memref<2x1x128xf32, #tpu.memory_space<vmem>>, vector<1x1x128xf32>
    %495 = vector.shape_cast %494 : vector<1x1x128xf32> to vector<1x128xf32>
    %c0_196 = arith.constant 0 : index
    %c0_197 = arith.constant 0 : index
    %c0_198 = arith.constant 0 : index
    %496 = vector.load %arg24[%c0_196, %c0_197, %c0_198] : memref<2x1x128xf32, #tpu.memory_space<vmem>>, vector<1x1x128xf32>
    %497 = vector.shape_cast %496 : vector<1x1x128xf32> to vector<1x128xf32>
    %cst_199 = arith.constant dense<0.000000e+00> : vector<16xf32>
    %498 = vector.multi_reduction <add>, %493, %cst_199 [1] : vector<16x128xf32> to vector<16xf32>
    %499 = vector.shape_cast %498 : vector<16xf32> to vector<16x1xf32>
    %cst_200 = arith.constant 1.280000e+02 : f32
    %500 = vector.broadcast %cst_200 : f32 to vector<16x1xf32>
    %501 = arith.divf %499, %500 : vector<16x1xf32>
    %502 = vector.broadcast %501 : vector<16x1xf32> to vector<16x128xf32>
    %503 = arith.subf %493, %502 : vector<16x128xf32>
    %504 = arith.mulf %503, %503 : vector<16x128xf32>
    %cst_201 = arith.constant dense<0.000000e+00> : vector<16xf32>
    %505 = vector.multi_reduction <add>, %504, %cst_201 [1] : vector<16x128xf32> to vector<16xf32>
    %506 = vector.shape_cast %505 : vector<16xf32> to vector<16x1xf32>
    %cst_202 = arith.constant 1.280000e+02 : f32
    %507 = vector.broadcast %cst_202 : f32 to vector<16x1xf32>
    %508 = arith.divf %506, %507 : vector<16x1xf32>
    %509 = vector.broadcast %501 : vector<16x1xf32> to vector<16x128xf32>
    %510 = arith.subf %493, %509 : vector<16x128xf32>
    %cst_203 = arith.constant 9.99999974E-6 : f32
    %511 = vector.broadcast %cst_203 : f32 to vector<16x1xf32>
    %512 = arith.addf %508, %511 : vector<16x1xf32>
    %513 = math.rsqrt %512 : vector<16x1xf32>
    %514 = vector.broadcast %513 : vector<16x1xf32> to vector<16x128xf32>
    %515 = arith.mulf %510, %514 : vector<16x128xf32>
    %516 = vector.broadcast %495 : vector<1x128xf32> to vector<16x128xf32>
    %517 = arith.mulf %515, %516 : vector<16x128xf32>
    %518 = vector.broadcast %497 : vector<1x128xf32> to vector<16x128xf32>
    %519 = arith.addf %517, %518 : vector<16x128xf32>
    %c1 = arith.constant 1 : index
    %c0_204 = arith.constant 0 : index
    %c0_205 = arith.constant 0 : index
    %520 = vector.load %arg5[%c1, %c0_204, %c0_205] : memref<2x128x384xbf16, #tpu.memory_space<vmem>>, vector<1x128x384xbf16>
    %521 = vector.shape_cast %520 : vector<1x128x384xbf16> to vector<128x384xbf16>
    %522 = arith.truncf %519 : vector<16x128xf32> to vector<16x128xbf16>
    %cst_206 = arith.constant dense<0.000000e+00> : vector<16x384xf32>
    %523 = tpu.matmul %522, %521, %cst_206 {dimension_numbers = #tpu.dot_dimension_numbers<[1], [0], [0], [1], [0, 0, 1, 1], [], []>} : vector<16x128xbf16>, vector<128x384xbf16>, vector<16x384xf32> -> vector<16x384xf32>
    %c1_207 = arith.constant 1 : index
    %c0_208 = arith.constant 0 : index
    %c0_209 = arith.constant 0 : index
    %524 = vector.load %arg6[%c1_207, %c0_208, %c0_209] : memref<2x1x384xf32, #tpu.memory_space<vmem>>, vector<1x1x384xf32>
    %525 = vector.shape_cast %524 : vector<1x1x384xf32> to vector<1x384xf32>
    %526 = vector.broadcast %525 : vector<1x384xf32> to vector<16x384xf32>
    %527 = arith.addf %523, %526 : vector<16x384xf32>
    %528 = vector.extract_strided_slice %527 {offsets = [0, 0], sizes = [16, 128], strides = [1, 1]} : vector<16x384xf32> to vector<16x128xf32>
    %529 = vector.extract_strided_slice %527 {offsets = [0, 128], sizes = [16, 128], strides = [1, 1]} : vector<16x384xf32> to vector<16x128xf32>
    %530 = vector.extract_strided_slice %527 {offsets = [0, 256], sizes = [16, 128], strides = [1, 1]} : vector<16x384xf32> to vector<16x128xf32>
    %531 = vector.extract_strided_slice %528 {offsets = [0, 0], sizes = [8, 128], strides = [1, 1]} : vector<16x128xf32> to vector<8x128xf32>
    %532 = vector.extract_strided_slice %529 {offsets = [0, 0], sizes = [8, 128], strides = [1, 1]} : vector<16x128xf32> to vector<8x128xf32>
    %533 = vector.extract_strided_slice %530 {offsets = [0, 0], sizes = [8, 128], strides = [1, 1]} : vector<16x128xf32> to vector<8x128xf32>
    %534 = vector.extract_strided_slice %531 {offsets = [0, 0], sizes = [8, 32], strides = [1, 1]} : vector<8x128xf32> to vector<8x32xf32>
    %535 = arith.truncf %534 : vector<8x32xf32> to vector<8x32xbf16>
    %536 = vector.extract_strided_slice %532 {offsets = [0, 0], sizes = [8, 32], strides = [1, 1]} : vector<8x128xf32> to vector<8x32xf32>
    %537 = arith.truncf %536 : vector<8x32xf32> to vector<8x32xbf16>
    %cst_210 = arith.constant dense<0.000000e+00> : vector<8x8xf32>
    %538 = tpu.matmul %535, %537, %cst_210 {dimension_numbers = #tpu.dot_dimension_numbers<[1], [1], [0], [0], [0, 0, 1, 0], [], []>} : vector<8x32xbf16>, vector<8x32xbf16>, vector<8x8xf32> -> vector<8x8xf32>
    %cst_211 = arith.constant 0.176776692 : f32
    %539 = vector.broadcast %cst_211 : f32 to vector<8x8xf32>
    %540 = arith.mulf %538, %539 : vector<8x8xf32>
    %cst_212 = arith.constant dense<0xFF800000> : vector<8xf32>
    %541 = vector.multi_reduction <maximumf>, %540, %cst_212 [1] : vector<8x8xf32> to vector<8xf32>
    %542 = vector.shape_cast %541 : vector<8xf32> to vector<8x1xf32>
    %543 = vector.broadcast %542 : vector<8x1xf32> to vector<8x8xf32>
    %544 = arith.subf %540, %543 : vector<8x8xf32>
    %545 = math.exp %544 : vector<8x8xf32>
    %cst_213 = arith.constant dense<0.000000e+00> : vector<8xf32>
    %546 = vector.multi_reduction <add>, %545, %cst_213 [1] : vector<8x8xf32> to vector<8xf32>
    %547 = vector.shape_cast %546 : vector<8xf32> to vector<8x1xf32>
    %548 = tpu.reciprocal %547 {approx = true} : vector<8x1xf32> -> vector<8x1xf32>
    %549 = vector.broadcast %548 : vector<8x1xf32> to vector<8x8xf32>
    %550 = arith.mulf %545, %549 : vector<8x8xf32>
    %551 = arith.truncf %550 : vector<8x8xf32> to vector<8x8xbf16>
    %552 = vector.extract_strided_slice %533 {offsets = [0, 0], sizes = [8, 32], strides = [1, 1]} : vector<8x128xf32> to vector<8x32xf32>
    %553 = arith.truncf %552 : vector<8x32xf32> to vector<8x32xbf16>
    %cst_214 = arith.constant dense<0.000000e+00> : vector<8x32xf32>
    %554 = tpu.matmul %551, %553, %cst_214 {dimension_numbers = #tpu.dot_dimension_numbers<[1], [0], [0], [1], [0, 0, 1, 1], [], []>} : vector<8x8xbf16>, vector<8x32xbf16>, vector<8x32xf32> -> vector<8x32xf32>
    %c0_215 = arith.constant 0 : index
    %c0_216 = arith.constant 0 : index
    %555 = vector.load %arg28[%c0_215, %c0_216] : memref<16x128xf32, #tpu.memory_space<vmem>>, vector<8x32xf32>
    tpu.vector_store %arg28[%c0_215, %c0_216], %554 {strides = array<i32>} : memref<16x128xf32, #tpu.memory_space<vmem>>, vector<8x32xf32>,
    %556 = vector.extract_strided_slice %531 {offsets = [0, 32], sizes = [8, 32], strides = [1, 1]} : vector<8x128xf32> to vector<8x32xf32>
    %557 = arith.truncf %556 : vector<8x32xf32> to vector<8x32xbf16>
    %558 = vector.extract_strided_slice %532 {offsets = [0, 32], sizes = [8, 32], strides = [1, 1]} : vector<8x128xf32> to vector<8x32xf32>
    %559 = arith.truncf %558 : vector<8x32xf32> to vector<8x32xbf16>
    %cst_217 = arith.constant dense<0.000000e+00> : vector<8x8xf32>
    %560 = tpu.matmul %557, %559, %cst_217 {dimension_numbers = #tpu.dot_dimension_numbers<[1], [1], [0], [0], [0, 0, 1, 0], [], []>} : vector<8x32xbf16>, vector<8x32xbf16>, vector<8x8xf32> -> vector<8x8xf32>
    %cst_218 = arith.constant 0.176776692 : f32
    %561 = vector.broadcast %cst_218 : f32 to vector<8x8xf32>
    %562 = arith.mulf %560, %561 : vector<8x8xf32>
    %cst_219 = arith.constant dense<0xFF800000> : vector<8xf32>
    %563 = vector.multi_reduction <maximumf>, %562, %cst_219 [1] : vector<8x8xf32> to vector<8xf32>
    %564 = vector.shape_cast %563 : vector<8xf32> to vector<8x1xf32>
    %565 = vector.broadcast %564 : vector<8x1xf32> to vector<8x8xf32>
    %566 = arith.subf %562, %565 : vector<8x8xf32>
    %567 = math.exp %566 : vector<8x8xf32>
    %cst_220 = arith.constant dense<0.000000e+00> : vector<8xf32>
    %568 = vector.multi_reduction <add>, %567, %cst_220 [1] : vector<8x8xf32> to vector<8xf32>
    %569 = vector.shape_cast %568 : vector<8xf32> to vector<8x1xf32>
    %570 = tpu.reciprocal %569 {approx = true} : vector<8x1xf32> -> vector<8x1xf32>
    %571 = vector.broadcast %570 : vector<8x1xf32> to vector<8x8xf32>
    %572 = arith.mulf %567, %571 : vector<8x8xf32>
    %573 = arith.truncf %572 : vector<8x8xf32> to vector<8x8xbf16>
    %574 = vector.extract_strided_slice %533 {offsets = [0, 32], sizes = [8, 32], strides = [1, 1]} : vector<8x128xf32> to vector<8x32xf32>
    %575 = arith.truncf %574 : vector<8x32xf32> to vector<8x32xbf16>
    %cst_221 = arith.constant dense<0.000000e+00> : vector<8x32xf32>
    %576 = tpu.matmul %573, %575, %cst_221 {dimension_numbers = #tpu.dot_dimension_numbers<[1], [0], [0], [1], [0, 0, 1, 1], [], []>} : vector<8x8xbf16>, vector<8x32xbf16>, vector<8x32xf32> -> vector<8x32xf32>
    %c0_222 = arith.constant 0 : index
    %c32_223 = arith.constant 32 : index
    %577 = vector.load %arg28[%c0_222, %c32_223] : memref<16x128xf32, #tpu.memory_space<vmem>>, vector<8x32xf32>
    tpu.vector_store %arg28[%c0_222, %c32_223], %576 {strides = array<i32>} : memref<16x128xf32, #tpu.memory_space<vmem>>, vector<8x32xf32>,
    %578 = vector.extract_strided_slice %531 {offsets = [0, 64], sizes = [8, 32], strides = [1, 1]} : vector<8x128xf32> to vector<8x32xf32>
    %579 = arith.truncf %578 : vector<8x32xf32> to vector<8x32xbf16>
    %580 = vector.extract_strided_slice %532 {offsets = [0, 64], sizes = [8, 32], strides = [1, 1]} : vector<8x128xf32> to vector<8x32xf32>
    %581 = arith.truncf %580 : vector<8x32xf32> to vector<8x32xbf16>
    %cst_224 = arith.constant dense<0.000000e+00> : vector<8x8xf32>
    %582 = tpu.matmul %579, %581, %cst_224 {dimension_numbers = #tpu.dot_dimension_numbers<[1], [1], [0], [0], [0, 0, 1, 0], [], []>} : vector<8x32xbf16>, vector<8x32xbf16>, vector<8x8xf32> -> vector<8x8xf32>
    %cst_225 = arith.constant 0.176776692 : f32
    %583 = vector.broadcast %cst_225 : f32 to vector<8x8xf32>
    %584 = arith.mulf %582, %583 : vector<8x8xf32>
    %cst_226 = arith.constant dense<0xFF800000> : vector<8xf32>
    %585 = vector.multi_reduction <maximumf>, %584, %cst_226 [1] : vector<8x8xf32> to vector<8xf32>
    %586 = vector.shape_cast %585 : vector<8xf32> to vector<8x1xf32>
    %587 = vector.broadcast %586 : vector<8x1xf32> to vector<8x8xf32>
    %588 = arith.subf %584, %587 : vector<8x8xf32>
    %589 = math.exp %588 : vector<8x8xf32>
    %cst_227 = arith.constant dense<0.000000e+00> : vector<8xf32>
    %590 = vector.multi_reduction <add>, %589, %cst_227 [1] : vector<8x8xf32> to vector<8xf32>
    %591 = vector.shape_cast %590 : vector<8xf32> to vector<8x1xf32>
    %592 = tpu.reciprocal %591 {approx = true} : vector<8x1xf32> -> vector<8x1xf32>
    %593 = vector.broadcast %592 : vector<8x1xf32> to vector<8x8xf32>
    %594 = arith.mulf %589, %593 : vector<8x8xf32>
    %595 = arith.truncf %594 : vector<8x8xf32> to vector<8x8xbf16>
    %596 = vector.extract_strided_slice %533 {offsets = [0, 64], sizes = [8, 32], strides = [1, 1]} : vector<8x128xf32> to vector<8x32xf32>
    %597 = arith.truncf %596 : vector<8x32xf32> to vector<8x32xbf16>
    %cst_228 = arith.constant dense<0.000000e+00> : vector<8x32xf32>
    %598 = tpu.matmul %595, %597, %cst_228 {dimension_numbers = #tpu.dot_dimension_numbers<[1], [0], [0], [1], [0, 0, 1, 1], [], []>} : vector<8x8xbf16>, vector<8x32xbf16>, vector<8x32xf32> -> vector<8x32xf32>
    %c0_229 = arith.constant 0 : index
    %c64_230 = arith.constant 64 : index
    %599 = vector.load %arg28[%c0_229, %c64_230] : memref<16x128xf32, #tpu.memory_space<vmem>>, vector<8x32xf32>
    tpu.vector_store %arg28[%c0_229, %c64_230], %598 {strides = array<i32>} : memref<16x128xf32, #tpu.memory_space<vmem>>, vector<8x32xf32>,
    %600 = vector.extract_strided_slice %531 {offsets = [0, 96], sizes = [8, 32], strides = [1, 1]} : vector<8x128xf32> to vector<8x32xf32>
    %601 = arith.truncf %600 : vector<8x32xf32> to vector<8x32xbf16>
    %602 = vector.extract_strided_slice %532 {offsets = [0, 96], sizes = [8, 32], strides = [1, 1]} : vector<8x128xf32> to vector<8x32xf32>
    %603 = arith.truncf %602 : vector<8x32xf32> to vector<8x32xbf16>
    %cst_231 = arith.constant dense<0.000000e+00> : vector<8x8xf32>
    %604 = tpu.matmul %601, %603, %cst_231 {dimension_numbers = #tpu.dot_dimension_numbers<[1], [1], [0], [0], [0, 0, 1, 0], [], []>} : vector<8x32xbf16>, vector<8x32xbf16>, vector<8x8xf32> -> vector<8x8xf32>
    %cst_232 = arith.constant 0.176776692 : f32
    %605 = vector.broadcast %cst_232 : f32 to vector<8x8xf32>
    %606 = arith.mulf %604, %605 : vector<8x8xf32>
    %cst_233 = arith.constant dense<0xFF800000> : vector<8xf32>
    %607 = vector.multi_reduction <maximumf>, %606, %cst_233 [1] : vector<8x8xf32> to vector<8xf32>
    %608 = vector.shape_cast %607 : vector<8xf32> to vector<8x1xf32>
    %609 = vector.broadcast %608 : vector<8x1xf32> to vector<8x8xf32>
    %610 = arith.subf %606, %609 : vector<8x8xf32>
    %611 = math.exp %610 : vector<8x8xf32>
    %cst_234 = arith.constant dense<0.000000e+00> : vector<8xf32>
    %612 = vector.multi_reduction <add>, %611, %cst_234 [1] : vector<8x8xf32> to vector<8xf32>
    %613 = vector.shape_cast %612 : vector<8xf32> to vector<8x1xf32>
    %614 = tpu.reciprocal %613 {approx = true} : vector<8x1xf32> -> vector<8x1xf32>
    %615 = vector.broadcast %614 : vector<8x1xf32> to vector<8x8xf32>
    %616 = arith.mulf %611, %615 : vector<8x8xf32>
    %617 = arith.truncf %616 : vector<8x8xf32> to vector<8x8xbf16>
    %618 = vector.extract_strided_slice %533 {offsets = [0, 96], sizes = [8, 32], strides = [1, 1]} : vector<8x128xf32> to vector<8x32xf32>
    %619 = arith.truncf %618 : vector<8x32xf32> to vector<8x32xbf16>
    %cst_235 = arith.constant dense<0.000000e+00> : vector<8x32xf32>
    %620 = tpu.matmul %617, %619, %cst_235 {dimension_numbers = #tpu.dot_dimension_numbers<[1], [0], [0], [1], [0, 0, 1, 1], [], []>} : vector<8x8xbf16>, vector<8x32xbf16>, vector<8x32xf32> -> vector<8x32xf32>
    %c0_236 = arith.constant 0 : index
    %c96_237 = arith.constant 96 : index
    %621 = vector.load %arg28[%c0_236, %c96_237] : memref<16x128xf32, #tpu.memory_space<vmem>>, vector<8x32xf32>
    tpu.vector_store %arg28[%c0_236, %c96_237], %620 {strides = array<i32>} : memref<16x128xf32, #tpu.memory_space<vmem>>, vector<8x32xf32>,
    %622 = vector.extract_strided_slice %528 {offsets = [8, 0], sizes = [8, 128], strides = [1, 1]} : vector<16x128xf32> to vector<8x128xf32>
    %623 = vector.extract_strided_slice %529 {offsets = [8, 0], sizes = [8, 128], strides = [1, 1]} : vector<16x128xf32> to vector<8x128xf32>
    %624 = vector.extract_strided_slice %530 {offsets = [8, 0], sizes = [8, 128], strides = [1, 1]} : vector<16x128xf32> to vector<8x128xf32>
    %625 = vector.extract_strided_slice %622 {offsets = [0, 0], sizes = [8, 32], strides = [1, 1]} : vector<8x128xf32> to vector<8x32xf32>
    %626 = arith.truncf %625 : vector<8x32xf32> to vector<8x32xbf16>
    %627 = vector.extract_strided_slice %623 {offsets = [0, 0], sizes = [8, 32], strides = [1, 1]} : vector<8x128xf32> to vector<8x32xf32>
    %628 = arith.truncf %627 : vector<8x32xf32> to vector<8x32xbf16>
    %cst_238 = arith.constant dense<0.000000e+00> : vector<8x8xf32>
    %629 = tpu.matmul %626, %628, %cst_238 {dimension_numbers = #tpu.dot_dimension_numbers<[1], [1], [0], [0], [0, 0, 1, 0], [], []>} : vector<8x32xbf16>, vector<8x32xbf16>, vector<8x8xf32> -> vector<8x8xf32>
    %cst_239 = arith.constant 0.176776692 : f32
    %630 = vector.broadcast %cst_239 : f32 to vector<8x8xf32>
    %631 = arith.mulf %629, %630 : vector<8x8xf32>
    %cst_240 = arith.constant dense<0xFF800000> : vector<8xf32>
    %632 = vector.multi_reduction <maximumf>, %631, %cst_240 [1] : vector<8x8xf32> to vector<8xf32>
    %633 = vector.shape_cast %632 : vector<8xf32> to vector<8x1xf32>
    %634 = vector.broadcast %633 : vector<8x1xf32> to vector<8x8xf32>
    %635 = arith.subf %631, %634 : vector<8x8xf32>
    %636 = math.exp %635 : vector<8x8xf32>
    %cst_241 = arith.constant dense<0.000000e+00> : vector<8xf32>
    %637 = vector.multi_reduction <add>, %636, %cst_241 [1] : vector<8x8xf32> to vector<8xf32>
    %638 = vector.shape_cast %637 : vector<8xf32> to vector<8x1xf32>
    %639 = tpu.reciprocal %638 {approx = true} : vector<8x1xf32> -> vector<8x1xf32>
    %640 = vector.broadcast %639 : vector<8x1xf32> to vector<8x8xf32>
    %641 = arith.mulf %636, %640 : vector<8x8xf32>
    %642 = arith.truncf %641 : vector<8x8xf32> to vector<8x8xbf16>
    %643 = vector.extract_strided_slice %624 {offsets = [0, 0], sizes = [8, 32], strides = [1, 1]} : vector<8x128xf32> to vector<8x32xf32>
    %644 = arith.truncf %643 : vector<8x32xf32> to vector<8x32xbf16>
    %cst_242 = arith.constant dense<0.000000e+00> : vector<8x32xf32>
    %645 = tpu.matmul %642, %644, %cst_242 {dimension_numbers = #tpu.dot_dimension_numbers<[1], [0], [0], [1], [0, 0, 1, 1], [], []>} : vector<8x8xbf16>, vector<8x32xbf16>, vector<8x32xf32> -> vector<8x32xf32>
    %c8_243 = arith.constant 8 : index
    %c0_244 = arith.constant 0 : index
    %646 = vector.load %arg28[%c8_243, %c0_244] : memref<16x128xf32, #tpu.memory_space<vmem>>, vector<8x32xf32>
    tpu.vector_store %arg28[%c8_243, %c0_244], %645 {strides = array<i32>} : memref<16x128xf32, #tpu.memory_space<vmem>>, vector<8x32xf32>,
    %647 = vector.extract_strided_slice %622 {offsets = [0, 32], sizes = [8, 32], strides = [1, 1]} : vector<8x128xf32> to vector<8x32xf32>
    %648 = arith.truncf %647 : vector<8x32xf32> to vector<8x32xbf16>
    %649 = vector.extract_strided_slice %623 {offsets = [0, 32], sizes = [8, 32], strides = [1, 1]} : vector<8x128xf32> to vector<8x32xf32>
    %650 = arith.truncf %649 : vector<8x32xf32> to vector<8x32xbf16>
    %cst_245 = arith.constant dense<0.000000e+00> : vector<8x8xf32>
    %651 = tpu.matmul %648, %650, %cst_245 {dimension_numbers = #tpu.dot_dimension_numbers<[1], [1], [0], [0], [0, 0, 1, 0], [], []>} : vector<8x32xbf16>, vector<8x32xbf16>, vector<8x8xf32> -> vector<8x8xf32>
    %cst_246 = arith.constant 0.176776692 : f32
    %652 = vector.broadcast %cst_246 : f32 to vector<8x8xf32>
    %653 = arith.mulf %651, %652 : vector<8x8xf32>
    %cst_247 = arith.constant dense<0xFF800000> : vector<8xf32>
    %654 = vector.multi_reduction <maximumf>, %653, %cst_247 [1] : vector<8x8xf32> to vector<8xf32>
    %655 = vector.shape_cast %654 : vector<8xf32> to vector<8x1xf32>
    %656 = vector.broadcast %655 : vector<8x1xf32> to vector<8x8xf32>
    %657 = arith.subf %653, %656 : vector<8x8xf32>
    %658 = math.exp %657 : vector<8x8xf32>
    %cst_248 = arith.constant dense<0.000000e+00> : vector<8xf32>
    %659 = vector.multi_reduction <add>, %658, %cst_248 [1] : vector<8x8xf32> to vector<8xf32>
    %660 = vector.shape_cast %659 : vector<8xf32> to vector<8x1xf32>
    %661 = tpu.reciprocal %660 {approx = true} : vector<8x1xf32> -> vector<8x1xf32>
    %662 = vector.broadcast %661 : vector<8x1xf32> to vector<8x8xf32>
    %663 = arith.mulf %658, %662 : vector<8x8xf32>
    %664 = arith.truncf %663 : vector<8x8xf32> to vector<8x8xbf16>
    %665 = vector.extract_strided_slice %624 {offsets = [0, 32], sizes = [8, 32], strides = [1, 1]} : vector<8x128xf32> to vector<8x32xf32>
    %666 = arith.truncf %665 : vector<8x32xf32> to vector<8x32xbf16>
    %cst_249 = arith.constant dense<0.000000e+00> : vector<8x32xf32>
    %667 = tpu.matmul %664, %666, %cst_249 {dimension_numbers = #tpu.dot_dimension_numbers<[1], [0], [0], [1], [0, 0, 1, 1], [], []>} : vector<8x8xbf16>, vector<8x32xbf16>, vector<8x32xf32> -> vector<8x32xf32>
    %c8_250 = arith.constant 8 : index
    %c32_251 = arith.constant 32 : index
    %668 = vector.load %arg28[%c8_250, %c32_251] : memref<16x128xf32, #tpu.memory_space<vmem>>, vector<8x32xf32>
    tpu.vector_store %arg28[%c8_250, %c32_251], %667 {strides = array<i32>} : memref<16x128xf32, #tpu.memory_space<vmem>>, vector<8x32xf32>,
    %669 = vector.extract_strided_slice %622 {offsets = [0, 64], sizes = [8, 32], strides = [1, 1]} : vector<8x128xf32> to vector<8x32xf32>
    %670 = arith.truncf %669 : vector<8x32xf32> to vector<8x32xbf16>
    %671 = vector.extract_strided_slice %623 {offsets = [0, 64], sizes = [8, 32], strides = [1, 1]} : vector<8x128xf32> to vector<8x32xf32>
    %672 = arith.truncf %671 : vector<8x32xf32> to vector<8x32xbf16>
    %cst_252 = arith.constant dense<0.000000e+00> : vector<8x8xf32>
    %673 = tpu.matmul %670, %672, %cst_252 {dimension_numbers = #tpu.dot_dimension_numbers<[1], [1], [0], [0], [0, 0, 1, 0], [], []>} : vector<8x32xbf16>, vector<8x32xbf16>, vector<8x8xf32> -> vector<8x8xf32>
    %cst_253 = arith.constant 0.176776692 : f32
    %674 = vector.broadcast %cst_253 : f32 to vector<8x8xf32>
    %675 = arith.mulf %673, %674 : vector<8x8xf32>
    %cst_254 = arith.constant dense<0xFF800000> : vector<8xf32>
    %676 = vector.multi_reduction <maximumf>, %675, %cst_254 [1] : vector<8x8xf32> to vector<8xf32>
    %677 = vector.shape_cast %676 : vector<8xf32> to vector<8x1xf32>
    %678 = vector.broadcast %677 : vector<8x1xf32> to vector<8x8xf32>
    %679 = arith.subf %675, %678 : vector<8x8xf32>
    %680 = math.exp %679 : vector<8x8xf32>
    %cst_255 = arith.constant dense<0.000000e+00> : vector<8xf32>
    %681 = vector.multi_reduction <add>, %680, %cst_255 [1] : vector<8x8xf32> to vector<8xf32>
    %682 = vector.shape_cast %681 : vector<8xf32> to vector<8x1xf32>
    %683 = tpu.reciprocal %682 {approx = true} : vector<8x1xf32> -> vector<8x1xf32>
    %684 = vector.broadcast %683 : vector<8x1xf32> to vector<8x8xf32>
    %685 = arith.mulf %680, %684 : vector<8x8xf32>
    %686 = arith.truncf %685 : vector<8x8xf32> to vector<8x8xbf16>
    %687 = vector.extract_strided_slice %624 {offsets = [0, 64], sizes = [8, 32], strides = [1, 1]} : vector<8x128xf32> to vector<8x32xf32>
    %688 = arith.truncf %687 : vector<8x32xf32> to vector<8x32xbf16>
    %cst_256 = arith.constant dense<0.000000e+00> : vector<8x32xf32>
    %689 = tpu.matmul %686, %688, %cst_256 {dimension_numbers = #tpu.dot_dimension_numbers<[1], [0], [0], [1], [0, 0, 1, 1], [], []>} : vector<8x8xbf16>, vector<8x32xbf16>, vector<8x32xf32> -> vector<8x32xf32>
    %c8_257 = arith.constant 8 : index
    %c64_258 = arith.constant 64 : index
    %690 = vector.load %arg28[%c8_257, %c64_258] : memref<16x128xf32, #tpu.memory_space<vmem>>, vector<8x32xf32>
    tpu.vector_store %arg28[%c8_257, %c64_258], %689 {strides = array<i32>} : memref<16x128xf32, #tpu.memory_space<vmem>>, vector<8x32xf32>,
    %691 = vector.extract_strided_slice %622 {offsets = [0, 96], sizes = [8, 32], strides = [1, 1]} : vector<8x128xf32> to vector<8x32xf32>
    %692 = arith.truncf %691 : vector<8x32xf32> to vector<8x32xbf16>
    %693 = vector.extract_strided_slice %623 {offsets = [0, 96], sizes = [8, 32], strides = [1, 1]} : vector<8x128xf32> to vector<8x32xf32>
    %694 = arith.truncf %693 : vector<8x32xf32> to vector<8x32xbf16>
    %cst_259 = arith.constant dense<0.000000e+00> : vector<8x8xf32>
    %695 = tpu.matmul %692, %694, %cst_259 {dimension_numbers = #tpu.dot_dimension_numbers<[1], [1], [0], [0], [0, 0, 1, 0], [], []>} : vector<8x32xbf16>, vector<8x32xbf16>, vector<8x8xf32> -> vector<8x8xf32>
    %cst_260 = arith.constant 0.176776692 : f32
    %696 = vector.broadcast %cst_260 : f32 to vector<8x8xf32>
    %697 = arith.mulf %695, %696 : vector<8x8xf32>
    %cst_261 = arith.constant dense<0xFF800000> : vector<8xf32>
    %698 = vector.multi_reduction <maximumf>, %697, %cst_261 [1] : vector<8x8xf32> to vector<8xf32>
    %699 = vector.shape_cast %698 : vector<8xf32> to vector<8x1xf32>
    %700 = vector.broadcast %699 : vector<8x1xf32> to vector<8x8xf32>
    %701 = arith.subf %697, %700 : vector<8x8xf32>
    %702 = math.exp %701 : vector<8x8xf32>
    %cst_262 = arith.constant dense<0.000000e+00> : vector<8xf32>
    %703 = vector.multi_reduction <add>, %702, %cst_262 [1] : vector<8x8xf32> to vector<8xf32>
    %704 = vector.shape_cast %703 : vector<8xf32> to vector<8x1xf32>
    %705 = tpu.reciprocal %704 {approx = true} : vector<8x1xf32> -> vector<8x1xf32>
    %706 = vector.broadcast %705 : vector<8x1xf32> to vector<8x8xf32>
    %707 = arith.mulf %702, %706 : vector<8x8xf32>
    %708 = arith.truncf %707 : vector<8x8xf32> to vector<8x8xbf16>
    %709 = vector.extract_strided_slice %624 {offsets = [0, 96], sizes = [8, 32], strides = [1, 1]} : vector<8x128xf32> to vector<8x32xf32>
    %710 = arith.truncf %709 : vector<8x32xf32> to vector<8x32xbf16>
    %cst_263 = arith.constant dense<0.000000e+00> : vector<8x32xf32>
    %711 = tpu.matmul %708, %710, %cst_263 {dimension_numbers = #tpu.dot_dimension_numbers<[1], [0], [0], [1], [0, 0, 1, 1], [], []>} : vector<8x8xbf16>, vector<8x32xbf16>, vector<8x32xf32> -> vector<8x32xf32>
    %c8_264 = arith.constant 8 : index
    %c96_265 = arith.constant 96 : index
    %712 = vector.load %arg28[%c8_264, %c96_265] : memref<16x128xf32, #tpu.memory_space<vmem>>, vector<8x32xf32>
    tpu.vector_store %arg28[%c8_264, %c96_265], %711 {strides = array<i32>} : memref<16x128xf32, #tpu.memory_space<vmem>>, vector<8x32xf32>,
    %c0_266 = arith.constant 0 : index
    %c0_267 = arith.constant 0 : index
    %713 = vector.load %arg28[%c0_266, %c0_267] : memref<16x128xf32, #tpu.memory_space<vmem>>, vector<16x128xf32>
    %c1_268 = arith.constant 1 : index
    %c0_269 = arith.constant 0 : index
    %c0_270 = arith.constant 0 : index
    %714 = vector.load %arg7[%c1_268, %c0_269, %c0_270] : memref<2x128x128xbf16, #tpu.memory_space<vmem>>, vector<1x128x128xbf16>
    %715 = vector.shape_cast %714 : vector<1x128x128xbf16> to vector<128x128xbf16>
    %716 = arith.truncf %713 : vector<16x128xf32> to vector<16x128xbf16>
    %cst_271 = arith.constant dense<0.000000e+00> : vector<16x128xf32>
    %717 = tpu.matmul %716, %715, %cst_271 {dimension_numbers = #tpu.dot_dimension_numbers<[1], [0], [0], [1], [0, 0, 1, 1], [], []>} : vector<16x128xbf16>, vector<128x128xbf16>, vector<16x128xf32> -> vector<16x128xf32>
    %c1_272 = arith.constant 1 : index
    %c0_273 = arith.constant 0 : index
    %c0_274 = arith.constant 0 : index
    %718 = vector.load %arg8[%c1_272, %c0_273, %c0_274] : memref<2x1x128xf32, #tpu.memory_space<vmem>>, vector<1x1x128xf32>
    %719 = vector.shape_cast %718 : vector<1x1x128xf32> to vector<1x128xf32>
    %720 = vector.broadcast %719 : vector<1x128xf32> to vector<16x128xf32>
    %721 = arith.addf %717, %720 : vector<16x128xf32>
    %722 = arith.addf %721, %519 : vector<16x128xf32>
    %c1_275 = arith.constant 1 : index
    %c0_276 = arith.constant 0 : index
    %c0_277 = arith.constant 0 : index
    %723 = vector.load %arg9[%c1_275, %c0_276, %c0_277] : memref<2x1x128xf32, #tpu.memory_space<vmem>>, vector<1x1x128xf32>
    %724 = vector.shape_cast %723 : vector<1x1x128xf32> to vector<1x128xf32>
    %c1_278 = arith.constant 1 : index
    %c0_279 = arith.constant 0 : index
    %c0_280 = arith.constant 0 : index
    %725 = vector.load %arg10[%c1_278, %c0_279, %c0_280] : memref<2x1x128xf32, #tpu.memory_space<vmem>>, vector<1x1x128xf32>
    %726 = vector.shape_cast %725 : vector<1x1x128xf32> to vector<1x128xf32>
    %cst_281 = arith.constant dense<0.000000e+00> : vector<16xf32>
    %727 = vector.multi_reduction <add>, %722, %cst_281 [1] : vector<16x128xf32> to vector<16xf32>
    %728 = vector.shape_cast %727 : vector<16xf32> to vector<16x1xf32>
    %cst_282 = arith.constant 1.280000e+02 : f32
    %729 = vector.broadcast %cst_282 : f32 to vector<16x1xf32>
    %730 = arith.divf %728, %729 : vector<16x1xf32>
    %731 = vector.broadcast %730 : vector<16x1xf32> to vector<16x128xf32>
    %732 = arith.subf %722, %731 : vector<16x128xf32>
    %733 = arith.mulf %732, %732 : vector<16x128xf32>
    %cst_283 = arith.constant dense<0.000000e+00> : vector<16xf32>
    %734 = vector.multi_reduction <add>, %733, %cst_283 [1] : vector<16x128xf32> to vector<16xf32>
    %735 = vector.shape_cast %734 : vector<16xf32> to vector<16x1xf32>
    %cst_284 = arith.constant 1.280000e+02 : f32
    %736 = vector.broadcast %cst_284 : f32 to vector<16x1xf32>
    %737 = arith.divf %735, %736 : vector<16x1xf32>
    %738 = vector.broadcast %730 : vector<16x1xf32> to vector<16x128xf32>
    %739 = arith.subf %722, %738 : vector<16x128xf32>
    %cst_285 = arith.constant 9.99999974E-6 : f32
    %740 = vector.broadcast %cst_285 : f32 to vector<16x1xf32>
    %741 = arith.addf %737, %740 : vector<16x1xf32>
    %742 = math.rsqrt %741 : vector<16x1xf32>
    %743 = vector.broadcast %742 : vector<16x1xf32> to vector<16x128xf32>
    %744 = arith.mulf %739, %743 : vector<16x128xf32>
    %745 = vector.broadcast %724 : vector<1x128xf32> to vector<16x128xf32>
    %746 = arith.mulf %744, %745 : vector<16x128xf32>
    %747 = vector.broadcast %726 : vector<1x128xf32> to vector<16x128xf32>
    %748 = arith.addf %746, %747 : vector<16x128xf32>
    %c1_286 = arith.constant 1 : index
    %c0_287 = arith.constant 0 : index
    %c0_288 = arith.constant 0 : index
    %749 = vector.load %arg11[%c1_286, %c0_287, %c0_288] : memref<2x128x128xbf16, #tpu.memory_space<vmem>>, vector<1x128x128xbf16>
    %750 = vector.shape_cast %749 : vector<1x128x128xbf16> to vector<128x128xbf16>
    %751 = arith.truncf %748 : vector<16x128xf32> to vector<16x128xbf16>
    %cst_289 = arith.constant dense<0.000000e+00> : vector<16x128xf32>
    %752 = tpu.matmul %751, %750, %cst_289 {dimension_numbers = #tpu.dot_dimension_numbers<[1], [0], [0], [1], [0, 0, 1, 1], [], []>} : vector<16x128xbf16>, vector<128x128xbf16>, vector<16x128xf32> -> vector<16x128xf32>
    %c1_290 = arith.constant 1 : index
    %c0_291 = arith.constant 0 : index
    %c0_292 = arith.constant 0 : index
    %753 = vector.load %arg12[%c1_290, %c0_291, %c0_292] : memref<2x1x128xf32, #tpu.memory_space<vmem>>, vector<1x1x128xf32>
    %754 = vector.shape_cast %753 : vector<1x1x128xf32> to vector<1x128xf32>
    %755 = vector.broadcast %754 : vector<1x128xf32> to vector<16x128xf32>
    %756 = arith.addf %752, %755 : vector<16x128xf32>
    %c1_293 = arith.constant 1 : index
    %c0_294 = arith.constant 0 : index
    %c0_295 = arith.constant 0 : index
    %757 = vector.load %arg13[%c1_293, %c0_294, %c0_295] : memref<2x128x256xbf16, #tpu.memory_space<vmem>>, vector<1x128x256xbf16>
    %758 = vector.shape_cast %757 : vector<1x128x256xbf16> to vector<128x256xbf16>
    %759 = arith.truncf %9 : vector<32x128xf32> to vector<32x128xbf16>
    %cst_296 = arith.constant dense<0.000000e+00> : vector<32x256xf32>
    %760 = tpu.matmul %759, %758, %cst_296 {dimension_numbers = #tpu.dot_dimension_numbers<[1], [0], [0], [1], [0, 0, 1, 1], [], []>} : vector<32x128xbf16>, vector<128x256xbf16>, vector<32x256xf32> -> vector<32x256xf32>
    %c1_297 = arith.constant 1 : index
    %c0_298 = arith.constant 0 : index
    %c0_299 = arith.constant 0 : index
    %761 = vector.load %arg14[%c1_297, %c0_298, %c0_299] : memref<2x1x256xf32, #tpu.memory_space<vmem>>, vector<1x1x256xf32>
    %762 = vector.shape_cast %761 : vector<1x1x256xf32> to vector<1x256xf32>
    %763 = vector.broadcast %762 : vector<1x256xf32> to vector<32x256xf32>
    %764 = arith.addf %760, %763 : vector<32x256xf32>
    %765 = vector.extract_strided_slice %764 {offsets = [0, 0], sizes = [32, 128], strides = [1, 1]} : vector<32x256xf32> to vector<32x128xf32>
    %766 = vector.extract_strided_slice %764 {offsets = [0, 128], sizes = [32, 128], strides = [1, 1]} : vector<32x256xf32> to vector<32x128xf32>
    %767 = vector.extract_strided_slice %756 {offsets = [0, 0], sizes = [8, 128], strides = [1, 1]} : vector<16x128xf32> to vector<8x128xf32>
    %768 = vector.extract_strided_slice %765 {offsets = [0, 0], sizes = [16, 128], strides = [1, 1]} : vector<32x128xf32> to vector<16x128xf32>
    %769 = vector.extract_strided_slice %766 {offsets = [0, 0], sizes = [16, 128], strides = [1, 1]} : vector<32x128xf32> to vector<16x128xf32>
    %770 = vector.extract_strided_slice %767 {offsets = [0, 0], sizes = [8, 32], strides = [1, 1]} : vector<8x128xf32> to vector<8x32xf32>
    %771 = arith.truncf %770 : vector<8x32xf32> to vector<8x32xbf16>
    %772 = vector.extract_strided_slice %768 {offsets = [0, 0], sizes = [16, 32], strides = [1, 1]} : vector<16x128xf32> to vector<16x32xf32>
    %773 = arith.truncf %772 : vector<16x32xf32> to vector<16x32xbf16>
    %cst_300 = arith.constant dense<0.000000e+00> : vector<8x16xf32>
    %774 = tpu.matmul %771, %773, %cst_300 {dimension_numbers = #tpu.dot_dimension_numbers<[1], [1], [0], [0], [0, 0, 1, 0], [], []>} : vector<8x32xbf16>, vector<16x32xbf16>, vector<8x16xf32> -> vector<8x16xf32>
    %cst_301 = arith.constant 0.176776692 : f32
    %775 = vector.broadcast %cst_301 : f32 to vector<8x16xf32>
    %776 = arith.mulf %774, %775 : vector<8x16xf32>
    %cst_302 = arith.constant dense<0xFF800000> : vector<8xf32>
    %777 = vector.multi_reduction <maximumf>, %776, %cst_302 [1] : vector<8x16xf32> to vector<8xf32>
    %778 = vector.shape_cast %777 : vector<8xf32> to vector<8x1xf32>
    %779 = vector.broadcast %778 : vector<8x1xf32> to vector<8x16xf32>
    %780 = arith.subf %776, %779 : vector<8x16xf32>
    %781 = math.exp %780 : vector<8x16xf32>
    %cst_303 = arith.constant dense<0.000000e+00> : vector<8xf32>
    %782 = vector.multi_reduction <add>, %781, %cst_303 [1] : vector<8x16xf32> to vector<8xf32>
    %783 = vector.shape_cast %782 : vector<8xf32> to vector<8x1xf32>
    %784 = tpu.reciprocal %783 {approx = true} : vector<8x1xf32> -> vector<8x1xf32>
    %785 = vector.broadcast %784 : vector<8x1xf32> to vector<8x16xf32>
    %786 = arith.mulf %781, %785 : vector<8x16xf32>
    %787 = arith.truncf %786 : vector<8x16xf32> to vector<8x16xbf16>
    %788 = vector.extract_strided_slice %769 {offsets = [0, 0], sizes = [16, 32], strides = [1, 1]} : vector<16x128xf32> to vector<16x32xf32>
    %789 = arith.truncf %788 : vector<16x32xf32> to vector<16x32xbf16>
    %cst_304 = arith.constant dense<0.000000e+00> : vector<8x32xf32>
    %790 = tpu.matmul %787, %789, %cst_304 {dimension_numbers = #tpu.dot_dimension_numbers<[1], [0], [0], [1], [0, 0, 1, 1], [], []>} : vector<8x16xbf16>, vector<16x32xbf16>, vector<8x32xf32> -> vector<8x32xf32>
    %c0_305 = arith.constant 0 : index
    %c0_306 = arith.constant 0 : index
    %791 = vector.load %arg28[%c0_305, %c0_306] : memref<16x128xf32, #tpu.memory_space<vmem>>, vector<8x32xf32>
    tpu.vector_store %arg28[%c0_305, %c0_306], %790 {strides = array<i32>} : memref<16x128xf32, #tpu.memory_space<vmem>>, vector<8x32xf32>,
    %792 = vector.extract_strided_slice %767 {offsets = [0, 32], sizes = [8, 32], strides = [1, 1]} : vector<8x128xf32> to vector<8x32xf32>
    %793 = arith.truncf %792 : vector<8x32xf32> to vector<8x32xbf16>
    %794 = vector.extract_strided_slice %768 {offsets = [0, 32], sizes = [16, 32], strides = [1, 1]} : vector<16x128xf32> to vector<16x32xf32>
    %795 = arith.truncf %794 : vector<16x32xf32> to vector<16x32xbf16>
    %cst_307 = arith.constant dense<0.000000e+00> : vector<8x16xf32>
    %796 = tpu.matmul %793, %795, %cst_307 {dimension_numbers = #tpu.dot_dimension_numbers<[1], [1], [0], [0], [0, 0, 1, 0], [], []>} : vector<8x32xbf16>, vector<16x32xbf16>, vector<8x16xf32> -> vector<8x16xf32>
    %cst_308 = arith.constant 0.176776692 : f32
    %797 = vector.broadcast %cst_308 : f32 to vector<8x16xf32>
    %798 = arith.mulf %796, %797 : vector<8x16xf32>
    %cst_309 = arith.constant dense<0xFF800000> : vector<8xf32>
    %799 = vector.multi_reduction <maximumf>, %798, %cst_309 [1] : vector<8x16xf32> to vector<8xf32>
    %800 = vector.shape_cast %799 : vector<8xf32> to vector<8x1xf32>
    %801 = vector.broadcast %800 : vector<8x1xf32> to vector<8x16xf32>
    %802 = arith.subf %798, %801 : vector<8x16xf32>
    %803 = math.exp %802 : vector<8x16xf32>
    %cst_310 = arith.constant dense<0.000000e+00> : vector<8xf32>
    %804 = vector.multi_reduction <add>, %803, %cst_310 [1] : vector<8x16xf32> to vector<8xf32>
    %805 = vector.shape_cast %804 : vector<8xf32> to vector<8x1xf32>
    %806 = tpu.reciprocal %805 {approx = true} : vector<8x1xf32> -> vector<8x1xf32>
    %807 = vector.broadcast %806 : vector<8x1xf32> to vector<8x16xf32>
    %808 = arith.mulf %803, %807 : vector<8x16xf32>
    %809 = arith.truncf %808 : vector<8x16xf32> to vector<8x16xbf16>
    %810 = vector.extract_strided_slice %769 {offsets = [0, 32], sizes = [16, 32], strides = [1, 1]} : vector<16x128xf32> to vector<16x32xf32>
    %811 = arith.truncf %810 : vector<16x32xf32> to vector<16x32xbf16>
    %cst_311 = arith.constant dense<0.000000e+00> : vector<8x32xf32>
    %812 = tpu.matmul %809, %811, %cst_311 {dimension_numbers = #tpu.dot_dimension_numbers<[1], [0], [0], [1], [0, 0, 1, 1], [], []>} : vector<8x16xbf16>, vector<16x32xbf16>, vector<8x32xf32> -> vector<8x32xf32>
    %c0_312 = arith.constant 0 : index
    %c32_313 = arith.constant 32 : index
    %813 = vector.load %arg28[%c0_312, %c32_313] : memref<16x128xf32, #tpu.memory_space<vmem>>, vector<8x32xf32>
    tpu.vector_store %arg28[%c0_312, %c32_313], %812 {strides = array<i32>} : memref<16x128xf32, #tpu.memory_space<vmem>>, vector<8x32xf32>,
    %814 = vector.extract_strided_slice %767 {offsets = [0, 64], sizes = [8, 32], strides = [1, 1]} : vector<8x128xf32> to vector<8x32xf32>
    %815 = arith.truncf %814 : vector<8x32xf32> to vector<8x32xbf16>
    %816 = vector.extract_strided_slice %768 {offsets = [0, 64], sizes = [16, 32], strides = [1, 1]} : vector<16x128xf32> to vector<16x32xf32>
    %817 = arith.truncf %816 : vector<16x32xf32> to vector<16x32xbf16>
    %cst_314 = arith.constant dense<0.000000e+00> : vector<8x16xf32>
    %818 = tpu.matmul %815, %817, %cst_314 {dimension_numbers = #tpu.dot_dimension_numbers<[1], [1], [0], [0], [0, 0, 1, 0], [], []>} : vector<8x32xbf16>, vector<16x32xbf16>, vector<8x16xf32> -> vector<8x16xf32>
    %cst_315 = arith.constant 0.176776692 : f32
    %819 = vector.broadcast %cst_315 : f32 to vector<8x16xf32>
    %820 = arith.mulf %818, %819 : vector<8x16xf32>
    %cst_316 = arith.constant dense<0xFF800000> : vector<8xf32>
    %821 = vector.multi_reduction <maximumf>, %820, %cst_316 [1] : vector<8x16xf32> to vector<8xf32>
    %822 = vector.shape_cast %821 : vector<8xf32> to vector<8x1xf32>
    %823 = vector.broadcast %822 : vector<8x1xf32> to vector<8x16xf32>
    %824 = arith.subf %820, %823 : vector<8x16xf32>
    %825 = math.exp %824 : vector<8x16xf32>
    %cst_317 = arith.constant dense<0.000000e+00> : vector<8xf32>
    %826 = vector.multi_reduction <add>, %825, %cst_317 [1] : vector<8x16xf32> to vector<8xf32>
    %827 = vector.shape_cast %826 : vector<8xf32> to vector<8x1xf32>
    %828 = tpu.reciprocal %827 {approx = true} : vector<8x1xf32> -> vector<8x1xf32>
    %829 = vector.broadcast %828 : vector<8x1xf32> to vector<8x16xf32>
    %830 = arith.mulf %825, %829 : vector<8x16xf32>
    %831 = arith.truncf %830 : vector<8x16xf32> to vector<8x16xbf16>
    %832 = vector.extract_strided_slice %769 {offsets = [0, 64], sizes = [16, 32], strides = [1, 1]} : vector<16x128xf32> to vector<16x32xf32>
    %833 = arith.truncf %832 : vector<16x32xf32> to vector<16x32xbf16>
    %cst_318 = arith.constant dense<0.000000e+00> : vector<8x32xf32>
    %834 = tpu.matmul %831, %833, %cst_318 {dimension_numbers = #tpu.dot_dimension_numbers<[1], [0], [0], [1], [0, 0, 1, 1], [], []>} : vector<8x16xbf16>, vector<16x32xbf16>, vector<8x32xf32> -> vector<8x32xf32>
    %c0_319 = arith.constant 0 : index
    %c64_320 = arith.constant 64 : index
    %835 = vector.load %arg28[%c0_319, %c64_320] : memref<16x128xf32, #tpu.memory_space<vmem>>, vector<8x32xf32>
    tpu.vector_store %arg28[%c0_319, %c64_320], %834 {strides = array<i32>} : memref<16x128xf32, #tpu.memory_space<vmem>>, vector<8x32xf32>,
    %836 = vector.extract_strided_slice %767 {offsets = [0, 96], sizes = [8, 32], strides = [1, 1]} : vector<8x128xf32> to vector<8x32xf32>
    %837 = arith.truncf %836 : vector<8x32xf32> to vector<8x32xbf16>
    %838 = vector.extract_strided_slice %768 {offsets = [0, 96], sizes = [16, 32], strides = [1, 1]} : vector<16x128xf32> to vector<16x32xf32>
    %839 = arith.truncf %838 : vector<16x32xf32> to vector<16x32xbf16>
    %cst_321 = arith.constant dense<0.000000e+00> : vector<8x16xf32>
    %840 = tpu.matmul %837, %839, %cst_321 {dimension_numbers = #tpu.dot_dimension_numbers<[1], [1], [0], [0], [0, 0, 1, 0], [], []>} : vector<8x32xbf16>, vector<16x32xbf16>, vector<8x16xf32> -> vector<8x16xf32>
    %cst_322 = arith.constant 0.176776692 : f32
    %841 = vector.broadcast %cst_322 : f32 to vector<8x16xf32>
    %842 = arith.mulf %840, %841 : vector<8x16xf32>
    %cst_323 = arith.constant dense<0xFF800000> : vector<8xf32>
    %843 = vector.multi_reduction <maximumf>, %842, %cst_323 [1] : vector<8x16xf32> to vector<8xf32>
    %844 = vector.shape_cast %843 : vector<8xf32> to vector<8x1xf32>
    %845 = vector.broadcast %844 : vector<8x1xf32> to vector<8x16xf32>
    %846 = arith.subf %842, %845 : vector<8x16xf32>
    %847 = math.exp %846 : vector<8x16xf32>
    %cst_324 = arith.constant dense<0.000000e+00> : vector<8xf32>
    %848 = vector.multi_reduction <add>, %847, %cst_324 [1] : vector<8x16xf32> to vector<8xf32>
    %849 = vector.shape_cast %848 : vector<8xf32> to vector<8x1xf32>
    %850 = tpu.reciprocal %849 {approx = true} : vector<8x1xf32> -> vector<8x1xf32>
    %851 = vector.broadcast %850 : vector<8x1xf32> to vector<8x16xf32>
    %852 = arith.mulf %847, %851 : vector<8x16xf32>
    %853 = arith.truncf %852 : vector<8x16xf32> to vector<8x16xbf16>
    %854 = vector.extract_strided_slice %769 {offsets = [0, 96], sizes = [16, 32], strides = [1, 1]} : vector<16x128xf32> to vector<16x32xf32>
    %855 = arith.truncf %854 : vector<16x32xf32> to vector<16x32xbf16>
    %cst_325 = arith.constant dense<0.000000e+00> : vector<8x32xf32>
    %856 = tpu.matmul %853, %855, %cst_325 {dimension_numbers = #tpu.dot_dimension_numbers<[1], [0], [0], [1], [0, 0, 1, 1], [], []>} : vector<8x16xbf16>, vector<16x32xbf16>, vector<8x32xf32> -> vector<8x32xf32>
    %c0_326 = arith.constant 0 : index
    %c96_327 = arith.constant 96 : index
    %857 = vector.load %arg28[%c0_326, %c96_327] : memref<16x128xf32, #tpu.memory_space<vmem>>, vector<8x32xf32>
    tpu.vector_store %arg28[%c0_326, %c96_327], %856 {strides = array<i32>} : memref<16x128xf32, #tpu.memory_space<vmem>>, vector<8x32xf32>,
    %858 = vector.extract_strided_slice %756 {offsets = [8, 0], sizes = [8, 128], strides = [1, 1]} : vector<16x128xf32> to vector<8x128xf32>
    %859 = vector.extract_strided_slice %765 {offsets = [16, 0], sizes = [16, 128], strides = [1, 1]} : vector<32x128xf32> to vector<16x128xf32>
    %860 = vector.extract_strided_slice %766 {offsets = [16, 0], sizes = [16, 128], strides = [1, 1]} : vector<32x128xf32> to vector<16x128xf32>
    %861 = vector.extract_strided_slice %858 {offsets = [0, 0], sizes = [8, 32], strides = [1, 1]} : vector<8x128xf32> to vector<8x32xf32>
    %862 = arith.truncf %861 : vector<8x32xf32> to vector<8x32xbf16>
    %863 = vector.extract_strided_slice %859 {offsets = [0, 0], sizes = [16, 32], strides = [1, 1]} : vector<16x128xf32> to vector<16x32xf32>
    %864 = arith.truncf %863 : vector<16x32xf32> to vector<16x32xbf16>
    %cst_328 = arith.constant dense<0.000000e+00> : vector<8x16xf32>
    %865 = tpu.matmul %862, %864, %cst_328 {dimension_numbers = #tpu.dot_dimension_numbers<[1], [1], [0], [0], [0, 0, 1, 0], [], []>} : vector<8x32xbf16>, vector<16x32xbf16>, vector<8x16xf32> -> vector<8x16xf32>
    %cst_329 = arith.constant 0.176776692 : f32
    %866 = vector.broadcast %cst_329 : f32 to vector<8x16xf32>
    %867 = arith.mulf %865, %866 : vector<8x16xf32>
    %cst_330 = arith.constant dense<0xFF800000> : vector<8xf32>
    %868 = vector.multi_reduction <maximumf>, %867, %cst_330 [1] : vector<8x16xf32> to vector<8xf32>
    %869 = vector.shape_cast %868 : vector<8xf32> to vector<8x1xf32>
    %870 = vector.broadcast %869 : vector<8x1xf32> to vector<8x16xf32>
    %871 = arith.subf %867, %870 : vector<8x16xf32>
    %872 = math.exp %871 : vector<8x16xf32>
    %cst_331 = arith.constant dense<0.000000e+00> : vector<8xf32>
    %873 = vector.multi_reduction <add>, %872, %cst_331 [1] : vector<8x16xf32> to vector<8xf32>
    %874 = vector.shape_cast %873 : vector<8xf32> to vector<8x1xf32>
    %875 = tpu.reciprocal %874 {approx = true} : vector<8x1xf32> -> vector<8x1xf32>
    %876 = vector.broadcast %875 : vector<8x1xf32> to vector<8x16xf32>
    %877 = arith.mulf %872, %876 : vector<8x16xf32>
    %878 = arith.truncf %877 : vector<8x16xf32> to vector<8x16xbf16>
    %879 = vector.extract_strided_slice %860 {offsets = [0, 0], sizes = [16, 32], strides = [1, 1]} : vector<16x128xf32> to vector<16x32xf32>
    %880 = arith.truncf %879 : vector<16x32xf32> to vector<16x32xbf16>
    %cst_332 = arith.constant dense<0.000000e+00> : vector<8x32xf32>
    %881 = tpu.matmul %878, %880, %cst_332 {dimension_numbers = #tpu.dot_dimension_numbers<[1], [0], [0], [1], [0, 0, 1, 1], [], []>} : vector<8x16xbf16>, vector<16x32xbf16>, vector<8x32xf32> -> vector<8x32xf32>
    %c8_333 = arith.constant 8 : index
    %c0_334 = arith.constant 0 : index
    %882 = vector.load %arg28[%c8_333, %c0_334] : memref<16x128xf32, #tpu.memory_space<vmem>>, vector<8x32xf32>
    tpu.vector_store %arg28[%c8_333, %c0_334], %881 {strides = array<i32>} : memref<16x128xf32, #tpu.memory_space<vmem>>, vector<8x32xf32>,
    %883 = vector.extract_strided_slice %858 {offsets = [0, 32], sizes = [8, 32], strides = [1, 1]} : vector<8x128xf32> to vector<8x32xf32>
    %884 = arith.truncf %883 : vector<8x32xf32> to vector<8x32xbf16>
    %885 = vector.extract_strided_slice %859 {offsets = [0, 32], sizes = [16, 32], strides = [1, 1]} : vector<16x128xf32> to vector<16x32xf32>
    %886 = arith.truncf %885 : vector<16x32xf32> to vector<16x32xbf16>
    %cst_335 = arith.constant dense<0.000000e+00> : vector<8x16xf32>
    %887 = tpu.matmul %884, %886, %cst_335 {dimension_numbers = #tpu.dot_dimension_numbers<[1], [1], [0], [0], [0, 0, 1, 0], [], []>} : vector<8x32xbf16>, vector<16x32xbf16>, vector<8x16xf32> -> vector<8x16xf32>
    %cst_336 = arith.constant 0.176776692 : f32
    %888 = vector.broadcast %cst_336 : f32 to vector<8x16xf32>
    %889 = arith.mulf %887, %888 : vector<8x16xf32>
    %cst_337 = arith.constant dense<0xFF800000> : vector<8xf32>
    %890 = vector.multi_reduction <maximumf>, %889, %cst_337 [1] : vector<8x16xf32> to vector<8xf32>
    %891 = vector.shape_cast %890 : vector<8xf32> to vector<8x1xf32>
    %892 = vector.broadcast %891 : vector<8x1xf32> to vector<8x16xf32>
    %893 = arith.subf %889, %892 : vector<8x16xf32>
    %894 = math.exp %893 : vector<8x16xf32>
    %cst_338 = arith.constant dense<0.000000e+00> : vector<8xf32>
    %895 = vector.multi_reduction <add>, %894, %cst_338 [1] : vector<8x16xf32> to vector<8xf32>
    %896 = vector.shape_cast %895 : vector<8xf32> to vector<8x1xf32>
    %897 = tpu.reciprocal %896 {approx = true} : vector<8x1xf32> -> vector<8x1xf32>
    %898 = vector.broadcast %897 : vector<8x1xf32> to vector<8x16xf32>
    %899 = arith.mulf %894, %898 : vector<8x16xf32>
    %900 = arith.truncf %899 : vector<8x16xf32> to vector<8x16xbf16>
    %901 = vector.extract_strided_slice %860 {offsets = [0, 32], sizes = [16, 32], strides = [1, 1]} : vector<16x128xf32> to vector<16x32xf32>
    %902 = arith.truncf %901 : vector<16x32xf32> to vector<16x32xbf16>
    %cst_339 = arith.constant dense<0.000000e+00> : vector<8x32xf32>
    %903 = tpu.matmul %900, %902, %cst_339 {dimension_numbers = #tpu.dot_dimension_numbers<[1], [0], [0], [1], [0, 0, 1, 1], [], []>} : vector<8x16xbf16>, vector<16x32xbf16>, vector<8x32xf32> -> vector<8x32xf32>
    %c8_340 = arith.constant 8 : index
    %c32_341 = arith.constant 32 : index
    %904 = vector.load %arg28[%c8_340, %c32_341] : memref<16x128xf32, #tpu.memory_space<vmem>>, vector<8x32xf32>
    tpu.vector_store %arg28[%c8_340, %c32_341], %903 {strides = array<i32>} : memref<16x128xf32, #tpu.memory_space<vmem>>, vector<8x32xf32>,
    %905 = vector.extract_strided_slice %858 {offsets = [0, 64], sizes = [8, 32], strides = [1, 1]} : vector<8x128xf32> to vector<8x32xf32>
    %906 = arith.truncf %905 : vector<8x32xf32> to vector<8x32xbf16>
    %907 = vector.extract_strided_slice %859 {offsets = [0, 64], sizes = [16, 32], strides = [1, 1]} : vector<16x128xf32> to vector<16x32xf32>
    %908 = arith.truncf %907 : vector<16x32xf32> to vector<16x32xbf16>
    %cst_342 = arith.constant dense<0.000000e+00> : vector<8x16xf32>
    %909 = tpu.matmul %906, %908, %cst_342 {dimension_numbers = #tpu.dot_dimension_numbers<[1], [1], [0], [0], [0, 0, 1, 0], [], []>} : vector<8x32xbf16>, vector<16x32xbf16>, vector<8x16xf32> -> vector<8x16xf32>
    %cst_343 = arith.constant 0.176776692 : f32
    %910 = vector.broadcast %cst_343 : f32 to vector<8x16xf32>
    %911 = arith.mulf %909, %910 : vector<8x16xf32>
    %cst_344 = arith.constant dense<0xFF800000> : vector<8xf32>
    %912 = vector.multi_reduction <maximumf>, %911, %cst_344 [1] : vector<8x16xf32> to vector<8xf32>
    %913 = vector.shape_cast %912 : vector<8xf32> to vector<8x1xf32>
    %914 = vector.broadcast %913 : vector<8x1xf32> to vector<8x16xf32>
    %915 = arith.subf %911, %914 : vector<8x16xf32>
    %916 = math.exp %915 : vector<8x16xf32>
    %cst_345 = arith.constant dense<0.000000e+00> : vector<8xf32>
    %917 = vector.multi_reduction <add>, %916, %cst_345 [1] : vector<8x16xf32> to vector<8xf32>
    %918 = vector.shape_cast %917 : vector<8xf32> to vector<8x1xf32>
    %919 = tpu.reciprocal %918 {approx = true} : vector<8x1xf32> -> vector<8x1xf32>
    %920 = vector.broadcast %919 : vector<8x1xf32> to vector<8x16xf32>
    %921 = arith.mulf %916, %920 : vector<8x16xf32>
    %922 = arith.truncf %921 : vector<8x16xf32> to vector<8x16xbf16>
    %923 = vector.extract_strided_slice %860 {offsets = [0, 64], sizes = [16, 32], strides = [1, 1]} : vector<16x128xf32> to vector<16x32xf32>
    %924 = arith.truncf %923 : vector<16x32xf32> to vector<16x32xbf16>
    %cst_346 = arith.constant dense<0.000000e+00> : vector<8x32xf32>
    %925 = tpu.matmul %922, %924, %cst_346 {dimension_numbers = #tpu.dot_dimension_numbers<[1], [0], [0], [1], [0, 0, 1, 1], [], []>} : vector<8x16xbf16>, vector<16x32xbf16>, vector<8x32xf32> -> vector<8x32xf32>
    %c8_347 = arith.constant 8 : index
    %c64_348 = arith.constant 64 : index
    %926 = vector.load %arg28[%c8_347, %c64_348] : memref<16x128xf32, #tpu.memory_space<vmem>>, vector<8x32xf32>
    tpu.vector_store %arg28[%c8_347, %c64_348], %925 {strides = array<i32>} : memref<16x128xf32, #tpu.memory_space<vmem>>, vector<8x32xf32>,
    %927 = vector.extract_strided_slice %858 {offsets = [0, 96], sizes = [8, 32], strides = [1, 1]} : vector<8x128xf32> to vector<8x32xf32>
    %928 = arith.truncf %927 : vector<8x32xf32> to vector<8x32xbf16>
    %929 = vector.extract_strided_slice %859 {offsets = [0, 96], sizes = [16, 32], strides = [1, 1]} : vector<16x128xf32> to vector<16x32xf32>
    %930 = arith.truncf %929 : vector<16x32xf32> to vector<16x32xbf16>
    %cst_349 = arith.constant dense<0.000000e+00> : vector<8x16xf32>
    %931 = tpu.matmul %928, %930, %cst_349 {dimension_numbers = #tpu.dot_dimension_numbers<[1], [1], [0], [0], [0, 0, 1, 0], [], []>} : vector<8x32xbf16>, vector<16x32xbf16>, vector<8x16xf32> -> vector<8x16xf32>
    %cst_350 = arith.constant 0.176776692 : f32
    %932 = vector.broadcast %cst_350 : f32 to vector<8x16xf32>
    %933 = arith.mulf %931, %932 : vector<8x16xf32>
    %cst_351 = arith.constant dense<0xFF800000> : vector<8xf32>
    %934 = vector.multi_reduction <maximumf>, %933, %cst_351 [1] : vector<8x16xf32> to vector<8xf32>
    %935 = vector.shape_cast %934 : vector<8xf32> to vector<8x1xf32>
    %936 = vector.broadcast %935 : vector<8x1xf32> to vector<8x16xf32>
    %937 = arith.subf %933, %936 : vector<8x16xf32>
    %938 = math.exp %937 : vector<8x16xf32>
    %cst_352 = arith.constant dense<0.000000e+00> : vector<8xf32>
    %939 = vector.multi_reduction <add>, %938, %cst_352 [1] : vector<8x16xf32> to vector<8xf32>
    %940 = vector.shape_cast %939 : vector<8xf32> to vector<8x1xf32>
    %941 = tpu.reciprocal %940 {approx = true} : vector<8x1xf32> -> vector<8x1xf32>
    %942 = vector.broadcast %941 : vector<8x1xf32> to vector<8x16xf32>
    %943 = arith.mulf %938, %942 : vector<8x16xf32>
    %944 = arith.truncf %943 : vector<8x16xf32> to vector<8x16xbf16>
    %945 = vector.extract_strided_slice %860 {offsets = [0, 96], sizes = [16, 32], strides = [1, 1]} : vector<16x128xf32> to vector<16x32xf32>
    %946 = arith.truncf %945 : vector<16x32xf32> to vector<16x32xbf16>
    %cst_353 = arith.constant dense<0.000000e+00> : vector<8x32xf32>
    %947 = tpu.matmul %944, %946, %cst_353 {dimension_numbers = #tpu.dot_dimension_numbers<[1], [0], [0], [1], [0, 0, 1, 1], [], []>} : vector<8x16xbf16>, vector<16x32xbf16>, vector<8x32xf32> -> vector<8x32xf32>
    %c8_354 = arith.constant 8 : index
    %c96_355 = arith.constant 96 : index
    %948 = vector.load %arg28[%c8_354, %c96_355] : memref<16x128xf32, #tpu.memory_space<vmem>>, vector<8x32xf32>
    tpu.vector_store %arg28[%c8_354, %c96_355], %947 {strides = array<i32>} : memref<16x128xf32, #tpu.memory_space<vmem>>, vector<8x32xf32>,
    %c0_356 = arith.constant 0 : index
    %c0_357 = arith.constant 0 : index
    %949 = vector.load %arg28[%c0_356, %c0_357] : memref<16x128xf32, #tpu.memory_space<vmem>>, vector<16x128xf32>
    %c1_358 = arith.constant 1 : index
    %c0_359 = arith.constant 0 : index
    %c0_360 = arith.constant 0 : index
    %950 = vector.load %arg15[%c1_358, %c0_359, %c0_360] : memref<2x128x128xbf16, #tpu.memory_space<vmem>>, vector<1x128x128xbf16>
    %951 = vector.shape_cast %950 : vector<1x128x128xbf16> to vector<128x128xbf16>
    %952 = arith.truncf %949 : vector<16x128xf32> to vector<16x128xbf16>
    %cst_361 = arith.constant dense<0.000000e+00> : vector<16x128xf32>
    %953 = tpu.matmul %952, %951, %cst_361 {dimension_numbers = #tpu.dot_dimension_numbers<[1], [0], [0], [1], [0, 0, 1, 1], [], []>} : vector<16x128xbf16>, vector<128x128xbf16>, vector<16x128xf32> -> vector<16x128xf32>
    %c1_362 = arith.constant 1 : index
    %c0_363 = arith.constant 0 : index
    %c0_364 = arith.constant 0 : index
    %954 = vector.load %arg16[%c1_362, %c0_363, %c0_364] : memref<2x1x128xf32, #tpu.memory_space<vmem>>, vector<1x1x128xf32>
    %955 = vector.shape_cast %954 : vector<1x1x128xf32> to vector<1x128xf32>
    %956 = vector.broadcast %955 : vector<1x128xf32> to vector<16x128xf32>
    %957 = arith.addf %953, %956 : vector<16x128xf32>
    %958 = arith.addf %957, %748 : vector<16x128xf32>
    %c1_365 = arith.constant 1 : index
    %c0_366 = arith.constant 0 : index
    %c0_367 = arith.constant 0 : index
    %959 = vector.load %arg17[%c1_365, %c0_366, %c0_367] : memref<2x1x128xf32, #tpu.memory_space<vmem>>, vector<1x1x128xf32>
    %960 = vector.shape_cast %959 : vector<1x1x128xf32> to vector<1x128xf32>
    %c1_368 = arith.constant 1 : index
    %c0_369 = arith.constant 0 : index
    %c0_370 = arith.constant 0 : index
    %961 = vector.load %arg18[%c1_368, %c0_369, %c0_370] : memref<2x1x128xf32, #tpu.memory_space<vmem>>, vector<1x1x128xf32>
    %962 = vector.shape_cast %961 : vector<1x1x128xf32> to vector<1x128xf32>
    %cst_371 = arith.constant dense<0.000000e+00> : vector<16xf32>
    %963 = vector.multi_reduction <add>, %958, %cst_371 [1] : vector<16x128xf32> to vector<16xf32>
    %964 = vector.shape_cast %963 : vector<16xf32> to vector<16x1xf32>
    %cst_372 = arith.constant 1.280000e+02 : f32
    %965 = vector.broadcast %cst_372 : f32 to vector<16x1xf32>
    %966 = arith.divf %964, %965 : vector<16x1xf32>
    %967 = vector.broadcast %966 : vector<16x1xf32> to vector<16x128xf32>
    %968 = arith.subf %958, %967 : vector<16x128xf32>
    %969 = arith.mulf %968, %968 : vector<16x128xf32>
    %cst_373 = arith.constant dense<0.000000e+00> : vector<16xf32>
    %970 = vector.multi_reduction <add>, %969, %cst_373 [1] : vector<16x128xf32> to vector<16xf32>
    %971 = vector.shape_cast %970 : vector<16xf32> to vector<16x1xf32>
    %cst_374 = arith.constant 1.280000e+02 : f32
    %972 = vector.broadcast %cst_374 : f32 to vector<16x1xf32>
    %973 = arith.divf %971, %972 : vector<16x1xf32>
    %974 = vector.broadcast %966 : vector<16x1xf32> to vector<16x128xf32>
    %975 = arith.subf %958, %974 : vector<16x128xf32>
    %cst_375 = arith.constant 9.99999974E-6 : f32
    %976 = vector.broadcast %cst_375 : f32 to vector<16x1xf32>
    %977 = arith.addf %973, %976 : vector<16x1xf32>
    %978 = math.rsqrt %977 : vector<16x1xf32>
    %979 = vector.broadcast %978 : vector<16x1xf32> to vector<16x128xf32>
    %980 = arith.mulf %975, %979 : vector<16x128xf32>
    %981 = vector.broadcast %960 : vector<1x128xf32> to vector<16x128xf32>
    %982 = arith.mulf %980, %981 : vector<16x128xf32>
    %983 = vector.broadcast %962 : vector<1x128xf32> to vector<16x128xf32>
    %984 = arith.addf %982, %983 : vector<16x128xf32>
    %c1_376 = arith.constant 1 : index
    %c0_377 = arith.constant 0 : index
    %c0_378 = arith.constant 0 : index
    %985 = vector.load %arg19[%c1_376, %c0_377, %c0_378] : memref<2x128x256xbf16, #tpu.memory_space<vmem>>, vector<1x128x256xbf16>
    %986 = vector.shape_cast %985 : vector<1x128x256xbf16> to vector<128x256xbf16>
    %987 = arith.truncf %984 : vector<16x128xf32> to vector<16x128xbf16>
    %cst_379 = arith.constant dense<0.000000e+00> : vector<16x256xf32>
    %988 = tpu.matmul %987, %986, %cst_379 {dimension_numbers = #tpu.dot_dimension_numbers<[1], [0], [0], [1], [0, 0, 1, 1], [], []>} : vector<16x128xbf16>, vector<128x256xbf16>, vector<16x256xf32> -> vector<16x256xf32>
    %c1_380 = arith.constant 1 : index
    %c0_381 = arith.constant 0 : index
    %c0_382 = arith.constant 0 : index
    %989 = vector.load %arg20[%c1_380, %c0_381, %c0_382] : memref<2x1x256xf32, #tpu.memory_space<vmem>>, vector<1x1x256xf32>
    %990 = vector.shape_cast %989 : vector<1x1x256xf32> to vector<1x256xf32>
    %991 = vector.broadcast %990 : vector<1x256xf32> to vector<16x256xf32>
    %992 = arith.addf %988, %991 : vector<16x256xf32>
    %cst_383 = arith.constant 0.000000e+00 : f32
    %993 = vector.broadcast %cst_383 : f32 to vector<16x256xf32>
    %994 = arith.maximumf %992, %993 : vector<16x256xf32>
    %c1_384 = arith.constant 1 : index
    %c0_385 = arith.constant 0 : index
    %c0_386 = arith.constant 0 : index
    %995 = vector.load %arg21[%c1_384, %c0_385, %c0_386] : memref<2x256x128xbf16, #tpu.memory_space<vmem>>, vector<1x256x128xbf16>
    %996 = vector.shape_cast %995 : vector<1x256x128xbf16> to vector<256x128xbf16>
    %997 = arith.truncf %994 : vector<16x256xf32> to vector<16x256xbf16>
    %cst_387 = arith.constant dense<0.000000e+00> : vector<16x128xf32>
    %998 = tpu.matmul %997, %996, %cst_387 {dimension_numbers = #tpu.dot_dimension_numbers<[1], [0], [0], [1], [0, 0, 1, 1], [], []>} : vector<16x256xbf16>, vector<256x128xbf16>, vector<16x128xf32> -> vector<16x128xf32>
    %c1_388 = arith.constant 1 : index
    %c0_389 = arith.constant 0 : index
    %c0_390 = arith.constant 0 : index
    %999 = vector.load %arg22[%c1_388, %c0_389, %c0_390] : memref<2x1x128xf32, #tpu.memory_space<vmem>>, vector<1x1x128xf32>
    %1000 = vector.shape_cast %999 : vector<1x1x128xf32> to vector<1x128xf32>
    %1001 = vector.broadcast %1000 : vector<1x128xf32> to vector<16x128xf32>
    %1002 = arith.addf %998, %1001 : vector<16x128xf32>
    %1003 = arith.addf %1002, %984 : vector<16x128xf32>
    %c1_391 = arith.constant 1 : index
    %c0_392 = arith.constant 0 : index
    %c0_393 = arith.constant 0 : index
    %1004 = vector.load %arg23[%c1_391, %c0_392, %c0_393] : memref<2x1x128xf32, #tpu.memory_space<vmem>>, vector<1x1x128xf32>
    %1005 = vector.shape_cast %1004 : vector<1x1x128xf32> to vector<1x128xf32>
    %c1_394 = arith.constant 1 : index
    %c0_395 = arith.constant 0 : index
    %c0_396 = arith.constant 0 : index
    %1006 = vector.load %arg24[%c1_394, %c0_395, %c0_396] : memref<2x1x128xf32, #tpu.memory_space<vmem>>, vector<1x1x128xf32>
    %1007 = vector.shape_cast %1006 : vector<1x1x128xf32> to vector<1x128xf32>
    %cst_397 = arith.constant dense<0.000000e+00> : vector<16xf32>
    %1008 = vector.multi_reduction <add>, %1003, %cst_397 [1] : vector<16x128xf32> to vector<16xf32>
    %1009 = vector.shape_cast %1008 : vector<16xf32> to vector<16x1xf32>
    %cst_398 = arith.constant 1.280000e+02 : f32
    %1010 = vector.broadcast %cst_398 : f32 to vector<16x1xf32>
    %1011 = arith.divf %1009, %1010 : vector<16x1xf32>
    %1012 = vector.broadcast %1011 : vector<16x1xf32> to vector<16x128xf32>
    %1013 = arith.subf %1003, %1012 : vector<16x128xf32>
    %1014 = arith.mulf %1013, %1013 : vector<16x128xf32>
    %cst_399 = arith.constant dense<0.000000e+00> : vector<16xf32>
    %1015 = vector.multi_reduction <add>, %1014, %cst_399 [1] : vector<16x128xf32> to vector<16xf32>
    %1016 = vector.shape_cast %1015 : vector<16xf32> to vector<16x1xf32>
    %cst_400 = arith.constant 1.280000e+02 : f32
    %1017 = vector.broadcast %cst_400 : f32 to vector<16x1xf32>
    %1018 = arith.divf %1016, %1017 : vector<16x1xf32>
    %1019 = vector.broadcast %1011 : vector<16x1xf32> to vector<16x128xf32>
    %1020 = arith.subf %1003, %1019 : vector<16x128xf32>
    %cst_401 = arith.constant 9.99999974E-6 : f32
    %1021 = vector.broadcast %cst_401 : f32 to vector<16x1xf32>
    %1022 = arith.addf %1018, %1021 : vector<16x1xf32>
    %1023 = math.rsqrt %1022 : vector<16x1xf32>
    %1024 = vector.broadcast %1023 : vector<16x1xf32> to vector<16x128xf32>
    %1025 = arith.mulf %1020, %1024 : vector<16x128xf32>
    %1026 = vector.broadcast %1005 : vector<1x128xf32> to vector<16x128xf32>
    %1027 = arith.mulf %1025, %1026 : vector<16x128xf32>
    %1028 = vector.broadcast %1007 : vector<1x128xf32> to vector<16x128xf32>
    %1029 = arith.addf %1027, %1028 : vector<16x128xf32>
    %c0_402 = arith.constant 0 : index
    %c0_403 = arith.constant 0 : index
    %1030 = vector.load %arg25[%c0_402, %c0_403] : memref<128x32xbf16, #tpu.memory_space<vmem>>, vector<128x32xbf16>
    %1031 = arith.truncf %1029 : vector<16x128xf32> to vector<16x128xbf16>
    %cst_404 = arith.constant dense<0.000000e+00> : vector<16x32xf32>
    %1032 = tpu.matmul %1031, %1030, %cst_404 {dimension_numbers = #tpu.dot_dimension_numbers<[1], [0], [0], [1], [0, 0, 1, 1], [], []>} : vector<16x128xbf16>, vector<128x32xbf16>, vector<16x32xf32> -> vector<16x32xf32>
    %c0_405 = arith.constant 0 : index
    %c0_406 = arith.constant 0 : index
    %1033 = vector.load %arg26[%c0_405, %c0_406] : memref<1x32xf32, #tpu.memory_space<vmem>>, vector<1x32xf32>
    %1034 = vector.broadcast %1033 : vector<1x32xf32> to vector<16x32xf32>
    %1035 = arith.addf %1032, %1034 : vector<16x32xf32>
    %c0_407 = arith.constant 0 : index
    %c0_408 = arith.constant 0 : index
    %1036 = vector.load %arg27[%c0_407, %c0_408] : memref<16x32xf32, #tpu.memory_space<vmem>>, vector<16x32xf32>
    tpu.vector_store %arg27[%c0_407, %c0_408], %1035 {strides = array<i32>} : memref<16x32xf32, #tpu.memory_space<vmem>>, vector<16x32xf32>,
    return
  }
}

</mosaic_0001>

<bundles_post_ra>
// kernel: transformer_decoder_forward.1
= control target key start
LH: loop header
LB: loop body
LE: loop exit
PB: predicated region body
PF: predicated region fallthrough
CT: control target
= control target key end

     0   :  { %s7408_s0 = inlined_call_operand.vmem [shape: f32[16,32], index: 0, kind: input, shape index: {}]   ;;  %s7409_s1 = inlined_call_operand.vmem [shape: f32[32,128], index: 1, kind: input, shape index: {}]   ;;  %s7410_s2 = inlined_call_operand.vmem [shape: f32[16,128], index: 2, kind: input, shape index: {}]   ;;  %s7411_s3 = inlined_call_operand.vmem [shape: bf16[32,128], index: 3, kind: input, shape index: {}]   ;;  %s7412_s4 = inlined_call_operand.hbm [shape: f32[1,128], index: 4, kind: input, shape index: {}]   ;;  %s7413_s5 = inlined_call_operand.vmem [shape: bf16[2,128,384], index: 5, kind: input, shape index: {}]   ;;  %s7414_s6 = inlined_call_operand.vmem [shape: f32[2,1,384], index: 6, kind: input, shape index: {}]   ;;  %s7415_s7 = inlined_call_operand.vmem [shape: bf16[2,128,128], index: 7, kind: input, shape index: {}]   ;;  %s7416_s8 = inlined_call_operand.vmem [shape: f32[2,1,128], index: 8, kind: input, shape index: {}]   ;;  %s7417_s9 = inlined_call_operand.hbm [shape: f32[2,1,128], index: 9, kind: input, shape index: {}]   ;;  %s7418_s10 = inlined_call_operand.hbm [shape: f32[2,1,128], index: 10, kind: input, shape index: {}]   ;;  %s7419_s11 = inlined_call_operand.hbm [shape: bf16[2,128,128], index: 11, kind: input, shape index: {}]   ;;  %s7420_s12 = inlined_call_operand.vmem [shape: f32[2,1,128], index: 12, kind: input, shape index: {}]   ;;  %s7421_s13 = inlined_call_operand.hbm [shape: bf16[2,128,256], index: 13, kind: input, shape index: {}]   ;;  %s7422_s14 = inlined_call_operand.vmem [shape: f32[2,1,256], index: 14, kind: input, shape index: {}]   ;;  %s7423_s15 = inlined_call_operand.hbm [shape: bf16[2,128,128], index: 15, kind: input, shape index: {}]   ;;  %s7424_s16 = inlined_call_operand.vmem [shape: f32[2,1,128], index: 16, kind: input, shape index: {}]   ;;  %s7425_s17 = inlined_call_operand.hbm [shape: f32[2,1,128], index: 17, kind: input, shape index: {}]   ;;  %s7426_s18 = inlined_call_operand.hbm [shape: f32[2,1,128], index: 18, kind: input, shape index: {}]   ;;  %s7427_s19 = inlined_call_operand.hbm [shape: bf16[2,128,256], index: 19, kind: input, shape index: {}]   ;;  %s7428_s20 = inlined_call_operand.vmem [shape: f32[2,1,256], index: 20, kind: input, shape index: {}]   ;;  %s7429_s21 = inlined_call_operand.hbm [shape: bf16[2,256,128], index: 21, kind: input, shape index: {}]   ;;  %s7430_s22 = inlined_call_operand.hbm [shape: f32[2,1,128], index: 22, kind: input, shape index: {}]   ;;  %s7431_s23 = inlined_call_operand.hbm [shape: f32[2,1,128], index: 23, kind: input, shape index: {}]   ;;  %s7432_s24 = inlined_call_operand.hbm [shape: f32[2,1,128], index: 24, kind: input, shape index: {}]   ;;  %s7433_s25 = inlined_call_operand.vmem [shape: bf16[128,32], index: 25, kind: input, shape index: {}]   ;;  %s7434_s26 = inlined_call_operand.hbm [shape: f32[1,32], index: 26, kind: input, shape index: {}]   ;;  %s7435_s27 = inlined_call_operand.vmem [shape: f32[16,32], index: 27, kind: output, shape index: {}]  }
   0x1   :  { %7447 = sst [smem:[#allocation33_spill]] %s7408_s0 }
   0x2   :  { %7448 = sst [smem:[#allocation34_spill]] %s7409_s1 }
   0x3   :  { %7449 = sst [smem:[#allocation35_spill]] %s7410_s2 }
   0x4   :  { %7450 = sst [smem:[#allocation36_spill]] %s7411_s3 }
   0x5   :  { %7451 = sst [smem:[#allocation37_spill]] %s7412_s4 }
   0x6   :  { %7452 = sst [smem:[#allocation38_spill]] %s7413_s5 }
   0x7   :  { %7453 = sst [smem:[#allocation39_spill]] %s7414_s6 }
   0x8   :  { %7454 = sst [smem:[#allocation40_spill]] %s7415_s7 }
   0x9   :  { %7455 = sst [smem:[#allocation41_spill]] %s7416_s8 }
   0xa   :  { %7456 = sst [smem:[#allocation42_spill]] %s7417_s9 }
   0xb   :  { %7457 = sst [smem:[#allocation43_spill]] %s7418_s10 }
   0xc   :  { %7458 = sst [smem:[#allocation44_spill]] %s7419_s11 }
   0xd   :  { %7459 = sst [smem:[#allocation45_spill]] %s7435_s27 }
   0xe   :  { %32 = vsyncpa [#allocation4], 0 }
   0xf   :  { %33 = vsyncpa [#allocation6], 0 }
  0x10   :  { %34 = vsyncpa [#allocation9], 0 }
  0x11   :  { %35 = vsyncpa [#allocation12], 0 }
  0x12   :  { %36 = vsyncpa [#allocation15], 0 }
  0x13   :  { %37 = vsyncpa [#allocation18], 0 }
  0x14   :  { %38 = vsyncpa [#allocation21], 0  ;;  %s7460_s8 = sld [smem:[#allocation42_spill]] }
  0x1a   :  { %s71_s30 = sshll.u32 %s7460_s8, 4  ;;  %s72_s30 = int_to_ptr.hbm [resolvable:$true] %s71_s30 }
  0x1b   :  { %39 = vsyncpa [#allocation24], 0  ;;  %s6204_s9 = smov [#allocation5]   ;;  %s7461_s10 = sld [smem:[#allocation44_spill]] }
  0x1c   :  { %s73_s5 = sshll.u32 %s6204_s9, 4  ;;  %s7445_s1 = smov 16   ;;  %s74_s5 = int_to_ptr.vmem [resolvable:$true] %s73_s5 }
  0x1d   :  { %s6206_s6 = smov 1   ;;  %s6207_s11 = smov [#allocation8]  }
  0x1e   :  { %79 = dma.hbm_to_vmem [thread:$0]  %s72_s30, 32, %s74_s5, [#allocation6], %s7445_s1, %s7445_s1, %s6206_s6  }
  0x1f   :  { %s99_s2 = sshll.u32 %s6207_s11, 4  ;;  %s6208_s3 = smov 64   ;;  %s100_s2 = int_to_ptr.vmem [resolvable:$true] %s99_s2 }
  0x20   :  { %s6209_s7 = smov 4   ;;  %s127_s9 = sshll.u32 %s7423_s15, 4  ;;  %s128_s9 = int_to_ptr.hbm [resolvable:$true] %s127_s9 }
  0x21   :  { %s97_s29 = sshll.u32 %s7461_s10, 4  ;;  %s6210_s28 = smov [#allocation11]   ;;  %s98_s29 = int_to_ptr.hbm [resolvable:$true] %s97_s29 }
  0x22   :  { %105 = dma.hbm_to_vmem [thread:$0]  %s98_s29, 2048, %s100_s2, [#allocation9], %s6208_s3, %s6208_s3, %s6209_s7  }
  0x23   :  { %s129_s0 = sshll.u32 %s6210_s28, 4  ;;  %s155_s30 = sshll.u32 %s7426_s18, 4  ;;  %s130_s0 = int_to_ptr.vmem [resolvable:$true] %s129_s0  ;;  %s156_s30 = int_to_ptr.hbm [resolvable:$true] %s155_s30 }
  0x24   :  { %135 = dma.hbm_to_vmem [thread:$0]  %s128_s9, 2048, %s130_s0, [#allocation12], %s6208_s3, %s6208_s3, %s6209_s7  }
  0x25   :  { %s6211_s5 = smov [#allocation14]   ;;  %s183_s2 = sshll.u32 %s7429_s21, 4  ;;  %s184_s2 = int_to_ptr.hbm [resolvable:$true] %s183_s2 }
  0x26   :  { %s157_s11 = sshll.u32 %s6211_s5, 4  ;;  %s7462_s15 = smov 16   ;;  %s158_s11 = int_to_ptr.vmem [resolvable:$true] %s157_s11 }
  0x27   :  { %163 = dma.hbm_to_vmem [thread:$0]  %s156_s30, 32, %s158_s11, [#allocation15], %s7462_s15, %s7462_s15, %s6206_s6  }
  0x28   :  { %s209_s18 = sshll.u32 %s7431_s23, 4  ;;  %s6212_s27 = smov [#allocation17]   ;;  %s210_s18 = int_to_ptr.hbm [resolvable:$true] %s209_s18 }
  0x29   :  { %s185_s28 = sshll.u32 %s6212_s27, 4  ;;  %s6213_s9 = smov [#allocation20]   ;;  %s186_s28 = int_to_ptr.vmem [resolvable:$true] %s185_s28 }
  0x2a   :  { %191 = dma.hbm_to_vmem [thread:$0]  %s184_s2, 4096, %s186_s28, [#allocation18], %s6208_s3, %s6208_s3, %s6209_s7  }
  0x2b   :  { %s211_s1 = sshll.u32 %s6213_s9, 4  ;;  %s7463_s10 = sld [smem:[#allocation37_spill]]  ;;  %s212_s1 = int_to_ptr.vmem [resolvable:$true] %s211_s1 }
  0x2c   :  { %217 = dma.hbm_to_vmem [thread:$0]  %s210_s18, 32, %s212_s1, [#allocation21], %s7462_s15, %s7462_s15, %s6206_s6  }
  0x2d   :  { %s7464_s11 = sld [smem:[#allocation43_spill]]  ;;  %s6214_s4 = smov [#allocation3]  }
  0x2e   :  { %s55_s8 = sshll.u32 %s6214_s4, 4  ;;  %s6215_s7 = smov [#allocation7]   ;;  %s56_s8 = int_to_ptr.vmem [resolvable:$true] %s55_s8 }
  0x2f   :  { %s86_s2 = sshll.u32 %s6215_s7, 4  ;;  %s112_s9 = sshll.u32 %s7421_s13, 4  ;;  %s87_s2 = int_to_ptr.vmem [resolvable:$true] %s86_s2  ;;  %s113_s9 = int_to_ptr.hbm [resolvable:$true] %s112_s9 }
  0x30   :  { %s6216_s18 = smov [#allocation10]   ;;  %s6218_s23 = smov 8  }
  0x31   :  { %s53_s5 = sshll.u32 %s7463_s10, 4  ;;  %s114_s1 = sshll.u32 %s6216_s18, 4  ;;  %s54_s5 = int_to_ptr.hbm [resolvable:$true] %s53_s5  ;;  %s115_s1 = int_to_ptr.vmem [resolvable:$true] %s114_s1 }
  0x32   :  { %58 = dma.hbm_to_vmem [thread:$0]  %s54_s5, 16, %s56_s8, [#allocation4]  }
  0x33   :  { %s84_s29 = sshll.u32 %s7464_s11, 4  ;;  %s142_s10 = sshll.u32 %s7425_s17, 4  ;;  %s85_s29 = int_to_ptr.hbm [resolvable:$true] %s84_s29  ;;  %s143_s10 = int_to_ptr.hbm [resolvable:$true] %s142_s10 }
  0x34   :  { %92 = dma.hbm_to_vmem [thread:$0]  %s85_s29, 32, %s87_s2, [#allocation6], %s7462_s15, %s7462_s15, %s6206_s6  }
  0x35   :  { %s6217_s5 = smov 128   ;;  %s6219_s30 = smov [#allocation13]  }
  0x36   :  { %120 = dma.hbm_to_vmem [thread:$0]  %s113_s9, 4096, %s115_s1, [#allocation9], %s6217_s5, %s6217_s5, %s6218_s23  }
  0x37   :  { %s144_s11 = sshll.u32 %s6219_s30, 4  ;;  %s168_s8 = sshll.u32 %s7427_s19, 4  ;;  %s145_s11 = int_to_ptr.vmem [resolvable:$true] %s144_s11  ;;  %s169_s8 = int_to_ptr.hbm [resolvable:$true] %s168_s8 }
  0x38   :  { %150 = dma.hbm_to_vmem [thread:$0]  %s143_s10, 32, %s145_s11, [#allocation12], %s7462_s15, %s7462_s15, %s6206_s6  }
  0x39   :  { %s196_s17 = sshll.u32 %s7430_s22, 4  ;;  %s6220_s2 = smov [#allocation16]   ;;  %s197_s17 = int_to_ptr.hbm [resolvable:$true] %s196_s17 }
  0x3a   :  { %s170_s27 = sshll.u32 %s6220_s2, 4  ;;  %s6221_s28 = smov [#allocation19]   ;;  %s171_s27 = int_to_ptr.vmem [resolvable:$true] %s170_s27 }
  0x3b   :  { %176 = dma.hbm_to_vmem [thread:$0]  %s169_s8, 4096, %s171_s27, [#allocation15], %s6217_s5, %s6217_s5, %s6218_s23  }
  0x3c   :  { %s198_s9 = sshll.u32 %s6221_s28, 4  ;;  %s222_s19 = sshll.u32 %s7432_s24, 4  ;;  %s199_s9 = int_to_ptr.vmem [resolvable:$true] %s198_s9  ;;  %s223_s19 = int_to_ptr.hbm [resolvable:$true] %s222_s19 }
  0x3d   :  { %204 = dma.hbm_to_vmem [thread:$0]  %s197_s17, 32, %s199_s9, [#allocation18], %s7462_s15, %s7462_s15, %s6206_s6  }
  0x3e   :  { %s238_s22 = sshll.u32 %s7434_s26, 4  ;;  %s6222_s10 = smov [#allocation22]   ;;  %s239_s22 = int_to_ptr.hbm [resolvable:$true] %s238_s22 }
  0x3f   :  { %s224_s30 = sshll.u32 %s6222_s10, 4  ;;  %s6223_s5 = smov [#allocation23]   ;;  %s225_s30 = int_to_ptr.vmem [resolvable:$true] %s224_s30 }
  0x40   :  { %230 = dma.hbm_to_vmem [thread:$0]  %s223_s19, 32, %s225_s30, [#allocation21], %s7462_s15, %s7462_s15, %s6206_s6  }
  0x41   :  { %s240_s24 = sshll.u32 %s6223_s5, 4  ;;  %s241_s24 = int_to_ptr.vmem [resolvable:$true] %s240_s24 }
  0x42   :  { %243 = dma.hbm_to_vmem [thread:$0]  %s239_s22, 16, %s241_s24, [#allocation24]  }
  0x43   :  { %6188 = dma.done.wait [#allocation4], 16  }
  0x44   :  { %6189 = vsyncadd [#allocation4], 4294967280 }
  0x45   :  { %6190 = dma.done.wait [#allocation6], 64  }
  0x46   :  { %6191 = vsyncadd [#allocation6], 4294967232 }
  0x47   :  { %6192 = dma.done.wait [#allocation9], 6144  }
  0x48   :  { %6193 = vsyncadd [#allocation9], 4294961152 }
  0x49   :  { %6194 = dma.done.wait [#allocation12], 2080  }
  0x4a   :  { %6195 = vsyncadd [#allocation12], 4294965216 }
  0x4b   :  { %6196 = dma.done.wait [#allocation15], 4128  }
  0x4c   :  { %6197 = vsyncadd [#allocation15], 4294963168 }
  0x4d   :  { %6198 = dma.done.wait [#allocation18], 4128  }
  0x4e   :  { %6199 = vsyncadd [#allocation18], 4294963168 }
  0x4f   :  { %6200 = dma.done.wait [#allocation21], 64  }
  0x50   :  { %6201 = vsyncadd [#allocation21], 4294967232 }
  0x51   :  { %6202 = dma.done.wait [#allocation24], 16  }
  0x52   :  { %6203 = vsyncadd [#allocation24], 4294967280  ;;  %s7465_s15 = sld [smem:[#allocation36_spill]]  ;;  %vm324_vm0 = vcmask 261120   ;;  %vm600_vm1 = vcmask 1043456   ;;  %s6224_s0 = smov 96  }
  0x53   :  { %s7466_s8 = sld [smem:[#allocation33_spill]]  ;;  %s6225_s22 = smov 32   ;;  %vm583_vm2 = vcmask 64512   ;;  %vm682_vm3 = vcmask 523520   ;;  %vm745_vm4 = vcmask 785920   ;;  %vm808_vm5 = vcmask 1048320  }
  0x54   :  { %s7467_s27 = sld [smem:[#allocation38_spill]]  ;;  %vm1447_vm13 = vcmask 130048  }
  0x55   :  { %s7468_s28 = sld [smem:[#allocation35_spill]] }
  0x56   :  { %s7469_s21 = sld [smem:[#allocation39_spill]] }
  0x57   :  { %s7470_s5 = sld [smem:[#allocation40_spill]] }
  0x58   :  { %v5452_v0 = vld [vmem:[%s7465_s15 + $0x8] sm:$0xff]  ;;  %v5451_v1 = vld [vmem:[%s7465_s15] sm:$0xff]  ;;  %s7471_s1 = sld [smem:[#allocation41_spill]] }
  0x59   :  { %v301_v2 = vld [vmem:[%s7466_s8] sm:$0xff]  ;;  %v302_v3 = vld [vmem:[%s7466_s8 + $0x8] sm:$0xff]  ;;  %334 = vmatpush.bf16.msra.mxu1 %v5452_v0  ;;  %s7472_s30 = sld [smem:[#allocation34_spill]] }
  0x5a   :  { %v4619_v4 = vld [vmem:[%s7467_s27 + $0xa8] sm:$0xf]  ;;  %v5475_v5 = vld [vmem:[%s7467_s27 + $0xb0] sm:$0xf0]  ;;  %v5474_v6 = vld [vmem:[%s7467_s27 + $0xac] sm:$0xf]  ;;  %v307_v18 = vpack.c.bf16 %v302_v3, %v301_v2 }
  0x5b   :  { %v4621_v7 = vld [vmem:[%s7467_s27 + $0xb4] sm:$0xf0]  ;;  %v4627_v8 = vld [vmem:[%s7467_s27 + $0xb0] sm:$0xf]  ;;  %v4620_v9 = vor.u32 %v5475_v5, %v4619_v4  ;;  %v5476_v11 = vld [vmem:[%s7467_s27 + $0xb8] sm:$0xf0] }
  0x5c   :  { %v4624_v10 = vor.u32 %v5474_v6, %v4621_v7  ;;  %v4607_v12 = vld [vmem:[%s7467_s27 + $0x90] sm:$0xf]  ;;  %v5472_v13 = vld [vmem:[%s7467_s27 + $0x98] sm:$0xf0]  ;;  %v4628_v14 = vor.u32 %v5476_v11, %v4627_v8  ;;  %v5471_v15 = vld [vmem:[%s7467_s27 + $0x94] sm:$0xf] }
  0x5d   :  { %v4609_v16 = vld [vmem:[%s7467_s27 + $0x9c] sm:$0xf0]  ;;  %v4615_v17 = vld [vmem:[%s7467_s27 + $0x98] sm:$0xf]  ;;  %v5473_v20 = vld [vmem:[%s7467_s27 + $0xa0] sm:$0xf0]  ;;  %335 = vmatpush.bf16.msra.mxu1 %v5451_v1  ;;  %v4608_v24 = vor.u32 %v5472_v13, %v4607_v12 }
  0x5e   :  { %533 = vmatpush.bf16.msra.mxu2 %v4624_v10  ;;  %v4612_v19 = vor.u32 %v5471_v15, %v4609_v16  ;;  %547 = vmatpush.bf16.msra.mxu3 %v4628_v14  ;;  %v4616_v21 = vor.u32 %v5473_v20, %v4615_v17  ;;  %v5468_v22 = vld [vmem:[%s7467_s27 + $0x7c] sm:$0xf]  ;;  %v4597_v23 = vld [vmem:[%s7467_s27 + $0x84] sm:$0xf0]  ;;  %v4595_v25 = vld [vmem:[%s7467_s27 + $0x78] sm:$0xf] }
  0x5f   :  { %v4603_v26 = vld [vmem:[%s7467_s27 + $0x80] sm:$0xf]  ;;  %v5470_v27 = vld [vmem:[%s7467_s27 + $0x88] sm:$0xf0]  ;;  %v5469_v28 = vld [vmem:[%s7467_s27 + $0x80] sm:$0xf0]  ;;  %v4600_v31 = vor.u32 %v5468_v22, %v4597_v23 }
  0x60   :  { %v5465_v29 = vld [vmem:[%s7467_s27 + $0x64] sm:$0xf]  ;;  %v4585_v30 = vld [vmem:[%s7467_s27 + $0x6c] sm:$0xf0]  ;;  %4532 = vmatmul.msk.bf16.vlgmr.msra.gmra.mxu1 %vm324_vm0, %v307_v18  ;;  %v4591_v32 = vld [vmem:[%s7467_s27 + $0x68] sm:$0xf]  ;;  %v4604_v34 = vor.u32 %v5470_v27, %v4603_v26  ;;  %v4596_v37 = vor.u32 %v5469_v28, %v4595_v25 }
  0x61   :  { %519 = vmatpush.bf16.msrb.mxu1 %v4620_v9  ;;  %v5467_v33 = vld [vmem:[%s7467_s27 + $0x70] sm:$0xf0]  ;;  %v4583_v35 = vld [vmem:[%s7467_s27 + $0x60] sm:$0xf]  ;;  %v5466_v36 = vld [vmem:[%s7467_s27 + $0x68] sm:$0xf0]  ;;  %v4588_v38 = vor.u32 %v5465_v29, %v4585_v30 }
  0x62   :  { %534 = vmatpush.bf16.msra.mxu2 %v4612_v19  ;;  %548 = vmatpush.bf16.msra.mxu3 %v4616_v21  ;;  %v4592_v39 = vor.u32 %v5467_v33, %v4591_v32  ;;  %v4584_v40 = vor.u32 %v5466_v36, %v4583_v35  ;;  %v4571_v41 = vld [vmem:[%s7467_s27 + $0x48] sm:$0xf]  ;;  %v5463_v42 = vld [vmem:[%s7467_s27 + $0x50] sm:$0xf0]  ;;  %v5462_v43 = vld [vmem:[%s7467_s27 + $0x4c] sm:$0xf] }
  0x63   :  { %v4572_v44 = vor.u32 %v5463_v42, %v4571_v41  ;;  %v4573_v45 = vld [vmem:[%s7467_s27 + $0x54] sm:$0xf0]  ;;  %v4579_v46 = vld [vmem:[%s7467_s27 + $0x50] sm:$0xf]  ;;  %v5464_v47 = vld [vmem:[%s7467_s27 + $0x58] sm:$0xf0] }
  0x64   :  { %v4576_v48 = vor.u32 %v5462_v43, %v4573_v45  ;;  %v4580_v49 = vor.u32 %v5464_v47, %v4579_v46  ;;  %v4559_v50 = vld [vmem:[%s7467_s27 + $0x30] sm:$0xf]  ;;  %v5460_v51 = vld [vmem:[%s7467_s27 + $0x38] sm:$0xf0]  ;;  %v5459_v53 = vld [vmem:[%s7467_s27 + $0x34] sm:$0xf] }
  0x65   :  { %520 = vmatpush.bf16.msrb.mxu1 %v4608_v24  ;;  %v4560_v52 = vor.u32 %v5460_v51, %v4559_v50  ;;  %v4561_v54 = vld [vmem:[%s7467_s27 + $0x3c] sm:$0xf0]  ;;  %v4567_v55 = vld [vmem:[%s7467_s27 + $0x38] sm:$0xf]  ;;  %v5461_v57 = vld [vmem:[%s7467_s27 + $0x40] sm:$0xf0] }
  0x66   :  { %535 = vmatpush.bf16.msra.mxu2 %v4600_v31  ;;  %549 = vmatpush.bf16.msra.mxu3 %v4604_v34  ;;  %v4564_v56 = vor.u32 %v5459_v53, %v4561_v54  ;;  %v4568_v58 = vor.u32 %v5461_v57, %v4567_v55  ;;  %v4547_v59 = vld [vmem:[%s7467_s27 + $0x18] sm:$0xf]  ;;  %v5457_v60 = vld [vmem:[%s7467_s27 + $0x20] sm:$0xf0]  ;;  %v5456_v61 = vld [vmem:[%s7467_s27 + $0x1c] sm:$0xf] }
  0x67   :  { %v4548_v62 = vor.u32 %v5457_v60, %v4547_v59  ;;  %v4549_v63 = vld [vmem:[%s7467_s27 + $0x24] sm:$0xf0]  ;;  %v4555_v0 = vld [vmem:[%s7467_s27 + $0x20] sm:$0xf]  ;;  %v5458_v1 = vld [vmem:[%s7467_s27 + $0x28] sm:$0xf0] }
  0x68   :  { %v4552_v2 = vor.u32 %v5456_v61, %v4549_v63  ;;  %v4556_v3 = vor.u32 %v5458_v1, %v4555_v0  ;;  %v4535_v4 = vld [vmem:[%s7467_s27] sm:$0xf]  ;;  %v5454_v5 = vld [vmem:[%s7467_s27 + $0x8] sm:$0xf0]  ;;  %v5453_v7 = vld [vmem:[%s7467_s27 + $0x4] sm:$0xf] }
  0x69   :  { %521 = vmatpush.bf16.msrb.mxu1 %v4596_v37  ;;  %v4536_v6 = vor.u32 %v5454_v5, %v4535_v4  ;;  %v4537_v8 = vld [vmem:[%s7467_s27 + $0xc] sm:$0xf0]  ;;  %v4543_v9 = vld [vmem:[%s7467_s27 + $0x8] sm:$0xf]  ;;  %v5455_v11 = vld [vmem:[%s7467_s27 + $0x10] sm:$0xf0] }
  0x6a   :  { %536 = vmatpush.bf16.msra.mxu2 %v4588_v38  ;;  %550 = vmatpush.bf16.msra.mxu3 %v4592_v39  ;;  %v4540_v10 = vor.u32 %v5453_v7, %v4537_v8  ;;  %v4544_v12 = vor.u32 %v5455_v11, %v4543_v9  ;;  %v5676_v14 = vld [vmem:[#allocation3] ss:$0 sm:$0xff]  ;;  %v342_v16 = vld [vmem:[%s7468_s28] sm:$0xff]  ;;  %v343_v18 = vld [vmem:[%s7468_s28 + $0x8] sm:$0xff]  ;;  %s7473_s29 = sld [smem:[#allocation45_spill]] }
  0x6b   :  { %v6608_v23 = vld [vmem:[%s7469_s21] sm:$0x7] }
  0x6c   :  { %v385_v24 = vperm.slane %v6608_v23, 0  ;;  %v386_v28 = vperm.slane %v6608_v23, 1  ;;  %v387_v29 = vperm.slane %v6608_v23, 2 }
  0x6d   :  { %522 = vmatpush.bf16.msrb.mxu1 %v4584_v40 }
  0x6e   :  { %537 = vmatpush.bf16.msra.mxu2 %v4576_v48  ;;  %551 = vmatpush.bf16.msra.mxu3 %v4580_v49 }
  0x71   :  { %523 = vmatpush.bf16.msrb.mxu1 %v4572_v44 }
  0x72   :  { %538 = vmatpush.bf16.msra.mxu2 %v4564_v56  ;;  %552 = vmatpush.bf16.msra.mxu3 %v4568_v58 }
  0x75   :  { %524 = vmatpush.bf16.msrb.mxu1 %v4560_v52 }
  0x76   :  { %539 = vmatpush.bf16.msra.mxu2 %v4552_v2  ;;  %553 = vmatpush.bf16.msra.mxu3 %v4556_v3 }
  0x79   :  { %525 = vmatpush.bf16.msrb.mxu1 %v4548_v62 }
  0x7a   :  { %540 = vmatpush.bf16.msra.mxu2 %v4540_v10  ;;  %554 = vmatpush.bf16.msra.mxu3 %v4544_v12 }
  0x7d   :  { %526 = vmatpush.bf16.msrb.mxu1 %v4536_v6 }
  0xdd   :  { %v337_v13 = vpop.f32.mrf.mxu1 }
  0xde   :  { %v338_v15 = vadd.f32 %v5676_v14, %v337_v13 }
  0xe0   :  { %v6599_v20 = vadd.f32 %v342_v16, %v338_v15 }
  0xe5   :  { %v339_v17 = vpop.f32.mrf.mxu1 }
  0xe6   :  { %v340_v19 = vadd.f32 %v5676_v14, %v339_v17 }
  0xe8   :  { %v6601_v21 = vadd.f32 %v343_v18, %v340_v19 }
  0xea   :  { %v382_v22 = vpack.c.bf16 %v6601_v21, %v6599_v20 }
  0xec   :  { %527 = vmatmul.bf16.vlgmr.msrb.gmra.mxu1 %v382_v22  ;;  %541 = vmatmul.bf16.vlgmr.msra.gmra.mxu2 %v382_v22 }
  0xed   :  { %555 = vmatmul.bf16.vlgmr.msra.gmra.mxu3 %v382_v22 }
 0x169   :  { %v528_v25 = vpop.f32.mrf.mxu1 }
 0x16a   :  { %v529_v26 = vadd.f32 %v528_v25, %v385_v24 }
 0x16c   :  { %v561_v27 = vpack.c.bf16 %v529_v26, %v529_v26 }
 0x16e   :  { %684 = vrot.lane.b32.xlu2 %v561_v27, %s6208_s3 }
 0x16f   :  { %v542_v30 = vpop.f32.mrf.mxu2 }
 0x170   :  { %v543_v31 = vadd.f32 %v542_v30, %v386_v28  ;;  %v556_v32 = vpop.f32.mrf.mxu3 }
 0x171   :  { %v557_v33 = vadd.f32 %v556_v32, %v387_v29  ;;  %v530_v40 = vpop.f32.mrf.mxu1 }
 0x172   :  { %v562_v34 = vpack.c.bf16 %v543_v31, %v543_v31  ;;  %v531_v42 = vadd.f32 %v530_v40, %v385_v24 }
 0x173   :  { %v6616_v35 = vpack.c.bf16 %v557_v33, %v557_v33 }
 0x174   :  { %686 = vrot.lane.b32.xlu1 %v562_v34, %s6208_s3  ;;  %622 = vrot.lane.b32.xlu0 %v562_v34, %s6224_s0  ;;  %v567_v36 = vsel %vm324_vm0, %v562_v34, 0  ;;  %v810_v43 = vpack.c.bf16 %v531_v42, %v531_v42 }
 0x175   :  { %576 = vmatpush.bf16.xpose.msra.mxu0 %v567_v36  ;;  %v602_v37 = vsel %vm600_vm1, %v6616_v35, 0 }
 0x176   :  { %747 = vrot.lane.b32.xlu2 %v561_v27, %s6225_s22 }
 0x177   :  { %v544_v38 = vpop.f32.mrf.mxu2 }
 0x178   :  { %v545_v39 = vadd.f32 %v544_v38, %v386_v28  ;;  %v6648_v3 = vpop.f32.mrf.mxu3 }
 0x17a   :  { %v811_v41 = vpack.c.bf16 %v545_v39, %v545_v39 }
 0x17c   :  { %749 = vrot.lane.b32.xlu1 %v562_v34, %s6225_s22  ;;  %619 = vrot.lane.b32.xlu0 %v561_v27, %s6224_s0  ;;  %v816_v50 = vsel %vm324_vm0, %v811_v41, 0 }
 0x17d   :  { %611 = vmatpush.bf16.msrb.mxu0 %v602_v37 }
 0x17e   :  { %4629 = vmatmul.msk.bf16.vlgmr.msra.gmra.mxu0 %vm324_vm0, %v561_v27  ;;  %932 = vrot.lane.b32.xlu2 %v811_v41, %s6208_s3 }
 0x184   :  { %866 = vrot.lane.b32.xlu1 %v810_v43, %s6224_s0  ;;  %869 = vrot.lane.b32.xlu0 %v811_v41, %s6224_s0 }
 0x186   :  { %992 = vrot.lane.b32.xlu2 %v810_v43, %s6225_s22 }
 0x18c   :  { %930 = vrot.lane.b32.xlu1 %v810_v43, %s6208_s3  ;;  %994 = vrot.lane.b32.xlu0 %v811_v41, %s6225_s22 }
 0x1c8   :  { %v685_v44 = vpop.permute.xlu2 %684 }
 0x1d0   :  { %v748_v45 = vpop.permute.xlu2 %747 }
 0x1d8   :  { %v933_v51 = vpop.permute.xlu2 %932 }
 0x1d9   :  { %v938_v54 = vsel %vm324_vm0, %v933_v51, 0 }
 0x1e0   :  { %v993_v2 = vpop.permute.xlu2 %992 }
 0x1e6   :  { %v687_v46 = vpop.permute.xlu1 %686  ;;  %v623_v47 = vpop.permute.xlu0 %622 }
 0x1e7   :  { %v628_v48 = vsel %vm324_vm0, %v623_v47, 0  ;;  %v692_v49 = vsel %vm324_vm0, %v687_v46, 0 }
 0x1e8   :  { %637 = vmatpush.bf16.xpose.msra.mxu1 %v628_v48  ;;  %701 = vmatpush.bf16.xpose.msrb.mxu3 %v692_v49 }
 0x1ee   :  { %v750_v52 = vpop.permute.xlu1 %749  ;;  %v620_v53 = vpop.permute.xlu0 %619 }
 0x1ef   :  { %v755_v55 = vsel %vm324_vm0, %v750_v52, 0  ;;  %4631 = vmatmul.msk.bf16.vlgmr.msra.gmra.mxu1 %vm324_vm0, %v620_v53  ;;  %4633 = vmatmul.msk.bf16.vlgmr.msrb.gmra.mxu3 %vm324_vm0, %v685_v44 }
 0x1f0   :  { %825 = vmatpush.bf16.xpose.msra.mxu3 %v816_v50  ;;  %764 = vmatpush.bf16.xpose.msrb.mxu1 %v755_v55 }
 0x1f6   :  { %v870_v56 = vpop.permute.xlu0 %869  ;;  %v867_v0 = vpop.permute.xlu1 %866 }
 0x1f7   :  { %v875_v57 = vsel %vm324_vm0, %v870_v56, 0 }
 0x1f8   :  { %947 = vmatpush.bf16.xpose.msrb.mxu3 %v938_v54  ;;  %884 = vmatpush.bf16.xpose.msra.mxu1 %v875_v57  ;;  %v559_v57 = vadd.f32 %v6648_v3, %v387_v29 }
 0x1fb   :  { %v578_v58 = vpop.f32.mrf.mxu0 }
 0x1fc   :  { %v582_v59 = vmul.f32 0.17677669, %v578_v58 }
 0x1fe   :  { %v584_v60 = vsel %vm583_vm2, %v582_v59, -inf  ;;  %v995_v61 = vpop.permute.xlu0 %994  ;;  %v931_v1 = vpop.permute.xlu1 %930 }
 0x1ff   :  { %585 = vmax.xlane.f32.xlu1 %v584_v60  ;;  %v1000_v62 = vsel %vm324_vm0, %v995_v61, 0  ;;  %4635 = vmatmul.msk.bf16.vlgmr.msrb.gmra.mxu1 %vm324_vm0, %v748_v45  ;;  %v844_v61 = vpack.c.bf16 %v559_v57, %v559_v57 }
 0x200   :  { %4637 = vmatmul.msk.bf16.vlgmr.msra.gmra.mxu3 %vm324_vm0, %v810_v43  ;;  %1009 = vmatpush.bf16.xpose.msrb.mxu1 %v1000_v62 }
 0x203   :  { %v580_v63 = vpop.f32.mrf.mxu0 }
 0x20f   :  { %4639 = vmatmul.msk.bf16.vlgmr.msra.gmra.mxu1 %vm324_vm0, %v867_v0 }
 0x210   :  { %4641 = vmatmul.msk.bf16.vlgmr.msrb.gmra.mxu3 %vm324_vm0, %v931_v1 }
 0x21f   :  { %4643 = vmatmul.msk.bf16.vlgmr.msrb.gmra.mxu1 %vm324_vm0, %v993_v2  ;;  %v849_v2 = vsel %vm600_vm1, %v844_v61, 0 }
 0x26c   :  { %v639_v4 = vpop.f32.mrf.mxu1 }
 0x26d   :  { %v643_v5 = vmul.f32 0.17677669, %v639_v4 }
 0x26f   :  { %v644_v6 = vsel %vm583_vm2, %v643_v5, -inf }
 0x270   :  { %645 = vmax.xlane.f32.xlu0 %v644_v6 }
 0x272   :  { %v586_v7 = vpop.xlane.xlu1 %585  ;;  %v703_v9 = vpop.f32.mrf.mxu3 }
 0x273   :  { %v587_v8 = vsub.f32 %v582_v59, %v586_v7  ;;  %v707_v10 = vmul.f32 0.17677669, %v703_v9 }
 0x274   :  { %v641_v12 = vpop.f32.mrf.mxu1 }
 0x275   :  { %v588_v11 = vmul.f32 1.442695, %v587_v8  ;;  %v708_v13 = vsel %vm583_vm2, %v707_v10, -inf }
 0x276   :  { %709 = vmax.xlane.f32.xlu2 %v708_v13 }
 0x277   :  { %5698 = vpow2.f32 %v588_v11 }
 0x27a   :  { %v705_v14 = vpop.f32.mrf.mxu3 }
 0x27c   :  { %v766_v16 = vpop.f32.mrf.mxu1 }
 0x27d   :  { %v5699_v15 = vpop.eup %5698  ;;  %v770_v18 = vmul.f32 0.17677669, %v766_v16 }
 0x27e   :  { %v590_v17 = vsel %vm583_vm2, %v5699_v15, 0.0 }
 0x27f   :  { %591 = vadd.xlane.f32.xlu2 %v590_v17  ;;  %v771_v26 = vsel %vm583_vm2, %v770_v18, -inf }
 0x283   :  { %v827_v19 = vpop.f32.mrf.mxu3 }
 0x284   :  { %v831_v22 = vmul.f32 0.17677669, %v827_v19  ;;  %v768_v24 = vpop.f32.mrf.mxu1 }
 0x286   :  { %v832_v25 = vsel %vm583_vm2, %v831_v22, -inf }
 0x287   :  { %833 = vmax.xlane.f32.xlu1 %v832_v25  ;;  %772 = vmax.xlane.f32.xlu2 %v771_v26 }
 0x28b   :  { %v829_v27 = vpop.f32.mrf.mxu3 }
 0x28c   :  { %v886_v28 = vpop.f32.mrf.mxu1 }
 0x28d   :  { %v890_v30 = vmul.f32 0.17677669, %v886_v28 }
 0x28f   :  { %v891_v31 = vsel %vm583_vm2, %v890_v30, -inf }
 0x290   :  { %892 = vmax.xlane.f32.xlu0 %v891_v31 }
 0x293   :  { %v949_v32 = vpop.f32.mrf.mxu3 }
 0x294   :  { %v953_v33 = vmul.f32 0.17677669, %v949_v32  ;;  %v888_v34 = vpop.f32.mrf.mxu1 }
 0x296   :  { %v954_v36 = vsel %vm583_vm2, %v953_v33, -inf }
 0x297   :  { %955 = vmax.xlane.f32.xlu1 %v954_v36 }
 0x29b   :  { %v951_v37 = vpop.f32.mrf.mxu3 }
 0x29c   :  { %v1011_v38 = vpop.f32.mrf.mxu1 }
 0x29d   :  { %v6663_v40 = vmul.f32 0.17677669, %v1011_v38 }
 0x29f   :  { %720 = vrot.lane.b32.xlu2 %v6616_v35, %s6208_s3  ;;  %v1016_v41 = vsel %vm583_vm2, %v6663_v40, -inf }
 0x2a4   :  { %657 = vrot.lane.b32.xlu0 %v6616_v35, %s6224_s0  ;;  %v1013_v39 = vpop.f32.mrf.mxu1 }
 0x2b0   :  { %783 = vrot.lane.b32.xlu1 %v6616_v35, %s6225_s22 }
 0x2c8   :  { %1017 = vmax.xlane.f32.xlu2 %v1016_v41 }
 0x2e3   :  { %v646_v42 = vpop.xlane.xlu0 %645 }
 0x2e4   :  { %v647_v43 = vsub.f32 %v643_v5, %v646_v42 }
 0x2e6   :  { %v648_v44 = vmul.f32 1.442695, %v647_v43 }
 0x2e8   :  { %5700 = vpow2.f32 %v648_v44 }
 0x2e9   :  { %v710_v45 = vpop.xlane.xlu2 %709 }
 0x2ea   :  { %v711_v46 = vsub.f32 %v707_v10, %v710_v45 }
 0x2ec   :  { %v712_v47 = vmul.f32 1.442695, %v711_v46 }
 0x2ee   :  { %v6667_v48 = vpop.eup %5700  ;;  %5702 = vpow2.f32 %v712_v47 }
 0x2ef   :  { %v650_v49 = vsel %vm583_vm2, %v6667_v48, 0.0 }
 0x2f0   :  { %651 = vadd.xlane.f32.xlu0 %v650_v49 }
 0x2f2   :  { %v592_v35 = vpop.xlane.xlu2 %591 }
 0x2f3   :  { %5704 = vrcp.f32 %v592_v35 }
 0x2f4   :  { %v6671_v50 = vpop.eup %5702 }
 0x2f5   :  { %v714_v51 = vsel %vm583_vm2, %v6671_v50, 0.0 }
 0x2f6   :  { %715 = vadd.xlane.f32.xlu2 %v714_v51 }
 0x2f9   :  { %v5705_v52 = vpop.eup %5704 }
 0x2fa   :  { %v773_v53 = vpop.xlane.xlu2 %772  ;;  %v834_v54 = vpop.xlane.xlu1 %833  ;;  %v594_v55 = vmul.f32 %v5705_v52, %v5699_v15 }
 0x2fb   :  { %v774_v56 = vsub.f32 %v770_v18, %v773_v53  ;;  %v835_v60 = vsub.f32 %v831_v22, %v834_v54 }
 0x2fc   :  { %v595_v58 = vpack.c.bf16 %v594_v55, %v594_v55 }
 0x2fd   :  { %v775_v59 = vmul.f32 1.442695, %v774_v56  ;;  %v836_v62 = vmul.f32 1.442695, %v835_v60 }
 0x2fe   :  { %4630 = vmatmul.msk.bf16.vlgmr.msrb.gmra.mxu0 %vm583_vm2, %v595_v58 }
 0x2ff   :  { %5706 = vpow2.f32 %v775_v59 }
 0x300   :  { %5708 = vpow2.f32 %v836_v62 }
 0x302   :  { %v721_v63 = vpop.permute.xlu2 %720 }
 0x303   :  { %v726_v0 = vsel %vm600_vm1, %v721_v63, 0  ;;  %v893_v1 = vpop.xlane.xlu0 %892 }
 0x304   :  { %735 = vmatpush.bf16.msra.mxu0 %v726_v0  ;;  %v894_v23 = vsub.f32 %v890_v30, %v893_v1 }
 0x305   :  { %v5707_v4 = vpop.eup %5706 }
 0x306   :  { %v777_v29 = vsel %vm583_vm2, %v5707_v4, 0.0  ;;  %v895_v3 = vmul.f32 1.442695, %v894_v23  ;;  %v5709_v6 = vpop.eup %5708 }
 0x307   :  { %778 = vadd.xlane.f32.xlu1 %v777_v29  ;;  %v838_v9 = vsel %vm583_vm2, %v5709_v6, 0.0 }
 0x308   :  { %858 = vmatpush.bf16.msrb.mxu0 %v849_v2  ;;  %5710 = vpow2.f32 %v895_v3 }
 0x30a   :  { %v956_v5 = vpop.xlane.xlu1 %955 }
 0x30b   :  { %v957_v7 = vsub.f32 %v953_v33, %v956_v5 }
 0x30d   :  { %v958_v8 = vmul.f32 1.442695, %v957_v7 }
 0x30e   :  { %v5711_v10 = vpop.eup %5710  ;;  %904 = vrot.lane.b32.xlu2 %v844_v61, %s6224_s0 }
 0x30f   :  { %5712 = vpow2.f32 %v958_v8  ;;  %839 = vadd.xlane.f32.xlu1 %v838_v9  ;;  %v897_v11 = vsel %vm583_vm2, %v5711_v10, 0.0 }
 0x310   :  { %898 = vadd.xlane.f32.xlu0 %v897_v11 }
 0x315   :  { %v5713_v12 = vpop.eup %5712 }
 0x316   :  { %v658_v13 = vpop.permute.xlu0 %657  ;;  %v960_v15 = vsel %vm583_vm2, %v5713_v12, 0.0 }
 0x317   :  { %v663_v14 = vsel %vm600_vm1, %v658_v13, 0  ;;  %v5484_v13 = vld [vmem:[%s7470_s5 + $0x38] sm:$0xff] }
 0x318   :  { %672 = vmatpush.bf16.msrb.mxu2 %v663_v14  ;;  %961 = vadd.xlane.f32.xlu0 %v960_v15  ;;  %v5483_v14 = vld [vmem:[%s7470_s5 + $0x30] sm:$0xff]  ;;  %v5482_v15 = vld [vmem:[%s7470_s5 + $0x28] sm:$0xff] }
 0x319   :  { %1125 = vmatpush.bf16.msra.mxu3 %v5484_v13  ;;  %v5492_v13 = vld [vmem:[#allocation8 + $0x38] sm:$0xff] }
 0x31d   :  { %1126 = vmatpush.bf16.msra.mxu3 %v5483_v14  ;;  %v5491_v14 = vld [vmem:[#allocation8 + $0x30] sm:$0xff] }
 0x321   :  { %1127 = vmatpush.bf16.msra.mxu3 %v5482_v15  ;;  %v5490_v15 = vld [vmem:[#allocation8 + $0x28] sm:$0xff] }
 0x322   :  { %v784_v16 = vpop.permute.xlu1 %783 }
 0x323   :  { %v789_v17 = vsel %vm600_vm1, %v784_v16, 0  ;;  %v5481_v16 = vld [vmem:[%s7470_s5 + $0x20] sm:$0xff] }
 0x324   :  { %798 = vmatpush.bf16.msra.mxu2 %v789_v17  ;;  %v5480_v17 = vld [vmem:[%s7470_s5 + $0x18] sm:$0xff] }
 0x325   :  { %1128 = vmatpush.bf16.msra.mxu3 %v5481_v16  ;;  %v5489_v16 = vld [vmem:[#allocation8 + $0x20] sm:$0xff] }
 0x328   :  { %966 = vrot.lane.b32.xlu1 %v844_v61, %s6208_s3 }
 0x329   :  { %1129 = vmatpush.bf16.msra.mxu3 %v5480_v17  ;;  %v5488_v17 = vld [vmem:[#allocation8 + $0x18] sm:$0xff] }
 0x32c   :  { %1028 = vrot.lane.b32.xlu0 %v844_v61, %s6225_s22 }
 0x33b   :  { %v1018_v18 = vpop.xlane.xlu2 %1017 }
 0x33c   :  { %v1019_v19 = vsub.f32 %v6663_v40, %v1018_v18  ;;  %v5479_v18 = vld [vmem:[%s7470_s5 + $0x10] sm:$0xff] }
 0x33d   :  { %1130 = vmatpush.bf16.msra.mxu3 %v5479_v18  ;;  %v5487_v18 = vld [vmem:[#allocation8 + $0x10] sm:$0xff] }
 0x33e   :  { %v1020_v22 = vmul.f32 1.442695, %v1019_v19 }
 0x340   :  { %5714 = vpow2.f32 %v1020_v22 }
 0x346   :  { %v5715_v24 = vpop.eup %5714 }
 0x347   :  { %v1022_v25 = vsel %vm583_vm2, %v5715_v24, 0.0 }
 0x348   :  { %1023 = vadd.xlane.f32.xlu2 %v1022_v25  ;;  %v5478_v25 = vld [vmem:[%s7470_s5 + $0x8] sm:$0xff] }
 0x349   :  { %1131 = vmatpush.bf16.msra.mxu3 %v5478_v25  ;;  %v5485_v25 = vld [vmem:[#allocation8] sm:$0xff] }
 0x363   :  { %v652_v26 = vpop.xlane.xlu0 %651 }
 0x364   :  { %5716 = vrcp.f32 %v652_v26  ;;  %v5477_v26 = vld [vmem:[%s7470_s5] sm:$0xff] }
 0x365   :  { %1132 = vmatpush.bf16.msra.mxu3 %v5477_v26 }
 0x369   :  { %v716_v27 = vpop.xlane.xlu2 %715 }
 0x36a   :  { %v5717_v28 = vpop.eup %5716  ;;  %5718 = vrcp.f32 %v716_v27 }
 0x36b   :  { %v654_v30 = vmul.f32 %v5717_v28, %v6667_v48 }
 0x36d   :  { %v655_v31 = vpack.c.bf16 %v654_v30, %v654_v30 }
 0x36f   :  { %4632 = vmatmul.msk.bf16.vlgmr.msrb.gmra.mxu2 %vm583_vm2, %v655_v31 }
 0x370   :  { %v5719_v32 = vpop.eup %5718 }
 0x371   :  { %v718_v33 = vmul.f32 %v5719_v32, %v6671_v50  ;;  %v905_v34 = vpop.permute.xlu2 %904  ;;  %v5677_v32 = vld [vmem:[%s7471_s1] ss:$0 sm:$0xff] }
 0x372   :  { %v910_v36 = vsel %vm600_vm1, %v905_v34, 0 }
 0x373   :  { %v719_v37 = vpack.c.bf16 %v718_v33, %v718_v33  ;;  %919 = vmatpush.bf16.msrb.mxu2 %v910_v36 }
 0x375   :  { %4634 = vmatmul.msk.bf16.vlgmr.msra.gmra.mxu0 %vm583_vm2, %v719_v37 }
 0x37a   :  { %v779_v38 = vpop.xlane.xlu1 %778 }
 0x37b   :  { %5720 = vrcp.f32 %v779_v38  ;;  %v613_v39 = vpop.f32.mrf.mxu0 }
 0x37c   :  { %617 = vst.msk [vmem:[#allocation2] sm:$0xff] %vm324_vm0, %v613_v39 }
 0x381   :  { %v5721_v40 = vpop.eup %5720 }
 0x382   :  { %v781_v41 = vmul.f32 %v5721_v40, %v5707_v4  ;;  %v840_v42 = vpop.xlane.xlu1 %839  ;;  %v6226_v40 = vmov 128.0  }
 0x383   :  { %5722 = vrcp.f32 %v840_v42  ;;  %v615_v43 = vpop.f32.mrf.mxu0  ;;  %v899_v45 = vpop.xlane.xlu0 %898 }
 0x384   :  { %v782_v44 = vpack.c.bf16 %v781_v41, %v781_v41  ;;  %5724 = vrcp.f32 %v899_v45  ;;  %v4767_v43 = vld [vmem:[#allocation10 + $0x70] sm:$0xf]  ;;  %v4759_v45 = vld [vmem:[#allocation10 + $0x60] sm:$0xf] }
 0x386   :  { %4636 = vmatmul.msk.bf16.vlgmr.msra.gmra.mxu2 %vm583_vm2, %v782_v44  ;;  %v5508_v44 = vld [vmem:[#allocation10 + $0x74] sm:$0xf0] }
 0x389   :  { %v5723_v46 = vpop.eup %5722 }
 0x38a   :  { %v842_v47 = vmul.f32 %v5723_v46, %v5709_v6  ;;  %v5725_v49 = vpop.eup %5724  ;;  %v4768_v46 = vor.u32 %v5508_v44, %v4767_v43  ;;  %v6782_v43 = vld [vmem:[%s7422_s14] sm:$0x3] }
 0x38b   :  { %v962_v35 = vpop.xlane.xlu0 %961  ;;  %v901_v50 = vmul.f32 %v5725_v49, %v5711_v10 }
 0x38c   :  { %v843_v48 = vpack.c.bf16 %v842_v47, %v842_v47  ;;  %5726 = vrcp.f32 %v962_v35  ;;  %v5506_v47 = vld [vmem:[#allocation10 + $0x64] sm:$0xf0]  ;;  %1387 = vmatpush.bf16.msra.mxu1 %v4768_v46  ;;  %v4751_v35 = vld [vmem:[#allocation10 + $0x50] sm:$0xf]  ;;  %v1303_v46 = vperm.slane %v6782_v43, 0 }
 0x38d   :  { %v902_v51 = vpack.c.bf16 %v901_v50, %v901_v50  ;;  %v4760_v49 = vor.u32 %v5506_v47, %v4759_v45 }
 0x38e   :  { %4638 = vmatmul.msk.bf16.vlgmr.msrb.gmra.mxu0 %vm583_vm2, %v843_v48 }
 0x390   :  { %1388 = vmatpush.bf16.msra.mxu1 %v4760_v49 }
 0x392   :  { %v5727_v52 = vpop.eup %5726 }
 0x393   :  { %v964_v53 = vmul.f32 %v5727_v52, %v5713_v12  ;;  %v4743_v52 = vld [vmem:[#allocation10 + $0x40] sm:$0xf] }
 0x395   :  { %v965_v56 = vpack.c.bf16 %v964_v53, %v964_v53 }
 0x396   :  { %4640 = vmatmul.msk.bf16.vlgmr.msrb.gmra.mxu2 %vm583_vm2, %v902_v51 }
 0x39a   :  { %v967_v54 = vpop.permute.xlu1 %966 }
 0x39b   :  { %v972_v55 = vsel %vm600_vm1, %v967_v54, 0 }
 0x39c   :  { %981 = vmatpush.bf16.msra.mxu0 %v972_v55  ;;  %v4735_v55 = vld [vmem:[#allocation10 + $0x30] sm:$0xf] }
 0x39e   :  { %v1029_v57 = vpop.permute.xlu0 %1028 }
 0x39f   :  { %4642 = vmatmul.msk.bf16.vlgmr.msra.gmra.mxu0 %vm583_vm2, %v965_v56  ;;  %v1034_v58 = vsel %vm600_vm1, %v1029_v57, 0  ;;  %v5500_v56 = vld [vmem:[#allocation10 + $0x34] sm:$0xf0] }
 0x3a0   :  { %1043 = vmatpush.bf16.msra.mxu2 %v1034_v58  ;;  %v4736_v58 = vor.u32 %v5500_v56, %v4735_v55  ;;  %1269 = vmatpush.bf16.msrb.mxu0 %v5492_v13  ;;  %v5679_v56 = vld [vmem:[#allocation7] ss:$0 sm:$0xff] }
 0x3a4   :  { %1270 = vmatpush.bf16.msrb.mxu0 %v5491_v14 }
 0x3a8   :  { %1271 = vmatpush.bf16.msrb.mxu0 %v5490_v15 }
 0x3ac   :  { %1272 = vmatpush.bf16.msrb.mxu0 %v5489_v16 }
 0x3b0   :  { %1273 = vmatpush.bf16.msrb.mxu0 %v5488_v17 }
 0x3b4   :  { %1274 = vmatpush.bf16.msrb.mxu0 %v5487_v18  ;;  %v5507_v18 = vld [vmem:[#allocation10 + $0x74] sm:$0xf] }
 0x3bb   :  { %v1024_v59 = vpop.xlane.xlu2 %1023 }
 0x3bc   :  { %5728 = vrcp.f32 %v1024_v59  ;;  %v4727_v59 = vld [vmem:[#allocation10 + $0x20] sm:$0xf] }
 0x3bd   :  { %5730 = vrcp.f32 %v6226_v40 }
 0x3c2   :  { %v5729_v60 = vpop.eup %5728 }
 0x3c3   :  { %v1026_v61 = vmul.f32 %v5729_v60, %v5715_v24  ;;  %v5731_v41 = vpop.eup %5730  ;;  %v5498_v60 = vld [vmem:[#allocation10 + $0x24] sm:$0xf0] }
 0x3c4   :  { %v1148_v42 = vmul.f32 128.0, %v5731_v41  ;;  %vm1152_vm6 = vweird.f32 %v5731_v41 }
 0x3c5   :  { %v1027_v62 = vpack.c.bf16 %v1026_v61, %v1026_v61 }
 0x3c6   :  { %v1149_v48 = vsub.f32 1.0, %v1148_v42 }
 0x3c7   :  { %4644 = vmatmul.msk.bf16.vlgmr.msra.gmra.mxu2 %vm583_vm2, %v1027_v62 }
 0x3c8   :  { %v1150_v50 = vmul.f32 %v5731_v41, %v1149_v48 }
 0x3ca   :  { %v1151_v53 = vadd.f32 %v5731_v41, %v1150_v50 }
 0x3cc   :  { %v6747_v57 = vsel %vm1152_vm6, %v5731_v41, %v1151_v53 }
 0x3f2   :  { %v674_v63 = vpop.f32.mrf.mxu2  ;;  %v737_v0 = vpop.f32.mrf.mxu0 }
 0x3f3   :  { %679 = vrot.lane.b32.xlu2 %v674_v63, %s6225_s22  ;;  %742 = vrot.lane.b32.xlu0 %v737_v0, %s6208_s3  ;;  %v4728_v63 = vor.u32 %v5498_v60, %v4727_v59 }
 0x3fa   :  { %v676_v1 = vpop.f32.mrf.mxu2  ;;  %v739_v2 = vpop.f32.mrf.mxu0 }
 0x3fb   :  { %v4719_v1 = vld [vmem:[#allocation10 + $0x10] sm:$0xf]  ;;  %v5496_v2 = vld [vmem:[#allocation10 + $0x14] sm:$0xf0] }
 0x409   :  { %v800_v4 = vpop.f32.mrf.mxu2 }
 0x40b   :  { %v860_v23 = vpop.f32.mrf.mxu0 }
 0x40c   :  { %864 = vst.msk [vmem:[#allocation2 + $0x8] sm:$0xff] %vm324_vm0, %v860_v23  ;;  %v4720_v23 = vor.u32 %v5496_v2, %v4719_v1 }
 0x411   :  { %v802_v29 = vpop.f32.mrf.mxu2 }
 0x412   :  { %v4711_v29 = vld [vmem:[#allocation10] sm:$0xf] }
 0x413   :  { %v862_v3 = vpop.f32.mrf.mxu0 }
 0x414   :  { %v5494_v3 = vld [vmem:[#allocation10 + $0x4] sm:$0xf0] }
 0x419   :  { %v921_v5 = vpop.f32.mrf.mxu2 }
 0x41a   :  { %926 = vrot.lane.b32.xlu0 %v921_v5, %s6225_s22 }
 0x41c   :  { %v983_v6 = vpop.f32.mrf.mxu0 }
 0x41d   :  { %988 = vrot.lane.b32.xlu1 %v983_v6, %s6208_s3 }
 0x421   :  { %v923_v7 = vpop.f32.mrf.mxu2 }
 0x422   :  { %805 = vrot.lane.b32.xlu0 %v800_v4, %s6224_s0  ;;  %v4712_v7 = vor.u32 %v5494_v3, %v4711_v29  ;;  %v5680_v29 = vld [vmem:[%s7420_s12] ss:$0 sm:$0xff] }
 0x424   :  { %v985_v8 = vpop.f32.mrf.mxu0 }
 0x425   :  { %v346_v8 = vld [vmem:[%s7472_s30] sm:$0xff] }
 0x44a   :  { %v1045_v9 = vpop.f32.mrf.mxu2 }
 0x44b   :  { %1050 = vrot.lane.b32.xlu1 %v1045_v9, %s6224_s0  ;;  %v347_v9 = vld [vmem:[%s7472_s30 + $0x8] sm:$0xff] }
 0x44d   :  { %v680_v10 = vpop.permute.xlu2 %679 }
 0x44e   :  { %683 = vst.msk [vmem:[#allocation2] sm:$0xff] %vm682_vm3, %v680_v10 }
 0x452   :  { %v1047_v11 = vpop.f32.mrf.mxu2 }
 0x465   :  { %v743_v12 = vpop.permute.xlu0 %742 }
 0x466   :  { %746 = vst.msk [vmem:[#allocation2] sm:$0xff] %vm745_vm4, %v743_v12  ;;  %v6765_v12 = vpack.c.bf16 %v347_v9, %v346_v8 }
 0x48c   :  { %v927_v19 = vpop.permute.xlu0 %926 }
 0x48d   :  { %929 = vst.msk [vmem:[#allocation2 + $0x8] sm:$0xff] %vm682_vm3, %v927_v19  ;;  %v5486_v19 = vld [vmem:[#allocation8 + $0x8] sm:$0xff] }
 0x48e   :  { %1275 = vmatpush.bf16.msrb.mxu0 %v5486_v19  ;;  %v4769_v19 = vld [vmem:[#allocation10 + $0x78] sm:$0xf0] }
 0x48f   :  { %v989_v22 = vpop.permute.xlu1 %988 }
 0x490   :  { %991 = vst.msk [vmem:[#allocation2 + $0x8] sm:$0xff] %vm745_vm4, %v989_v22 }
 0x492   :  { %1276 = vmatpush.bf16.msrb.mxu0 %v5485_v25  ;;  %v4761_v25 = vld [vmem:[#allocation10 + $0x68] sm:$0xf0] }
 0x494   :  { %v806_v24 = vpop.permute.xlu0 %805 }
 0x495   :  { %809 = vst.msk [vmem:[#allocation2] sm:$0xff] %vm808_vm5, %v806_v24 }
 0x49c   :  { %v1054_v28 = vld [vmem:[#allocation2] sm:$0xff] }
 0x4bd   :  { %v1051_v27 = vpop.permute.xlu1 %1050 }
 0x4be   :  { %1053 = vst.msk [vmem:[#allocation2 + $0x8] sm:$0xff] %vm808_vm5, %v1051_v27  ;;  %v348_v27 = vld [vmem:[%s7472_s30 + $0x10] sm:$0xff] }
 0x4c5   :  { %v1055_v30 = vld [vmem:[#allocation2 + $0x8] sm:$0xff] }
 0x4c6   :  { %v1072_v31 = vpack.c.bf16 %v1055_v30, %v1054_v28  ;;  %v349_v28 = vld [vmem:[%s7472_s30 + $0x18] sm:$0xff] }
 0x4c7   :  { %v6775_v30 = vpack.c.bf16 %v349_v28, %v348_v27  ;;  %v5503_v27 = vld [vmem:[#allocation10 + $0x54] sm:$0xf]  ;;  %v4753_v28 = vld [vmem:[#allocation10 + $0x58] sm:$0xf0] }
 0x4c8   :  { %1133 = vmatmul.bf16.vlgmr.msra.gmra.mxu3 %v1072_v31 }
 0x54b   :  { %v1134_v33 = vpop.f32.mrf.mxu3 }
 0x54c   :  { %v1135_v34 = vadd.f32 %v5677_v32, %v1134_v33 }
 0x54e   :  { %v1139_v36 = vadd.f32 %v1135_v34, %v6599_v20  ;;  %v5504_v20 = vld [vmem:[#allocation10 + $0x54] sm:$0xf0] }
 0x54f   :  { %v4752_v51 = vor.u32 %v5504_v20, %v4751_v35  ;;  %v5678_v20 = vld [vmem:[#allocation5] ss:$0 sm:$0xff] }
 0x550   :  { %1143 = vadd.xlane.f32.xlu2 %v1139_v36 }
 0x551   :  { %1389 = vmatpush.bf16.msra.mxu1 %v4752_v51 }
 0x553   :  { %v1136_v37 = vpop.f32.mrf.mxu3 }
 0x554   :  { %v1137_v38 = vadd.f32 %v5677_v32, %v1136_v37 }
 0x556   :  { %v1140_v39 = vadd.f32 %v1137_v38, %v6601_v21  ;;  %v5502_v21 = vld [vmem:[#allocation10 + $0x44] sm:$0xf0] }
 0x557   :  { %v4744_v54 = vor.u32 %v5502_v21, %v4743_v52 }
 0x558   :  { %1145 = vadd.xlane.f32.xlu0 %v1140_v39 }
 0x559   :  { %1390 = vmatpush.bf16.msra.mxu1 %v4744_v54 }
 0x55d   :  { %1391 = vmatpush.bf16.msra.mxu1 %v4736_v58 }
 0x561   :  { %1392 = vmatpush.bf16.msra.mxu1 %v4728_v63 }
 0x565   :  { %1393 = vmatpush.bf16.msra.mxu1 %v4720_v23 }
 0x569   :  { %1394 = vmatpush.bf16.msra.mxu1 %v4712_v7 }
 0x56c   :  { %1395 = vmatmul.bf16.vlgmr.msra.gmra.mxu1 %v6765_v12 }
 0x57c   :  { %1400 = vmatmul.bf16.gmra.mxu1 %v6775_v30 }
 0x5c3   :  { %v1144_v61 = vpop.xlane.xlu2 %1143 }
 0x5c4   :  { %v1154_v62 = vmul.f32 %v6747_v57, %v1144_v61 }
 0x5c6   :  { %v6750_v0 = vsub.f32 %v1139_v36, %v1154_v62 }
 0x5c8   :  { %v1158_v4 = vmul.f32 %v6750_v0, %v6750_v0 }
 0x5ca   :  { %1160 = vadd.xlane.f32.xlu1 %v1158_v4 }
 0x5cb   :  { %v1146_v5 = vpop.xlane.xlu0 %1145 }
 0x5cc   :  { %v1155_v6 = vmul.f32 %v6747_v57, %v1146_v5 }
 0x5ce   :  { %v6761_v10 = vsub.f32 %v1140_v39, %v1155_v6 }
 0x5d0   :  { %v1159_v11 = vmul.f32 %v6761_v10, %v6761_v10 }
 0x5d2   :  { %1162 = vadd.xlane.f32.xlu2 %v1159_v11 }
 0x5e9   :  { %v1396_v44 = vpop.f32.mrf.mxu1 }
 0x5ea   :  { %v1397_v50 = vadd.f32 %v1396_v44, %v1303_v46  ;;  %v4721_v44 = vld [vmem:[#allocation10 + $0x18] sm:$0xf0] }
 0x5f1   :  { %v1398_v52 = vpop.f32.mrf.mxu1 }
 0x5f2   :  { %v1399_v21 = vadd.f32 %v1398_v52, %v1303_v46 }
 0x5f4   :  { %v1426_v58 = vpack.c.bf16 %v1399_v21, %v1397_v50 }
 0x5f6   :  { %1543 = vrot.lane.b32.xlu2 %v1426_v58, %s6208_s3  ;;  %1482 = vrot.lane.b32.xlu0 %v1426_v58, %s6224_s0  ;;  %v1431_v60 = vsel %vm324_vm0, %v1426_v58, 0 }
 0x5f7   :  { %1440 = vmatpush.bf16.xpose.msrb.mxu3 %v1431_v60 }
 0x5fe   :  { %1603 = vrot.lane.b32.xlu0 %v1426_v58, %s6225_s22 }
 0x63d   :  { %v1161_v22 = vpop.xlane.xlu1 %1160 }
 0x63e   :  { %v1164_v24 = vmul.f32 %v1161_v22, %v6747_v57  ;;  %v4772_v22 = vor.u32 %v5507_v18, %v4769_v19 }
 0x640   :  { %v1166_v26 = vadd.f32 1e-05, %v1164_v24  ;;  %1406 = vmatpush.bf16.msrb.mxu2 %v4772_v22  ;;  %v5505_v24 = vld [vmem:[#allocation10 + $0x64] sm:$0xf] }
 0x642   :  { %5732 = vrsqrt.f32 %v1166_v26  ;;  %vm1174_vm8 = vweird.f32 %v1166_v26 }
 0x645   :  { %v1163_v31 = vpop.xlane.xlu2 %1162 }
 0x646   :  { %v1165_v32 = vmul.f32 %v1163_v31, %v6747_v57  ;;  %v4756_v31 = vor.u32 %v5503_v27, %v4753_v28 }
 0x648   :  { %v5733_v33 = vpop.eup %5732  ;;  %v1167_v34 = vadd.f32 1e-05, %v1165_v32  ;;  %v5501_v32 = vld [vmem:[#allocation10 + $0x44] sm:$0xf] }
 0x649   :  { %v1169_v36 = vmul.f32 %v5733_v33, %v1166_v26  ;;  %vm1175_vm7 = vweird.f32 %v5733_v33  ;;  %v4764_v26 = vor.u32 %v5505_v24, %v4761_v25 }
 0x64a   :  { %5734 = vrsqrt.f32 %v1167_v34  ;;  %vm1176_vm9 = vmor %vm1174_vm8, %vm1175_vm7  ;;  %vm1184_vm11 = vweird.f32 %v1167_v34 }
 0x64b   :  { %v1170_v37 = vmul.f32 %v5733_v33, %v1169_v36  ;;  %1407 = vmatpush.bf16.msrb.mxu2 %v4764_v26  ;;  %v5499_v36 = vld [vmem:[#allocation10 + $0x34] sm:$0xf] }
 0x64d   :  { %v1171_v38 = vmul.f32 0.5, %v1170_v37  ;;  %v4737_v37 = vld [vmem:[#allocation10 + $0x38] sm:$0xf0] }
 0x64f   :  { %v1172_v39 = vsub.f32 1.5, %v1171_v38  ;;  %1408 = vmatpush.bf16.msrb.mxu2 %v4756_v31  ;;  %v4740_v38 = vor.u32 %v5499_v36, %v4737_v37 }
 0x650   :  { %v5735_v40 = vpop.eup %5734  ;;  %v1544_v3 = vpop.permute.xlu2 %1543 }
 0x651   :  { %v1173_v41 = vmul.f32 %v5733_v33, %v1172_v39  ;;  %v1179_v42 = vmul.f32 %v5735_v40, %v1167_v34  ;;  %vm1185_vm10 = vweird.f32 %v5735_v40  ;;  %v1549_v7 = vsel %vm324_vm0, %v1544_v3, 0  ;;  %v5497_v39 = vld [vmem:[#allocation10 + $0x24] sm:$0xf] }
 0x652   :  { %vm1186_vm12 = vmor %vm1184_vm11, %vm1185_vm10  ;;  %1558 = vmatpush.bf16.xpose.msrb.mxu1 %v1549_v7 }
 0x653   :  { %v1180_v45 = vmul.f32 %v5735_v40, %v1179_v42  ;;  %v1177_v47 = vsel %vm1176_vm9, %v5733_v33, %v1173_v41  ;;  %v4745_v33 = vld [vmem:[#allocation10 + $0x48] sm:$0xf0]  ;;  %v5495_v42 = vld [vmem:[#allocation10 + $0x14] sm:$0xf] }
 0x654   :  { %v1188_v35 = vmul.f32 %v1177_v47, %v6750_v0  ;;  %v1401_v0 = vpop.f32.mrf.mxu1  ;;  %v4748_v34 = vor.u32 %v5501_v32, %v4745_v33  ;;  %v4713_v47 = vld [vmem:[#allocation10 + $0x8] sm:$0xf0] }
 0x655   :  { %v1181_v48 = vmul.f32 0.5, %v1180_v45  ;;  %v1402_v1 = vadd.f32 %v1401_v0, %v1303_v46  ;;  %v4724_v45 = vor.u32 %v5495_v42, %v4721_v44 }
 0x656   :  { %v1193_v55 = vmul.f32 %v5678_v20, %v1188_v35  ;;  %1409 = vmatpush.bf16.msrb.mxu2 %v4748_v34 }
 0x657   :  { %v1182_v49 = vsub.f32 1.5, %v1181_v48 }
 0x658   :  { %v6790_v61 = vadd.f32 %v5679_v56, %v1193_v55 }
 0x659   :  { %v1183_v51 = vmul.f32 %v5735_v40, %v1182_v49 }
 0x65a   :  { %1410 = vmatpush.bf16.msrb.mxu2 %v4740_v38 }
 0x65b   :  { %v1187_v53 = vsel %vm1186_vm12, %v5735_v40, %v1183_v51  ;;  %v4729_v40 = vld [vmem:[#allocation10 + $0x28] sm:$0xf0] }
 0x65c   :  { %v1189_v54 = vmul.f32 %v1187_v53, %v6761_v10  ;;  %v1403_v2 = vpop.f32.mrf.mxu1  ;;  %v4732_v41 = vor.u32 %v5497_v39, %v4729_v40 }
 0x65d   :  { %v1404_v4 = vadd.f32 %v1403_v2, %v1303_v46  ;;  %v5493_v46 = vld [vmem:[#allocation10 + $0x4] sm:$0xf] }
 0x65e   :  { %v1194_v59 = vmul.f32 %v5678_v20, %v1189_v54  ;;  %1411 = vmatpush.bf16.msrb.mxu2 %v4732_v41  ;;  %v4716_v49 = vor.u32 %v5493_v46, %v4713_v47 }
 0x65f   :  { %v1662_v23 = vpack.c.bf16 %v1404_v4, %v1402_v1 }
 0x660   :  { %v6792_v62 = vadd.f32 %v5679_v56, %v1194_v59 }
 0x661   :  { %1717 = vrot.lane.b32.xlu2 %v1662_v23, %s6224_s0  ;;  %v1667_v5 = vsel %vm324_vm0, %v1662_v23, 0 }
 0x662   :  { %v1216_v63 = vpack.c.bf16 %v6792_v62, %v6790_v61  ;;  %1676 = vmatpush.bf16.xpose.msra.mxu1 %v1667_v5  ;;  %1412 = vmatpush.bf16.msrb.mxu2 %v4724_v45 }
 0x664   :  { %1277 = vmatmul.bf16.vlgmr.msrb.gmra.mxu0 %v1216_v63 }
 0x666   :  { %1413 = vmatpush.bf16.msrb.mxu2 %v4716_v49 }
 0x668   :  { %v1483_v6 = vpop.permute.xlu0 %1482 }
 0x669   :  { %1838 = vrot.lane.b32.xlu2 %v1662_v23, %s6225_s22  ;;  %v1488_v8 = vsel %vm324_vm0, %v1483_v6, 0  ;;  %1414 = vmatmul.bf16.vlgmr.msrb.gmra.mxu2 %v6765_v12 }
 0x66a   :  { %1497 = vmatpush.bf16.xpose.msra.mxu3 %v1488_v8  ;;  %v6830_v8 = vperm.slane %v6782_v43, 1 }
 0x670   :  { %v1604_v13 = vpop.permute.xlu0 %1603 }
 0x671   :  { %v1609_v14 = vsel %vm324_vm0, %v1604_v13, 0 }
 0x679   :  { %1419 = vmatmul.bf16.gmra.mxu2 %v6775_v30 }
 0x6bb   :  { %v1718_v48 = vpop.permute.xlu2 %1717 }
 0x6bc   :  { %v1723_v35 = vsel %vm324_vm0, %v1718_v48, 0 }
 0x6c3   :  { %v1839_v53 = vpop.permute.xlu2 %1838 }
 0x6c4   :  { %v1844_v54 = vsel %vm324_vm0, %v1839_v53, 0 }
 0x6e1   :  { %v1278_v9 = vpop.f32.mrf.mxu0 }
 0x6e2   :  { %v1279_v10 = vadd.f32 %v5680_v29, %v1278_v9 }
 0x6e4   :  { %v1425_v11 = vpack.c.bf16 %v1279_v10, %v1279_v10 }
 0x6e6   :  { %1601 = vrot.lane.b32.xlu0 %v1425_v11, %s6225_s22  ;;  %1479 = vrot.lane.b32.xlu1 %v1425_v11, %s6224_s0 }
 0x6e7   :  { %4773 = vmatmul.msk.bf16.vlgmr.msrb.gmra.mxu3 %vm324_vm0, %v1425_v11 }
 0x6e8   :  { %1618 = vmatpush.bf16.xpose.msrb.mxu3 %v1609_v14 }
 0x6e9   :  { %v1280_v15 = vpop.f32.mrf.mxu0 }
 0x6ea   :  { %v1281_v16 = vadd.f32 %v5680_v29, %v1280_v15 }
 0x6ec   :  { %v1661_v17 = vpack.c.bf16 %v1281_v16, %v1281_v16  ;;  %v1415_v3 = vpop.f32.mrf.mxu2 }
 0x6ed   :  { %v1416_v13 = vadd.f32 %v1415_v3, %v6830_v8 }
 0x6ee   :  { %1778 = vrot.lane.b32.xlu0 %v1662_v23, %s6208_s3  ;;  %1541 = vrot.lane.b32.xlu1 %v1425_v11, %s6208_s3 }
 0x6f4   :  { %v1417_v14 = vpop.f32.mrf.mxu2 }
 0x6f5   :  { %v1418_v15 = vadd.f32 %v1417_v14, %v6830_v8 }
 0x6f6   :  { %1836 = vrot.lane.b32.xlu0 %v1661_v17, %s6225_s22  ;;  %1714 = vrot.lane.b32.xlu1 %v1661_v17, %s6224_s0 }
 0x6f7   :  { %v1460_v16 = vpack.c.bf16 %v1418_v15, %v1416_v13 }
 0x6f9   :  { %1471 = vmatpush.bf16.msra.mxu0 %v1460_v16 }
 0x6fe   :  { %1776 = vrot.lane.b32.xlu1 %v1661_v17, %s6208_s3 }
 0x758   :  { %v1602_v20 = vpop.permute.xlu0 %1601  ;;  %v1480_v50 = vpop.permute.xlu1 %1479 }
 0x759   :  { %4775 = vmatmul.msk.bf16.vlgmr.msra.gmra.mxu3 %vm324_vm0, %v1480_v50 }
 0x75a   :  { %1732 = vmatpush.bf16.xpose.msra.mxu3 %v1723_v35 }
 0x760   :  { %v1779_v51 = vpop.permute.xlu0 %1778  ;;  %v1542_v52 = vpop.permute.xlu1 %1541 }
 0x761   :  { %v1784_v21 = vsel %vm324_vm0, %v1779_v51, 0  ;;  %4777 = vmatmul.msk.bf16.vlgmr.msrb.gmra.mxu1 %vm324_vm0, %v1542_v52 }
 0x762   :  { %1793 = vmatpush.bf16.xpose.msrb.mxu1 %v1784_v21 }
 0x768   :  { %v1715_v60 = vpop.permute.xlu1 %1714  ;;  %v1837_v0 = vpop.permute.xlu0 %1836 }
 0x769   :  { %4779 = vmatmul.msk.bf16.vlgmr.msrb.gmra.mxu3 %vm324_vm0, %v1602_v20 }
 0x76a   :  { %v1442_v55 = vpop.f32.mrf.mxu3  ;;  %1853 = vmatpush.bf16.xpose.msrb.mxu3 %v1844_v54 }
 0x76b   :  { %v1446_v56 = vmul.f32 0.17677669, %v1442_v55 }
 0x76d   :  { %v1448_v58 = vsel %vm1447_vm13, %v1446_v56, -inf }
 0x76e   :  { %1449 = vmax.xlane.f32.xlu2 %v1448_v58 }
 0x770   :  { %v1777_v63 = vpop.permute.xlu1 %1776 }
 0x771   :  { %4781 = vmatmul.msk.bf16.vlgmr.msra.gmra.mxu1 %vm324_vm0, %v1661_v17 }
 0x772   :  { %v1444_v59 = vpop.f32.mrf.mxu3 }
 0x779   :  { %4783 = vmatmul.msk.bf16.vlgmr.msra.gmra.mxu3 %vm324_vm0, %v1715_v60 }
 0x781   :  { %4785 = vmatmul.msk.bf16.vlgmr.msrb.gmra.mxu1 %vm324_vm0, %v1777_v63 }
 0x789   :  { %4787 = vmatmul.msk.bf16.vlgmr.msrb.gmra.mxu3 %vm324_vm0, %v1837_v0 }
 0x7dc   :  { %v1499_v1 = vpop.f32.mrf.mxu3 }
 0x7dd   :  { %v1503_v2 = vmul.f32 0.17677669, %v1499_v1 }
 0x7de   :  { %v1560_v4 = vpop.f32.mrf.mxu1 }
 0x7df   :  { %v1564_v23 = vmul.f32 0.17677669, %v1560_v4  ;;  %v1504_v29 = vsel %vm1447_vm13, %v1503_v2, -inf }
 0x7e0   :  { %1505 = vmax.xlane.f32.xlu1 %v1504_v29 }
 0x7e1   :  { %v1450_v5 = vpop.xlane.xlu2 %1449  ;;  %v1565_v6 = vsel %vm1447_vm13, %v1564_v23, -inf }
 0x7e2   :  { %v1451_v7 = vsub.f32 %v1446_v56, %v1450_v5  ;;  %1566 = vmax.xlane.f32.xlu0 %v1565_v6  ;;  %v1420_v5 = vpop.f32.mrf.mxu2 }
 0x7e4   :  { %v1452_v9 = vmul.f32 1.442695, %v1451_v7  ;;  %v1501_v10 = vpop.f32.mrf.mxu3 }
 0x7e6   :  { %5736 = vpow2.f32 %v1452_v9  ;;  %v1562_v11 = vpop.f32.mrf.mxu1 }
 0x7e7   :  { %v1421_v11 = vadd.f32 %v1420_v5, %v6830_v8 }
 0x7ea   :  { %v1422_v10 = vpop.f32.mrf.mxu2 }
 0x7eb   :  { %v1423_v13 = vadd.f32 %v1422_v10, %v6830_v8 }
 0x7ec   :  { %v5737_v17 = vpop.eup %5736  ;;  %v1620_v18 = vpop.f32.mrf.mxu3 }
 0x7ed   :  { %v1454_v19 = vsel %vm1447_vm13, %v5737_v17, 0.0  ;;  %v1624_v43 = vmul.f32 0.17677669, %v1620_v18 }
 0x7ee   :  { %1455 = vadd.xlane.f32.xlu2 %v1454_v19  ;;  %v1678_v22 = vpop.f32.mrf.mxu1 }
 0x7ef   :  { %v1682_v24 = vmul.f32 0.17677669, %v1678_v22  ;;  %v1625_v27 = vsel %vm1447_vm13, %v1624_v43, -inf }
 0x7f1   :  { %v1683_v25 = vsel %vm1447_vm13, %v1682_v24, -inf }
 0x7f2   :  { %1684 = vmax.xlane.f32.xlu1 %v1683_v25 }
 0x7f4   :  { %v1622_v26 = vpop.f32.mrf.mxu3 }
 0x7f6   :  { %1626 = vmax.xlane.f32.xlu2 %v1625_v27  ;;  %v1680_v28 = vpop.f32.mrf.mxu1 }
 0x7fc   :  { %v1734_v31 = vpop.f32.mrf.mxu3 }
 0x7fd   :  { %v1738_v32 = vmul.f32 0.17677669, %v1734_v31 }
 0x7fe   :  { %v1795_v33 = vpop.f32.mrf.mxu1 }
 0x7ff   :  { %v6837_v34 = vmul.f32 0.17677669, %v1795_v33  ;;  %v1739_v36 = vsel %vm1447_vm13, %v1738_v32, -inf }
 0x800   :  { %1740 = vmax.xlane.f32.xlu0 %v1739_v36 }
 0x801   :  { %v1800_v37 = vsel %vm1447_vm13, %v6837_v34, -inf }
 0x802   :  { %1801 = vmax.xlane.f32.xlu1 %v1800_v37 }
 0x804   :  { %v1736_v38 = vpop.f32.mrf.mxu3 }
 0x806   :  { %v1797_v39 = vpop.f32.mrf.mxu1 }
 0x80c   :  { %v1855_v40 = vpop.f32.mrf.mxu3 }
 0x80d   :  { %v6845_v42 = vmul.f32 0.17677669, %v1855_v40 }
 0x80e   :  { %1637 = vrot.lane.b32.xlu2 %v1460_v16, %s6225_s22 }
 0x80f   :  { %v1860_v44 = vsel %vm1447_vm13, %v6845_v42, -inf }
 0x814   :  { %1577 = vrot.lane.b32.xlu0 %v1460_v16, %s6208_s3  ;;  %v1857_v41 = vpop.f32.mrf.mxu3 }
 0x81b   :  { %1517 = vrot.lane.b32.xlu1 %v1460_v16, %s6224_s0  ;;  %v1695_v16 = vpack.c.bf16 %v1423_v13, %v1421_v11 }
 0x83e   :  { %1861 = vmax.xlane.f32.xlu0 %v1860_v44 }
 0x853   :  { %v1506_v45 = vpop.xlane.xlu1 %1505 }
 0x854   :  { %v1507_v46 = vsub.f32 %v1503_v2, %v1506_v45 }
 0x855   :  { %v1567_v47 = vpop.xlane.xlu0 %1566 }
 0x856   :  { %v1508_v48 = vmul.f32 1.442695, %v1507_v46  ;;  %v1568_v49 = vsub.f32 %v1564_v23, %v1567_v47 }
 0x858   :  { %5738 = vpow2.f32 %v1508_v48  ;;  %v1569_v35 = vmul.f32 1.442695, %v1568_v49 }
 0x85a   :  { %5740 = vpow2.f32 %v1569_v35 }
 0x85e   :  { %v6849_v20 = vpop.eup %5738 }
 0x85f   :  { %v1510_v50 = vsel %vm1447_vm13, %v6849_v20, 0.0 }
 0x860   :  { %v6853_v51 = vpop.eup %5740  ;;  %1511 = vadd.xlane.f32.xlu2 %v1510_v50 }
 0x861   :  { %v1456_v52 = vpop.xlane.xlu2 %1455  ;;  %v1571_v21 = vsel %vm1447_vm13, %v6853_v51, 0.0 }
 0x862   :  { %5742 = vrcp.f32 %v1456_v52  ;;  %1572 = vadd.xlane.f32.xlu0 %v1571_v21 }
 0x865   :  { %v1685_v53 = vpop.xlane.xlu1 %1684 }
 0x866   :  { %v1686_v54 = vsub.f32 %v1682_v24, %v1685_v53 }
 0x868   :  { %v5743_v55 = vpop.eup %5742  ;;  %v1687_v56 = vmul.f32 1.442695, %v1686_v54 }
 0x869   :  { %v1458_v58 = vmul.f32 %v5743_v55, %v5737_v17  ;;  %v1627_v59 = vpop.xlane.xlu2 %1626 }
 0x86a   :  { %5744 = vpow2.f32 %v1687_v56  ;;  %v1628_v60 = vsub.f32 %v1624_v43, %v1627_v59 }
 0x86b   :  { %v1459_v63 = vpack.c.bf16 %v1458_v58, %v1458_v58 }
 0x86c   :  { %v1629_v0 = vmul.f32 1.442695, %v1628_v60 }
 0x86d   :  { %4774 = vmatmul.msk.bf16.vlgmr.msra.gmra.mxu0 %vm1447_vm13, %v1459_v63 }
 0x86e   :  { %5746 = vpow2.f32 %v1629_v0 }
 0x870   :  { %v5745_v1 = vpop.eup %5744 }
 0x871   :  { %v1689_v2 = vsel %vm1447_vm13, %v5745_v1, 0.0  ;;  %v1638_v18 = vpop.permute.xlu2 %1637 }
 0x872   :  { %1690 = vadd.xlane.f32.xlu1 %v1689_v2 }
 0x873   :  { %v1741_v4 = vpop.xlane.xlu0 %1740 }
 0x874   :  { %v5747_v23 = vpop.eup %5746  ;;  %v1742_v29 = vsub.f32 %v1738_v32, %v1741_v4 }
 0x875   :  { %v1631_v3 = vsel %vm1447_vm13, %v5747_v23, 0.0  ;;  %v1802_v14 = vpop.xlane.xlu1 %1801 }
 0x876   :  { %v1743_v6 = vmul.f32 1.442695, %v1742_v29  ;;  %1632 = vadd.xlane.f32.xlu2 %v1631_v3  ;;  %v1803_v19 = vsub.f32 %v6837_v34, %v1802_v14 }
 0x878   :  { %5748 = vpow2.f32 %v1743_v6  ;;  %v1804_v22 = vmul.f32 1.442695, %v1803_v19 }
 0x87a   :  { %5750 = vpow2.f32 %v1804_v22 }
 0x87e   :  { %v6860_v7 = vpop.eup %5748 }
 0x87f   :  { %v1745_v9 = vsel %vm1447_vm13, %v6860_v7, 0.0 }
 0x880   :  { %1746 = vadd.xlane.f32.xlu0 %v1745_v9  ;;  %v5751_v43 = vpop.eup %5750 }
 0x881   :  { %v1806_v26 = vsel %vm1447_vm13, %v5751_v43, 0.0 }
 0x886   :  { %v1578_v15 = vpop.permute.xlu0 %1577 }
 0x887   :  { %1590 = vmatpush.bf16.msra.mxu2 %v1578_v15 }
 0x88b   :  { %1706 = vmatpush.bf16.msrb.mxu2 %v1695_v16 }
 0x88d   :  { %v1518_v17 = vpop.permute.xlu1 %1517 }
 0x88e   :  { %1752 = vrot.lane.b32.xlu2 %v1695_v16, %s6224_s0  ;;  %1530 = vmatpush.bf16.msrb.mxu0 %v1518_v17  ;;  %v5516_v17 = vld [vmem:[#allocation11 + $0x38] sm:$0xff] }
 0x88f   :  { %1967 = vmatpush.bf16.msra.mxu1 %v5516_v17  ;;  %v4839_v17 = vld [vmem:[#allocation16 + $0x20] sm:$0xf] }
 0x892   :  { %1650 = vmatpush.bf16.msra.mxu0 %v1638_v18 }
 0x894   :  { %1812 = vrot.lane.b32.xlu0 %v1695_v16, %s6208_s3 }
 0x8b1   :  { %v1862_v24 = vpop.xlane.xlu0 %1861 }
 0x8b2   :  { %v1863_v8 = vsub.f32 %v6845_v42, %v1862_v24  ;;  %v5515_v24 = vld [vmem:[#allocation11 + $0x30] sm:$0xff] }
 0x8b3   :  { %1968 = vmatpush.bf16.msra.mxu1 %v5515_v24  ;;  %v4841_v24 = vld [vmem:[#allocation16 + $0x28] sm:$0xf0] }
 0x8b4   :  { %v1864_v25 = vmul.f32 1.442695, %v1863_v8  ;;  %v5514_v8 = vld [vmem:[#allocation11 + $0x28] sm:$0xff] }
 0x8b6   :  { %5752 = vpow2.f32 %v1864_v25  ;;  %v5512_v25 = vld [vmem:[#allocation11 + $0x18] sm:$0xff] }
 0x8b7   :  { %1807 = vadd.xlane.f32.xlu2 %v1806_v26  ;;  %1969 = vmatpush.bf16.msra.mxu1 %v5514_v8  ;;  %v5511_v26 = vld [vmem:[#allocation11 + $0x10] sm:$0xff] }
 0x8bc   :  { %v5753_v27 = vpop.eup %5752 }
 0x8bd   :  { %v1866_v28 = vsel %vm1447_vm13, %v5753_v27, 0.0 }
 0x8be   :  { %1867 = vadd.xlane.f32.xlu1 %v1866_v28  ;;  %v5509_v28 = vld [vmem:[#allocation11] sm:$0xff] }
 0x8d3   :  { %v1512_v31 = vpop.xlane.xlu2 %1511 }
 0x8d4   :  { %5754 = vrcp.f32 %v1512_v31 }
 0x8d5   :  { %v1573_v32 = vpop.xlane.xlu0 %1572 }
 0x8d6   :  { %5756 = vrcp.f32 %v1573_v32 }
 0x8d7   :  { %1872 = vrot.lane.b32.xlu1 %v1695_v16, %s6225_s22 }
 0x8da   :  { %v5755_v33 = vpop.eup %5754 }
 0x8db   :  { %v1514_v34 = vmul.f32 %v5755_v33, %v6849_v20 }
 0x8dc   :  { %v5757_v36 = vpop.eup %5756 }
 0x8dd   :  { %v1515_v37 = vpack.c.bf16 %v1514_v34, %v1514_v34  ;;  %v1575_v38 = vmul.f32 %v5757_v36, %v6853_v51 }
 0x8df   :  { %v1576_v39 = vpack.c.bf16 %v1575_v38, %v1575_v38  ;;  %4776 = vmatmul.msk.bf16.vlgmr.msrb.gmra.mxu0 %vm1447_vm13, %v1515_v37  ;;  %v5681_v37 = vld [vmem:[%s7424_s16] ss:$0 sm:$0xff] }
 0x8e1   :  { %4778 = vmatmul.msk.bf16.vlgmr.msra.gmra.mxu2 %vm1447_vm13, %v1576_v39 }
 0x8e5   :  { %v1691_v40 = vpop.xlane.xlu1 %1690 }
 0x8e6   :  { %5758 = vrcp.f32 %v1691_v40 }
 0x8e9   :  { %v1633_v41 = vpop.xlane.xlu2 %1632 }
 0x8ea   :  { %5760 = vrcp.f32 %v1633_v41  ;;  %v1473_v42 = vpop.f32.mrf.mxu0 }
 0x8eb   :  { %1477 = vst.msk [vmem:[#allocation2] sm:$0xff] %vm324_vm0, %v1473_v42 }
 0x8ec   :  { %v5759_v44 = vpop.eup %5758 }
 0x8ed   :  { %v1693_v45 = vmul.f32 %v5759_v44, %v5745_v1 }
 0x8ef   :  { %v1694_v46 = vpack.c.bf16 %v1693_v45, %v1693_v45 }
 0x8f0   :  { %v5761_v47 = vpop.eup %5760 }
 0x8f1   :  { %v1635_v48 = vmul.f32 %v5761_v47, %v5747_v23  ;;  %v1753_v49 = vpop.permute.xlu2 %1752  ;;  %4782 = vmatmul.msk.bf16.vlgmr.msrb.gmra.mxu2 %vm1447_vm13, %v1694_v46 }
 0x8f2   :  { %v1475_v35 = vpop.f32.mrf.mxu0  ;;  %1765 = vmatpush.bf16.msrb.mxu0 %v1753_v49 }
 0x8f3   :  { %v1636_v20 = vpack.c.bf16 %v1635_v48, %v1635_v48  ;;  %v1747_v50 = vpop.xlane.xlu0 %1746 }
 0x8f4   :  { %5762 = vrcp.f32 %v1747_v50  ;;  %v5532_v50 = vld [vmem:[#allocation16 + $0x74] sm:$0xf0] }
 0x8f5   :  { %4780 = vmatmul.msk.bf16.vlgmr.msra.gmra.mxu0 %vm1447_vm13, %v1636_v20 }
 0x8fa   :  { %v5763_v51 = vpop.eup %5762 }
 0x8fb   :  { %v1749_v52 = vmul.f32 %v5763_v51, %v6860_v7  ;;  %v5531_v51 = vld [vmem:[#allocation16 + $0x74] sm:$0xf] }
 0x8fd   :  { %v1750_v21 = vpack.c.bf16 %v1749_v52, %v1749_v52 }
 0x905   :  { %4784 = vmatmul.msk.bf16.vlgmr.msrb.gmra.mxu0 %vm1447_vm13, %v1750_v21  ;;  %v4881_v21 = vld [vmem:[#allocation16 + $0x78] sm:$0xf0] }
 0x906   :  { %v1813_v53 = vpop.permute.xlu0 %1812 }
 0x907   :  { %1825 = vmatpush.bf16.msra.mxu2 %v1813_v53  ;;  %v4884_v53 = vor.u32 %v5531_v51, %v4881_v21  ;;  %v5546_v51 = vld [vmem:[#allocation17 + $0x68] sm:$0xff] }
 0x909   :  { %2152 = vmatpush.bf16.msra.mxu3 %v4884_v53  ;;  %v5537_v53 = vld [vmem:[#allocation17 + $0x20] sm:$0xff] }
 0x92a   :  { %v1808_v54 = vpop.xlane.xlu2 %1807 }
 0x92b   :  { %5764 = vrcp.f32 %v1808_v54  ;;  %v4871_v54 = vld [vmem:[#allocation16 + $0x60] sm:$0xf] }
 0x931   :  { %v5765_v55 = vpop.eup %5764  ;;  %v1868_v59 = vpop.xlane.xlu1 %1867 }
 0x932   :  { %v1810_v56 = vmul.f32 %v5765_v55, %v5751_v43  ;;  %5766 = vrcp.f32 %v1868_v59  ;;  %v5513_v43 = vld [vmem:[#allocation11 + $0x20] sm:$0xff]  ;;  %v5530_v55 = vld [vmem:[#allocation16 + $0x64] sm:$0xf0]  ;;  %v4873_v59 = vld [vmem:[#allocation16 + $0x68] sm:$0xf0] }
 0x933   :  { %1970 = vmatpush.bf16.msra.mxu1 %v5513_v43  ;;  %v4831_v43 = vld [vmem:[#allocation16 + $0x10] sm:$0xf] }
 0x934   :  { %v1811_v58 = vpack.c.bf16 %v1810_v56, %v1810_v56  ;;  %v5529_v56 = vld [vmem:[#allocation16 + $0x64] sm:$0xf] }
 0x936   :  { %4786 = vmatmul.msk.bf16.vlgmr.msra.gmra.mxu2 %vm1447_vm13, %v1811_v58  ;;  %v4872_v58 = vor.u32 %v5530_v55, %v4871_v54  ;;  %v5545_v54 = vld [vmem:[#allocation17 + $0x60] sm:$0xff] }
 0x937   :  { %1971 = vmatpush.bf16.msra.mxu1 %v5512_v25  ;;  %v5520_v25 = vld [vmem:[#allocation16 + $0x14] sm:$0xf0] }
 0x938   :  { %v5767_v60 = vpop.eup %5766 }
 0x939   :  { %v1870_v63 = vmul.f32 %v5767_v60, %v5753_v27  ;;  %v5510_v27 = vld [vmem:[#allocation11 + $0x8] sm:$0xff]  ;;  %v4876_v60 = vor.u32 %v5529_v56, %v4873_v59 }
 0x93b   :  { %v1871_v1 = vpack.c.bf16 %v1870_v63, %v1870_v63  ;;  %1972 = vmatpush.bf16.msra.mxu1 %v5511_v26  ;;  %2153 = vmatpush.bf16.msra.mxu3 %v4876_v60  ;;  %v4863_v63 = vld [vmem:[#allocation16 + $0x50] sm:$0xf]  ;;  %v5519_v26 = vld [vmem:[#allocation16 + $0x14] sm:$0xf] }
 0x93f   :  { %1973 = vmatpush.bf16.msra.mxu1 %v5510_v27  ;;  %v4832_v27 = vor.u32 %v5520_v25, %v4831_v43 }
 0x943   :  { %1974 = vmatpush.bf16.msra.mxu1 %v5509_v28  ;;  %v4833_v28 = vld [vmem:[#allocation16 + $0x18] sm:$0xf0] }
 0x949   :  { %v1873_v0 = vpop.permute.xlu1 %1872 }
 0x94a   :  { %1885 = vmatpush.bf16.msra.mxu0 %v1873_v0  ;;  %v5528_v0 = vld [vmem:[#allocation16 + $0x54] sm:$0xf0] }
 0x94d   :  { %4788 = vmatmul.msk.bf16.vlgmr.msra.gmra.mxu0 %vm1447_vm13, %v1871_v1  ;;  %v5527_v1 = vld [vmem:[#allocation16 + $0x54] sm:$0xf] }
 0x95c   :  { %v1532_v2 = vpop.f32.mrf.mxu0 }
 0x95d   :  { %1537 = vrot.lane.b32.xlu2 %v1532_v2, %s6225_s22  ;;  %v4864_v2 = vor.u32 %v5528_v0, %v4863_v63 }
 0x964   :  { %v1534_v4 = vpop.f32.mrf.mxu0  ;;  %v1592_v23 = vpop.f32.mrf.mxu2 }
 0x965   :  { %1597 = vrot.lane.b32.xlu0 %v1592_v23, %s6208_s3  ;;  %v4865_v4 = vld [vmem:[#allocation16 + $0x58] sm:$0xf0] }
 0x966   :  { %v4868_v23 = vor.u32 %v5527_v1, %v4865_v4  ;;  %v5682_v4 = vld [vmem:[#allocation13] ss:$0 sm:$0xff] }
 0x968   :  { %2154 = vmatpush.bf16.msra.mxu3 %v4868_v23 }
 0x96c   :  { %v1594_v29 = vpop.f32.mrf.mxu2 }
 0x96d   :  { %v4855_v29 = vld [vmem:[#allocation16 + $0x40] sm:$0xf] }
 0x972   :  { %v1652_v3 = vpop.f32.mrf.mxu0 }
 0x973   :  { %1657 = vrot.lane.b32.xlu2 %v1652_v3, %s6224_s0  ;;  %v5526_v3 = vld [vmem:[#allocation16 + $0x44] sm:$0xf0] }
 0x974   :  { %v1708_v5 = vpop.f32.mrf.mxu2 }
 0x975   :  { %1712 = vst.msk [vmem:[#allocation2 + $0x8] sm:$0xff] %vm324_vm0, %v1708_v5  ;;  %v5525_v5 = vld [vmem:[#allocation16 + $0x44] sm:$0xf] }
 0x97a   :  { %v1654_v6 = vpop.f32.mrf.mxu0 }
 0x97b   :  { %v4856_v6 = vor.u32 %v5526_v3, %v4855_v29 }
 0x97c   :  { %v1710_v7 = vpop.f32.mrf.mxu2 }
 0x97d   :  { %v4857_v7 = vld [vmem:[#allocation16 + $0x48] sm:$0xf0] }
 0x982   :  { %v1767_v9 = vpop.f32.mrf.mxu0 }
 0x983   :  { %1772 = vrot.lane.b32.xlu0 %v1767_v9, %s6225_s22  ;;  %v4860_v9 = vor.u32 %v5525_v5, %v4857_v7 }
 0x985   :  { %2155 = vmatpush.bf16.msra.mxu3 %v4860_v9 }
 0x98a   :  { %v1769_v10 = vpop.f32.mrf.mxu0 }
 0x98b   :  { %v4847_v10 = vld [vmem:[#allocation16 + $0x30] sm:$0xf] }
 0x9b7   :  { %v1538_v11 = vpop.permute.xlu2 %1537 }
 0x9b8   :  { %1540 = vst.msk [vmem:[#allocation2] sm:$0xff] %vm682_vm3, %v1538_v11  ;;  %v5524_v11 = vld [vmem:[#allocation16 + $0x34] sm:$0xf0] }
 0x9b9   :  { %v1827_v13 = vpop.f32.mrf.mxu2 }
 0x9ba   :  { %1832 = vrot.lane.b32.xlu1 %v1827_v13, %s6208_s3  ;;  %v5523_v13 = vld [vmem:[#allocation16 + $0x34] sm:$0xf] }
 0x9c1   :  { %v1829_v14 = vpop.f32.mrf.mxu2 }
 0x9c2   :  { %v4848_v14 = vor.u32 %v5524_v11, %v4847_v10 }
 0x9ca   :  { %v1887_v15 = vpop.f32.mrf.mxu0 }
 0x9cb   :  { %1892 = vrot.lane.b32.xlu0 %v1887_v15, %s6224_s0  ;;  %v4849_v15 = vld [vmem:[#allocation16 + $0x38] sm:$0xf0] }
 0x9cd   :  { %v1658_v19 = vpop.permute.xlu2 %1657 }
 0x9d2   :  { %v1889_v16 = vpop.f32.mrf.mxu0 }
 0x9d3   :  { %v4852_v16 = vor.u32 %v5523_v13, %v4849_v15  ;;  %v5536_v13 = vld [vmem:[#allocation17 + $0x18] sm:$0xff]  ;;  %v5543_v15 = vld [vmem:[#allocation17 + $0x50] sm:$0xff] }
 0x9d5   :  { %2156 = vmatpush.bf16.msra.mxu3 %v4852_v16  ;;  %v5534_v16 = vld [vmem:[#allocation17 + $0x8] sm:$0xff] }
 0x9d7   :  { %v1598_v18 = vpop.permute.xlu0 %1597 }
 0x9d8   :  { %1600 = vst.msk [vmem:[#allocation2] sm:$0xff] %vm745_vm4, %v1598_v18  ;;  %v5522_v18 = vld [vmem:[#allocation16 + $0x24] sm:$0xf0] }
 0x9d9   :  { %1660 = vst.msk [vmem:[#allocation2] sm:$0xff] %vm808_vm5, %v1658_v19  ;;  %v5521_v19 = vld [vmem:[#allocation16 + $0x24] sm:$0xf] }
 0x9da   :  { %v4844_v8 = vor.u32 %v5521_v19, %v4841_v24  ;;  %v2052_v19 = vld [vmem:[%s7428_s20] sm:$0x3] }
 0x9db   :  { %v2055_v43 = vperm.slane %v2052_v19, 1 }
 0x9dc   :  { %2157 = vmatpush.bf16.msra.mxu3 %v4844_v8  ;;  %v2054_v8 = vperm.slane %v2052_v19, 0 }
 0x9e0   :  { %v1896_v33 = vld [vmem:[#allocation2] sm:$0xff] }
 0x9f5   :  { %v1773_v22 = vpop.permute.xlu0 %1772 }
 0x9f6   :  { %1775 = vst.msk [vmem:[#allocation2 + $0x8] sm:$0xff] %vm682_vm3, %v1773_v22  ;;  %v4840_v22 = vor.u32 %v5522_v18, %v4839_v17  ;;  %v5542_v17 = vld [vmem:[#allocation17 + $0x48] sm:$0xff]  ;;  %v5541_v18 = vld [vmem:[#allocation17 + $0x40] sm:$0xff] }
 0xa2c   :  { %v1833_v31 = vpop.permute.xlu1 %1832 }
 0xa2d   :  { %1835 = vst.msk [vmem:[#allocation2 + $0x8] sm:$0xff] %vm745_vm4, %v1833_v31  ;;  %v4823_v31 = vld [vmem:[#allocation16] sm:$0xf] }
 0xa3d   :  { %v1893_v32 = vpop.permute.xlu0 %1892 }
 0xa3e   :  { %1895 = vst.msk [vmem:[#allocation2 + $0x8] sm:$0xff] %vm808_vm5, %v1893_v32  ;;  %v5518_v32 = vld [vmem:[#allocation16 + $0x4] sm:$0xf0] }
 0xa45   :  { %v1897_v34 = vld [vmem:[#allocation2 + $0x8] sm:$0xff] }
 0xa46   :  { %v1914_v36 = vpack.c.bf16 %v1897_v34, %v1896_v33  ;;  %v4836_v34 = vor.u32 %v5519_v26, %v4833_v28 }
 0xa48   :  { %1975 = vmatmul.bf16.vlgmr.msra.gmra.mxu1 %v1914_v36  ;;  %v5517_v36 = vld [vmem:[#allocation16 + $0x4] sm:$0xf]  ;;  %2158 = vmatpush.bf16.msra.mxu3 %v4836_v34 }
 0xac5   :  { %v1976_v38 = vpop.f32.mrf.mxu1 }
 0xac6   :  { %v1977_v39 = vadd.f32 %v5681_v37, %v1976_v38 }
 0xac8   :  { %v1981_v40 = vadd.f32 %v1977_v39, %v6790_v61  ;;  %v4824_v39 = vor.u32 %v5518_v32, %v4823_v31 }
 0xaca   :  { %1985 = vadd.xlane.f32.xlu1 %v1981_v40 }
 0xacd   :  { %v1978_v41 = vpop.f32.mrf.mxu1 }
 0xace   :  { %v1979_v42 = vadd.f32 %v5681_v37, %v1978_v41  ;;  %v4825_v37 = vld [vmem:[#allocation16 + $0x8] sm:$0xf0] }
 0xad0   :  { %v1982_v44 = vadd.f32 %v1979_v42, %v6792_v62  ;;  %v4879_v62 = vld [vmem:[#allocation16 + $0x70] sm:$0xf]  ;;  %v5540_v42 = vld [vmem:[#allocation17 + $0x38] sm:$0xff] }
 0xad1   :  { %v4880_v52 = vor.u32 %v5532_v50, %v4879_v62  ;;  %2304 = vmatpush.bf16.msrb.mxu0 %v5540_v42  ;;  %v5538_v50 = vld [vmem:[#allocation17 + $0x28] sm:$0xff] }
 0xad2   :  { %1987 = vadd.xlane.f32.xlu2 %v1982_v44 }
 0xad3   :  { %2138 = vmatpush.bf16.msrb.mxu2 %v4880_v52 }
 0xad7   :  { %2139 = vmatpush.bf16.msrb.mxu2 %v4872_v58 }
 0xadb   :  { %2140 = vmatpush.bf16.msrb.mxu2 %v4864_v2 }
 0xadf   :  { %2141 = vmatpush.bf16.msrb.mxu2 %v4856_v6  ;;  %v5683_v6 = vld [vmem:[#allocation14] ss:$0 sm:$0xff] }
 0xae3   :  { %2142 = vmatpush.bf16.msrb.mxu2 %v4848_v14  ;;  %v5544_v14 = vld [vmem:[#allocation17 + $0x58] sm:$0xff] }
 0xae7   :  { %2143 = vmatpush.bf16.msrb.mxu2 %v4840_v22 }
 0xaeb   :  { %2144 = vmatpush.bf16.msrb.mxu2 %v4832_v27 }
 0xaef   :  { %2145 = vmatpush.bf16.msrb.mxu2 %v4824_v39 }
 0xb3d   :  { %v1986_v45 = vpop.xlane.xlu1 %1985 }
 0xb3e   :  { %v1989_v46 = vmul.f32 %v1986_v45, %v6747_v57 }
 0xb40   :  { %v6903_v47 = vsub.f32 %v1981_v40, %v1989_v46  ;;  %v4828_v40 = vor.u32 %v5517_v36, %v4825_v37 }
 0xb42   :  { %v1993_v48 = vmul.f32 %v6903_v47, %v6903_v47  ;;  %2159 = vmatpush.bf16.msra.mxu3 %v4828_v40  ;;  %v5684_v40 = vld [vmem:[#allocation19] ss:$0 sm:$0xff] }
 0xb44   :  { %1995 = vadd.xlane.f32.xlu0 %v1993_v48  ;;  %v5539_v48 = vld [vmem:[#allocation17 + $0x30] sm:$0xff] }
 0xb45   :  { %v1988_v49 = vpop.xlane.xlu2 %1987  ;;  %2305 = vmatpush.bf16.msrb.mxu0 %v5539_v48 }
 0xb46   :  { %v1990_v35 = vmul.f32 %v1988_v49, %v6747_v57  ;;  %v5547_v49 = vld [vmem:[#allocation17 + $0x70] sm:$0xff] }
 0xb48   :  { %v6908_v20 = vsub.f32 %v1982_v44, %v1990_v35  ;;  %v5548_v44 = vld [vmem:[#allocation17 + $0x78] sm:$0xff] }
 0xb49   :  { %2318 = vmatpush.bf16.msrb.mxu1 %v5548_v44  ;;  %2306 = vmatpush.bf16.msrb.mxu0 %v5538_v50 }
 0xb4a   :  { %v1994_v61 = vmul.f32 %v6908_v20, %v6908_v20 }
 0xb4c   :  { %1997 = vadd.xlane.f32.xlu1 %v1994_v61 }
 0xb4d   :  { %2319 = vmatpush.bf16.msrb.mxu1 %v5547_v49  ;;  %2307 = vmatpush.bf16.msrb.mxu0 %v5537_v53 }
 0xb51   :  { %2320 = vmatpush.bf16.msrb.mxu1 %v5546_v51  ;;  %2308 = vmatpush.bf16.msrb.mxu0 %v5536_v13 }
 0xb55   :  { %2321 = vmatpush.bf16.msrb.mxu1 %v5545_v54 }
 0xb59   :  { %2322 = vmatpush.bf16.msrb.mxu1 %v5544_v14  ;;  %v5044_v14 = vld [vmem:[%s7467_s27 + $0x138] sm:$0xf] }
 0xb5d   :  { %2323 = vmatpush.bf16.msrb.mxu1 %v5543_v15  ;;  %v5564_v15 = vld [vmem:[%s7467_s27 + $0x13c] sm:$0xf] }
 0xb61   :  { %2324 = vmatpush.bf16.msrb.mxu1 %v5542_v17  ;;  %v5046_v17 = vld [vmem:[%s7467_s27 + $0x144] sm:$0xf0] }
 0xb62   :  { %v5049_v19 = vor.u32 %v5564_v15, %v5046_v17 }
 0xb65   :  { %2325 = vmatpush.bf16.msrb.mxu1 %v5541_v18  ;;  %v5566_v18 = vld [vmem:[%s7467_s27 + $0x148] sm:$0xf0] }
 0xbb7   :  { %v1996_v33 = vpop.xlane.xlu0 %1995 }
 0xbb8   :  { %v1999_v38 = vmul.f32 %v1996_v33, %v6747_v57 }
 0xbba   :  { %v2001_v41 = vadd.f32 1e-05, %v1999_v38 }
 0xbbc   :  { %5768 = vrsqrt.f32 %v2001_v41  ;;  %vm2009_vm15 = vweird.f32 %v2001_v41 }
 0xbbf   :  { %v1998_v45 = vpop.xlane.xlu1 %1997 }
 0xbc0   :  { %v2000_v46 = vmul.f32 %v1998_v45, %v6747_v57 }
 0xbc2   :  { %v5769_v35 = vpop.eup %5768  ;;  %v2002_v61 = vadd.f32 1e-05, %v2000_v46 }
 0xbc3   :  { %v2004_v62 = vmul.f32 %v5769_v35, %v2001_v41  ;;  %vm2010_vm14 = vweird.f32 %v5769_v35 }
 0xbc4   :  { %5770 = vrsqrt.f32 %v2002_v61  ;;  %vm2011_vm6 = vmor %vm2009_vm15, %vm2010_vm14  ;;  %vm2019_vm8 = vweird.f32 %v2002_v61 }
 0xbc5   :  { %v2005_v52 = vmul.f32 %v5769_v35, %v2004_v62 }
 0xbc7   :  { %v2006_v21 = vmul.f32 0.5, %v2005_v52 }
 0xbc9   :  { %v2007_v55 = vsub.f32 1.5, %v2006_v21 }
 0xbca   :  { %v5771_v56 = vpop.eup %5770 }
 0xbcb   :  { %v2008_v58 = vmul.f32 %v5769_v35, %v2007_v55  ;;  %v2014_v59 = vmul.f32 %v5771_v56, %v2002_v61  ;;  %vm2020_vm7 = vweird.f32 %v5771_v56 }
 0xbcc   :  { %vm2021_vm9 = vmor %vm2019_vm8, %vm2020_vm7 }
 0xbcd   :  { %v2015_v60 = vmul.f32 %v5771_v56, %v2014_v59  ;;  %v2012_v63 = vsel %vm2011_vm6, %v5769_v35, %v2008_v58  ;;  %v5068_v58 = vld [vmem:[%s7467_s27 + $0x168] sm:$0xf]  ;;  %v5571_v59 = vld [vmem:[%s7467_s27 + $0x170] sm:$0xf0] }
 0xbce   :  { %v2023_v2 = vmul.f32 %v2012_v63, %v6903_v47  ;;  %v5535_v47 = vld [vmem:[#allocation17 + $0x10] sm:$0xff]  ;;  %v5069_v63 = vor.u32 %v5571_v59, %v5068_v58  ;;  %v5004_v58 = vld [vmem:[%s7467_s27 + $0xe0] sm:$0xf] }
 0xbcf   :  { %v2016_v0 = vmul.f32 0.5, %v2015_v60  ;;  %2309 = vmatpush.bf16.msrb.mxu0 %v5535_v47  ;;  %v5570_v60 = vld [vmem:[%s7467_s27 + $0x16c] sm:$0xf]  ;;  %v5565_v47 = vld [vmem:[%s7467_s27 + $0x140] sm:$0xf0] }
 0xbd0   :  { %v2028_v5 = vmul.f32 %v5682_v4, %v2023_v2  ;;  %v5572_v2 = vld [vmem:[%s7467_s27 + $0x178] sm:$0xf0]  ;;  %2557 = vmatpush.bf16.msra.mxu2 %v5069_v63  ;;  %v5554_v59 = vld [vmem:[%s7467_s27 + $0xe8] sm:$0xf0] }
 0xbd1   :  { %v2017_v1 = vsub.f32 1.5, %v2016_v0  ;;  %v5070_v0 = vld [vmem:[%s7467_s27 + $0x174] sm:$0xf0] }
 0xbd2   :  { %v2033_v9 = vadd.f32 %v5683_v6, %v2028_v5  ;;  %v5567_v5 = vld [vmem:[%s7467_s27 + $0x154] sm:$0xf] }
 0xbd3   :  { %v2018_v23 = vmul.f32 %v5771_v56, %v2017_v1  ;;  %2310 = vmatpush.bf16.msrb.mxu0 %v5534_v16  ;;  %v5076_v1 = vld [vmem:[%s7467_s27 + $0x170] sm:$0xf]  ;;  %v5045_v16 = vor.u32 %v5565_v47, %v5044_v14 }
 0xbd5   :  { %v2022_v29 = vsel %vm2021_vm9, %v5771_v56, %v2018_v23  ;;  %v5077_v23 = vor.u32 %v5572_v2, %v5076_v1  ;;  %v4984_v1 = vld [vmem:[%s7467_s27 + $0xc0] sm:$0xf]  ;;  %v5550_v2 = vld [vmem:[%s7467_s27 + $0xc8] sm:$0xf0] }
 0xbd6   :  { %v2024_v3 = vmul.f32 %v2022_v29, %v6908_v20  ;;  %v5533_v20 = vld [vmem:[#allocation17] sm:$0xff]  ;;  %v5056_v29 = vld [vmem:[%s7467_s27 + $0x150] sm:$0xf] }
 0xbd7   :  { %2311 = vmatpush.bf16.msrb.mxu0 %v5533_v20  ;;  %v5052_v20 = vld [vmem:[%s7467_s27 + $0x140] sm:$0xf] }
 0xbd8   :  { %v2029_v7 = vmul.f32 %v5682_v4, %v2024_v3  ;;  %v5073_v4 = vor.u32 %v5570_v60, %v5070_v0  ;;  %v5568_v3 = vld [vmem:[%s7467_s27 + $0x158] sm:$0xf0]  ;;  %v5005_v0 = vor.u32 %v5554_v59, %v5004_v58 }
 0xbda   :  { %v2034_v10 = vadd.f32 %v5683_v6, %v2029_v7  ;;  %2571 = vmatpush.bf16.msrb.mxu3 %v5073_v4  ;;  %v5057_v6 = vor.u32 %v5568_v3, %v5056_v29  ;;  %v5058_v7 = vld [vmem:[%s7467_s27 + $0x15c] sm:$0xf0]  ;;  %v5549_v4 = vld [vmem:[%s7467_s27 + $0xc4] sm:$0xf]  ;;  %v4985_v29 = vor.u32 %v5550_v2, %v4984_v1  ;;  %v4986_v3 = vld [vmem:[%s7467_s27 + $0xcc] sm:$0xf0] }
 0xbdb   :  { %2585 = vmatpush.bf16.msra.mxu0 %v5077_v23 }
 0xbdc   :  { %v2051_v11 = vpack.c.bf16 %v2034_v10, %v2033_v9  ;;  %2558 = vmatpush.bf16.msra.mxu2 %v5057_v6  ;;  %v5551_v6 = vld [vmem:[%s7467_s27 + $0xd0] sm:$0xf0] }
 0xbde   :  { %2146 = vmatmul.bf16.vlgmr.msrb.gmra.mxu2 %v2051_v11  ;;  %2160 = vmatmul.bf16.vlgmr.msra.gmra.mxu3 %v2051_v11  ;;  %v5061_v11 = vor.u32 %v5567_v5, %v5058_v7  ;;  %v4992_v5 = vld [vmem:[%s7467_s27 + $0xc8] sm:$0xf]  ;;  %v4989_v7 = vor.u32 %v5549_v4, %v4986_v3 }
 0xbe0   :  { %2572 = vmatpush.bf16.msrb.mxu3 %v5061_v11  ;;  %2559 = vmatpush.bf16.msra.mxu2 %v5045_v16 }
 0xbe4   :  { %2573 = vmatpush.bf16.msrb.mxu3 %v5049_v19 }
 0xc61   :  { %v2147_v22 = vpop.f32.mrf.mxu2  ;;  %v2161_v24 = vpop.f32.mrf.mxu3 }
 0xc62   :  { %v2148_v25 = vadd.f32 %v2147_v22, %v2054_v8  ;;  %v2162_v26 = vadd.f32 %v2161_v24, %v2055_v43  ;;  %v5053_v22 = vor.u32 %v5566_v18, %v5052_v20  ;;  %v5032_v24 = vld [vmem:[%s7467_s27 + $0x120] sm:$0xf] }
 0xc64   :  { %v2166_v33 = vmax.f32 %v2148_v25, 0.0  ;;  %v2167_v34 = vmax.f32 %v2162_v26, 0.0  ;;  %v5034_v26 = vld [vmem:[%s7467_s27 + $0x12c] sm:$0xf0] }
 0xc69   :  { %v2149_v27 = vpop.f32.mrf.mxu2  ;;  %v2163_v28 = vpop.f32.mrf.mxu3 }
 0xc6a   :  { %v2150_v31 = vadd.f32 %v2149_v27, %v2054_v8  ;;  %v2164_v32 = vadd.f32 %v2163_v28, %v2055_v43  ;;  %v5562_v8 = vld [vmem:[%s7467_s27 + $0x128] sm:$0xf0]  ;;  %v5561_v43 = vld [vmem:[%s7467_s27 + $0x124] sm:$0xf]  ;;  %v5040_v27 = vld [vmem:[%s7467_s27 + $0x128] sm:$0xf] }
 0xc6b   :  { %v5033_v25 = vor.u32 %v5562_v8, %v5032_v24  ;;  %v5563_v28 = vld [vmem:[%s7467_s27 + $0x130] sm:$0xf0] }
 0xc6c   :  { %v2168_v36 = vmax.f32 %v2150_v31, 0.0  ;;  %v2169_v37 = vmax.f32 %v2164_v32, 0.0  ;;  %v5037_v31 = vor.u32 %v5561_v43, %v5034_v26  ;;  %v5041_v32 = vor.u32 %v5563_v28, %v5040_v27  ;;  %v5685_v27 = vld [vmem:[#allocation20] ss:$0 sm:$0xff] }
 0xc6d   :  { %2560 = vmatpush.bf16.msra.mxu2 %v5033_v25 }
 0xc6e   :  { %v2202_v38 = vpack.c.bf16 %v2168_v36, %v2166_v33  ;;  %v2203_v39 = vpack.c.bf16 %v2169_v37, %v2167_v34  ;;  %2574 = vmatpush.bf16.msrb.mxu3 %v5037_v31  ;;  %v5020_v33 = vld [vmem:[%s7467_s27 + $0x108] sm:$0xf]  ;;  %v5559_v34 = vld [vmem:[%s7467_s27 + $0x110] sm:$0xf0]  ;;  %v5558_v36 = vld [vmem:[%s7467_s27 + $0x10c] sm:$0xf] }
 0xc6f   :  { %v5021_v37 = vor.u32 %v5559_v34, %v5020_v33  ;;  %v5686_v34 = vld [vmem:[#allocation22] ss:$0 sm:$0xff] }
 0xc70   :  { %2312 = vmatmul.bf16.vlgmr.msrb.gmra.mxu0 %v2202_v38  ;;  %2326 = vmatmul.bf16.vlgmr.msrb.gmra.mxu1 %v2203_v39  ;;  %v5022_v38 = vld [vmem:[%s7467_s27 + $0x114] sm:$0xf0]  ;;  %v5028_v39 = vld [vmem:[%s7467_s27 + $0x110] sm:$0xf] }
 0xc71   :  { %2561 = vmatpush.bf16.msra.mxu2 %v5021_v37 }
 0xced   :  { %v2313_v41 = vpop.f32.mrf.mxu0  ;;  %v2327_v42 = vpop.f32.mrf.mxu1 }
 0xcee   :  { %v2314_v44 = vadd.f32 %v5684_v40, %v2313_v41  ;;  %v5025_v41 = vor.u32 %v5558_v36, %v5022_v38 }
 0xcf0   :  { %v2328_v45 = vadd.f32 %v2327_v42, %v2314_v44  ;;  %2575 = vmatpush.bf16.msrb.mxu3 %v5025_v41  ;;  %v5008_v44 = vld [vmem:[%s7467_s27 + $0xf0] sm:$0xf] }
 0xcf2   :  { %v2332_v46 = vadd.f32 %v2328_v45, %v2033_v9  ;;  %v5064_v9 = vld [vmem:[%s7467_s27 + $0x158] sm:$0xf]  ;;  %v5556_v45 = vld [vmem:[%s7467_s27 + $0xf8] sm:$0xf0] }
 0xcf4   :  { %2336 = vadd.xlane.f32.xlu2 %v2332_v46 }
 0xcf5   :  { %v2315_v48 = vpop.f32.mrf.mxu0  ;;  %v2329_v35 = vpop.f32.mrf.mxu1 }
 0xcf6   :  { %v2316_v49 = vadd.f32 %v5684_v40, %v2315_v48  ;;  %v5560_v40 = vld [vmem:[%s7467_s27 + $0x118] sm:$0xf0]  ;;  %v5009_v48 = vor.u32 %v5556_v45, %v5008_v44 }
 0xcf7   :  { %v5029_v42 = vor.u32 %v5560_v40, %v5028_v39 }
 0xcf8   :  { %v2330_v61 = vadd.f32 %v2329_v35, %v2316_v49  ;;  %v5010_v49 = vld [vmem:[%s7467_s27 + $0xfc] sm:$0xf0]  ;;  %v5016_v35 = vld [vmem:[%s7467_s27 + $0xf8] sm:$0xf]  ;;  %2562 = vmatpush.bf16.msra.mxu2 %v5009_v48 }
 0xcfa   :  { %v2333_v62 = vadd.f32 %v2330_v61, %v2034_v10  ;;  %v5569_v10 = vld [vmem:[%s7467_s27 + $0x160] sm:$0xf0] }
 0xcfb   :  { %v5065_v13 = vor.u32 %v5569_v10, %v5064_v9  ;;  %v5557_v61 = vld [vmem:[%s7467_s27 + $0x100] sm:$0xf0]  ;;  %v4993_v9 = vor.u32 %v5551_v6, %v4992_v5 }
 0xcfc   :  { %2338 = vadd.xlane.f32.xlu0 %v2333_v62 }
 0xcfd   :  { %2586 = vmatpush.bf16.msra.mxu0 %v5065_v13 }
 0xd01   :  { %2587 = vmatpush.bf16.msra.mxu0 %v5053_v22 }
 0xd05   :  { %2588 = vmatpush.bf16.msra.mxu0 %v5041_v32 }
 0xd09   :  { %2589 = vmatpush.bf16.msra.mxu0 %v5029_v42 }
 0xd67   :  { %v2337_v50 = vpop.xlane.xlu2 %2336 }
 0xd68   :  { %v2340_v51 = vmul.f32 %v2337_v50, %v6747_v57  ;;  %v5017_v50 = vor.u32 %v5557_v61, %v5016_v35 }
 0xd6a   :  { %v6920_v52 = vsub.f32 %v2332_v46, %v2340_v51  ;;  %v5555_v46 = vld [vmem:[%s7467_s27 + $0xf4] sm:$0xf]  ;;  %2590 = vmatpush.bf16.msra.mxu0 %v5017_v50  ;;  %v4996_v51 = vld [vmem:[%s7467_s27 + $0xd8] sm:$0xf] }
 0xd6c   :  { %v2344_v21 = vmul.f32 %v6920_v52, %v6920_v52 }
 0xd6e   :  { %2346 = vadd.xlane.f32.xlu1 %v2344_v21  ;;  %v5553_v21 = vld [vmem:[%s7467_s27 + $0xe0] sm:$0xf0]  ;;  %2591 = vmatpush.bf16.msra.mxu0 %v5005_v0 }
 0xd6f   :  { %v2339_v53 = vpop.xlane.xlu0 %2338 }
 0xd70   :  { %v2341_v54 = vmul.f32 %v2339_v53, %v6747_v57  ;;  %v5552_v53 = vld [vmem:[%s7467_s27 + $0xdc] sm:$0xf] }
 0xd72   :  { %v6925_v55 = vsub.f32 %v2333_v62, %v2341_v54  ;;  %v5013_v62 = vor.u32 %v5555_v46, %v5010_v49  ;;  %v4997_v54 = vor.u32 %v5553_v21, %v4996_v51  ;;  %2592 = vmatpush.bf16.msra.mxu0 %v4993_v9 }
 0xd74   :  { %v2345_v56 = vmul.f32 %v6925_v55, %v6925_v55  ;;  %2576 = vmatpush.bf16.msrb.mxu3 %v5013_v62  ;;  %2563 = vmatpush.bf16.msra.mxu2 %v4997_v54 }
 0xd76   :  { %2348 = vadd.xlane.f32.xlu2 %v2345_v56  ;;  %v4998_v56 = vld [vmem:[%s7467_s27 + $0xe4] sm:$0xf0] }
 0xd77   :  { %v5001_v63 = vor.u32 %v5552_v53, %v4998_v56 }
 0xd78   :  { %2564 = vmatpush.bf16.msra.mxu2 %v4985_v29 }
 0xd79   :  { %2577 = vmatpush.bf16.msrb.mxu3 %v5001_v63 }
 0xd7d   :  { %2578 = vmatpush.bf16.msrb.mxu3 %v4989_v7 }
 0xde1   :  { %v2347_v60 = vpop.xlane.xlu1 %2346 }
 0xde2   :  { %v2350_v23 = vmul.f32 %v2347_v60, %v6747_v57 }
 0xde4   :  { %v2352_v10 = vadd.f32 1e-05, %v2350_v23 }
 0xde6   :  { %5772 = vrsqrt.f32 %v2352_v10  ;;  %vm2360_vm11 = vweird.f32 %v2352_v10 }
 0xde9   :  { %v2349_v11 = vpop.xlane.xlu2 %2348 }
 0xdea   :  { %v2351_v13 = vmul.f32 %v2349_v11, %v6747_v57 }
 0xdec   :  { %v5773_v14 = vpop.eup %5772  ;;  %v2353_v47 = vadd.f32 1e-05, %v2351_v13 }
 0xded   :  { %v2355_v15 = vmul.f32 %v5773_v14, %v2352_v10  ;;  %vm2361_vm10 = vweird.f32 %v5773_v14 }
 0xdee   :  { %5774 = vrsqrt.f32 %v2353_v47  ;;  %vm2362_vm12 = vmor %vm2360_vm11, %vm2361_vm10  ;;  %vm2370_vm15 = vweird.f32 %v2353_v47 }
 0xdef   :  { %v2356_v16 = vmul.f32 %v5773_v14, %v2355_v15 }
 0xdf1   :  { %v2357_v17 = vmul.f32 0.5, %v2356_v16 }
 0xdf3   :  { %v2358_v20 = vsub.f32 1.5, %v2357_v17 }
 0xdf4   :  { %v5775_v18 = vpop.eup %5774 }
 0xdf5   :  { %v2359_v19 = vmul.f32 %v5773_v14, %v2358_v20  ;;  %v2365_v22 = vmul.f32 %v5775_v18, %v2353_v47  ;;  %vm2371_vm14 = vweird.f32 %v5775_v18 }
 0xdf6   :  { %vm2372_vm6 = vmor %vm2370_vm15, %vm2371_vm14 }
 0xdf7   :  { %v2366_v24 = vmul.f32 %v5775_v18, %v2365_v22  ;;  %v2363_v8 = vsel %vm2362_vm12, %v5773_v14, %v2359_v19 }
 0xdf8   :  { %v2374_v26 = vmul.f32 %v2363_v8, %v6920_v52  ;;  %v7086_v52 = vld [vmem:[%s7469_s21 + $0x3] sm:$0x7] }
 0xdf9   :  { %v2367_v43 = vmul.f32 0.5, %v2366_v24  ;;  %v2423_v42 = vperm.slane %v7086_v52, 0  ;;  %v2424_v44 = vperm.slane %v7086_v52, 1 }
 0xdfa   :  { %v2379_v33 = vmul.f32 %v5685_v27, %v2374_v26 }
 0xdfb   :  { %v2368_v25 = vsub.f32 1.5, %v2367_v43 }
 0xdfc   :  { %v7077_v37 = vadd.f32 %v5686_v34, %v2379_v33 }
 0xdfd   :  { %v2369_v28 = vmul.f32 %v5775_v18, %v2368_v25 }
 0xdff   :  { %v2373_v31 = vsel %vm2372_vm6, %v5775_v18, %v2369_v28 }
 0xe00   :  { %v2375_v32 = vmul.f32 %v2373_v31, %v6925_v55  ;;  %v2425_v55 = vperm.slane %v7086_v52, 2 }
 0xe02   :  { %v2380_v36 = vmul.f32 %v5685_v27, %v2375_v32 }
 0xe04   :  { %v7079_v38 = vadd.f32 %v5686_v34, %v2380_v36 }
 0xe06   :  { %v2419_v39 = vpack.c.bf16 %v7079_v38, %v7077_v37 }
 0xe08   :  { %2565 = vmatmul.bf16.vlgmr.msra.gmra.mxu2 %v2419_v39  ;;  %2579 = vmatmul.bf16.vlgmr.msrb.gmra.mxu3 %v2419_v39 }
 0xe09   :  { %2593 = vmatmul.bf16.vlgmr.msra.gmra.mxu0 %v2419_v39 }
 0xe86   :  { %v2594_v40 = vpop.f32.mrf.mxu0 }
 0xe87   :  { %v2595_v41 = vadd.f32 %v2594_v40, %v2425_v55 }
 0xe89   :  { %v7093_v45 = vpack.c.bf16 %v2595_v41, %v2595_v41 }
 0xe8b   :  { %v2566_v46 = vpop.f32.mrf.mxu2  ;;  %v2580_v48 = vpop.f32.mrf.mxu3  ;;  %v2638_v49 = vsel %vm600_vm1, %v7093_v45, 0 }
 0xe8c   :  { %v2567_v35 = vadd.f32 %v2566_v46, %v2423_v42  ;;  %v2581_v61 = vadd.f32 %v2580_v48, %v2424_v44  ;;  %2647 = vmatpush.bf16.msrb.mxu2 %v2638_v49 }
 0xe8e   :  { %v2599_v62 = vpack.c.bf16 %v2567_v35, %v2567_v35  ;;  %v2600_v50 = vpack.c.bf16 %v2581_v61, %v2581_v61 }
 0xe90   :  { %2721 = vrot.lane.b32.xlu2 %v2600_v50, %s6208_s3  ;;  %2658 = vrot.lane.b32.xlu0 %v2600_v50, %s6224_s0  ;;  %v2605_v51 = vsel %vm324_vm0, %v2600_v50, 0 }
 0xe91   :  { %2655 = vrot.lane.b32.xlu1 %v2599_v62, %s6224_s0  ;;  %2614 = vmatpush.bf16.xpose.msra.mxu1 %v2605_v51 }
 0xe93   :  { %v2582_v21 = vpop.f32.mrf.mxu3  ;;  %v2568_v56 = vpop.f32.mrf.mxu2 }
 0xe94   :  { %v2583_v53 = vadd.f32 %v2582_v21, %v2424_v44  ;;  %v2569_v58 = vadd.f32 %v2568_v56, %v2423_v42 }
 0xe96   :  { %v2844_v54 = vpack.c.bf16 %v2583_v53, %v2583_v53  ;;  %v2843_v59 = vpack.c.bf16 %v2569_v58, %v2569_v58 }
 0xe98   :  { %2902 = vrot.lane.b32.xlu2 %v2844_v54, %s6224_s0  ;;  %2783 = vrot.lane.b32.xlu0 %v2600_v50, %s6225_s22  ;;  %v2849_v0 = vsel %vm324_vm0, %v2844_v54, 0 }
 0xe99   :  { %2719 = vrot.lane.b32.xlu1 %v2599_v62, %s6208_s3  ;;  %5078 = vmatmul.msk.bf16.vlgmr.msra.gmra.mxu1 %vm324_vm0, %v2599_v62 }
 0xea0   :  { %3027 = vrot.lane.b32.xlu2 %v2844_v54, %s6225_s22  ;;  %2781 = vrot.lane.b32.xlu0 %v2599_v62, %s6225_s22 }
 0xea1   :  { %2899 = vrot.lane.b32.xlu1 %v2843_v59, %s6224_s0 }
 0xea8   :  { %2965 = vrot.lane.b32.xlu0 %v2844_v54, %s6208_s3 }
 0xea9   :  { %2963 = vrot.lane.b32.xlu1 %v2843_v59, %s6208_s3 }
 0xeb0   :  { %3025 = vrot.lane.b32.xlu0 %v2843_v59, %s6225_s22 }
 0xeea   :  { %v2722_v60 = vpop.permute.xlu2 %2721 }
 0xeeb   :  { %v2727_v63 = vsel %vm324_vm0, %v2722_v60, 0 }
 0xeec   :  { %2736 = vmatpush.bf16.xpose.msrb.mxu1 %v2727_v63 }
 0xef2   :  { %v2903_v23 = vpop.permute.xlu2 %2902 }
 0xef3   :  { %v2908_v6 = vsel %vm324_vm0, %v2903_v23, 0 }
 0xef4   :  { %2858 = vmatpush.bf16.xpose.msra.mxu1 %v2849_v0 }
 0xefa   :  { %v3028_v11 = vpop.permute.xlu2 %3027 }
 0xefb   :  { %v3033_v47 = vsel %vm324_vm0, %v3028_v11, 0 }
 0xf02   :  { %v2659_v1 = vpop.permute.xlu0 %2658 }
 0xf03   :  { %v2664_v2 = vsel %vm324_vm0, %v2659_v1, 0  ;;  %v2656_v4 = vpop.permute.xlu1 %2655 }
 0xf04   :  { %2673 = vmatpush.bf16.xpose.msra.mxu3 %v2664_v2 }
 0xf0a   :  { %v2784_v29 = vpop.permute.xlu0 %2783 }
 0xf0b   :  { %v2789_v3 = vsel %vm324_vm0, %v2784_v29, 0  ;;  %v2720_v5 = vpop.permute.xlu1 %2719  ;;  %5080 = vmatmul.msk.bf16.vlgmr.msra.gmra.mxu3 %vm324_vm0, %v2656_v4 }
 0xf0c   :  { %5082 = vmatmul.msk.bf16.vlgmr.msrb.gmra.mxu1 %vm324_vm0, %v2720_v5  ;;  %2798 = vmatpush.bf16.xpose.msrb.mxu3 %v2789_v3 }
 0xf12   :  { %v2782_v7 = vpop.permute.xlu0 %2781 }
 0xf13   :  { %v2900_v17 = vpop.permute.xlu1 %2899 }
 0xf14   :  { %2917 = vmatpush.bf16.xpose.msra.mxu3 %v2908_v6 }
 0xf16   :  { %v2616_v9 = vpop.f32.mrf.mxu1 }
 0xf17   :  { %v2620_v10 = vmul.f32 0.17677669, %v2616_v9 }
 0xf19   :  { %v2621_v13 = vsel %vm583_vm2, %v2620_v10, -inf }
 0xf1a   :  { %2622 = vmax.xlane.f32.xlu2 %v2621_v13  ;;  %v2966_v14 = vpop.permute.xlu0 %2965 }
 0xf1b   :  { %v2971_v15 = vsel %vm324_vm0, %v2966_v14, 0  ;;  %5084 = vmatmul.msk.bf16.vlgmr.msrb.gmra.mxu3 %vm324_vm0, %v2782_v7  ;;  %v2964_v20 = vpop.permute.xlu1 %2963 }
 0xf1c   :  { %5086 = vmatmul.msk.bf16.vlgmr.msra.gmra.mxu1 %vm324_vm0, %v2843_v59  ;;  %3042 = vmatpush.bf16.xpose.msrb.mxu3 %v3033_v47 }
 0xf1d   :  { %2980 = vmatpush.bf16.xpose.msrb.mxu1 %v2971_v15 }
 0xf1e   :  { %v2618_v16 = vpop.f32.mrf.mxu1 }
 0xf22   :  { %v3026_v18 = vpop.permute.xlu0 %3025 }
 0xf2b   :  { %5088 = vmatmul.msk.bf16.vlgmr.msra.gmra.mxu3 %vm324_vm0, %v2900_v17 }
 0xf2c   :  { %5090 = vmatmul.msk.bf16.vlgmr.msrb.gmra.mxu1 %vm324_vm0, %v2964_v20 }
 0xf3b   :  { %5092 = vmatmul.msk.bf16.vlgmr.msrb.gmra.mxu3 %vm324_vm0, %v3026_v18 }
 0xf89   :  { %v2738_v19 = vpop.f32.mrf.mxu1 }
 0xf8a   :  { %v2742_v22 = vmul.f32 0.17677669, %v2738_v19 }
 0xf8c   :  { %v2743_v24 = vsel %vm583_vm2, %v2742_v22, -inf }
 0xf8d   :  { %v2623_v8 = vpop.xlane.xlu2 %2622  ;;  %2744 = vmax.xlane.f32.xlu0 %v2743_v24 }
 0xf8e   :  { %v2624_v43 = vsub.f32 %v2620_v10, %v2623_v8  ;;  %v2675_v25 = vpop.f32.mrf.mxu3 }
 0xf8f   :  { %v2679_v26 = vmul.f32 0.17677669, %v2675_v25 }
 0xf90   :  { %v2625_v27 = vmul.f32 1.442695, %v2624_v43 }
 0xf91   :  { %v2740_v28 = vpop.f32.mrf.mxu1  ;;  %v2680_v31 = vsel %vm583_vm2, %v2679_v26, -inf }
 0xf92   :  { %5776 = vpow2.f32 %v2625_v27  ;;  %2681 = vmax.xlane.f32.xlu1 %v2680_v31  ;;  %v2596_v27 = vpop.f32.mrf.mxu0 }
 0xf96   :  { %v2677_v32 = vpop.f32.mrf.mxu3 }
 0xf98   :  { %v5777_v33 = vpop.eup %5776 }
 0xf99   :  { %v2860_v34 = vpop.f32.mrf.mxu1  ;;  %v2627_v36 = vsel %vm583_vm2, %v5777_v33, 0.0 }
 0xf9a   :  { %2628 = vadd.xlane.f32.xlu1 %v2627_v36  ;;  %v2864_v39 = vmul.f32 0.17677669, %v2860_v34 }
 0xf9c   :  { %v2865_v46 = vsel %vm583_vm2, %v2864_v39, -inf }
 0xf9e   :  { %v2800_v40 = vpop.f32.mrf.mxu3 }
 0xf9f   :  { %v2804_v41 = vmul.f32 0.17677669, %v2800_v40 }
 0xfa1   :  { %v2862_v42 = vpop.f32.mrf.mxu1  ;;  %v2805_v44 = vsel %vm583_vm2, %v2804_v41, -inf }
 0xfa2   :  { %2806 = vmax.xlane.f32.xlu2 %v2805_v44  ;;  %2866 = vmax.xlane.f32.xlu1 %v2865_v46 }
 0xfa6   :  { %v2802_v48 = vpop.f32.mrf.mxu3 }
 0xfa9   :  { %v2982_v49 = vpop.f32.mrf.mxu1 }
 0xfaa   :  { %v7131_v35 = vmul.f32 0.17677669, %v2982_v49 }
 0xfac   :  { %v2987_v61 = vsel %vm583_vm2, %v7131_v35, -inf }
 0xfad   :  { %2988 = vmax.xlane.f32.xlu2 %v2987_v61 }
 0xfae   :  { %v2919_v62 = vpop.f32.mrf.mxu3 }
 0xfaf   :  { %v2923_v50 = vmul.f32 0.17677669, %v2919_v62 }
 0xfb1   :  { %v2984_v51 = vpop.f32.mrf.mxu1  ;;  %v2924_v21 = vsel %vm583_vm2, %v2923_v50, -inf }
 0xfb2   :  { %2925 = vmax.xlane.f32.xlu0 %v2924_v21 }
 0xfb6   :  { %v2921_v53 = vpop.f32.mrf.mxu3 }
 0xfbb   :  { %2693 = vrot.lane.b32.xlu1 %v7093_v45, %s6224_s0 }
 0xfbe   :  { %v3044_v54 = vpop.f32.mrf.mxu3 }
 0xfbf   :  { %v7142_v58 = vmul.f32 0.17677669, %v3044_v54 }
 0xfc1   :  { %v3049_v59 = vsel %vm583_vm2, %v7142_v58, -inf }
 0xfc5   :  { %2817 = vrot.lane.b32.xlu2 %v7093_v45, %s6225_s22 }
 0xfc6   :  { %v3046_v56 = vpop.f32.mrf.mxu3  ;;  %2755 = vrot.lane.b32.xlu0 %v7093_v45, %s6208_s3 }
 0xff0   :  { %3050 = vmax.xlane.f32.xlu0 %v3049_v59 }
0x1000   :  { %v2745_v60 = vpop.xlane.xlu0 %2744 }
0x1001   :  { %v2746_v63 = vsub.f32 %v2742_v22, %v2745_v60 }
0x1003   :  { %v2747_v0 = vmul.f32 1.442695, %v2746_v63 }
0x1005   :  { %5778 = vpow2.f32 %v2747_v0  ;;  %v2682_v1 = vpop.xlane.xlu1 %2681 }
0x1006   :  { %v2683_v2 = vsub.f32 %v2679_v26, %v2682_v1 }
0x1008   :  { %v2684_v4 = vmul.f32 1.442695, %v2683_v2 }
0x100a   :  { %5780 = vpow2.f32 %v2684_v4 }
0x100b   :  { %v7146_v23 = vpop.eup %5778 }
0x100c   :  { %v2749_v29 = vsel %vm583_vm2, %v7146_v23, 0.0 }
0x100d   :  { %2750 = vadd.xlane.f32.xlu0 %v2749_v29  ;;  %v2629_v45 = vpop.xlane.xlu1 %2628 }
0x100e   :  { %5782 = vrcp.f32 %v2629_v45 }
0x1010   :  { %v7150_v3 = vpop.eup %5780 }
0x1011   :  { %v2686_v5 = vsel %vm583_vm2, %v7150_v3, 0.0 }
0x1012   :  { %2687 = vadd.xlane.f32.xlu2 %v2686_v5 }
0x1014   :  { %v5783_v6 = vpop.eup %5782 }
0x1015   :  { %v2631_v7 = vmul.f32 %v5783_v6, %v5777_v33  ;;  %v2807_v9 = vpop.xlane.xlu2 %2806  ;;  %v2867_v10 = vpop.xlane.xlu1 %2866  ;;  %v2597_v33 = vadd.f32 %v2596_v27, %v2425_v55 }
0x1016   :  { %v2808_v11 = vsub.f32 %v2804_v41, %v2807_v9  ;;  %v2868_v13 = vsub.f32 %v2864_v39, %v2867_v10 }
0x1017   :  { %v2632_v14 = vpack.c.bf16 %v2631_v7, %v2631_v7  ;;  %v2877_v34 = vpack.c.bf16 %v2597_v33, %v2597_v33 }
0x1018   :  { %v2809_v47 = vmul.f32 1.442695, %v2808_v11  ;;  %v2869_v15 = vmul.f32 1.442695, %v2868_v13 }
0x1019   :  { %5079 = vmatmul.msk.bf16.vlgmr.msrb.gmra.mxu2 %vm583_vm2, %v2632_v14  ;;  %v2882_v40 = vsel %vm600_vm1, %v2877_v34, 0 }
0x101a   :  { %5784 = vpow2.f32 %v2809_v47 }
0x101b   :  { %5786 = vpow2.f32 %v2869_v15 }
0x1020   :  { %v7155_v16 = vpop.eup %5784  ;;  %v2989_v18 = vpop.xlane.xlu2 %2988 }
0x1021   :  { %v7157_v17 = vpop.eup %5786  ;;  %v2811_v20 = vsel %vm583_vm2, %v7155_v16, 0.0  ;;  %v2990_v41 = vsub.f32 %v7131_v35, %v2989_v18 }
0x1022   :  { %v2871_v19 = vsel %vm583_vm2, %v7157_v17, 0.0  ;;  %2812 = vadd.xlane.f32.xlu2 %v2811_v20 }
0x1023   :  { %2872 = vadd.xlane.f32.xlu1 %v2871_v19  ;;  %v2991_v42 = vmul.f32 1.442695, %v2990_v41 }
0x1025   :  { %v2926_v22 = vpop.xlane.xlu0 %2925 }
0x1026   :  { %v2927_v24 = vsub.f32 %v2923_v50, %v2926_v22 }
0x1028   :  { %v2928_v8 = vmul.f32 1.442695, %v2927_v24  ;;  %v2818_v43 = vpop.permute.xlu2 %2817 }
0x1029   :  { %v2823_v28 = vsel %vm600_vm1, %v2818_v43, 0 }
0x102a   :  { %5788 = vpow2.f32 %v2928_v8 }
0x102b   :  { %5790 = vpow2.f32 %v2991_v42 }
0x102d   :  { %v2694_v25 = vpop.permute.xlu1 %2693 }
0x102e   :  { %v2699_v26 = vsel %vm600_vm1, %v2694_v25, 0 }
0x102f   :  { %2708 = vmatpush.bf16.msrb.mxu0 %v2699_v26 }
0x1030   :  { %v5789_v31 = vpop.eup %5788 }
0x1031   :  { %v2930_v32 = vsel %vm583_vm2, %v5789_v31, 0.0  ;;  %v5791_v44 = vpop.eup %5790 }
0x1032   :  { %2931 = vadd.xlane.f32.xlu0 %v2930_v32  ;;  %v2993_v52 = vsel %vm583_vm2, %v5791_v44, 0.0 }
0x1033   :  { %2832 = vmatpush.bf16.msra.mxu0 %v2823_v28 }
0x1038   :  { %v2756_v36 = vpop.permute.xlu0 %2755 }
0x1039   :  { %v2761_v39 = vsel %vm600_vm1, %v2756_v36, 0 }
0x103a   :  { %2770 = vmatpush.bf16.msra.mxu2 %v2761_v39  ;;  %2937 = vrot.lane.b32.xlu2 %v2877_v34, %s6224_s0 }
0x103e   :  { %2891 = vmatpush.bf16.msrb.mxu2 %v2882_v40 }
0x1046   :  { %2999 = vrot.lane.b32.xlu0 %v2877_v34, %s6208_s3 }
0x1063   :  { %v3051_v55 = vpop.xlane.xlu0 %3050  ;;  %2994 = vadd.xlane.f32.xlu2 %v2993_v52 }
0x1064   :  { %v3052_v46 = vsub.f32 %v7142_v58, %v3051_v55  ;;  %v5580_v55 = vld [vmem:[%s7470_s5 + $0x78] sm:$0xff] }
0x1065   :  { %3160 = vmatpush.bf16.msra.mxu1 %v5580_v55 }
0x1066   :  { %v3053_v48 = vmul.f32 1.442695, %v3052_v46  ;;  %v5579_v46 = vld [vmem:[%s7470_s5 + $0x70] sm:$0xff] }
0x1068   :  { %5792 = vpow2.f32 %v3053_v48  ;;  %v5578_v48 = vld [vmem:[%s7470_s5 + $0x68] sm:$0xff] }
0x1069   :  { %3161 = vmatpush.bf16.msra.mxu1 %v5579_v46  ;;  %v5581_v46 = vld [vmem:[#allocation8 + $0x40] sm:$0xff] }
0x106d   :  { %3162 = vmatpush.bf16.msra.mxu1 %v5578_v48 }
0x106e   :  { %v5793_v49 = vpop.eup %5792 }
0x106f   :  { %v3055_v61 = vsel %vm583_vm2, %v5793_v49, 0.0 }
0x1070   :  { %3056 = vadd.xlane.f32.xlu1 %v3055_v61  ;;  %v5576_v61 = vld [vmem:[%s7470_s5 + $0x58] sm:$0xff] }
0x1080   :  { %v2751_v62 = vpop.xlane.xlu0 %2750 }
0x1081   :  { %5794 = vrcp.f32 %v2751_v62  ;;  %v5575_v62 = vld [vmem:[%s7470_s5 + $0x50] sm:$0xff] }
0x1085   :  { %v2688_v50 = vpop.xlane.xlu2 %2687 }
0x1086   :  { %5796 = vrcp.f32 %v2688_v50  ;;  %v5574_v50 = vld [vmem:[%s7470_s5 + $0x48] sm:$0xff] }
0x1087   :  { %v5795_v35 = vpop.eup %5794 }
0x1088   :  { %v2753_v51 = vmul.f32 %v5795_v35, %v7146_v23  ;;  %v5573_v35 = vld [vmem:[%s7470_s5 + $0x40] sm:$0xff] }
0x1089   :  { %3061 = vrot.lane.b32.xlu1 %v2877_v34, %s6225_s22 }
0x108a   :  { %v2754_v21 = vpack.c.bf16 %v2753_v51, %v2753_v51 }
0x108c   :  { %v5797_v53 = vpop.eup %5796  ;;  %5083 = vmatmul.msk.bf16.vlgmr.msra.gmra.mxu2 %vm583_vm2, %v2754_v21 }
0x108d   :  { %v2690_v54 = vmul.f32 %v5797_v53, %v7150_v3 }
0x108f   :  { %v2691_v56 = vpack.c.bf16 %v2690_v54, %v2690_v54 }
0x1091   :  { %5081 = vmatmul.msk.bf16.vlgmr.msrb.gmra.mxu0 %vm583_vm2, %v2691_v56 }
0x1095   :  { %v2813_v58 = vpop.xlane.xlu2 %2812 }
0x1096   :  { %v2873_v59 = vpop.xlane.xlu1 %2872  ;;  %5798 = vrcp.f32 %v2813_v58  ;;  %v5687_v58 = vld [vmem:[%s7471_s1 + $0x1] ss:$0 sm:$0xff] }
0x1097   :  { %5800 = vrcp.f32 %v2873_v59 }
0x109c   :  { %v5799_v60 = vpop.eup %5798  ;;  %v2649_v63 = vpop.f32.mrf.mxu2 }
0x109d   :  { %v5801_v0 = vpop.eup %5800  ;;  %v2815_v1 = vmul.f32 %v5799_v60, %v7155_v16  ;;  %2653 = vst.msk [vmem:[#allocation2] sm:$0xff] %vm324_vm0, %v2649_v63  ;;  %v2938_v2 = vpop.permute.xlu2 %2937 }
0x109e   :  { %v2875_v4 = vmul.f32 %v5801_v0, %v7157_v17  ;;  %v2943_v23 = vsel %vm600_vm1, %v2938_v2, 0 }
0x109f   :  { %v2816_v29 = vpack.c.bf16 %v2815_v1, %v2815_v1  ;;  %2952 = vmatpush.bf16.msrb.mxu0 %v2943_v23  ;;  %v5604_v23 = vld [vmem:[#allocation10 + $0xf4] sm:$0xf0] }
0x10a0   :  { %v2876_v45 = vpack.c.bf16 %v2875_v4, %v2875_v4  ;;  %v5235_v4 = vld [vmem:[#allocation10 + $0xf0] sm:$0xf] }
0x10a1   :  { %5085 = vmatmul.msk.bf16.vlgmr.msra.gmra.mxu0 %vm583_vm2, %v2816_v29  ;;  %v5227_v29 = vld [vmem:[#allocation10 + $0xe0] sm:$0xf] }
0x10a2   :  { %5087 = vmatmul.msk.bf16.vlgmr.msrb.gmra.mxu2 %vm583_vm2, %v2876_v45  ;;  %v5236_v45 = vor.u32 %v5604_v23, %v5235_v4 }
0x10a4   :  { %v2651_v3 = vpop.f32.mrf.mxu2  ;;  %3419 = vmatpush.bf16.msra.mxu3 %v5236_v45 }
0x10a5   :  { %v2932_v5 = vpop.xlane.xlu0 %2931  ;;  %v5602_v3 = vld [vmem:[#allocation10 + $0xe4] sm:$0xf0] }
0x10a6   :  { %5802 = vrcp.f32 %v2932_v5  ;;  %v5228_v5 = vor.u32 %v5602_v3, %v5227_v29  ;;  %v5689_v3 = vld [vmem:[#allocation7 + $0x1] ss:$0 sm:$0xff] }
0x10a8   :  { %3420 = vmatpush.bf16.msra.mxu3 %v5228_v5 }
0x10ac   :  { %v5803_v6 = vpop.eup %5802 }
0x10ad   :  { %v2934_v7 = vmul.f32 %v5803_v6, %v5789_v31  ;;  %v5219_v6 = vld [vmem:[#allocation10 + $0xd0] sm:$0xf] }
0x10af   :  { %v2935_v9 = vpack.c.bf16 %v2934_v7, %v2934_v7  ;;  %v5600_v7 = vld [vmem:[#allocation10 + $0xd4] sm:$0xf0] }
0x10b1   :  { %5089 = vmatmul.msk.bf16.vlgmr.msrb.gmra.mxu0 %vm583_vm2, %v2935_v9  ;;  %v5220_v9 = vor.u32 %v5600_v7, %v5219_v6 }
0x10b3   :  { %3421 = vmatpush.bf16.msra.mxu3 %v5220_v9 }
0x10b8   :  { %v3000_v10 = vpop.permute.xlu0 %2999 }
0x10b9   :  { %v3005_v11 = vsel %vm600_vm1, %v3000_v10, 0  ;;  %v5211_v10 = vld [vmem:[#allocation10 + $0xc0] sm:$0xf] }
0x10ba   :  { %3014 = vmatpush.bf16.msra.mxu2 %v3005_v11  ;;  %v5598_v11 = vld [vmem:[#allocation10 + $0xc4] sm:$0xf0] }
0x10d6   :  { %v2995_v13 = vpop.xlane.xlu2 %2994 }
0x10d7   :  { %5804 = vrcp.f32 %v2995_v13  ;;  %v5203_v13 = vld [vmem:[#allocation10 + $0xb0] sm:$0xf] }
0x10dd   :  { %v5805_v14 = vpop.eup %5804 }
0x10de   :  { %v2997_v47 = vmul.f32 %v5805_v14, %v5791_v44  ;;  %v5596_v14 = vld [vmem:[#allocation10 + $0xb4] sm:$0xf0] }
0x10e0   :  { %v2998_v15 = vpack.c.bf16 %v2997_v47, %v2997_v47  ;;  %v5195_v47 = vld [vmem:[#allocation10 + $0xa0] sm:$0xf] }
0x10e2   :  { %5091 = vmatmul.msk.bf16.vlgmr.msra.gmra.mxu2 %vm583_vm2, %v2998_v15  ;;  %v5594_v15 = vld [vmem:[#allocation10 + $0xa4] sm:$0xf0] }
0x10e3   :  { %v3057_v16 = vpop.xlane.xlu1 %3056 }
0x10e4   :  { %5806 = vrcp.f32 %v3057_v16 }
0x10ea   :  { %v5807_v17 = vpop.eup %5806 }
0x10eb   :  { %v3059_v20 = vmul.f32 %v5807_v17, %v5793_v49  ;;  %v5577_v49 = vld [vmem:[%s7470_s5 + $0x60] sm:$0xff] }
0x10ec   :  { %3163 = vmatpush.bf16.msra.mxu1 %v5577_v49 }
0x10ed   :  { %v3060_v22 = vpack.c.bf16 %v3059_v20, %v3059_v20  ;;  %v5196_v20 = vor.u32 %v5594_v15, %v5195_v47 }
0x10f0   :  { %3164 = vmatpush.bf16.msra.mxu1 %v5576_v61 }
0x10f4   :  { %3165 = vmatpush.bf16.msra.mxu1 %v5575_v62 }
0x10f8   :  { %3166 = vmatpush.bf16.msra.mxu1 %v5574_v50 }
0x10fb   :  { %v3062_v18 = vpop.permute.xlu1 %3061 }
0x10fc   :  { %v3067_v19 = vsel %vm600_vm1, %v3062_v18, 0  ;;  %3167 = vmatpush.bf16.msra.mxu1 %v5573_v35 }
0x10fd   :  { %3076 = vmatpush.bf16.msra.mxu0 %v3067_v19  ;;  %v5187_v19 = vld [vmem:[#allocation10 + $0x90] sm:$0xf] }
0x1100   :  { %5093 = vmatmul.msk.bf16.vlgmr.msra.gmra.mxu0 %vm583_vm2, %v3060_v22  ;;  %v5592_v22 = vld [vmem:[#allocation10 + $0x94] sm:$0xf0] }
0x110e   :  { %v2710_v24 = vpop.f32.mrf.mxu0 }
0x110f   :  { %v2772_v8 = vpop.f32.mrf.mxu2  ;;  %2715 = vrot.lane.b32.xlu2 %v2710_v24, %s6225_s22 }
0x1110   :  { %2777 = vrot.lane.b32.xlu0 %v2772_v8, %s6208_s3  ;;  %v5188_v8 = vor.u32 %v5592_v22, %v5187_v19  ;;  %v5690_v19 = vld [vmem:[%s7420_s12 + $0x1] ss:$0 sm:$0xff] }
0x1116   :  { %v2712_v43 = vpop.f32.mrf.mxu0 }
0x1117   :  { %v2774_v25 = vpop.f32.mrf.mxu2  ;;  %v5179_v43 = vld [vmem:[#allocation10 + $0x80] sm:$0xf] }
0x1118   :  { %v5590_v25 = vld [vmem:[#allocation10 + $0x84] sm:$0xf0] }
0x111e   :  { %v2834_v26 = vpop.f32.mrf.mxu0 }
0x1125   :  { %v2893_v27 = vpop.f32.mrf.mxu2 }
0x1126   :  { %2897 = vst.msk [vmem:[#allocation2 + $0x8] sm:$0xff] %vm324_vm0, %v2893_v27  ;;  %v2836_v28 = vpop.f32.mrf.mxu0 }
0x1127   :  { %v5180_v28 = vor.u32 %v5590_v25, %v5179_v43 }
0x112d   :  { %v2895_v31 = vpop.f32.mrf.mxu2 }
0x112e   :  { %v2954_v32 = vpop.f32.mrf.mxu0 }
0x112f   :  { %2959 = vrot.lane.b32.xlu0 %v2954_v32, %s6225_s22 }
0x1136   :  { %v2956_v33 = vpop.f32.mrf.mxu0 }
0x1137   :  { %2839 = vrot.lane.b32.xlu0 %v2834_v26, %s6224_s0  ;;  %v5588_v33 = vld [vmem:[#allocation8 + $0x78] sm:$0xff] }
0x1138   :  { %3301 = vmatpush.bf16.msrb.mxu2 %v5588_v33 }
0x1165   :  { %v3016_v34 = vpop.f32.mrf.mxu2 }
0x1166   :  { %3021 = vrot.lane.b32.xlu1 %v3016_v34, %s6208_s3  ;;  %v5587_v34 = vld [vmem:[#allocation8 + $0x70] sm:$0xff] }
0x1167   :  { %3302 = vmatpush.bf16.msrb.mxu2 %v5587_v34 }
0x1169   :  { %v2716_v36 = vpop.permute.xlu2 %2715 }
0x116a   :  { %2718 = vst.msk [vmem:[#allocation2] sm:$0xff] %vm682_vm3, %v2716_v36  ;;  %v5586_v36 = vld [vmem:[#allocation8 + $0x68] sm:$0xff] }
0x116b   :  { %3303 = vmatpush.bf16.msrb.mxu2 %v5586_v36  ;;  %v5603_v36 = vld [vmem:[#allocation10 + $0xf4] sm:$0xf] }
0x116d   :  { %v3018_v39 = vpop.f32.mrf.mxu2 }
0x116e   :  { %v5585_v39 = vld [vmem:[#allocation8 + $0x60] sm:$0xff] }
0x116f   :  { %3304 = vmatpush.bf16.msrb.mxu2 %v5585_v39  ;;  %v5237_v39 = vld [vmem:[#allocation10 + $0xf8] sm:$0xf0] }
0x117d   :  { %v3078_v40 = vpop.f32.mrf.mxu0 }
0x117e   :  { %3083 = vrot.lane.b32.xlu1 %v3078_v40, %s6224_s0  ;;  %v5584_v40 = vld [vmem:[#allocation8 + $0x58] sm:$0xff] }
0x117f   :  { %3305 = vmatpush.bf16.msrb.mxu2 %v5584_v40  ;;  %v5240_v40 = vor.u32 %v5603_v36, %v5237_v39 }
0x1181   :  { %3438 = vmatpush.bf16.msrb.mxu0 %v5240_v40 }
0x1182   :  { %v2778_v41 = vpop.permute.xlu0 %2777 }
0x1183   :  { %2780 = vst.msk [vmem:[#allocation2] sm:$0xff] %vm745_vm4, %v2778_v41  ;;  %v5583_v41 = vld [vmem:[#allocation8 + $0x50] sm:$0xff] }
0x1184   :  { %3306 = vmatpush.bf16.msrb.mxu2 %v5583_v41  ;;  %v5601_v41 = vld [vmem:[#allocation10 + $0xe4] sm:$0xf] }
0x1185   :  { %v3080_v42 = vpop.f32.mrf.mxu0 }
0x1186   :  { %v5582_v42 = vld [vmem:[#allocation8 + $0x48] sm:$0xff] }
0x1188   :  { %3307 = vmatpush.bf16.msrb.mxu2 %v5582_v42  ;;  %v5229_v42 = vld [vmem:[#allocation10 + $0xe8] sm:$0xf0] }
0x118c   :  { %3308 = vmatpush.bf16.msrb.mxu2 %v5581_v46 }
0x11a1   :  { %v2960_v44 = vpop.permute.xlu0 %2959 }
0x11a2   :  { %2962 = vst.msk [vmem:[#allocation2 + $0x8] sm:$0xff] %vm682_vm3, %v2960_v44 }
0x11a9   :  { %v2840_v52 = vpop.permute.xlu0 %2839 }
0x11aa   :  { %2842 = vst.msk [vmem:[#allocation2] sm:$0xff] %vm808_vm5, %v2840_v52 }
0x11b1   :  { %v3087_v53 = vld [vmem:[#allocation2] sm:$0xff] }
0x11d8   :  { %v3022_v51 = vpop.permute.xlu1 %3021 }
0x11d9   :  { %3024 = vst.msk [vmem:[#allocation2 + $0x8] sm:$0xff] %vm745_vm4, %v3022_v51 }
0x11f0   :  { %v3084_v21 = vpop.permute.xlu1 %3083 }
0x11f1   :  { %3086 = vst.msk [vmem:[#allocation2 + $0x8] sm:$0xff] %vm808_vm5, %v3084_v21 }
0x11f8   :  { %v3088_v54 = vld [vmem:[#allocation2 + $0x8] sm:$0xff] }
0x11f9   :  { %v3106_v56 = vpack.c.bf16 %v3088_v54, %v3087_v53 }
0x11fb   :  { %3168 = vmatmul.bf16.vlgmr.msra.gmra.mxu1 %v3106_v56 }
0x1278   :  { %v3169_v59 = vpop.f32.mrf.mxu1 }
0x1279   :  { %v3170_v60 = vadd.f32 %v5687_v58, %v3169_v59 }
0x127b   :  { %v3174_v63 = vadd.f32 %v3170_v60, %v7077_v37  ;;  %v5212_v37 = vor.u32 %v5598_v11, %v5211_v10 }
0x127d   :  { %3180 = vadd.xlane.f32.xlu2 %v3174_v63  ;;  %3422 = vmatpush.bf16.msra.mxu3 %v5212_v37 }
0x1280   :  { %v3171_v0 = vpop.f32.mrf.mxu1 }
0x1281   :  { %v3172_v1 = vadd.f32 %v5687_v58, %v3171_v0  ;;  %v7243_v0 = vld [vmem:[%s7422_s14 + $0x2] sm:$0x3] }
0x1282   :  { %v3335_v29 = vperm.slane %v7243_v0, 0  ;;  %v3336_v36 = vperm.slane %v7243_v0, 1 }
0x1283   :  { %v3175_v2 = vadd.f32 %v3172_v1, %v7079_v38  ;;  %v5204_v38 = vor.u32 %v5596_v14, %v5203_v13 }
0x1285   :  { %3182 = vadd.xlane.f32.xlu0 %v3175_v2  ;;  %3423 = vmatpush.bf16.msra.mxu3 %v5204_v38 }
0x1289   :  { %3424 = vmatpush.bf16.msra.mxu3 %v5196_v20 }
0x128d   :  { %3425 = vmatpush.bf16.msra.mxu3 %v5188_v8 }
0x1291   :  { %3426 = vmatpush.bf16.msra.mxu3 %v5180_v28 }
0x1294   :  { %3427 = vmatmul.bf16.vlgmr.msra.gmra.mxu3 %v6765_v12 }
0x12a4   :  { %3432 = vmatmul.bf16.gmra.mxu3 %v6775_v30 }
0x12f0   :  { %v3181_v16 = vpop.xlane.xlu2 %3180 }
0x12f1   :  { %v3184_v17 = vmul.f32 %v3181_v16, %v6747_v57 }
0x12f3   :  { %v3186_v18 = vsub.f32 %v3174_v63, %v3184_v17 }
0x12f5   :  { %v3188_v24 = vmul.f32 %v3186_v18, %v3186_v18 }
0x12f7   :  { %3190 = vadd.xlane.f32.xlu1 %v3188_v24 }
0x12f8   :  { %v3183_v26 = vpop.xlane.xlu0 %3182 }
0x12f9   :  { %v3185_v27 = vmul.f32 %v3183_v26, %v6747_v57 }
0x12fb   :  { %v3187_v31 = vsub.f32 %v3175_v2, %v3185_v27  ;;  %v5688_v2 = vld [vmem:[#allocation5 + $0x1] ss:$0 sm:$0xff] }
0x12fd   :  { %v3189_v32 = vmul.f32 %v3187_v31, %v3187_v31 }
0x12ff   :  { %3192 = vadd.xlane.f32.xlu2 %v3189_v32 }
0x1317   :  { %v3428_v1 = vpop.f32.mrf.mxu3 }
0x1318   :  { %v3429_v9 = vadd.f32 %v3428_v1, %v3335_v29  ;;  %v5181_v1 = vld [vmem:[#allocation10 + $0x88] sm:$0xf0] }
0x131f   :  { %v3430_v10 = vpop.f32.mrf.mxu3 }
0x1320   :  { %v3431_v13 = vadd.f32 %v3430_v10, %v3335_v29 }
0x1322   :  { %v3458_v38 = vpack.c.bf16 %v3431_v13, %v3429_v9 }
0x1324   :  { %3574 = vrot.lane.b32.xlu1 %v3458_v38, %s6208_s3  ;;  %v3463_v47 = vsel %vm324_vm0, %v3458_v38, 0  ;;  %3513 = vrot.lane.b32.xlu2 %v3458_v38, %s6224_s0 }
0x1325   :  { %3472 = vmatpush.bf16.xpose.msrb.mxu1 %v3463_v47 }
0x1327   :  { %v3433_v15 = vpop.f32.mrf.mxu3 }
0x1328   :  { %v3434_v17 = vadd.f32 %v3433_v15, %v3335_v29 }
0x132f   :  { %v3435_v16 = vpop.f32.mrf.mxu3 }
0x1330   :  { %v3436_v20 = vadd.f32 %v3435_v16, %v3335_v29 }
0x136a   :  { %v3191_v44 = vpop.xlane.xlu1 %3190 }
0x136b   :  { %v3194_v52 = vmul.f32 %v3191_v44, %v6747_v57  ;;  %v5232_v44 = vor.u32 %v5601_v41, %v5229_v42 }
0x136d   :  { %v3196_v55 = vadd.f32 1e-05, %v3194_v52  ;;  %3439 = vmatpush.bf16.msrb.mxu0 %v5232_v44  ;;  %v5599_v52 = vld [vmem:[#allocation10 + $0xd4] sm:$0xf] }
0x136f   :  { %5808 = vrsqrt.f32 %v3196_v55  ;;  %vm3204_vm2 = vweird.f32 %v3196_v55 }
0x1372   :  { %v3193_v48 = vpop.xlane.xlu2 %3192 }
0x1373   :  { %v3195_v49 = vmul.f32 %v3193_v48, %v6747_v57  ;;  %v5597_v48 = vld [vmem:[#allocation10 + $0xc4] sm:$0xf] }
0x1375   :  { %v5809_v61 = vpop.eup %5808  ;;  %v3197_v62 = vadd.f32 1e-05, %v3195_v49  ;;  %v5213_v49 = vld [vmem:[#allocation10 + $0xc8] sm:$0xf0] }
0x1376   :  { %v3199_v50 = vmul.f32 %v5809_v61, %v3196_v55  ;;  %vm3205_vm1 = vweird.f32 %v5809_v61  ;;  %v5221_v55 = vld [vmem:[#allocation10 + $0xd8] sm:$0xf0] }
0x1377   :  { %5810 = vrsqrt.f32 %v3197_v62  ;;  %vm3206_vm7 = vmor %vm3204_vm2, %vm3205_vm1  ;;  %vm3214_vm9 = vweird.f32 %v3197_v62  ;;  %v5224_v46 = vor.u32 %v5599_v52, %v5221_v55 }
0x1378   :  { %v3200_v35 = vmul.f32 %v5809_v61, %v3199_v50  ;;  %v5205_v50 = vld [vmem:[#allocation10 + $0xb8] sm:$0xf0] }
0x1379   :  { %3440 = vmatpush.bf16.msrb.mxu0 %v5224_v46 }
0x137a   :  { %v3201_v51 = vmul.f32 0.5, %v3200_v35 }
0x137c   :  { %v3202_v21 = vsub.f32 1.5, %v3201_v51  ;;  %v5593_v51 = vld [vmem:[#allocation10 + $0xa4] sm:$0xf] }
0x137d   :  { %v5811_v53 = vpop.eup %5810 }
0x137e   :  { %v3203_v54 = vmul.f32 %v5809_v61, %v3202_v21  ;;  %v3209_v56 = vmul.f32 %v5811_v53, %v3197_v62  ;;  %vm3215_vm8 = vweird.f32 %v5811_v53  ;;  %v3514_v8 = vpop.permute.xlu2 %3513  ;;  %v5595_v62 = vld [vmem:[#allocation10 + $0xb4] sm:$0xf]  ;;  %v5197_v21 = vld [vmem:[#allocation10 + $0xa8] sm:$0xf0] }
0x137f   :  { %vm3216_vm10 = vmor %vm3214_vm9, %vm3215_vm8  ;;  %v3519_v25 = vsel %vm324_vm0, %v3514_v8, 0  ;;  %v5208_v35 = vor.u32 %v5595_v62, %v5205_v50 }
0x1380   :  { %v3210_v58 = vmul.f32 %v5811_v53, %v3209_v56  ;;  %v3207_v59 = vsel %vm3206_vm7, %v5809_v61, %v3203_v54  ;;  %3528 = vmatpush.bf16.xpose.msra.mxu1 %v3519_v25  ;;  %v5216_v61 = vor.u32 %v5597_v48, %v5213_v49 }
0x1381   :  { %v3218_v4 = vmul.f32 %v3207_v59, %v3186_v18  ;;  %v3693_v18 = vpack.c.bf16 %v3436_v20, %v3434_v17  ;;  %v5189_v59 = vld [vmem:[#allocation10 + $0x98] sm:$0xf0] }
0x1382   :  { %v3211_v60 = vmul.f32 0.5, %v3210_v58  ;;  %3441 = vmatpush.bf16.msrb.mxu0 %v5216_v61  ;;  %v5591_v58 = vld [vmem:[#allocation10 + $0x94] sm:$0xf] }
0x1383   :  { %v3223_v5 = vmul.f32 %v5688_v2, %v3218_v4  ;;  %v3698_v24 = vsel %vm324_vm0, %v3693_v18, 0 }
0x1384   :  { %v3212_v63 = vsub.f32 1.5, %v3211_v60  ;;  %v5192_v60 = vor.u32 %v5591_v58, %v5189_v59 }
0x1385   :  { %v7246_v11 = vadd.f32 %v5689_v3, %v3223_v5 }
0x1386   :  { %v3213_v23 = vmul.f32 %v5811_v53, %v3212_v63  ;;  %3442 = vmatpush.bf16.msrb.mxu0 %v5208_v35  ;;  %v5589_v63 = vld [vmem:[#allocation10 + $0x84] sm:$0xf] }
0x1387   :  { %v5184_v4 = vor.u32 %v5589_v63, %v5181_v1 }
0x1388   :  { %v3217_v45 = vsel %vm3216_vm10, %v5811_v53, %v3213_v23  ;;  %v5200_v53 = vor.u32 %v5593_v51, %v5197_v21 }
0x1389   :  { %v3219_v6 = vmul.f32 %v3217_v45, %v3187_v31 }
0x138a   :  { %3443 = vmatpush.bf16.msrb.mxu0 %v5200_v53 }
0x138b   :  { %v3224_v7 = vmul.f32 %v5688_v2, %v3219_v6 }
0x138d   :  { %v7248_v37 = vadd.f32 %v5689_v3, %v3224_v7 }
0x138e   :  { %3444 = vmatpush.bf16.msrb.mxu0 %v5192_v60 }
0x138f   :  { %v3247_v14 = vpack.c.bf16 %v7248_v37, %v7246_v11 }
0x1391   :  { %3309 = vmatmul.bf16.vlgmr.msrb.gmra.mxu2 %v3247_v14 }
0x1392   :  { %3445 = vmatpush.bf16.msrb.mxu0 %v5184_v4 }
0x1395   :  { %3446 = vmatmul.bf16.vlgmr.msrb.gmra.mxu0 %v6765_v12 }
0x1396   :  { %v3575_v22 = vpop.permute.xlu1 %3574 }
0x1397   :  { %v3580_v43 = vsel %vm324_vm0, %v3575_v22, 0 }
0x1398   :  { %3589 = vmatpush.bf16.xpose.msrb.mxu3 %v3580_v43 }
0x13a0   :  { %3707 = vmatpush.bf16.xpose.msra.mxu3 %v3698_v24 }
0x13a5   :  { %3451 = vmatmul.bf16.gmra.mxu0 %v6775_v30 }
0x1414   :  { %v3310_v26 = vpop.f32.mrf.mxu2 }
0x1415   :  { %v3311_v27 = vadd.f32 %v5690_v19, %v3310_v26 }
0x1417   :  { %v3457_v28 = vpack.c.bf16 %v3311_v27, %v3311_v27 }
0x1419   :  { %3632 = vrot.lane.b32.xlu1 %v3457_v28, %s6225_s22  ;;  %3572 = vrot.lane.b32.xlu2 %v3457_v28, %s6208_s3 }
0x141a   :  { %3510 = vrot.lane.b32.xlu0 %v3457_v28, %s6224_s0  ;;  %5241 = vmatmul.msk.bf16.vlgmr.msrb.gmra.mxu1 %vm324_vm0, %v3457_v28 }
0x141c   :  { %v3312_v31 = vpop.f32.mrf.mxu2 }
0x141d   :  { %v3313_v32 = vadd.f32 %v5690_v19, %v3312_v31  ;;  %v3447_v31 = vpop.f32.mrf.mxu0 }
0x141e   :  { %v3448_v40 = vadd.f32 %v3447_v31, %v3336_v36 }
0x141f   :  { %v3692_v33 = vpack.c.bf16 %v3313_v32, %v3313_v32 }
0x1421   :  { %3809 = vrot.lane.b32.xlu1 %v3693_v18, %s6208_s3  ;;  %3745 = vrot.lane.b32.xlu2 %v3692_v33, %s6224_s0 }
0x1422   :  { %3634 = vrot.lane.b32.xlu0 %v3458_v38, %s6225_s22 }
0x1425   :  { %v3449_v39 = vpop.f32.mrf.mxu0 }
0x1426   :  { %v3450_v41 = vadd.f32 %v3449_v39, %v3336_v36 }
0x1428   :  { %v3491_v44 = vpack.c.bf16 %v3450_v41, %v3448_v40 }
0x1429   :  { %3867 = vrot.lane.b32.xlu1 %v3692_v33, %s6225_s22  ;;  %3807 = vrot.lane.b32.xlu2 %v3692_v33, %s6208_s3 }
0x142a   :  { %3748 = vrot.lane.b32.xlu0 %v3693_v18, %s6224_s0  ;;  %3502 = vmatpush.bf16.msra.mxu2 %v3491_v44 }
0x1432   :  { %3869 = vrot.lane.b32.xlu0 %v3693_v18, %s6225_s22 }
0x1473   :  { %v3573_v34 = vpop.permute.xlu2 %3572 }
0x1474   :  { %5245 = vmatmul.msk.bf16.vlgmr.msrb.gmra.mxu3 %vm324_vm0, %v3573_v34 }
0x147b   :  { %v3746_v2 = vpop.permute.xlu2 %3745 }
0x1483   :  { %v3808_v9 = vpop.permute.xlu2 %3807 }
0x1484   :  { %5249 = vmatmul.msk.bf16.vlgmr.msra.gmra.mxu3 %vm324_vm0, %v3692_v33 }
0x148b   :  { %v3633_v54 = vpop.permute.xlu1 %3632 }
0x148c   :  { %v3511_v56 = vpop.permute.xlu0 %3510 }
0x148d   :  { %5243 = vmatmul.msk.bf16.vlgmr.msra.gmra.mxu1 %vm324_vm0, %v3511_v56 }
0x1493   :  { %v3810_v23 = vpop.permute.xlu1 %3809 }
0x1494   :  { %v3815_v29 = vsel %vm324_vm0, %v3810_v23, 0  ;;  %v3635_v45 = vpop.permute.xlu0 %3634 }
0x1495   :  { %v3640_v3 = vsel %vm324_vm0, %v3635_v45, 0  ;;  %3824 = vmatpush.bf16.xpose.msrb.mxu3 %v3815_v29 }
0x1496   :  { %3649 = vmatpush.bf16.xpose.msrb.mxu1 %v3640_v3 }
0x1497   :  { %v3474_v5 = vpop.f32.mrf.mxu1 }
0x1498   :  { %v3478_v6 = vmul.f32 0.17677669, %v3474_v5 }
0x149a   :  { %v3479_v7 = vsel %vm1447_vm13, %v3478_v6, -inf }
0x149b   :  { %3480 = vmax.xlane.f32.xlu0 %v3479_v7  ;;  %v3868_v12 = vpop.permute.xlu1 %3867 }
0x149c   :  { %5253 = vmatmul.msk.bf16.vlgmr.msrb.gmra.mxu3 %vm324_vm0, %v3808_v9  ;;  %v3749_v10 = vpop.permute.xlu0 %3748 }
0x149d   :  { %5247 = vmatmul.msk.bf16.vlgmr.msrb.gmra.mxu1 %vm324_vm0, %v3633_v54  ;;  %v3754_v13 = vsel %vm324_vm0, %v3749_v10, 0 }
0x149e   :  { %3763 = vmatpush.bf16.xpose.msra.mxu1 %v3754_v13 }
0x149f   :  { %v3476_v14 = vpop.f32.mrf.mxu1 }
0x14a4   :  { %v3870_v38 = vpop.permute.xlu0 %3869 }
0x14a5   :  { %v3875_v47 = vsel %vm324_vm0, %v3870_v38, 0 }
0x14a6   :  { %3884 = vmatpush.bf16.xpose.msrb.mxu1 %v3875_v47 }
0x14ad   :  { %5251 = vmatmul.msk.bf16.vlgmr.msra.gmra.mxu1 %vm324_vm0, %v3746_v2 }
0x14bd   :  { %5255 = vmatmul.msk.bf16.vlgmr.msrb.gmra.mxu1 %vm324_vm0, %v3868_v12 }
0x14f7   :  { %v3591_v15 = vpop.f32.mrf.mxu3 }
0x14f8   :  { %v3595_v16 = vmul.f32 0.17677669, %v3591_v15 }
0x14fa   :  { %v3596_v17 = vsel %vm1447_vm13, %v3595_v16, -inf }
0x14fb   :  { %3597 = vmax.xlane.f32.xlu0 %v3596_v17 }
0x14ff   :  { %v3593_v20 = vpop.f32.mrf.mxu3 }
0x1507   :  { %v3709_v18 = vpop.f32.mrf.mxu3 }
0x1508   :  { %v3713_v19 = vmul.f32 0.17677669, %v3709_v18 }
0x150a   :  { %v3530_v22 = vpop.f32.mrf.mxu1  ;;  %v3714_v24 = vsel %vm1447_vm13, %v3713_v19, -inf }
0x150b   :  { %v3534_v8 = vmul.f32 0.17677669, %v3530_v22  ;;  %3715 = vmax.xlane.f32.xlu0 %v3714_v24 }
0x150d   :  { %v3535_v30 = vsel %vm1447_vm13, %v3534_v8, -inf }
0x150e   :  { %v3481_v43 = vpop.xlane.xlu0 %3480  ;;  %3536 = vmax.xlane.f32.xlu2 %v3535_v30 }
0x150f   :  { %v3482_v25 = vsub.f32 %v3478_v6, %v3481_v43  ;;  %v3711_v26 = vpop.f32.mrf.mxu3  ;;  %v3452_v6 = vpop.f32.mrf.mxu0 }
0x1510   :  { %v3453_v15 = vadd.f32 %v3452_v6, %v3336_v36 }
0x1511   :  { %v3483_v27 = vmul.f32 1.442695, %v3482_v25 }
0x1512   :  { %v3532_v28 = vpop.f32.mrf.mxu1 }
0x1513   :  { %5812 = vpow2.f32 %v3483_v27 }
0x1517   :  { %v3454_v13 = vpop.f32.mrf.mxu0 }
0x1519   :  { %v5813_v32 = vpop.eup %5812 }
0x151a   :  { %v3651_v33 = vpop.f32.mrf.mxu1  ;;  %v3485_v34 = vsel %vm1447_vm13, %v5813_v32, 0.0 }
0x151b   :  { %3486 = vadd.xlane.f32.xlu1 %v3485_v34  ;;  %v3655_v42 = vmul.f32 0.17677669, %v3651_v33 }
0x151d   :  { %v3656_v48 = vsel %vm1447_vm13, %v3655_v42, -inf }
0x151f   :  { %v3826_v52 = vpop.f32.mrf.mxu3 }
0x1520   :  { %v7291_v55 = vmul.f32 0.17677669, %v3826_v52 }
0x1522   :  { %v3653_v46 = vpop.f32.mrf.mxu1  ;;  %v3831_v49 = vsel %vm1447_vm13, %v7291_v55, -inf }
0x1523   :  { %3657 = vmax.xlane.f32.xlu1 %v3656_v48  ;;  %3832 = vmax.xlane.f32.xlu0 %v3831_v49 }
0x1527   :  { %v3828_v61 = vpop.f32.mrf.mxu3 }
0x152a   :  { %v3765_v0 = vpop.f32.mrf.mxu1 }
0x152b   :  { %v3769_v62 = vmul.f32 0.17677669, %v3765_v0 }
0x152d   :  { %v3770_v50 = vsel %vm1447_vm13, %v3769_v62, -inf }
0x152e   :  { %3771 = vmax.xlane.f32.xlu2 %v3770_v50 }
0x1532   :  { %v3767_v35 = vpop.f32.mrf.mxu1 }
0x1537   :  { %3608 = vrot.lane.b32.xlu0 %v3491_v44, %s6208_s3 }
0x153a   :  { %v3886_v51 = vpop.f32.mrf.mxu1 }
0x153b   :  { %v7298_v21 = vmul.f32 0.17677669, %v3886_v51 }
0x153c   :  { %3668 = vrot.lane.b32.xlu1 %v3491_v44, %s6225_s22 }
0x153d   :  { %v3891_v53 = vsel %vm1447_vm13, %v7298_v21, -inf }
0x153e   :  { %3892 = vmax.xlane.f32.xlu2 %v3891_v53 }
0x1542   :  { %v3888_v54 = vpop.f32.mrf.mxu1 }
0x1556   :  { %3548 = vrot.lane.b32.xlu2 %v3491_v44, %s6224_s0 }
0x156e   :  { %v3598_v56 = vpop.xlane.xlu0 %3597 }
0x156f   :  { %v3599_v58 = vsub.f32 %v3595_v16, %v3598_v56  ;;  %v3455_v16 = vadd.f32 %v3454_v13, %v3336_v36 }
0x1571   :  { %v3600_v59 = vmul.f32 1.442695, %v3599_v58  ;;  %v3726_v18 = vpack.c.bf16 %v3455_v16, %v3453_v15 }
0x1573   :  { %5814 = vpow2.f32 %v3600_v59 }
0x1579   :  { %v7304_v60 = vpop.eup %5814 }
0x157a   :  { %v3602_v63 = vsel %vm1447_vm13, %v7304_v60, 0.0 }
0x157b   :  { %3603 = vadd.xlane.f32.xlu0 %v3602_v63 }
0x157e   :  { %v3716_v1 = vpop.xlane.xlu0 %3715 }
0x157f   :  { %v3717_v2 = vsub.f32 %v3713_v19, %v3716_v1 }
0x1581   :  { %v3718_v4 = vmul.f32 1.442695, %v3717_v2  ;;  %v3537_v23 = vpop.xlane.xlu2 %3536 }
0x1582   :  { %v3538_v29 = vsub.f32 %v3534_v8, %v3537_v23 }
0x1583   :  { %5816 = vpow2.f32 %v3718_v4 }
0x1584   :  { %v3539_v45 = vmul.f32 1.442695, %v3538_v29 }
0x1586   :  { %5818 = vpow2.f32 %v3539_v45 }
0x1589   :  { %v7308_v3 = vpop.eup %5816 }
0x158a   :  { %v3720_v5 = vsel %vm1447_vm13, %v7308_v3, 0.0 }
0x158b   :  { %3721 = vadd.xlane.f32.xlu0 %v3720_v5 }
0x158c   :  { %v7312_v7 = vpop.eup %5818 }
0x158d   :  { %v3541_v9 = vsel %vm1447_vm13, %v7312_v7, 0.0 }
0x158e   :  { %v3487_v10 = vpop.xlane.xlu1 %3486  ;;  %3542 = vadd.xlane.f32.xlu1 %v3541_v9 }
0x158f   :  { %5820 = vrcp.f32 %v3487_v10 }
0x1595   :  { %v5821_v14 = vpop.eup %5820 }
0x1596   :  { %v3489_v38 = vmul.f32 %v5821_v14, %v5813_v32  ;;  %v3658_v47 = vpop.xlane.xlu1 %3657  ;;  %v3833_v22 = vpop.xlane.xlu0 %3832 }
0x1597   :  { %v3659_v12 = vsub.f32 %v3655_v42, %v3658_v47  ;;  %v3834_v43 = vsub.f32 %v7291_v55, %v3833_v22 }
0x1598   :  { %v3490_v17 = vpack.c.bf16 %v3489_v38, %v3489_v38 }
0x1599   :  { %v3660_v20 = vmul.f32 1.442695, %v3659_v12  ;;  %v3835_v26 = vmul.f32 1.442695, %v3834_v43 }
0x159a   :  { %5242 = vmatmul.msk.bf16.vlgmr.msra.gmra.mxu2 %vm1447_vm13, %v3490_v17 }
0x159b   :  { %5822 = vpow2.f32 %v3660_v20 }
0x159f   :  { %3843 = vrot.lane.b32.xlu0 %v3726_v18, %s6208_s3 }
0x15a1   :  { %v5823_v19 = vpop.eup %5822  ;;  %v3772_v24 = vpop.xlane.xlu2 %3771 }
0x15a2   :  { %v3773_v8 = vsub.f32 %v3769_v62, %v3772_v24  ;;  %v3662_v30 = vsel %vm1447_vm13, %v5823_v19, 0.0 }
0x15a3   :  { %3663 = vadd.xlane.f32.xlu1 %v3662_v30 }
0x15a4   :  { %v3774_v25 = vmul.f32 1.442695, %v3773_v8 }
0x15a6   :  { %5824 = vpow2.f32 %v3774_v25 }
0x15a7   :  { %5826 = vpow2.f32 %v3835_v26 }
0x15a9   :  { %v3609_v27 = vpop.permute.xlu0 %3608 }
0x15aa   :  { %3621 = vmatpush.bf16.msra.mxu0 %v3609_v27 }
0x15ac   :  { %v5825_v28 = vpop.eup %5824 }
0x15ad   :  { %v3776_v31 = vsel %vm1447_vm13, %v5825_v28, 0.0  ;;  %v5827_v33 = vpop.eup %5826 }
0x15ae   :  { %3737 = vmatpush.bf16.msrb.mxu0 %v3726_v18  ;;  %3777 = vadd.xlane.f32.xlu2 %v3776_v31  ;;  %v3837_v34 = vsel %vm1447_vm13, %v5827_v33, 0.0  ;;  %v3669_v39 = vpop.permute.xlu1 %3668  ;;  %v5611_v31 = vld [vmem:[#allocation11 + $0x70] sm:$0xff] }
0x15b1   :  { %v3893_v32 = vpop.xlane.xlu2 %3892 }
0x15b2   :  { %v3894_v40 = vsub.f32 %v7298_v21, %v3893_v32  ;;  %v5610_v32 = vld [vmem:[#allocation11 + $0x68] sm:$0xff] }
0x15b4   :  { %v3895_v41 = vmul.f32 1.442695, %v3894_v40 }
0x15b6   :  { %3838 = vadd.xlane.f32.xlu2 %v3837_v34  ;;  %5828 = vpow2.f32 %v3895_v41  ;;  %v5608_v34 = vld [vmem:[#allocation11 + $0x58] sm:$0xff]  ;;  %v5606_v41 = vld [vmem:[#allocation11 + $0x48] sm:$0xff] }
0x15b9   :  { %v3549_v36 = vpop.permute.xlu2 %3548 }
0x15ba   :  { %3561 = vmatpush.bf16.msrb.mxu2 %v3549_v36  ;;  %v5607_v36 = vld [vmem:[#allocation11 + $0x50] sm:$0xff] }
0x15bc   :  { %3783 = vrot.lane.b32.xlu1 %v3726_v18, %s6224_s0  ;;  %v5829_v42 = vpop.eup %5828 }
0x15bd   :  { %v3897_v44 = vsel %vm1447_vm13, %v5829_v42, 0.0 }
0x15be   :  { %3681 = vmatpush.bf16.msra.mxu2 %v3669_v39 }
0x15ce   :  { %3903 = vrot.lane.b32.xlu2 %v3726_v18, %s6225_s22 }
0x15e6   :  { %3898 = vadd.xlane.f32.xlu1 %v3897_v44 }
0x15ee   :  { %v3604_v52 = vpop.xlane.xlu0 %3603 }
0x15ef   :  { %5830 = vrcp.f32 %v3604_v52 }
0x15f5   :  { %v5831_v55 = vpop.eup %5830 }
0x15f6   :  { %v3606_v46 = vmul.f32 %v5831_v55, %v7304_v60 }
0x15f8   :  { %v3607_v48 = vpack.c.bf16 %v3606_v46, %v3606_v46 }
0x15fa   :  { %5246 = vmatmul.msk.bf16.vlgmr.msra.gmra.mxu0 %vm1447_vm13, %v3607_v48  ;;  %v5691_v48 = vld [vmem:[%s7424_s16 + $0x1] ss:$0 sm:$0xff] }
0x15fe   :  { %v3722_v49 = vpop.xlane.xlu0 %3721 }
0x15ff   :  { %5832 = vrcp.f32 %v3722_v49 }
0x1601   :  { %v3543_v61 = vpop.xlane.xlu1 %3542 }
0x1602   :  { %5834 = vrcp.f32 %v3543_v61 }
0x1605   :  { %v5833_v0 = vpop.eup %5832 }
0x1606   :  { %v3724_v62 = vmul.f32 %v5833_v0, %v7308_v3 }
0x1608   :  { %v5835_v50 = vpop.eup %5834  ;;  %v3725_v35 = vpack.c.bf16 %v3724_v62, %v3724_v62 }
0x1609   :  { %v3545_v51 = vmul.f32 %v5835_v50, %v7312_v7 }
0x160a   :  { %5250 = vmatmul.msk.bf16.vlgmr.msrb.gmra.mxu0 %vm1447_vm13, %v3725_v35 }
0x160b   :  { %v3546_v21 = vpack.c.bf16 %v3545_v51, %v3545_v51 }
0x160d   :  { %5244 = vmatmul.msk.bf16.vlgmr.msrb.gmra.mxu2 %vm1447_vm13, %v3546_v21 }
0x1611   :  { %v3844_v53 = vpop.permute.xlu0 %3843 }
0x1612   :  { %3856 = vmatpush.bf16.msra.mxu0 %v3844_v53 }
0x1616   :  { %v3664_v54 = vpop.xlane.xlu1 %3663 }
0x1617   :  { %5836 = vrcp.f32 %v3664_v54 }
0x161d   :  { %v5837_v56 = vpop.eup %5836  ;;  %v3504_v58 = vpop.f32.mrf.mxu2 }
0x161e   :  { %v3666_v59 = vmul.f32 %v5837_v56, %v5823_v19  ;;  %3508 = vst.msk [vmem:[#allocation2] sm:$0xff] %vm324_vm0, %v3504_v58 }
0x1620   :  { %v3667_v60 = vpack.c.bf16 %v3666_v59, %v3666_v59 }
0x1621   :  { %v3778_v63 = vpop.xlane.xlu2 %3777 }
0x1622   :  { %5248 = vmatmul.msk.bf16.vlgmr.msra.gmra.mxu2 %vm1447_vm13, %v3667_v60  ;;  %5838 = vrcp.f32 %v3778_v63  ;;  %v5628_v60 = vld [vmem:[#allocation16 + $0xf4] sm:$0xf0]  ;;  %v5627_v63 = vld [vmem:[#allocation16 + $0xf4] sm:$0xf] }
0x1625   :  { %v3506_v1 = vpop.f32.mrf.mxu2 }
0x1628   :  { %v5839_v2 = vpop.eup %5838 }
0x1629   :  { %v3839_v4 = vpop.xlane.xlu2 %3838  ;;  %v3780_v23 = vmul.f32 %v5839_v2, %v5825_v28  ;;  %v5612_v28 = vld [vmem:[#allocation11 + $0x78] sm:$0xff]  ;;  %v5351_v2 = vld [vmem:[#allocation16 + $0xf8] sm:$0xf0] }
0x162a   :  { %5840 = vrcp.f32 %v3839_v4  ;;  %4000 = vmatpush.bf16.msra.mxu3 %v5612_v28  ;;  %v5354_v4 = vor.u32 %v5627_v63, %v5351_v2  ;;  %v5311_v28 = vld [vmem:[#allocation16 + $0xa8] sm:$0xf0]  ;;  %v5641_v2 = vld [vmem:[#allocation17 + $0xe0] sm:$0xff] }
0x162b   :  { %v3781_v3 = vpack.c.bf16 %v3780_v23, %v3780_v23  ;;  %v5341_v23 = vld [vmem:[#allocation16 + $0xe0] sm:$0xf] }
0x162c   :  { %4189 = vmatpush.bf16.msra.mxu1 %v5354_v4 }
0x162e   :  { %v3784_v29 = vpop.permute.xlu1 %3783  ;;  %4001 = vmatpush.bf16.msra.mxu3 %v5611_v31 }
0x162f   :  { %3796 = vmatpush.bf16.msrb.mxu2 %v3784_v29  ;;  %v5626_v29 = vld [vmem:[#allocation16 + $0xe4] sm:$0xf0] }
0x1630   :  { %v5841_v45 = vpop.eup %5840 }
0x1631   :  { %v3841_v5 = vmul.f32 %v5841_v45, %v5827_v33  ;;  %v3904_v6 = vpop.permute.xlu2 %3903  ;;  %v5609_v33 = vld [vmem:[#allocation11 + $0x60] sm:$0xff]  ;;  %v5625_v45 = vld [vmem:[#allocation16 + $0xe4] sm:$0xf] }
0x1632   :  { %5252 = vmatmul.msk.bf16.vlgmr.msrb.gmra.mxu2 %vm1447_vm13, %v3781_v3  ;;  %4002 = vmatpush.bf16.msra.mxu3 %v5610_v32  ;;  %v5342_v3 = vor.u32 %v5626_v29, %v5341_v23  ;;  %v5301_v32 = vld [vmem:[#allocation16 + $0x90] sm:$0xf] }
0x1633   :  { %v3842_v7 = vpack.c.bf16 %v3841_v5, %v3841_v5  ;;  %3916 = vmatpush.bf16.msra.mxu2 %v3904_v6  ;;  %v5343_v5 = vld [vmem:[#allocation16 + $0xe8] sm:$0xf0] }
0x1634   :  { %v5346_v6 = vor.u32 %v5625_v45, %v5343_v5 }
0x1635   :  { %5254 = vmatmul.msk.bf16.vlgmr.msra.gmra.mxu0 %vm1447_vm13, %v3842_v7  ;;  %v5333_v7 = vld [vmem:[#allocation16 + $0xd0] sm:$0xf] }
0x1636   :  { %4003 = vmatpush.bf16.msra.mxu3 %v5609_v33  ;;  %4190 = vmatpush.bf16.msra.mxu1 %v5346_v6  ;;  %v5616_v33 = vld [vmem:[#allocation16 + $0x94] sm:$0xf0] }
0x163a   :  { %4004 = vmatpush.bf16.msra.mxu3 %v5608_v34  ;;  %v5615_v34 = vld [vmem:[#allocation16 + $0x94] sm:$0xf] }
0x163e   :  { %4005 = vmatpush.bf16.msra.mxu3 %v5607_v36  ;;  %v5302_v36 = vor.u32 %v5616_v33, %v5301_v32 }
0x1642   :  { %4006 = vmatpush.bf16.msra.mxu3 %v5606_v41 }
0x1659   :  { %v3899_v9 = vpop.xlane.xlu1 %3898 }
0x165a   :  { %5842 = vrcp.f32 %v3899_v9  ;;  %v5624_v9 = vld [vmem:[#allocation16 + $0xd4] sm:$0xf0] }
0x1660   :  { %v5843_v10 = vpop.eup %5842 }
0x1661   :  { %v3901_v13 = vmul.f32 %v5843_v10, %v5829_v42  ;;  %v5605_v42 = vld [vmem:[#allocation11 + $0x40] sm:$0xff]  ;;  %v5623_v10 = vld [vmem:[#allocation16 + $0xd4] sm:$0xf] }
0x1662   :  { %4007 = vmatpush.bf16.msra.mxu3 %v5605_v42 }
0x1663   :  { %v3902_v14 = vpack.c.bf16 %v3901_v13, %v3901_v13  ;;  %v5334_v13 = vor.u32 %v5624_v9, %v5333_v7  ;;  %v5692_v9 = vld [vmem:[#allocation13 + $0x1] ss:$0 sm:$0xff] }
0x1665   :  { %5256 = vmatmul.msk.bf16.vlgmr.msra.gmra.mxu2 %vm1447_vm13, %v3902_v14  ;;  %v5335_v14 = vld [vmem:[#allocation16 + $0xd8] sm:$0xf0] }
0x1677   :  { %v3623_v38 = vpop.f32.mrf.mxu0 }
0x1678   :  { %3628 = vrot.lane.b32.xlu2 %v3623_v38, %s6208_s3  ;;  %v5338_v38 = vor.u32 %v5623_v10, %v5335_v14 }
0x167a   :  { %4191 = vmatpush.bf16.msra.mxu1 %v5338_v38  ;;  %v5693_v38 = vld [vmem:[#allocation14 + $0x1] ss:$0 sm:$0xff] }
0x167f   :  { %v3625_v47 = vpop.f32.mrf.mxu0 }
0x1680   :  { %v5325_v47 = vld [vmem:[#allocation16 + $0xc0] sm:$0xf] }
0x1687   :  { %v3739_v12 = vpop.f32.mrf.mxu0 }
0x1688   :  { %3743 = vst.msk [vmem:[#allocation2 + $0x8] sm:$0xff] %vm324_vm0, %v3739_v12  ;;  %v5622_v12 = vld [vmem:[#allocation16 + $0xc4] sm:$0xf0] }
0x168f   :  { %v3741_v15 = vpop.f32.mrf.mxu0 }
0x1690   :  { %v3563_v16 = vpop.f32.mrf.mxu2  ;;  %v5621_v15 = vld [vmem:[#allocation16 + $0xc4] sm:$0xf] }
0x1691   :  { %3568 = vrot.lane.b32.xlu1 %v3563_v16, %s6225_s22  ;;  %v5326_v16 = vor.u32 %v5622_v12, %v5325_v47 }
0x1698   :  { %v3565_v17 = vpop.f32.mrf.mxu2 }
0x1699   :  { %v5327_v17 = vld [vmem:[#allocation16 + $0xc8] sm:$0xf0] }
0x16a5   :  { %v3683_v20 = vpop.f32.mrf.mxu2 }
0x16a6   :  { %3688 = vrot.lane.b32.xlu2 %v3683_v20, %s6224_s0  ;;  %v5330_v20 = vor.u32 %v5621_v15, %v5327_v17 }
0x16a8   :  { %4192 = vmatpush.bf16.msra.mxu1 %v5330_v20 }
0x16ad   :  { %v3685_v18 = vpop.f32.mrf.mxu2 }
0x16ae   :  { %v5317_v18 = vld [vmem:[#allocation16 + $0xb0] sm:$0xf] }
0x16b2   :  { %v3858_v19 = vpop.f32.mrf.mxu0 }
0x16b5   :  { %v3798_v22 = vpop.f32.mrf.mxu2 }
0x16b6   :  { %3803 = vrot.lane.b32.xlu0 %v3798_v22, %s6225_s22  ;;  %v5619_v22 = vld [vmem:[#allocation16 + $0xb4] sm:$0xf] }
0x16ba   :  { %v3860_v24 = vpop.f32.mrf.mxu0 }
0x16bd   :  { %v3800_v8 = vpop.f32.mrf.mxu2 }
0x16be   :  { %3863 = vrot.lane.b32.xlu0 %v3858_v19, %s6208_s3  ;;  %v5620_v19 = vld [vmem:[#allocation16 + $0xb4] sm:$0xf0]  ;;  %v5319_v8 = vld [vmem:[#allocation16 + $0xb8] sm:$0xf0] }
0x16bf   :  { %v5318_v24 = vor.u32 %v5620_v19, %v5317_v18  ;;  %v5632_v18 = vld [vmem:[#allocation17 + $0x98] sm:$0xff] }
0x16c0   :  { %v5640_v19 = vld [vmem:[#allocation17 + $0xd8] sm:$0xff] }
0x16d2   :  { %v3629_v25 = vpop.permute.xlu2 %3628 }
0x16e8   :  { %v3918_v30 = vpop.f32.mrf.mxu2 }
0x16e9   :  { %3923 = vrot.lane.b32.xlu1 %v3918_v30, %s6224_s0  ;;  %v5322_v30 = vor.u32 %v5619_v22, %v5319_v8  ;;  %v5631_v22 = vld [vmem:[#allocation17 + $0x90] sm:$0xff]  ;;  %v5638_v8 = vld [vmem:[#allocation17 + $0xc8] sm:$0xff] }
0x16eb   :  { %4193 = vmatpush.bf16.msra.mxu1 %v5322_v30  ;;  %v5629_v30 = vld [vmem:[#allocation17 + $0x80] sm:$0xff] }
0x16f0   :  { %v3920_v43 = vpop.f32.mrf.mxu2 }
0x16f1   :  { %v5309_v43 = vld [vmem:[#allocation16 + $0xa0] sm:$0xf] }
0x1700   :  { %v3689_v27 = vpop.permute.xlu2 %3688 }
0x1703   :  { %v3569_v26 = vpop.permute.xlu1 %3568 }
0x1704   :  { %3571 = vst.msk [vmem:[#allocation2] sm:$0xff] %vm682_vm3, %v3569_v26  ;;  %v5617_v26 = vld [vmem:[#allocation16 + $0xa4] sm:$0xf] }
0x1705   :  { %3631 = vst.msk [vmem:[#allocation2] sm:$0xff] %vm745_vm4, %v3629_v25  ;;  %v5618_v25 = vld [vmem:[#allocation16 + $0xa4] sm:$0xf0]  ;;  %v5314_v31 = vor.u32 %v5617_v26, %v5311_v28 }
0x1706   :  { %3691 = vst.msk [vmem:[#allocation2] sm:$0xff] %vm808_vm5, %v3689_v27  ;;  %v5310_v27 = vor.u32 %v5618_v25, %v5309_v43  ;;  %v5290_v43 = vld [vmem:[%s7428_s20 + $0x2] sm:$0x3] }
0x1707   :  { %4194 = vmatpush.bf16.msra.mxu1 %v5314_v31  ;;  %v4092_v28 = vperm.slane %v5290_v43, 1 }
0x170d   :  { %v3927_v52 = vld [vmem:[#allocation2] sm:$0xff] }
0x1728   :  { %v3804_v39 = vpop.permute.xlu0 %3803 }
0x1729   :  { %3806 = vst.msk [vmem:[#allocation2 + $0x8] sm:$0xff] %vm682_vm3, %v3804_v39  ;;  %v5303_v39 = vld [vmem:[#allocation16 + $0x98] sm:$0xf0] }
0x172a   :  { %v5306_v41 = vor.u32 %v5615_v34, %v5303_v39 }
0x172c   :  { %4195 = vmatpush.bf16.msra.mxu1 %v5306_v41 }
0x1730   :  { %v3864_v40 = vpop.permute.xlu0 %3863 }
0x1731   :  { %3866 = vst.msk [vmem:[#allocation2 + $0x8] sm:$0xff] %vm745_vm4, %v3864_v40 }
0x175b   :  { %v3924_v44 = vpop.permute.xlu1 %3923 }
0x175c   :  { %3926 = vst.msk [vmem:[#allocation2 + $0x8] sm:$0xff] %vm808_vm5, %v3924_v44  ;;  %v5293_v44 = vld [vmem:[#allocation16 + $0x80] sm:$0xf] }
0x1763   :  { %v3928_v55 = vld [vmem:[#allocation2 + $0x8] sm:$0xff] }
0x1764   :  { %v3946_v46 = vpack.c.bf16 %v3928_v55, %v3927_v52  ;;  %v5614_v52 = vld [vmem:[#allocation16 + $0x84] sm:$0xf0]  ;;  %v5613_v55 = vld [vmem:[#allocation16 + $0x84] sm:$0xf] }
0x1766   :  { %4008 = vmatmul.bf16.vlgmr.msra.gmra.mxu3 %v3946_v46 }
0x17e9   :  { %v4009_v49 = vpop.f32.mrf.mxu3 }
0x17ea   :  { %v4010_v61 = vadd.f32 %v5691_v48, %v4009_v49  ;;  %v5295_v49 = vld [vmem:[#allocation16 + $0x88] sm:$0xf0] }
0x17ec   :  { %v4014_v0 = vadd.f32 %v4010_v61, %v7246_v11  ;;  %v5298_v61 = vor.u32 %v5613_v55, %v5295_v49 }
0x17ee   :  { %4020 = vadd.xlane.f32.xlu0 %v4014_v0  ;;  %4196 = vmatpush.bf16.msra.mxu1 %v5298_v61 }
0x17f1   :  { %v4011_v62 = vpop.f32.mrf.mxu3 }
0x17f2   :  { %v4012_v50 = vadd.f32 %v5691_v48, %v4011_v62  ;;  %v5294_v48 = vor.u32 %v5614_v52, %v5293_v44  ;;  %v5644_v62 = vld [vmem:[#allocation17 + $0xf8] sm:$0xff] }
0x17f3   :  { %4357 = vmatpush.bf16.msrb.mxu3 %v5644_v62 }
0x17f4   :  { %v4015_v35 = vadd.f32 %v4012_v50, %v7248_v37  ;;  %v5349_v37 = vld [vmem:[#allocation16 + $0xf0] sm:$0xf] }
0x17f5   :  { %v5350_v1 = vor.u32 %v5628_v60, %v5349_v37  ;;  %v5642_v37 = vld [vmem:[#allocation17 + $0xe8] sm:$0xff] }
0x17f6   :  { %4022 = vadd.xlane.f32.xlu2 %v4015_v35 }
0x17f7   :  { %4175 = vmatpush.bf16.msrb.mxu0 %v5350_v1  ;;  %v5633_v1 = vld [vmem:[#allocation17 + $0xa0] sm:$0xff] }
0x17fb   :  { %4176 = vmatpush.bf16.msrb.mxu0 %v5342_v3 }
0x17ff   :  { %4177 = vmatpush.bf16.msrb.mxu0 %v5334_v13 }
0x1803   :  { %4178 = vmatpush.bf16.msrb.mxu0 %v5326_v16 }
0x1807   :  { %4179 = vmatpush.bf16.msrb.mxu0 %v5318_v24  ;;  %v5630_v24 = vld [vmem:[#allocation17 + $0x88] sm:$0xff] }
0x180b   :  { %4180 = vmatpush.bf16.msrb.mxu0 %v5310_v27  ;;  %v4091_v27 = vperm.slane %v5290_v43, 0 }
0x180f   :  { %4181 = vmatpush.bf16.msrb.mxu0 %v5302_v36 }
0x1813   :  { %4182 = vmatpush.bf16.msrb.mxu0 %v5294_v48 }
0x1861   :  { %v4021_v51 = vpop.xlane.xlu0 %4020 }
0x1862   :  { %v4024_v21 = vmul.f32 %v4021_v51, %v6747_v57  ;;  %v5635_v51 = vld [vmem:[#allocation17 + $0xb0] sm:$0xff] }
0x1864   :  { %v7356_v53 = vsub.f32 %v4014_v0, %v4024_v21  ;;  %v5636_v0 = vld [vmem:[#allocation17 + $0xb8] sm:$0xff]  ;;  %v5643_v21 = vld [vmem:[#allocation17 + $0xf0] sm:$0xff] }
0x1865   :  { %4343 = vmatpush.bf16.msrb.mxu2 %v5636_v0  ;;  %4358 = vmatpush.bf16.msrb.mxu3 %v5643_v21 }
0x1866   :  { %v4028_v54 = vmul.f32 %v7356_v53, %v7356_v53 }
0x1868   :  { %4030 = vadd.xlane.f32.xlu1 %v4028_v54 }
0x1869   :  { %v4023_v56 = vpop.xlane.xlu2 %4022  ;;  %4344 = vmatpush.bf16.msrb.mxu2 %v5635_v51  ;;  %4359 = vmatpush.bf16.msrb.mxu3 %v5642_v37 }
0x186a   :  { %v4025_v58 = vmul.f32 %v4023_v56, %v6747_v57 }
0x186c   :  { %v7361_v59 = vsub.f32 %v4015_v35, %v4025_v58 }
0x186d   :  { %4360 = vmatpush.bf16.msrb.mxu3 %v5641_v2 }
0x186e   :  { %v4029_v11 = vmul.f32 %v7361_v59, %v7361_v59 }
0x1870   :  { %4032 = vadd.xlane.f32.xlu0 %v4029_v11  ;;  %v5634_v11 = vld [vmem:[#allocation17 + $0xa8] sm:$0xff] }
0x1871   :  { %4345 = vmatpush.bf16.msrb.mxu2 %v5634_v11  ;;  %4361 = vmatpush.bf16.msrb.mxu3 %v5640_v19 }
0x1875   :  { %4346 = vmatpush.bf16.msrb.mxu2 %v5633_v1 }
0x1879   :  { %4347 = vmatpush.bf16.msrb.mxu2 %v5632_v18 }
0x187d   :  { %4348 = vmatpush.bf16.msrb.mxu2 %v5631_v22 }
0x1881   :  { %4349 = vmatpush.bf16.msrb.mxu2 %v5630_v24 }
0x1885   :  { %4350 = vmatpush.bf16.msrb.mxu2 %v5629_v30 }
0x18db   :  { %v4031_v40 = vpop.xlane.xlu1 %4030 }
0x18dc   :  { %v4034_v42 = vmul.f32 %v4031_v40, %v6747_v57 }
0x18de   :  { %v4036_v46 = vadd.f32 1e-05, %v4034_v42 }
0x18e0   :  { %5844 = vrsqrt.f32 %v4036_v46  ;;  %vm4044_vm4 = vweird.f32 %v4036_v46 }
0x18e3   :  { %v4033_v50 = vpop.xlane.xlu0 %4032 }
0x18e4   :  { %v4035_v35 = vmul.f32 %v4033_v50, %v6747_v57 }
0x18e6   :  { %v5845_v54 = vpop.eup %5844  ;;  %v4037_v56 = vadd.f32 1e-05, %v4035_v35 }
0x18e7   :  { %v4039_v58 = vmul.f32 %v5845_v54, %v4036_v46  ;;  %vm4045_vm3 = vweird.f32 %v5845_v54  ;;  %v5694_v46 = vld [vmem:[#allocation19 + $0x1] ss:$0 sm:$0xff] }
0x18e8   :  { %5846 = vrsqrt.f32 %v4037_v56  ;;  %vm4046_vm5 = vmor %vm4044_vm4, %vm4045_vm3  ;;  %vm4054_vm11 = vweird.f32 %v4037_v56 }
0x18e9   :  { %v4040_v60 = vmul.f32 %v5845_v54, %v4039_v58 }
0x18eb   :  { %v4041_v63 = vmul.f32 0.5, %v4040_v60 }
0x18ed   :  { %v4042_v4 = vsub.f32 1.5, %v4041_v63 }
0x18ee   :  { %v5847_v23 = vpop.eup %5846 }
0x18ef   :  { %v4043_v29 = vmul.f32 %v5845_v54, %v4042_v4  ;;  %v4049_v45 = vmul.f32 %v5847_v23, %v4037_v56  ;;  %vm4055_vm13 = vweird.f32 %v5847_v23  ;;  %v5652_v4 = vld [vmem:[%s7433_s25 + $0x38] sm:$0xff] }
0x18f0   :  { %vm4056_vm12 = vmor %vm4054_vm11, %vm4055_vm13  ;;  %4496 = vmatpush.bf16.msra.mxu0 %v5652_v4 }
0x18f1   :  { %v4050_v3 = vmul.f32 %v5847_v23, %v4049_v45  ;;  %v4047_v5 = vsel %vm4046_vm5, %v5845_v54, %v4043_v29  ;;  %v5650_v29 = vld [vmem:[%s7433_s25 + $0x28] sm:$0xff]  ;;  %v5649_v45 = vld [vmem:[%s7433_s25 + $0x20] sm:$0xff] }
0x18f2   :  { %v4058_v10 = vmul.f32 %v4047_v5, %v7356_v53  ;;  %v5639_v53 = vld [vmem:[#allocation17 + $0xd0] sm:$0xff] }
0x18f3   :  { %v4051_v6 = vmul.f32 0.5, %v4050_v3  ;;  %4362 = vmatpush.bf16.msrb.mxu3 %v5639_v53  ;;  %v5648_v3 = vld [vmem:[%s7433_s25 + $0x18] sm:$0xff]  ;;  %v5647_v5 = vld [vmem:[%s7433_s25 + $0x10] sm:$0xff] }
0x18f4   :  { %v4063_v47 = vmul.f32 %v5692_v9, %v4058_v10 }
0x18f5   :  { %v4052_v7 = vsub.f32 1.5, %v4051_v6  ;;  %v5646_v6 = vld [vmem:[%s7433_s25 + $0x8] sm:$0xff] }
0x18f6   :  { %v4068_v16 = vadd.f32 %v5693_v38, %v4063_v47 }
0x18f7   :  { %v4053_v13 = vmul.f32 %v5847_v23, %v4052_v7  ;;  %4363 = vmatpush.bf16.msrb.mxu3 %v5638_v8 }
0x18f9   :  { %v4057_v14 = vsel %vm4056_vm12, %v5847_v23, %v4053_v13  ;;  %v5651_v23 = vld [vmem:[%s7433_s25 + $0x30] sm:$0xff]  ;;  %v5645_v13 = vld [vmem:[%s7433_s25] sm:$0xff] }
0x18fa   :  { %v4059_v12 = vmul.f32 %v4057_v14, %v7361_v59  ;;  %v5637_v59 = vld [vmem:[#allocation17 + $0xc0] sm:$0xff]  ;;  %4497 = vmatpush.bf16.msra.mxu0 %v5651_v23 }
0x18fb   :  { %4364 = vmatpush.bf16.msrb.mxu3 %v5637_v59  ;;  %v5695_v59 = vld [vmem:[#allocation20 + $0x1] ss:$0 sm:$0xff] }
0x18fc   :  { %v4064_v15 = vmul.f32 %v5692_v9, %v4059_v12 }
0x18fe   :  { %v4069_v17 = vadd.f32 %v5693_v38, %v4064_v15  ;;  %4498 = vmatpush.bf16.msra.mxu0 %v5650_v29 }
0x1900   :  { %v4087_v20 = vpack.c.bf16 %v4069_v17, %v4068_v16 }
0x1902   :  { %4183 = vmatmul.bf16.vlgmr.msrb.gmra.mxu0 %v4087_v20  ;;  %4197 = vmatmul.bf16.vlgmr.msra.gmra.mxu1 %v4087_v20 }
0x1903   :  { %4499 = vmatpush.bf16.msra.mxu0 %v5649_v45 }
0x1907   :  { %4500 = vmatpush.bf16.msra.mxu0 %v5648_v3 }
0x190b   :  { %4501 = vmatpush.bf16.msra.mxu0 %v5647_v5 }
0x190f   :  { %4502 = vmatpush.bf16.msra.mxu0 %v5646_v6 }
0x1913   :  { %4503 = vmatpush.bf16.msra.mxu0 %v5645_v13 }
0x197f   :  { %v4184_v25 = vpop.f32.mrf.mxu0  ;;  %v4198_v26 = vpop.f32.mrf.mxu1 }
0x1980   :  { %v4185_v31 = vadd.f32 %v4184_v25, %v4091_v27  ;;  %v4199_v32 = vadd.f32 %v4198_v26, %v4092_v28  ;;  %v5696_v26 = vld [vmem:[#allocation22 + $0x1] ss:$0 sm:$0xff] }
0x1982   :  { %v4203_v40 = vmax.f32 %v4185_v31, 0.0  ;;  %v4204_v41 = vmax.f32 %v4199_v32, 0.0 }
0x1987   :  { %v4186_v33 = vpop.f32.mrf.mxu0  ;;  %v4200_v34 = vpop.f32.mrf.mxu1 }
0x1988   :  { %v4187_v36 = vadd.f32 %v4186_v33, %v4091_v27  ;;  %v4201_v39 = vadd.f32 %v4200_v34, %v4092_v28 }
0x198a   :  { %v4205_v42 = vmax.f32 %v4187_v36, 0.0  ;;  %v4206_v44 = vmax.f32 %v4201_v39, 0.0  ;;  %v5697_v36 = vld [vmem:[#allocation23] ss:$0 sm:$0xff] }
0x198c   :  { %v4240_v52 = vpack.c.bf16 %v4205_v42, %v4203_v40  ;;  %v4241_v55 = vpack.c.bf16 %v4206_v44, %v4204_v41 }
0x198e   :  { %4351 = vmatmul.bf16.vlgmr.msrb.gmra.mxu2 %v4240_v52  ;;  %4365 = vmatmul.bf16.vlgmr.msrb.gmra.mxu3 %v4241_v55 }
0x1a11   :  { %v4352_v48 = vpop.f32.mrf.mxu2  ;;  %v4366_v49 = vpop.f32.mrf.mxu3 }
0x1a12   :  { %v4353_v61 = vadd.f32 %v5694_v46, %v4352_v48 }
0x1a14   :  { %v4367_v0 = vadd.f32 %v4366_v49, %v4353_v61 }
0x1a16   :  { %v4371_v62 = vadd.f32 %v4367_v0, %v4068_v16 }
0x1a18   :  { %4377 = vadd.xlane.f32.xlu2 %v4371_v62 }
0x1a19   :  { %v4354_v50 = vpop.f32.mrf.mxu2  ;;  %v4368_v51 = vpop.f32.mrf.mxu3 }
0x1a1a   :  { %v4355_v35 = vadd.f32 %v5694_v46, %v4354_v50 }
0x1a1c   :  { %v4369_v21 = vadd.f32 %v4368_v51, %v4355_v35 }
0x1a1e   :  { %v4372_v54 = vadd.f32 %v4369_v21, %v4069_v17 }
0x1a20   :  { %4379 = vadd.xlane.f32.xlu1 %v4372_v54 }
0x1a8b   :  { %v4378_v56 = vpop.xlane.xlu2 %4377 }
0x1a8c   :  { %v4381_v58 = vmul.f32 %v4378_v56, %v6747_v57 }
0x1a8e   :  { %v4383_v11 = vsub.f32 %v4371_v62, %v4381_v58 }
0x1a90   :  { %v4385_v37 = vmul.f32 %v4383_v11, %v4383_v11 }
0x1a92   :  { %4387 = vadd.xlane.f32.xlu0 %v4385_v37 }
0x1a93   :  { %v4380_v60 = vpop.xlane.xlu1 %4379 }
0x1a94   :  { %v4382_v63 = vmul.f32 %v4380_v60, %v6747_v57 }
0x1a96   :  { %v4384_v1 = vsub.f32 %v4372_v54, %v4382_v63 }
0x1a98   :  { %v4386_v2 = vmul.f32 %v4384_v1, %v4384_v1 }
0x1a9a   :  { %4389 = vadd.xlane.f32.xlu2 %v4386_v2 }
0x1b05   :  { %v4388_v7 = vpop.xlane.xlu0 %4387 }
0x1b06   :  { %v4391_v9 = vmul.f32 %v4388_v7, %v6747_v57 }
0x1b08   :  { %v4393_v10 = vadd.f32 1e-05, %v4391_v9 }
0x1b0a   :  { %5848 = vrsqrt.f32 %v4393_v10  ;;  %vm4401_vm15 = vweird.f32 %v4393_v10 }
0x1b0d   :  { %v4390_v14 = vpop.xlane.xlu2 %4389 }
0x1b0e   :  { %v4392_v38 = vmul.f32 %v4390_v14, %v6747_v57 }
0x1b10   :  { %v5849_v47 = vpop.eup %5848  ;;  %v4394_v12 = vadd.f32 1e-05, %v4392_v38 }
0x1b11   :  { %v4396_v15 = vmul.f32 %v5849_v47, %v4393_v10  ;;  %vm4402_vm14 = vweird.f32 %v5849_v47 }
0x1b12   :  { %5850 = vrsqrt.f32 %v4394_v12  ;;  %vm4403_vm6 = vmor %vm4401_vm15, %vm4402_vm14  ;;  %vm4411_vm2 = vweird.f32 %v4394_v12 }
0x1b13   :  { %v4397_v16 = vmul.f32 %v5849_v47, %v4396_v15 }
0x1b15   :  { %v4398_v17 = vmul.f32 0.5, %v4397_v16 }
0x1b17   :  { %v4399_v20 = vsub.f32 1.5, %v4398_v17 }
0x1b18   :  { %v5851_v18 = vpop.eup %5850 }
0x1b19   :  { %v4400_v19 = vmul.f32 %v5849_v47, %v4399_v20  ;;  %v4406_v22 = vmul.f32 %v5851_v18, %v4394_v12  ;;  %vm4412_vm1 = vweird.f32 %v5851_v18 }
0x1b1a   :  { %vm4413_vm7 = vmor %vm4411_vm2, %vm4412_vm1 }
0x1b1b   :  { %v4407_v53 = vmul.f32 %v5851_v18, %v4406_v22  ;;  %v4404_v24 = vsel %vm4403_vm6, %v5849_v47, %v4400_v19 }
0x1b1c   :  { %v4415_v57 = vmul.f32 %v4404_v24, %v4383_v11 }
0x1b1d   :  { %v4408_v8 = vmul.f32 0.5, %v4407_v53 }
0x1b1e   :  { %v4420_v27 = vmul.f32 %v5695_v59, %v4415_v57 }
0x1b1f   :  { %v4409_v30 = vsub.f32 1.5, %v4408_v8 }
0x1b20   :  { %v4425_v32 = vadd.f32 %v5696_v26, %v4420_v27 }
0x1b21   :  { %v4410_v43 = vmul.f32 %v5851_v18, %v4409_v30 }
0x1b23   :  { %v4414_v25 = vsel %vm4413_vm7, %v5851_v18, %v4410_v43 }
0x1b24   :  { %v4416_v28 = vmul.f32 %v4414_v25, %v4384_v1 }
0x1b26   :  { %v4421_v31 = vmul.f32 %v5695_v59, %v4416_v28 }
0x1b28   :  { %v4426_v33 = vadd.f32 %v5696_v26, %v4421_v31 }
0x1b2a   :  { %v4443_v34 = vpack.c.bf16 %v4426_v33, %v4425_v32 }
0x1b2c   :  { %4504 = vmatmul.bf16.vlgmr.msra.gmra.mxu0 %v4443_v34 }
0x1ba9   :  { %v4505_v39 = vpop.f32.mrf.mxu0 }
0x1baa   :  { %v4506_v40 = vadd.f32 %v5697_v36, %v4505_v39 }
0x1bac   :  { %4510 = vst.msk [vmem:[%s7473_s29] sm:$0xff] %vm324_vm0, %v4506_v40 }
0x1bb1   :  { %v4507_v41 = vpop.f32.mrf.mxu0 }
0x1bb2   :  { %v4508_v42 = vadd.f32 %v5697_v36, %v4507_v41 }
0x1bb4   :  { %4511 = vst.msk [vmem:[%s7473_s29 + $0x8] sm:$0xff] %vm324_vm0, %v4508_v42 }
0x1bb5   :  { %4516 = vsyncpa [#allocation4], 1 }
0x1bb6   :  { %4517 = vsyncpa [#allocation6], 1 }
0x1bb7   :  { %4518 = vsyncpa [#allocation9], 1 }
0x1bb8   :  { %4519 = vsyncpa [#allocation12], 1 }
0x1bb9   :  { %4520 = vsyncpa [#allocation15], 1 }
0x1bba   :  { %4521 = vsyncpa [#allocation18], 1 }
0x1bbb   :  { %4522 = vsyncpa [#allocation21], 1 }
0x1bbc   :  { %4523 = vsyncpa [#allocation24], 1 }

</bundles_post_ra>
